<compile_context>
chip_gen: v5e
topology: v5e:2x2
jax: 0.10.0
libtpu: 0.0.40
codegen_flags: <defaults>
</compile_context>

<pallas_src>
import functools

import jax
import jax.numpy as jnp
from jax import lax
from jax.experimental import pallas as pl
from jax.experimental.pallas import tpu as pltpu

CNN_ARCH = [(5, 24, 2, 0), (5, 36, 2, 0), (5, 48, 2, 0), (3, 64, 1, 0), (3, 64, 1, 0)]
_BN_EPS = 1e-5
_VMEM = pl.BlockSpec(memory_space=pltpu.MemorySpace.VMEM)
# 32 MiB is safe on every generation (v7x has 64 MiB physical); chosen tiles stay well under.
_VMEM_LIMIT = 32 * 1024 * 1024


def _round_up(x, m):
    return ((x + m - 1) // m) * m


# ----------------------------- Pallas kernels ------------------------------

def _conv_matmul_stats_kernel(p_ref, w_ref, y_ref, s_ref, ss_ref, *, m_actual):
    """Lane-dense conv-as-matmul: y^T = W^T @ patches^T (bf16 x bf16 -> f32) + partial BN stats.

    p_ref: (kdim, tm) bf16     w_ref: (oc, kdim) bf16
    y_ref: (oc, tm)  bf16      s_ref/ss_ref: (1, oc, 1) f32 per-tile partial sums.
    """
    tm = p_ref.shape[1]
    y = jnp.dot(w_ref[...], p_ref[...], preferred_element_type=jnp.float32)  # (oc, tm)
    y_ref[...] = y.astype(y_ref.dtype)                                        # bf16, lane-dense
    # Mask columns that were padded up to the tile boundary so BN stats stay exact.
    cols = lax.broadcasted_iota(jnp.int32, (1, tm), 1) + pl.program_id(0) * tm
    yv = jnp.where(cols < m_actual, y, 0.0)
    s_ref[...] = jnp.sum(yv, axis=1, keepdims=True)[None]          # (1, oc, 1)
    ss_ref[...] = jnp.sum(yv * yv, axis=1, keepdims=True)[None]    # (1, oc, 1)


def _bn_relu_kernel(y_ref, scale_ref, shift_ref, o_ref):
    """Per-channel affine (precomputed BN scale/shift along sublanes) + ReLU, bf16 out."""
    y = y_ref[...].astype(jnp.float32)                              # (oc, tm)
    o_ref[...] = jnp.maximum(y * scale_ref[...] + shift_ref[...], 0.0).astype(o_ref.dtype)


def _ktiled_linear_kernel(x_ref, w_ref, b_ref, o_ref, acc_ref):
    """K-tiled linear with f32 VMEM accumulator (P3: init/accumulate/finalize)."""
    @pl.when(pl.program_id(0) == 0)
    def _init():
        acc_ref[...] = jnp.zeros_like(acc_ref)

    acc_ref[...] += jnp.dot(x_ref[...], w_ref[...],
                            preferred_element_type=jnp.float32)

    @pl.when(pl.program_id(0) == pl.num_programs(0) - 1)
    def _fin():
        o_ref[...] = acc_ref[...] + b_ref[...]


def _lstm_fc_head_kernel(x_ref, h0_ref, c0_ref, wih_ref, whh_ref, bg_ref,
                         w1_ref, b1_ref, w2_ref, b2_ref, w3_ref, b3_ref,
                         w4_ref, b4_ref, wo_ref, bo_ref,
                         y_ref, h_out_ref, c_out_ref,
                         seq_sc, gx_sc):
    T = x_ref.shape[0]
    Hp = whh_ref.shape[0]          # lane-padded hidden size (multiple of 128)

    # Hoisted input projection: one (T,H) x (H,4Hp) matmul instead of T row-matmuls.
    gx_sc[...] = (jnp.dot(x_ref[...].astype(jnp.bfloat16), wih_ref[...],
                          preferred_element_type=jnp.float32) + bg_ref[...])

    def body(t, carry):
        h, c = carry                                              # (1, Hp) f32 in vregs
        g = gx_sc[pl.ds(t, 1), :] + jnp.dot(
            h.astype(jnp.bfloat16), whh_ref[...],
            preferred_element_type=jnp.float32)                   # (1, 4Hp) gates i,f,g,o
        i_g = jax.nn.sigmoid(g[:, 0:Hp])                          # lane-aligned slices
        f_g = jax.nn.sigmoid(g[:, Hp:2 * Hp])
        g_g = jnp.tanh(g[:, 2 * Hp:3 * Hp])
        o_g = jax.nn.sigmoid(g[:, 3 * Hp:4 * Hp])
        c_new = f_g * c + i_g * g_g
        h_new = o_g * jnp.tanh(c_new)
        seq_sc[pl.ds(t, 1), :] = h_new
        return (h_new, c_new)

    # h/c live in registers across the serial chain; bounded unroll avoids vreg spill.
    h_fin, c_fin = lax.fori_loop(0, T, body, (h0_ref[...], c0_ref[...]),
                                 unroll=True if T <= 8 else 8)
    h_out_ref[...] = h_fin
    c_out_ref[...] = c_fin

    # Fused post-LSTM FC stack + scalar head; intermediates never leave VMEM.
    z = seq_sc[...]
    z = jnp.maximum(jnp.dot(z, w1_ref[...], preferred_element_type=jnp.float32) + b1_ref[...], 0.0)
    z = jnp.maximum(jnp.dot(z, w2_ref[...], preferred_element_type=jnp.float32) + b2_ref[...], 0.0)
    z = jnp.maximum(jnp.dot(z, w3_ref[...], preferred_element_type=jnp.float32) + b3_ref[...], 0.0)
    z = jnp.maximum(jnp.dot(z, w4_ref[...], preferred_element_type=jnp.float32) + b4_ref[...], 0.0)
    y_ref[...] = jnp.dot(z, wo_ref[...], preferred_element_type=jnp.float32) + bo_ref[...]


# ------------------------------ Pallas wrappers -----------------------------

def im2col_t(x_nhwc, k, stride):
    """Extract conv patches in TRANSPOSED layout: ((k*k*C, N*OH*OW), OH, OW), input dtype kept."""
    N, H, W, C = x_nhwc.shape
    oh = (H - k) // stride + 1
    ow = (W - k) // stride + 1
    cols = []
    for i in range(k):
        for j in range(k):
            cols.append(x_nhwc[:, i:i + (oh - 1) * stride + 1:stride,
                               j:j + (ow - 1) * stride + 1:stride, :])
    p = jnp.stack(cols, axis=0)                     # (k*k, N, oh, ow, C)
    p = jnp.transpose(p, (0, 4, 1, 2, 3))           # (k*k, C, N, oh, ow)
    return p.reshape(k * k * C, N * oh * ow), oh, ow


def conv_bn_relu(x_nhwc, w_t, gamma, beta, k, stride, *, tile_m=2048):
    """One Conv2d+BatchNorm2d(train)+ReLU block; returns bf16 NHWC activations.

    Lane-dense two-pass scheme:
      pass A: y^T = W^T @ patches^T (bf16 intermediate) + per-tile partial BN stats,
      pass B: per-channel scale/shift + ReLU fused with the store.
    Conv bias is omitted: training-mode BatchNorm mean subtraction cancels it exactly.
    """
    n = x_nhwc.shape[0]
    patches_t, oh, ow = im2col_t(x_nhwc, k, stride)     # (kdim, M) bf16
    kdim, m = patches_t.shape
    oc = w_t.shape[0]

    tm = min(tile_m, _round_up(m, 128))                 # lane dim -> multiple of 128
    m_pad = _round_up(m, tm)
    if m_pad != m:
        patches_t = jnp.pad(patches_t, ((0, 0), (0, m_pad - m)))
    grid_m = m_pad // tm

    cparams = pltpu.CompilerParams(dimension_semantics=("parallel",),
                                   vmem_limit_bytes=_VMEM_LIMIT)

    # Pass A: conv matmul + partial BN stats (tiled over M, pipelined, lane-dense stores).
    y, s_part, ss_part = pl.pallas_call(
        functools.partial(_conv_matmul_stats_kernel, m_actual=m),
        out_shape=(jax.ShapeDtypeStruct((oc, m_pad), jnp.bfloat16),
                   jax.ShapeDtypeStruct((grid_m, oc, 1), jnp.float32),
                   jax.ShapeDtypeStruct((grid_m, oc, 1), jnp.float32)),
        grid=(grid_m,),
        in_specs=[pl.BlockSpec((kdim, tm), lambda i: (0, i)),
                  pl.BlockSpec((oc, kdim), lambda i: (0, 0))],
        out_specs=(pl.BlockSpec((oc, tm), lambda i: (0, i)),
                   pl.BlockSpec((1, oc, 1), lambda i: (i, 0, 0)),
                   pl.BlockSpec((1, oc, 1), lambda i: (i, 0, 0))),
        compiler_params=cparams,
    )(patches_t, w_t)

    # Tiny reduction of per-tile partials -> global batch statistics (biased variance).
    sums = jnp.sum(s_part[:, :, 0], axis=0)
    sumsq = jnp.sum(ss_part[:, :, 0], axis=0)
    mean = sums / m
    var = jnp.maximum(sumsq / m - mean * mean, 0.0)
    inv = lax.rsqrt(var + _BN_EPS)
    scale = (gamma * inv).reshape(oc, 1)
    shift = (beta - mean * gamma * inv).reshape(oc, 1)

    # Pass B: normalize + ReLU fused with the store (tiled over M, lane-dense).
    out_t = pl.pallas_call(
        _bn_relu_kernel,
        out_shape=jax.ShapeDtypeStruct((oc, m_pad), jnp.bfloat16),
        grid=(grid_m,),
        in_specs=[pl.BlockSpec((oc, tm), lambda i: (0, i)),
                  pl.BlockSpec((oc, 1), lambda i: (0, 0)),
                  pl.BlockSpec((oc, 1), lambda i: (0, 0))],
        out_specs=pl.BlockSpec((oc, tm), lambda i: (0, i)),
        compiler_params=cparams,
    )(y, scale, shift)

    # (oc, M) -> NHWC; wrapper-side layout plumbing only.
    out = out_t[:, :m].reshape(oc, n, oh, ow)
    return jnp.transpose(out, (1, 2, 3, 0))


def pallas_linear_ktiled(x, w, b, *, tile_k=4096):
    """fc1: K-tiled matmul with f32 accumulator; x/w in bf16, output f32."""
    m, k = x.shape
    n = w.shape[1]
    tk = min(tile_k, _round_up(k, 128))
    k_pad = _round_up(k, tk)
    if k_pad != k:
        x = jnp.pad(x, ((0, 0), (0, k_pad - k)))
        w = jnp.pad(w, ((0, k_pad - k), (0, 0)))
    grid_k = k_pad // tk

    return pl.pallas_call(
        _ktiled_linear_kernel,
        out_shape=jax.ShapeDtypeStruct((m, n), jnp.float32),
        grid=(grid_k,),
        in_specs=[pl.BlockSpec((m, tk), lambda kk: (0, kk)),
                  pl.BlockSpec((tk, n), lambda kk: (kk, 0)),
                  pl.BlockSpec((1, n), lambda kk: (0, 0))],
        out_specs=pl.BlockSpec((m, n), lambda kk: (0, 0)),
        scratch_shapes=[pltpu.VMEM((m, n), jnp.float32)],
        compiler_params=pltpu.CompilerParams(dimension_semantics=("arbitrary",),
                                             vmem_limit_bytes=_VMEM_LIMIT),
    )(x, w, b.reshape(1, n))


def _pad_gate_cols(w, H, Hp):
    """Pad each of the 4 gate blocks along the last axis from H to Hp (zero fill)."""
    if Hp == H:
        return w
    pads = ((0, 0),) * (w.ndim - 1) + ((0, Hp - H),)
    parts = [jnp.pad(w[..., j * H:(j + 1) * H], pads) for j in range(4)]
    return jnp.concatenate(parts, axis=-1)


def pallas_lstm_fc_head(x_seq, h0, c0, p):
    """Fused LSTM recurrence + 4x(Linear+ReLU) + output head in one kernel."""
    T, H = x_seq.shape
    Hp = _round_up(H, 128)   # lane-align gates; no-op when hidden is a multiple of 128

    wih = _pad_gate_cols(p['lstm_wih'], H, Hp)                        # (H, 4Hp) bf16
    whh = jnp.pad(_pad_gate_cols(p['lstm_whh'], H, Hp),
                  ((0, Hp - H), (0, 0)))                              # (Hp, 4Hp) bf16
    bg = _pad_gate_cols(p['lstm_b'].reshape(1, 4 * H), H, Hp)         # (1, 4Hp) f32
    h0p = jnp.pad(h0, ((0, 0), (0, Hp - H)))
    c0p = jnp.pad(c0, ((0, 0), (0, Hp - H)))
    w1 = jnp.pad(p['fcs'][0][0], ((0, Hp - H), (0, 0)))               # (Hp, H) f32

    y, h_out, c_out = pl.pallas_call(
        _lstm_fc_head_kernel,
        out_shape=(jax.ShapeDtypeStruct((T, 1), jnp.float32),
                   jax.ShapeDtypeStruct((1, Hp), jnp.float32),
                   jax.ShapeDtypeStruct((1, Hp), jnp.float32)),
        in_specs=[_VMEM] * 16,
        out_specs=(_VMEM, _VMEM, _VMEM),
        scratch_shapes=[pltpu.VMEM((T, Hp), jnp.float32),        # LSTM outputs
                        pltpu.VMEM((T, 4 * Hp), jnp.float32)],   # hoisted x-gates
        compiler_params=pltpu.CompilerParams(vmem_limit_bytes=_VMEM_LIMIT),
    )(x_seq, h0p, c0p, wih, whh, bg,
      w1, p['fcs'][0][1].reshape(1, -1),
      p['fcs'][1][0], p['fcs'][1][1].reshape(1, -1),
      p['fcs'][2][0], p['fcs'][2][1].reshape(1, -1),
      p['fcs'][3][0], p['fcs'][3][1].reshape(1, -1),
      p['out_w'], p['out_b'].reshape(1, -1))
    return y, h_out[:, :H], c_out[:, :H]


# ------------------------------- Model glue ---------------------------------

def init_params(key, input_dims, hidden_size):
    c_in, H, W = input_dims
    keys = iter(jax.random.split(key, 64))
    params = {'cnn': []}

    ch, h, w = c_in, H, W
    for (k, oc, stride, _pad) in CNN_ARCH:
        wconv = jax.random.normal(next(keys), (k, k, ch, oc), jnp.float32) * 0.05
        # conv bias omitted: a per-channel constant is cancelled by training-mode BatchNorm.
        params['cnn'].append(dict(
            w_t=wconv.reshape(k * k * ch, oc).T.astype(jnp.bfloat16),   # (oc, k*k*ch)
            gamma=jnp.ones((oc,), jnp.float32),
            beta=jnp.zeros((oc,), jnp.float32)))
        ch = oc
        h = (h - k) // stride + 1
        w = (w - k) // stride + 1
    out_size = ch * h * w

    params['fc1_w'] = (jax.random.normal(next(keys), (out_size, hidden_size), jnp.float32)
                       * 0.05).astype(jnp.bfloat16)
    params['fc1_b'] = jax.random.normal(next(keys), (hidden_size,), jnp.float32) * 0.01

    params['lstm_wih'] = (jax.random.normal(next(keys), (hidden_size, 4 * hidden_size),
                                            jnp.float32) * 0.05).astype(jnp.bfloat16)
    params['lstm_whh'] = (jax.random.normal(next(keys), (hidden_size, 4 * hidden_size),
                                            jnp.float32) * 0.05).astype(jnp.bfloat16)
    params['lstm_b'] = jax.random.normal(next(keys), (4 * hidden_size,), jnp.float32) * 0.01

    fcs_sizes = [hidden_size, hidden_size, 100, 50, 10]
    params['fcs'] = []
    for d_in, d_out in zip(fcs_sizes[:-1], fcs_sizes[1:]):
        fw = jax.random.normal(next(keys), (d_in, d_out), jnp.float32) * 0.05
        fb = jax.random.normal(next(keys), (d_out,), jnp.float32) * 0.01
        params['fcs'].append((fw, fb))

    params['out_w'] = jax.random.normal(next(keys), (10, 1), jnp.float32) * 0.05
    params['out_b'] = jax.random.normal(next(keys), (1,), jnp.float32) * 0.01
    return params


def lstm_driver_forward(params, x_nchw, h_prev, c_prev):
    N = x_nchw.shape[0]
    x = jnp.transpose(x_nchw, (0, 2, 3, 1)).astype(jnp.bfloat16)   # NCHW -> NHWC, bf16

    for lp, (k, _oc, stride, _pad) in zip(params['cnn'], CNN_ARCH):
        x = conv_bn_relu(x, lp['w_t'], lp['gamma'], lp['beta'], k, stride)

    # match PyTorch's .reshape(batch, -1) on an NCHW tensor (C, H, W order)
    feat = jnp.transpose(x, (0, 3, 1, 2)).reshape(N, -1)           # bf16

    fc1_out = pallas_linear_ktiled(feat, params['fc1_w'], params['fc1_b'])  # (N, hidden) f32

    # PyTorch: fc1_out.unsqueeze(0) + batch_first LSTM => LSTM batch=1, seq=N
    h0 = h_prev.reshape(1, -1).astype(jnp.float32)
    c0 = c_prev.reshape(1, -1).astype(jnp.float32)
    y2d, h_out, c_out = pallas_lstm_fc_head(fc1_out, h0, c0, params)        # (N, 1)

    y = jnp.squeeze(y2d)                                                    # (N,)
    return y, h_out.reshape(1, 1, -1), c_out.reshape(1, 1, -1)


if __name__ == "__main__":
    key = jax.random.PRNGKey(0)
    input_dims = (3, 64, 64)     # small stand-in for (3, 455, 356)
    hidden = 32
    batch = 2

    pkey, xkey, hkey, ckey = jax.random.split(key, 4)
    params = init_params(pkey, input_dims, hidden)
    x = jax.random.normal(xkey, (batch,) + input_dims, jnp.float32)
    h_prev = jax.random.normal(hkey, (1, 1, hidden), jnp.float32) * 0.1
    c_prev = jax.random.normal(ckey, (1, 1, hidden), jnp.float32) * 0.1

    forward = jax.jit(lstm_driver_forward)
    y, h_out, c_out = forward(params, x, h_prev, c_prev)
    jax.block_until_ready((y, h_out, c_out))

    assert y.shape == (batch,)
    assert h_out.shape == (1, 1, hidden) and c_out.shape == (1, 1, hidden)
    print("KERNEL_OK")
</pallas_src>

<mosaic_0001>
module attributes {stable_mosaic.version = 11 : i64} {
  func.func @_conv_matmul_stats_kernel(%arg0: i32, %arg1: memref<75x1920xbf16, #tpu.memory_space<vmem>>, %arg2: memref<24x75xbf16, #tpu.memory_space<vmem>>, %arg3: memref<24x1920xbf16, #tpu.memory_space<vmem>>, %arg4: memref<1x24x1xf32, #tpu.memory_space<vmem>>, %arg5: memref<1x24x1xf32, #tpu.memory_space<vmem>>) attributes {dimension_semantics = [#tpu.dimension_semantics<parallel>], iteration_bounds = array<i64: 1>, scalar_prefetch = 0 : i64, scratch_operands = 0 : i64, tpu.core_type = #tpu.core_type<tc>, window_params = [{transform_indices = @transform_0, window_bounds = array<i64: 75, 1920>}, {pipeline_mode = #tpu.pipeline_mode<synchronous>, transform_indices = @transform_1, window_bounds = array<i64: 24, 75>}, {transform_indices = @transform_2, window_bounds = array<i64: 24, 1920>}, {transform_indices = @transform_3, window_bounds = array<i64: 1, 24, 1>}, {transform_indices = @transform_4, window_bounds = array<i64: 1, 24, 1>}]} {
    %c0 = arith.constant 0 : index
    %c0_0 = arith.constant 0 : index
    %0 = vector.load %arg2[%c0, %c0_0] : memref<24x75xbf16, #tpu.memory_space<vmem>>, vector<24x75xbf16>
    %c0_1 = arith.constant 0 : index
    %c0_2 = arith.constant 0 : index
    %1 = vector.load %arg1[%c0_1, %c0_2] : memref<75x1920xbf16, #tpu.memory_space<vmem>>, vector<75x1920xbf16>
    %cst = arith.constant dense<0.000000e+00> : vector<24x1920xf32>
    %2 = tpu.matmul %0, %1, %cst {dimension_numbers = #tpu.dot_dimension_numbers<[1], [0], [0], [1], [0, 0, 1, 1], [], []>} : vector<24x75xbf16>, vector<75x1920xbf16>, vector<24x1920xf32> -> vector<24x1920xf32>
    %3 = arith.truncf %2 : vector<24x1920xf32> to vector<24x1920xbf16>
    %c0_3 = arith.constant 0 : index
    %c0_4 = arith.constant 0 : index
    %4 = vector.load %arg3[%c0_3, %c0_4] : memref<24x1920xbf16, #tpu.memory_space<vmem>>, vector<24x1920xbf16>
    tpu.vector_store %arg3[%c0_3, %c0_4], %3 {strides = array<i32>} : memref<24x1920xbf16, #tpu.memory_space<vmem>>, vector<24x1920xbf16>,
    %5 = tpu.iota {dimensions = array<i32: 1>} : vector<1x1920xi32>
    %c1920_i32 = arith.constant 1920 : i32
    %6 = arith.muli %arg0, %c1920_i32 : i32
    %7 = vector.broadcast %6 : i32 to vector<1x1920xi32>
    %8 = arith.addi %5, %7 : vector<1x1920xi32>
    %c1800_i32 = arith.constant 1800 : i32
    %9 = vector.broadcast %c1800_i32 : i32 to vector<1x1920xi32>
    %10 = arith.cmpi slt, %8, %9 : vector<1x1920xi32>
    %cst_5 = arith.constant 0.000000e+00 : f32
    %11 = vector.shape_cast %10 : vector<1x1920xi1> to vector<1x1920xi1>
    %12 = vector.broadcast %11 : vector<1x1920xi1> to vector<24x1920xi1>
    %13 = vector.broadcast %cst_5 : f32 to vector<24x1920xf32>
    %14 = arith.select %12, %2, %13 : vector<24x1920xi1>, vector<24x1920xf32>
    %cst_6 = arith.constant dense<0.000000e+00> : vector<24xf32>
    %15 = vector.multi_reduction <add>, %14, %cst_6 [1] : vector<24x1920xf32> to vector<24xf32>
    %16 = vector.shape_cast %15 : vector<24xf32> to vector<24x1xf32>
    %17 = vector.shape_cast %16 : vector<24x1xf32> to vector<1x24x1xf32>
    %c0_7 = arith.constant 0 : index
    %c0_8 = arith.constant 0 : index
    %c0_9 = arith.constant 0 : index
    %18 = vector.load %arg4[%c0_7, %c0_8, %c0_9] : memref<1x24x1xf32, #tpu.memory_space<vmem>>, vector<1x24x1xf32>
    tpu.vector_store %arg4[%c0_7, %c0_8, %c0_9], %17 {strides = array<i32>} : memref<1x24x1xf32, #tpu.memory_space<vmem>>, vector<1x24x1xf32>,
    %19 = arith.mulf %14, %14 : vector<24x1920xf32>
    %cst_10 = arith.constant dense<0.000000e+00> : vector<24xf32>
    %20 = vector.multi_reduction <add>, %19, %cst_10 [1] : vector<24x1920xf32> to vector<24xf32>
    %21 = vector.shape_cast %20 : vector<24xf32> to vector<24x1xf32>
    %22 = vector.shape_cast %21 : vector<24x1xf32> to vector<1x24x1xf32>
    %c0_11 = arith.constant 0 : index
    %c0_12 = arith.constant 0 : index
    %c0_13 = arith.constant 0 : index
    %23 = vector.load %arg5[%c0_11, %c0_12, %c0_13] : memref<1x24x1xf32, #tpu.memory_space<vmem>>, vector<1x24x1xf32>
    tpu.vector_store %arg5[%c0_11, %c0_12, %c0_13], %22 {strides = array<i32>} : memref<1x24x1xf32, #tpu.memory_space<vmem>>, vector<1x24x1xf32>,
    return
  }
  func.func @transform_0(%arg0: i32) -> (i32, i32) {
    %c0_i32 = arith.constant 0 : i32
    %c0_i32_0 = arith.constant 0 : i32
    return %c0_i32, %arg0 : i32, i32
  }
  func.func @transform_1(%arg0: i32) -> (i32, i32) {
    %c0_i32 = arith.constant 0 : i32
    %c0_i32_0 = arith.constant 0 : i32
    %c0_i32_1 = arith.constant 0 : i32
    return %c0_i32, %c0_i32_0 : i32, i32
  }
  func.func @transform_2(%arg0: i32) -> (i32, i32) {
    %c0_i32 = arith.constant 0 : i32
    %c0_i32_0 = arith.constant 0 : i32
    return %c0_i32, %arg0 : i32, i32
  }
  func.func @transform_3(%arg0: i32) -> (i32, i32, i32) {
    %c0_i32 = arith.constant 0 : i32
    %c0_i32_0 = arith.constant 0 : i32
    %c0_i32_1 = arith.constant 0 : i32
    return %arg0, %c0_i32, %c0_i32_0 : i32, i32, i32
  }
  func.func @transform_4(%arg0: i32) -> (i32, i32, i32) {
    %c0_i32 = arith.constant 0 : i32
    %c0_i32_0 = arith.constant 0 : i32
    %c0_i32_1 = arith.constant 0 : i32
    return %arg0, %c0_i32, %c0_i32_0 : i32, i32, i32
  }
}

module attributes {stable_mosaic.version = 11 : i64} {
  func.func @_bn_relu_kernel(%arg0: i32, %arg1: memref<24x1920xbf16, #tpu.memory_space<vmem>>, %arg2: memref<24x1xf32, #tpu.memory_space<vmem>>, %arg3: memref<24x1xf32, #tpu.memory_space<vmem>>, %arg4: memref<24x1920xbf16, #tpu.memory_space<vmem>>) attributes {dimension_semantics = [#tpu.dimension_semantics<parallel>], iteration_bounds = array<i64: 1>, scalar_prefetch = 0 : i64, scratch_operands = 0 : i64, tpu.core_type = #tpu.core_type<tc>, window_params = [{transform_indices = @transform_0, window_bounds = array<i64: 24, 1920>}, {pipeline_mode = #tpu.pipeline_mode<synchronous>, transform_indices = @transform_1, window_bounds = array<i64: 24, 1>}, {pipeline_mode = #tpu.pipeline_mode<synchronous>, transform_indices = @transform_2, window_bounds = array<i64: 24, 1>}, {transform_indices = @transform_3, window_bounds = array<i64: 24, 1920>}]} {
    %c0 = arith.constant 0 : index
    %c0_0 = arith.constant 0 : index
    %0 = vector.load %arg1[%c0, %c0_0] : memref<24x1920xbf16, #tpu.memory_space<vmem>>, vector<24x1920xbf16>
    %1 = arith.extf %0 : vector<24x1920xbf16> to vector<24x1920xf32>
    %c0_1 = arith.constant 0 : index
    %c0_2 = arith.constant 0 : index
    %2 = vector.load %arg2[%c0_1, %c0_2] : memref<24x1xf32, #tpu.memory_space<vmem>>, vector<24x1xf32>
    %3 = vector.broadcast %2 : vector<24x1xf32> to vector<24x1920xf32>
    %4 = arith.mulf %1, %3 : vector<24x1920xf32>
    %c0_3 = arith.constant 0 : index
    %c0_4 = arith.constant 0 : index
    %5 = vector.load %arg3[%c0_3, %c0_4] : memref<24x1xf32, #tpu.memory_space<vmem>>, vector<24x1xf32>
    %6 = vector.broadcast %5 : vector<24x1xf32> to vector<24x1920xf32>
    %7 = arith.addf %4, %6 : vector<24x1920xf32>
    %cst = arith.constant 0.000000e+00 : f32
    %8 = vector.broadcast %cst : f32 to vector<24x1920xf32>
    %9 = arith.maximumf %7, %8 : vector<24x1920xf32>
    %10 = arith.truncf %9 : vector<24x1920xf32> to vector<24x1920xbf16>
    %c0_5 = arith.constant 0 : index
    %c0_6 = arith.constant 0 : index
    %11 = vector.load %arg4[%c0_5, %c0_6] : memref<24x1920xbf16, #tpu.memory_space<vmem>>, vector<24x1920xbf16>
    tpu.vector_store %arg4[%c0_5, %c0_6], %10 {strides = array<i32>} : memref<24x1920xbf16, #tpu.memory_space<vmem>>, vector<24x1920xbf16>,
    return
  }
  func.func @transform_0(%arg0: i32) -> (i32, i32) {
    %c0_i32 = arith.constant 0 : i32
    %c0_i32_0 = arith.constant 0 : i32
    return %c0_i32, %arg0 : i32, i32
  }
  func.func @transform_1(%arg0: i32) -> (i32, i32) {
    %c0_i32 = arith.constant 0 : i32
    %c0_i32_0 = arith.constant 0 : i32
    %c0_i32_1 = arith.constant 0 : i32
    return %c0_i32, %c0_i32_0 : i32, i32
  }
  func.func @transform_2(%arg0: i32) -> (i32, i32) {
    %c0_i32 = arith.constant 0 : i32
    %c0_i32_0 = arith.constant 0 : i32
    %c0_i32_1 = arith.constant 0 : i32
    return %c0_i32, %c0_i32_0 : i32, i32
  }
  func.func @transform_3(%arg0: i32) -> (i32, i32) {
    %c0_i32 = arith.constant 0 : i32
    %c0_i32_0 = arith.constant 0 : i32
    return %c0_i32, %arg0 : i32, i32
  }
}

module attributes {stable_mosaic.version = 11 : i64} {
  func.func @_conv_matmul_stats_kernel(%arg0: i32, %arg1: memref<600x384xbf16, #tpu.memory_space<vmem>>, %arg2: memref<36x600xbf16, #tpu.memory_space<vmem>>, %arg3: memref<36x384xbf16, #tpu.memory_space<vmem>>, %arg4: memref<1x36x1xf32, #tpu.memory_space<vmem>>, %arg5: memref<1x36x1xf32, #tpu.memory_space<vmem>>) attributes {dimension_semantics = [#tpu.dimension_semantics<parallel>], iteration_bounds = array<i64: 1>, scalar_prefetch = 0 : i64, scratch_operands = 0 : i64, tpu.core_type = #tpu.core_type<tc>, window_params = [{transform_indices = @transform_0, window_bounds = array<i64: 600, 384>}, {pipeline_mode = #tpu.pipeline_mode<synchronous>, transform_indices = @transform_1, window_bounds = array<i64: 36, 600>}, {transform_indices = @transform_2, window_bounds = array<i64: 36, 384>}, {transform_indices = @transform_3, window_bounds = array<i64: 1, 36, 1>}, {transform_indices = @transform_4, window_bounds = array<i64: 1, 36, 1>}]} {
    %c0 = arith.constant 0 : index
    %c0_0 = arith.constant 0 : index
    %0 = vector.load %arg2[%c0, %c0_0] : memref<36x600xbf16, #tpu.memory_space<vmem>>, vector<36x600xbf16>
    %c0_1 = arith.constant 0 : index
    %c0_2 = arith.constant 0 : index
    %1 = vector.load %arg1[%c0_1, %c0_2] : memref<600x384xbf16, #tpu.memory_space<vmem>>, vector<600x384xbf16>
    %cst = arith.constant dense<0.000000e+00> : vector<36x384xf32>
    %2 = tpu.matmul %0, %1, %cst {dimension_numbers = #tpu.dot_dimension_numbers<[1], [0], [0], [1], [0, 0, 1, 1], [], []>} : vector<36x600xbf16>, vector<600x384xbf16>, vector<36x384xf32> -> vector<36x384xf32>
    %3 = arith.truncf %2 : vector<36x384xf32> to vector<36x384xbf16>
    %c0_3 = arith.constant 0 : index
    %c0_4 = arith.constant 0 : index
    %4 = vector.load %arg3[%c0_3, %c0_4] : memref<36x384xbf16, #tpu.memory_space<vmem>>, vector<36x384xbf16>
    tpu.vector_store %arg3[%c0_3, %c0_4], %3 {strides = array<i32>} : memref<36x384xbf16, #tpu.memory_space<vmem>>, vector<36x384xbf16>,
    %5 = tpu.iota {dimensions = array<i32: 1>} : vector<1x384xi32>
    %c384_i32 = arith.constant 384 : i32
    %6 = arith.muli %arg0, %c384_i32 : i32
    %7 = vector.broadcast %6 : i32 to vector<1x384xi32>
    %8 = arith.addi %5, %7 : vector<1x384xi32>
    %c338_i32 = arith.constant 338 : i32
    %9 = vector.broadcast %c338_i32 : i32 to vector<1x384xi32>
    %10 = arith.cmpi slt, %8, %9 : vector<1x384xi32>
    %cst_5 = arith.constant 0.000000e+00 : f32
    %11 = vector.shape_cast %10 : vector<1x384xi1> to vector<1x384xi1>
    %12 = vector.broadcast %11 : vector<1x384xi1> to vector<36x384xi1>
    %13 = vector.broadcast %cst_5 : f32 to vector<36x384xf32>
    %14 = arith.select %12, %2, %13 : vector<36x384xi1>, vector<36x384xf32>
    %cst_6 = arith.constant dense<0.000000e+00> : vector<36xf32>
    %15 = vector.multi_reduction <add>, %14, %cst_6 [1] : vector<36x384xf32> to vector<36xf32>
    %16 = vector.shape_cast %15 : vector<36xf32> to vector<36x1xf32>
    %17 = vector.shape_cast %16 : vector<36x1xf32> to vector<1x36x1xf32>
    %c0_7 = arith.constant 0 : index
    %c0_8 = arith.constant 0 : index
    %c0_9 = arith.constant 0 : index
    %18 = vector.load %arg4[%c0_7, %c0_8, %c0_9] : memref<1x36x1xf32, #tpu.memory_space<vmem>>, vector<1x36x1xf32>
    tpu.vector_store %arg4[%c0_7, %c0_8, %c0_9], %17 {strides = array<i32>} : memref<1x36x1xf32, #tpu.memory_space<vmem>>, vector<1x36x1xf32>,
    %19 = arith.mulf %14, %14 : vector<36x384xf32>
    %cst_10 = arith.constant dense<0.000000e+00> : vector<36xf32>
    %20 = vector.multi_reduction <add>, %19, %cst_10 [1] : vector<36x384xf32> to vector<36xf32>
    %21 = vector.shape_cast %20 : vector<36xf32> to vector<36x1xf32>
    %22 = vector.shape_cast %21 : vector<36x1xf32> to vector<1x36x1xf32>
    %c0_11 = arith.constant 0 : index
    %c0_12 = arith.constant 0 : index
    %c0_13 = arith.constant 0 : index
    %23 = vector.load %arg5[%c0_11, %c0_12, %c0_13] : memref<1x36x1xf32, #tpu.memory_space<vmem>>, vector<1x36x1xf32>
    tpu.vector_store %arg5[%c0_11, %c0_12, %c0_13], %22 {strides = array<i32>} : memref<1x36x1xf32, #tpu.memory_space<vmem>>, vector<1x36x1xf32>,
    return
  }
  func.func @transform_0(%arg0: i32) -> (i32, i32) {
    %c0_i32 = arith.constant 0 : i32
    %c0_i32_0 = arith.constant 0 : i32
    return %c0_i32, %arg0 : i32, i32
  }
  func.func @transform_1(%arg0: i32) -> (i32, i32) {
    %c0_i32 = arith.constant 0 : i32
    %c0_i32_0 = arith.constant 0 : i32
    %c0_i32_1 = arith.constant 0 : i32
    return %c0_i32, %c0_i32_0 : i32, i32
  }
  func.func @transform_2(%arg0: i32) -> (i32, i32) {
    %c0_i32 = arith.constant 0 : i32
    %c0_i32_0 = arith.constant 0 : i32
    return %c0_i32, %arg0 : i32, i32
  }
  func.func @transform_3(%arg0: i32) -> (i32, i32, i32) {
    %c0_i32 = arith.constant 0 : i32
    %c0_i32_0 = arith.constant 0 : i32
    %c0_i32_1 = arith.constant 0 : i32
    return %arg0, %c0_i32, %c0_i32_0 : i32, i32, i32
  }
  func.func @transform_4(%arg0: i32) -> (i32, i32, i32) {
    %c0_i32 = arith.constant 0 : i32
    %c0_i32_0 = arith.constant 0 : i32
    %c0_i32_1 = arith.constant 0 : i32
    return %arg0, %c0_i32, %c0_i32_0 : i32, i32, i32
  }
}

module attributes {stable_mosaic.version = 11 : i64} {
  func.func @_bn_relu_kernel(%arg0: i32, %arg1: memref<36x384xbf16, #tpu.memory_space<vmem>>, %arg2: memref<36x1xf32, #tpu.memory_space<vmem>>, %arg3: memref<36x1xf32, #tpu.memory_space<vmem>>, %arg4: memref<36x384xbf16, #tpu.memory_space<vmem>>) attributes {dimension_semantics = [#tpu.dimension_semantics<parallel>], iteration_bounds = array<i64: 1>, scalar_prefetch = 0 : i64, scratch_operands = 0 : i64, tpu.core_type = #tpu.core_type<tc>, window_params = [{transform_indices = @transform_0, window_bounds = array<i64: 36, 384>}, {pipeline_mode = #tpu.pipeline_mode<synchronous>, transform_indices = @transform_1, window_bounds = array<i64: 36, 1>}, {pipeline_mode = #tpu.pipeline_mode<synchronous>, transform_indices = @transform_2, window_bounds = array<i64: 36, 1>}, {transform_indices = @transform_3, window_bounds = array<i64: 36, 384>}]} {
    %c0 = arith.constant 0 : index
    %c0_0 = arith.constant 0 : index
    %0 = vector.load %arg1[%c0, %c0_0] : memref<36x384xbf16, #tpu.memory_space<vmem>>, vector<36x384xbf16>
    %1 = arith.extf %0 : vector<36x384xbf16> to vector<36x384xf32>
    %c0_1 = arith.constant 0 : index
    %c0_2 = arith.constant 0 : index
    %2 = vector.load %arg2[%c0_1, %c0_2] : memref<36x1xf32, #tpu.memory_space<vmem>>, vector<36x1xf32>
    %3 = vector.broadcast %2 : vector<36x1xf32> to vector<36x384xf32>
    %4 = arith.mulf %1, %3 : vector<36x384xf32>
    %c0_3 = arith.constant 0 : index
    %c0_4 = arith.constant 0 : index
    %5 = vector.load %arg3[%c0_3, %c0_4] : memref<36x1xf32, #tpu.memory_space<vmem>>, vector<36x1xf32>
    %6 = vector.broadcast %5 : vector<36x1xf32> to vector<36x384xf32>
    %7 = arith.addf %4, %6 : vector<36x384xf32>
    %cst = arith.constant 0.000000e+00 : f32
    %8 = vector.broadcast %cst : f32 to vector<36x384xf32>
    %9 = arith.maximumf %7, %8 : vector<36x384xf32>
    %10 = arith.truncf %9 : vector<36x384xf32> to vector<36x384xbf16>
    %c0_5 = arith.constant 0 : index
    %c0_6 = arith.constant 0 : index
    %11 = vector.load %arg4[%c0_5, %c0_6] : memref<36x384xbf16, #tpu.memory_space<vmem>>, vector<36x384xbf16>
    tpu.vector_store %arg4[%c0_5, %c0_6], %10 {strides = array<i32>} : memref<36x384xbf16, #tpu.memory_space<vmem>>, vector<36x384xbf16>,
    return
  }
  func.func @transform_0(%arg0: i32) -> (i32, i32) {
    %c0_i32 = arith.constant 0 : i32
    %c0_i32_0 = arith.constant 0 : i32
    return %c0_i32, %arg0 : i32, i32
  }
  func.func @transform_1(%arg0: i32) -> (i32, i32) {
    %c0_i32 = arith.constant 0 : i32
    %c0_i32_0 = arith.constant 0 : i32
    %c0_i32_1 = arith.constant 0 : i32
    return %c0_i32, %c0_i32_0 : i32, i32
  }
  func.func @transform_2(%arg0: i32) -> (i32, i32) {
    %c0_i32 = arith.constant 0 : i32
    %c0_i32_0 = arith.constant 0 : i32
    %c0_i32_1 = arith.constant 0 : i32
    return %c0_i32, %c0_i32_0 : i32, i32
  }
  func.func @transform_3(%arg0: i32) -> (i32, i32) {
    %c0_i32 = arith.constant 0 : i32
    %c0_i32_0 = arith.constant 0 : i32
    return %c0_i32, %arg0 : i32, i32
  }
}

module attributes {stable_mosaic.version = 11 : i64} {
  func.func @_conv_matmul_stats_kernel(%arg0: i32, %arg1: memref<900x128xbf16, #tpu.memory_space<vmem>>, %arg2: memref<48x900xbf16, #tpu.memory_space<vmem>>, %arg3: memref<48x128xbf16, #tpu.memory_space<vmem>>, %arg4: memref<1x48x1xf32, #tpu.memory_space<vmem>>, %arg5: memref<1x48x1xf32, #tpu.memory_space<vmem>>) attributes {dimension_semantics = [#tpu.dimension_semantics<parallel>], iteration_bounds = array<i64: 1>, scalar_prefetch = 0 : i64, scratch_operands = 0 : i64, tpu.core_type = #tpu.core_type<tc>, window_params = [{transform_indices = @transform_0, window_bounds = array<i64: 900, 128>}, {pipeline_mode = #tpu.pipeline_mode<synchronous>, transform_indices = @transform_1, window_bounds = array<i64: 48, 900>}, {transform_indices = @transform_2, window_bounds = array<i64: 48, 128>}, {transform_indices = @transform_3, window_bounds = array<i64: 1, 48, 1>}, {transform_indices = @transform_4, window_bounds = array<i64: 1, 48, 1>}]} {
    %c0 = arith.constant 0 : index
    %c0_0 = arith.constant 0 : index
    %0 = vector.load %arg2[%c0, %c0_0] : memref<48x900xbf16, #tpu.memory_space<vmem>>, vector<48x900xbf16>
    %c0_1 = arith.constant 0 : index
    %c0_2 = arith.constant 0 : index
    %1 = vector.load %arg1[%c0_1, %c0_2] : memref<900x128xbf16, #tpu.memory_space<vmem>>, vector<900x128xbf16>
    %cst = arith.constant dense<0.000000e+00> : vector<48x128xf32>
    %2 = tpu.matmul %0, %1, %cst {dimension_numbers = #tpu.dot_dimension_numbers<[1], [0], [0], [1], [0, 0, 1, 1], [], []>} : vector<48x900xbf16>, vector<900x128xbf16>, vector<48x128xf32> -> vector<48x128xf32>
    %3 = arith.truncf %2 : vector<48x128xf32> to vector<48x128xbf16>
    %c0_3 = arith.constant 0 : index
    %c0_4 = arith.constant 0 : index
    %4 = vector.load %arg3[%c0_3, %c0_4] : memref<48x128xbf16, #tpu.memory_space<vmem>>, vector<48x128xbf16>
    tpu.vector_store %arg3[%c0_3, %c0_4], %3 {strides = array<i32>} : memref<48x128xbf16, #tpu.memory_space<vmem>>, vector<48x128xbf16>,
    %5 = tpu.iota {dimensions = array<i32: 1>} : vector<1x128xi32>
    %c128_i32 = arith.constant 128 : i32
    %6 = arith.muli %arg0, %c128_i32 : i32
    %7 = vector.broadcast %6 : i32 to vector<1x128xi32>
    %8 = arith.addi %5, %7 : vector<1x128xi32>
    %c50_i32 = arith.constant 50 : i32
    %9 = vector.broadcast %c50_i32 : i32 to vector<1x128xi32>
    %10 = arith.cmpi slt, %8, %9 : vector<1x128xi32>
    %cst_5 = arith.constant 0.000000e+00 : f32
    %11 = vector.shape_cast %10 : vector<1x128xi1> to vector<1x128xi1>
    %12 = vector.broadcast %11 : vector<1x128xi1> to vector<48x128xi1>
    %13 = vector.broadcast %cst_5 : f32 to vector<48x128xf32>
    %14 = arith.select %12, %2, %13 : vector<48x128xi1>, vector<48x128xf32>
    %cst_6 = arith.constant dense<0.000000e+00> : vector<48xf32>
    %15 = vector.multi_reduction <add>, %14, %cst_6 [1] : vector<48x128xf32> to vector<48xf32>
    %16 = vector.shape_cast %15 : vector<48xf32> to vector<48x1xf32>
    %17 = vector.shape_cast %16 : vector<48x1xf32> to vector<1x48x1xf32>
    %c0_7 = arith.constant 0 : index
    %c0_8 = arith.constant 0 : index
    %c0_9 = arith.constant 0 : index
    %18 = vector.load %arg4[%c0_7, %c0_8, %c0_9] : memref<1x48x1xf32, #tpu.memory_space<vmem>>, vector<1x48x1xf32>
    tpu.vector_store %arg4[%c0_7, %c0_8, %c0_9], %17 {strides = array<i32>} : memref<1x48x1xf32, #tpu.memory_space<vmem>>, vector<1x48x1xf32>,
    %19 = arith.mulf %14, %14 : vector<48x128xf32>
    %cst_10 = arith.constant dense<0.000000e+00> : vector<48xf32>
    %20 = vector.multi_reduction <add>, %19, %cst_10 [1] : vector<48x128xf32> to vector<48xf32>
    %21 = vector.shape_cast %20 : vector<48xf32> to vector<48x1xf32>
    %22 = vector.shape_cast %21 : vector<48x1xf32> to vector<1x48x1xf32>
    %c0_11 = arith.constant 0 : index
    %c0_12 = arith.constant 0 : index
    %c0_13 = arith.constant 0 : index
    %23 = vector.load %arg5[%c0_11, %c0_12, %c0_13] : memref<1x48x1xf32, #tpu.memory_space<vmem>>, vector<1x48x1xf32>
    tpu.vector_store %arg5[%c0_11, %c0_12, %c0_13], %22 {strides = array<i32>} : memref<1x48x1xf32, #tpu.memory_space<vmem>>, vector<1x48x1xf32>,
    return
  }
  func.func @transform_0(%arg0: i32) -> (i32, i32) {
    %c0_i32 = arith.constant 0 : i32
    %c0_i32_0 = arith.constant 0 : i32
    return %c0_i32, %arg0 : i32, i32
  }
  func.func @transform_1(%arg0: i32) -> (i32, i32) {
    %c0_i32 = arith.constant 0 : i32
    %c0_i32_0 = arith.constant 0 : i32
    %c0_i32_1 = arith.constant 0 : i32
    return %c0_i32, %c0_i32_0 : i32, i32
  }
  func.func @transform_2(%arg0: i32) -> (i32, i32) {
    %c0_i32 = arith.constant 0 : i32
    %c0_i32_0 = arith.constant 0 : i32
    return %c0_i32, %arg0 : i32, i32
  }
  func.func @transform_3(%arg0: i32) -> (i32, i32, i32) {
    %c0_i32 = arith.constant 0 : i32
    %c0_i32_0 = arith.constant 0 : i32
    %c0_i32_1 = arith.constant 0 : i32
    return %arg0, %c0_i32, %c0_i32_0 : i32, i32, i32
  }
  func.func @transform_4(%arg0: i32) -> (i32, i32, i32) {
    %c0_i32 = arith.constant 0 : i32
    %c0_i32_0 = arith.constant 0 : i32
    %c0_i32_1 = arith.constant 0 : i32
    return %arg0, %c0_i32, %c0_i32_0 : i32, i32, i32
  }
}

module attributes {stable_mosaic.version = 11 : i64} {
  func.func @_bn_relu_kernel(%arg0: i32, %arg1: memref<48x128xbf16, #tpu.memory_space<vmem>>, %arg2: memref<48x1xf32, #tpu.memory_space<vmem>>, %arg3: memref<48x1xf32, #tpu.memory_space<vmem>>, %arg4: memref<48x128xbf16, #tpu.memory_space<vmem>>) attributes {dimension_semantics = [#tpu.dimension_semantics<parallel>], iteration_bounds = array<i64: 1>, scalar_prefetch = 0 : i64, scratch_operands = 0 : i64, tpu.core_type = #tpu.core_type<tc>, window_params = [{transform_indices = @transform_0, window_bounds = array<i64: 48, 128>}, {pipeline_mode = #tpu.pipeline_mode<synchronous>, transform_indices = @transform_1, window_bounds = array<i64: 48, 1>}, {pipeline_mode = #tpu.pipeline_mode<synchronous>, transform_indices = @transform_2, window_bounds = array<i64: 48, 1>}, {transform_indices = @transform_3, window_bounds = array<i64: 48, 128>}]} {
    %c0 = arith.constant 0 : index
    %c0_0 = arith.constant 0 : index
    %0 = vector.load %arg1[%c0, %c0_0] : memref<48x128xbf16, #tpu.memory_space<vmem>>, vector<48x128xbf16>
    %1 = arith.extf %0 : vector<48x128xbf16> to vector<48x128xf32>
    %c0_1 = arith.constant 0 : index
    %c0_2 = arith.constant 0 : index
    %2 = vector.load %arg2[%c0_1, %c0_2] : memref<48x1xf32, #tpu.memory_space<vmem>>, vector<48x1xf32>
    %3 = vector.broadcast %2 : vector<48x1xf32> to vector<48x128xf32>
    %4 = arith.mulf %1, %3 : vector<48x128xf32>
    %c0_3 = arith.constant 0 : index
    %c0_4 = arith.constant 0 : index
    %5 = vector.load %arg3[%c0_3, %c0_4] : memref<48x1xf32, #tpu.memory_space<vmem>>, vector<48x1xf32>
    %6 = vector.broadcast %5 : vector<48x1xf32> to vector<48x128xf32>
    %7 = arith.addf %4, %6 : vector<48x128xf32>
    %cst = arith.constant 0.000000e+00 : f32
    %8 = vector.broadcast %cst : f32 to vector<48x128xf32>
    %9 = arith.maximumf %7, %8 : vector<48x128xf32>
    %10 = arith.truncf %9 : vector<48x128xf32> to vector<48x128xbf16>
    %c0_5 = arith.constant 0 : index
    %c0_6 = arith.constant 0 : index
    %11 = vector.load %arg4[%c0_5, %c0_6] : memref<48x128xbf16, #tpu.memory_space<vmem>>, vector<48x128xbf16>
    tpu.vector_store %arg4[%c0_5, %c0_6], %10 {strides = array<i32>} : memref<48x128xbf16, #tpu.memory_space<vmem>>, vector<48x128xbf16>,
    return
  }
  func.func @transform_0(%arg0: i32) -> (i32, i32) {
    %c0_i32 = arith.constant 0 : i32
    %c0_i32_0 = arith.constant 0 : i32
    return %c0_i32, %arg0 : i32, i32
  }
  func.func @transform_1(%arg0: i32) -> (i32, i32) {
    %c0_i32 = arith.constant 0 : i32
    %c0_i32_0 = arith.constant 0 : i32
    %c0_i32_1 = arith.constant 0 : i32
    return %c0_i32, %c0_i32_0 : i32, i32
  }
  func.func @transform_2(%arg0: i32) -> (i32, i32) {
    %c0_i32 = arith.constant 0 : i32
    %c0_i32_0 = arith.constant 0 : i32
    %c0_i32_1 = arith.constant 0 : i32
    return %c0_i32, %c0_i32_0 : i32, i32
  }
  func.func @transform_3(%arg0: i32) -> (i32, i32) {
    %c0_i32 = arith.constant 0 : i32
    %c0_i32_0 = arith.constant 0 : i32
    return %c0_i32, %arg0 : i32, i32
  }
}

module attributes {stable_mosaic.version = 11 : i64} {
  func.func @_conv_matmul_stats_kernel(%arg0: i32, %arg1: memref<432x128xbf16, #tpu.memory_space<vmem>>, %arg2: memref<64x432xbf16, #tpu.memory_space<vmem>>, %arg3: memref<64x128xbf16, #tpu.memory_space<vmem>>, %arg4: memref<1x64x1xf32, #tpu.memory_space<vmem>>, %arg5: memref<1x64x1xf32, #tpu.memory_space<vmem>>) attributes {dimension_semantics = [#tpu.dimension_semantics<parallel>], iteration_bounds = array<i64: 1>, scalar_prefetch = 0 : i64, scratch_operands = 0 : i64, tpu.core_type = #tpu.core_type<tc>, window_params = [{transform_indices = @transform_0, window_bounds = array<i64: 432, 128>}, {pipeline_mode = #tpu.pipeline_mode<synchronous>, transform_indices = @transform_1, window_bounds = array<i64: 64, 432>}, {transform_indices = @transform_2, window_bounds = array<i64: 64, 128>}, {transform_indices = @transform_3, window_bounds = array<i64: 1, 64, 1>}, {transform_indices = @transform_4, window_bounds = array<i64: 1, 64, 1>}]} {
    %c0 = arith.constant 0 : index
    %c0_0 = arith.constant 0 : index
    %0 = vector.load %arg2[%c0, %c0_0] : memref<64x432xbf16, #tpu.memory_space<vmem>>, vector<64x432xbf16>
    %c0_1 = arith.constant 0 : index
    %c0_2 = arith.constant 0 : index
    %1 = vector.load %arg1[%c0_1, %c0_2] : memref<432x128xbf16, #tpu.memory_space<vmem>>, vector<432x128xbf16>
    %cst = arith.constant dense<0.000000e+00> : vector<64x128xf32>
    %2 = tpu.matmul %0, %1, %cst {dimension_numbers = #tpu.dot_dimension_numbers<[1], [0], [0], [1], [0, 0, 1, 1], [], []>} : vector<64x432xbf16>, vector<432x128xbf16>, vector<64x128xf32> -> vector<64x128xf32>
    %3 = arith.truncf %2 : vector<64x128xf32> to vector<64x128xbf16>
    %c0_3 = arith.constant 0 : index
    %c0_4 = arith.constant 0 : index
    %4 = vector.load %arg3[%c0_3, %c0_4] : memref<64x128xbf16, #tpu.memory_space<vmem>>, vector<64x128xbf16>
    tpu.vector_store %arg3[%c0_3, %c0_4], %3 {strides = array<i32>} : memref<64x128xbf16, #tpu.memory_space<vmem>>, vector<64x128xbf16>,
    %5 = tpu.iota {dimensions = array<i32: 1>} : vector<1x128xi32>
    %c128_i32 = arith.constant 128 : i32
    %6 = arith.muli %arg0, %c128_i32 : i32
    %7 = vector.broadcast %6 : i32 to vector<1x128xi32>
    %8 = arith.addi %5, %7 : vector<1x128xi32>
    %c18_i32 = arith.constant 18 : i32
    %9 = vector.broadcast %c18_i32 : i32 to vector<1x128xi32>
    %10 = arith.cmpi slt, %8, %9 : vector<1x128xi32>
    %cst_5 = arith.constant 0.000000e+00 : f32
    %11 = vector.shape_cast %10 : vector<1x128xi1> to vector<1x128xi1>
    %12 = vector.broadcast %11 : vector<1x128xi1> to vector<64x128xi1>
    %13 = vector.broadcast %cst_5 : f32 to vector<64x128xf32>
    %14 = arith.select %12, %2, %13 : vector<64x128xi1>, vector<64x128xf32>
    %cst_6 = arith.constant dense<0.000000e+00> : vector<64xf32>
    %15 = vector.multi_reduction <add>, %14, %cst_6 [1] : vector<64x128xf32> to vector<64xf32>
    %16 = vector.shape_cast %15 : vector<64xf32> to vector<64x1xf32>
    %17 = vector.shape_cast %16 : vector<64x1xf32> to vector<1x64x1xf32>
    %c0_7 = arith.constant 0 : index
    %c0_8 = arith.constant 0 : index
    %c0_9 = arith.constant 0 : index
    %18 = vector.load %arg4[%c0_7, %c0_8, %c0_9] : memref<1x64x1xf32, #tpu.memory_space<vmem>>, vector<1x64x1xf32>
    tpu.vector_store %arg4[%c0_7, %c0_8, %c0_9], %17 {strides = array<i32>} : memref<1x64x1xf32, #tpu.memory_space<vmem>>, vector<1x64x1xf32>,
    %19 = arith.mulf %14, %14 : vector<64x128xf32>
    %cst_10 = arith.constant dense<0.000000e+00> : vector<64xf32>
    %20 = vector.multi_reduction <add>, %19, %cst_10 [1] : vector<64x128xf32> to vector<64xf32>
    %21 = vector.shape_cast %20 : vector<64xf32> to vector<64x1xf32>
    %22 = vector.shape_cast %21 : vector<64x1xf32> to vector<1x64x1xf32>
    %c0_11 = arith.constant 0 : index
    %c0_12 = arith.constant 0 : index
    %c0_13 = arith.constant 0 : index
    %23 = vector.load %arg5[%c0_11, %c0_12, %c0_13] : memref<1x64x1xf32, #tpu.memory_space<vmem>>, vector<1x64x1xf32>
    tpu.vector_store %arg5[%c0_11, %c0_12, %c0_13], %22 {strides = array<i32>} : memref<1x64x1xf32, #tpu.memory_space<vmem>>, vector<1x64x1xf32>,
    return
  }
  func.func @transform_0(%arg0: i32) -> (i32, i32) {
    %c0_i32 = arith.constant 0 : i32
    %c0_i32_0 = arith.constant 0 : i32
    return %c0_i32, %arg0 : i32, i32
  }
  func.func @transform_1(%arg0: i32) -> (i32, i32) {
    %c0_i32 = arith.constant 0 : i32
    %c0_i32_0 = arith.constant 0 : i32
    %c0_i32_1 = arith.constant 0 : i32
    return %c0_i32, %c0_i32_0 : i32, i32
  }
  func.func @transform_2(%arg0: i32) -> (i32, i32) {
    %c0_i32 = arith.constant 0 : i32
    %c0_i32_0 = arith.constant 0 : i32
    return %c0_i32, %arg0 : i32, i32
  }
  func.func @transform_3(%arg0: i32) -> (i32, i32, i32) {
    %c0_i32 = arith.constant 0 : i32
    %c0_i32_0 = arith.constant 0 : i32
    %c0_i32_1 = arith.constant 0 : i32
    return %arg0, %c0_i32, %c0_i32_0 : i32, i32, i32
  }
  func.func @transform_4(%arg0: i32) -> (i32, i32, i32) {
    %c0_i32 = arith.constant 0 : i32
    %c0_i32_0 = arith.constant 0 : i32
    %c0_i32_1 = arith.constant 0 : i32
    return %arg0, %c0_i32, %c0_i32_0 : i32, i32, i32
  }
}

module attributes {stable_mosaic.version = 11 : i64} {
  func.func @_bn_relu_kernel(%arg0: i32, %arg1: memref<64x128xbf16, #tpu.memory_space<vmem>>, %arg2: memref<64x1xf32, #tpu.memory_space<vmem>>, %arg3: memref<64x1xf32, #tpu.memory_space<vmem>>, %arg4: memref<64x128xbf16, #tpu.memory_space<vmem>>) attributes {dimension_semantics = [#tpu.dimension_semantics<parallel>], iteration_bounds = array<i64: 1>, scalar_prefetch = 0 : i64, scratch_operands = 0 : i64, tpu.core_type = #tpu.core_type<tc>, window_params = [{transform_indices = @transform_0, window_bounds = array<i64: 64, 128>}, {pipeline_mode = #tpu.pipeline_mode<synchronous>, transform_indices = @transform_1, window_bounds = array<i64: 64, 1>}, {pipeline_mode = #tpu.pipeline_mode<synchronous>, transform_indices = @transform_2, window_bounds = array<i64: 64, 1>}, {transform_indices = @transform_3, window_bounds = array<i64: 64, 128>}]} {
    %c0 = arith.constant 0 : index
    %c0_0 = arith.constant 0 : index
    %0 = vector.load %arg1[%c0, %c0_0] : memref<64x128xbf16, #tpu.memory_space<vmem>>, vector<64x128xbf16>
    %1 = arith.extf %0 : vector<64x128xbf16> to vector<64x128xf32>
    %c0_1 = arith.constant 0 : index
    %c0_2 = arith.constant 0 : index
    %2 = vector.load %arg2[%c0_1, %c0_2] : memref<64x1xf32, #tpu.memory_space<vmem>>, vector<64x1xf32>
    %3 = vector.broadcast %2 : vector<64x1xf32> to vector<64x128xf32>
    %4 = arith.mulf %1, %3 : vector<64x128xf32>
    %c0_3 = arith.constant 0 : index
    %c0_4 = arith.constant 0 : index
    %5 = vector.load %arg3[%c0_3, %c0_4] : memref<64x1xf32, #tpu.memory_space<vmem>>, vector<64x1xf32>
    %6 = vector.broadcast %5 : vector<64x1xf32> to vector<64x128xf32>
    %7 = arith.addf %4, %6 : vector<64x128xf32>
    %cst = arith.constant 0.000000e+00 : f32
    %8 = vector.broadcast %cst : f32 to vector<64x128xf32>
    %9 = arith.maximumf %7, %8 : vector<64x128xf32>
    %10 = arith.truncf %9 : vector<64x128xf32> to vector<64x128xbf16>
    %c0_5 = arith.constant 0 : index
    %c0_6 = arith.constant 0 : index
    %11 = vector.load %arg4[%c0_5, %c0_6] : memref<64x128xbf16, #tpu.memory_space<vmem>>, vector<64x128xbf16>
    tpu.vector_store %arg4[%c0_5, %c0_6], %10 {strides = array<i32>} : memref<64x128xbf16, #tpu.memory_space<vmem>>, vector<64x128xbf16>,
    return
  }
  func.func @transform_0(%arg0: i32) -> (i32, i32) {
    %c0_i32 = arith.constant 0 : i32
    %c0_i32_0 = arith.constant 0 : i32
    return %c0_i32, %arg0 : i32, i32
  }
  func.func @transform_1(%arg0: i32) -> (i32, i32) {
    %c0_i32 = arith.constant 0 : i32
    %c0_i32_0 = arith.constant 0 : i32
    %c0_i32_1 = arith.constant 0 : i32
    return %c0_i32, %c0_i32_0 : i32, i32
  }
  func.func @transform_2(%arg0: i32) -> (i32, i32) {
    %c0_i32 = arith.constant 0 : i32
    %c0_i32_0 = arith.constant 0 : i32
    %c0_i32_1 = arith.constant 0 : i32
    return %c0_i32, %c0_i32_0 : i32, i32
  }
  func.func @transform_3(%arg0: i32) -> (i32, i32) {
    %c0_i32 = arith.constant 0 : i32
    %c0_i32_0 = arith.constant 0 : i32
    return %c0_i32, %arg0 : i32, i32
  }
}

module attributes {stable_mosaic.version = 11 : i64} {
  func.func @_conv_matmul_stats_kernel(%arg0: i32, %arg1: memref<576x128xbf16, #tpu.memory_space<vmem>>, %arg2: memref<64x576xbf16, #tpu.memory_space<vmem>>, %arg3: memref<64x128xbf16, #tpu.memory_space<vmem>>, %arg4: memref<1x64x1xf32, #tpu.memory_space<vmem>>, %arg5: memref<1x64x1xf32, #tpu.memory_space<vmem>>) attributes {dimension_semantics = [#tpu.dimension_semantics<parallel>], iteration_bounds = array<i64: 1>, scalar_prefetch = 0 : i64, scratch_operands = 0 : i64, tpu.core_type = #tpu.core_type<tc>, window_params = [{transform_indices = @transform_0, window_bounds = array<i64: 576, 128>}, {pipeline_mode = #tpu.pipeline_mode<synchronous>, transform_indices = @transform_1, window_bounds = array<i64: 64, 576>}, {transform_indices = @transform_2, window_bounds = array<i64: 64, 128>}, {transform_indices = @transform_3, window_bounds = array<i64: 1, 64, 1>}, {transform_indices = @transform_4, window_bounds = array<i64: 1, 64, 1>}]} {
    %c0 = arith.constant 0 : index
    %c0_0 = arith.constant 0 : index
    %0 = vector.load %arg2[%c0, %c0_0] : memref<64x576xbf16, #tpu.memory_space<vmem>>, vector<64x576xbf16>
    %c0_1 = arith.constant 0 : index
    %c0_2 = arith.constant 0 : index
    %1 = vector.load %arg1[%c0_1, %c0_2] : memref<576x128xbf16, #tpu.memory_space<vmem>>, vector<576x128xbf16>
    %cst = arith.constant dense<0.000000e+00> : vector<64x128xf32>
    %2 = tpu.matmul %0, %1, %cst {dimension_numbers = #tpu.dot_dimension_numbers<[1], [0], [0], [1], [0, 0, 1, 1], [], []>} : vector<64x576xbf16>, vector<576x128xbf16>, vector<64x128xf32> -> vector<64x128xf32>
    %3 = arith.truncf %2 : vector<64x128xf32> to vector<64x128xbf16>
    %c0_3 = arith.constant 0 : index
    %c0_4 = arith.constant 0 : index
    %4 = vector.load %arg3[%c0_3, %c0_4] : memref<64x128xbf16, #tpu.memory_space<vmem>>, vector<64x128xbf16>
    tpu.vector_store %arg3[%c0_3, %c0_4], %3 {strides = array<i32>} : memref<64x128xbf16, #tpu.memory_space<vmem>>, vector<64x128xbf16>,
    %5 = tpu.iota {dimensions = array<i32: 1>} : vector<1x128xi32>
    %c128_i32 = arith.constant 128 : i32
    %6 = arith.muli %arg0, %c128_i32 : i32
    %7 = vector.broadcast %6 : i32 to vector<1x128xi32>
    %8 = arith.addi %5, %7 : vector<1x128xi32>
    %c2_i32 = arith.constant 2 : i32
    %9 = vector.broadcast %c2_i32 : i32 to vector<1x128xi32>
    %10 = arith.cmpi slt, %8, %9 : vector<1x128xi32>
    %cst_5 = arith.constant 0.000000e+00 : f32
    %11 = vector.shape_cast %10 : vector<1x128xi1> to vector<1x128xi1>
    %12 = vector.broadcast %11 : vector<1x128xi1> to vector<64x128xi1>
    %13 = vector.broadcast %cst_5 : f32 to vector<64x128xf32>
    %14 = arith.select %12, %2, %13 : vector<64x128xi1>, vector<64x128xf32>
    %cst_6 = arith.constant dense<0.000000e+00> : vector<64xf32>
    %15 = vector.multi_reduction <add>, %14, %cst_6 [1] : vector<64x128xf32> to vector<64xf32>
    %16 = vector.shape_cast %15 : vector<64xf32> to vector<64x1xf32>
    %17 = vector.shape_cast %16 : vector<64x1xf32> to vector<1x64x1xf32>
    %c0_7 = arith.constant 0 : index
    %c0_8 = arith.constant 0 : index
    %c0_9 = arith.constant 0 : index
    %18 = vector.load %arg4[%c0_7, %c0_8, %c0_9] : memref<1x64x1xf32, #tpu.memory_space<vmem>>, vector<1x64x1xf32>
    tpu.vector_store %arg4[%c0_7, %c0_8, %c0_9], %17 {strides = array<i32>} : memref<1x64x1xf32, #tpu.memory_space<vmem>>, vector<1x64x1xf32>,
    %19 = arith.mulf %14, %14 : vector<64x128xf32>
    %cst_10 = arith.constant dense<0.000000e+00> : vector<64xf32>
    %20 = vector.multi_reduction <add>, %19, %cst_10 [1] : vector<64x128xf32> to vector<64xf32>
    %21 = vector.shape_cast %20 : vector<64xf32> to vector<64x1xf32>
    %22 = vector.shape_cast %21 : vector<64x1xf32> to vector<1x64x1xf32>
    %c0_11 = arith.constant 0 : index
    %c0_12 = arith.constant 0 : index
    %c0_13 = arith.constant 0 : index
    %23 = vector.load %arg5[%c0_11, %c0_12, %c0_13] : memref<1x64x1xf32, #tpu.memory_space<vmem>>, vector<1x64x1xf32>
    tpu.vector_store %arg5[%c0_11, %c0_12, %c0_13], %22 {strides = array<i32>} : memref<1x64x1xf32, #tpu.memory_space<vmem>>, vector<1x64x1xf32>,
    return
  }
  func.func @transform_0(%arg0: i32) -> (i32, i32) {
    %c0_i32 = arith.constant 0 : i32
    %c0_i32_0 = arith.constant 0 : i32
    return %c0_i32, %arg0 : i32, i32
  }
  func.func @transform_1(%arg0: i32) -> (i32, i32) {
    %c0_i32 = arith.constant 0 : i32
    %c0_i32_0 = arith.constant 0 : i32
    %c0_i32_1 = arith.constant 0 : i32
    return %c0_i32, %c0_i32_0 : i32, i32
  }
  func.func @transform_2(%arg0: i32) -> (i32, i32) {
    %c0_i32 = arith.constant 0 : i32
    %c0_i32_0 = arith.constant 0 : i32
    return %c0_i32, %arg0 : i32, i32
  }
  func.func @transform_3(%arg0: i32) -> (i32, i32, i32) {
    %c0_i32 = arith.constant 0 : i32
    %c0_i32_0 = arith.constant 0 : i32
    %c0_i32_1 = arith.constant 0 : i32
    return %arg0, %c0_i32, %c0_i32_0 : i32, i32, i32
  }
  func.func @transform_4(%arg0: i32) -> (i32, i32, i32) {
    %c0_i32 = arith.constant 0 : i32
    %c0_i32_0 = arith.constant 0 : i32
    %c0_i32_1 = arith.constant 0 : i32
    return %arg0, %c0_i32, %c0_i32_0 : i32, i32, i32
  }
}

module attributes {stable_mosaic.version = 11 : i64} {
  func.func @_ktiled_linear_kernel(%arg0: i32, %arg1: memref<2x128xbf16, #tpu.memory_space<vmem>>, %arg2: memref<128x32xbf16, #tpu.memory_space<vmem>>, %arg3: memref<1x32xf32, #tpu.memory_space<vmem>>, %arg4: memref<2x32xf32, #tpu.memory_space<vmem>>, %arg5: memref<2x32xf32, #tpu.memory_space<vmem>>) attributes {dimension_semantics = [#tpu.dimension_semantics<arbitrary>], iteration_bounds = array<i64: 1>, scalar_prefetch = 0 : i64, scratch_operands = 1 : i64, tpu.core_type = #tpu.core_type<tc>, window_params = [{transform_indices = @transform_0, window_bounds = array<i64: 2, 128>}, {transform_indices = @transform_1, window_bounds = array<i64: 128, 32>}, {pipeline_mode = #tpu.pipeline_mode<synchronous>, transform_indices = @transform_2, window_bounds = array<i64: 1, 32>}, {pipeline_mode = #tpu.pipeline_mode<synchronous>, transform_indices = @transform_3, window_bounds = array<i64: 2, 32>}]} {
    %c0_i32 = arith.constant 0 : i32
    %0 = arith.cmpi eq, %arg0, %c0_i32 : i32
    %1 = arith.extui %0 : i1 to i32
    %c0_i32_0 = arith.constant 0 : i32
    %2 = arith.cmpi ne, %1, %c0_i32_0 : i32
    scf.if %2 {
      %cst_10 = arith.constant 0.000000e+00 : f32
      %12 = vector.broadcast %cst_10 : f32 to vector<2x32xf32>
      %c0_11 = arith.constant 0 : index
      %c0_12 = arith.constant 0 : index
      %13 = vector.load %arg5[%c0_11, %c0_12] : memref<2x32xf32, #tpu.memory_space<vmem>>, vector<2x32xf32>
      tpu.vector_store %arg5[%c0_11, %c0_12], %12 {strides = array<i32>} : memref<2x32xf32, #tpu.memory_space<vmem>>, vector<2x32xf32>,
    } else {
    }
    %c0 = arith.constant 0 : index
    %c0_1 = arith.constant 0 : index
    %3 = vector.load %arg5[%c0, %c0_1] : memref<2x32xf32, #tpu.memory_space<vmem>>, vector<2x32xf32>
    %c0_2 = arith.constant 0 : index
    %c0_3 = arith.constant 0 : index
    %4 = vector.load %arg1[%c0_2, %c0_3] : memref<2x128xbf16, #tpu.memory_space<vmem>>, vector<2x128xbf16>
    %c0_4 = arith.constant 0 : index
    %c0_5 = arith.constant 0 : index
    %5 = vector.load %arg2[%c0_4, %c0_5] : memref<128x32xbf16, #tpu.memory_space<vmem>>, vector<128x32xbf16>
    %cst = arith.constant dense<0.000000e+00> : vector<2x32xf32>
    %6 = tpu.matmul %4, %5, %cst {dimension_numbers = #tpu.dot_dimension_numbers<[1], [0], [0], [1], [0, 0, 1, 1], [], []>} : vector<2x128xbf16>, vector<128x32xbf16>, vector<2x32xf32> -> vector<2x32xf32>
    %7 = arith.addf %3, %6 : vector<2x32xf32>
    %c0_6 = arith.constant 0 : index
    %c0_7 = arith.constant 0 : index
    %8 = vector.load %arg5[%c0_6, %c0_7] : memref<2x32xf32, #tpu.memory_space<vmem>>, vector<2x32xf32>
    tpu.vector_store %arg5[%c0_6, %c0_7], %7 {strides = array<i32>} : memref<2x32xf32, #tpu.memory_space<vmem>>, vector<2x32xf32>,
    %c0_i32_8 = arith.constant 0 : i32
    %9 = arith.cmpi eq, %arg0, %c0_i32_8 : i32
    %10 = arith.extui %9 : i1 to i32
    %c0_i32_9 = arith.constant 0 : i32
    %11 = arith.cmpi ne, %10, %c0_i32_9 : i32
    scf.if %11 {
      %c0_10 = arith.constant 0 : index
      %c0_11 = arith.constant 0 : index
      %12 = vector.load %arg5[%c0_10, %c0_11] : memref<2x32xf32, #tpu.memory_space<vmem>>, vector<2x32xf32>
      %c0_12 = arith.constant 0 : index
      %c0_13 = arith.constant 0 : index
      %13 = vector.load %arg3[%c0_12, %c0_13] : memref<1x32xf32, #tpu.memory_space<vmem>>, vector<1x32xf32>
      %14 = vector.broadcast %13 : vector<1x32xf32> to vector<2x32xf32>
      %15 = arith.addf %12, %14 : vector<2x32xf32>
      %c0_14 = arith.constant 0 : index
      %c0_15 = arith.constant 0 : index
      %16 = vector.load %arg4[%c0_14, %c0_15] : memref<2x32xf32, #tpu.memory_space<vmem>>, vector<2x32xf32>
      tpu.vector_store %arg4[%c0_14, %c0_15], %15 {strides = array<i32>} : memref<2x32xf32, #tpu.memory_space<vmem>>, vector<2x32xf32>,
    } else {
    }
    return
  }
  func.func @transform_0(%arg0: i32) -> (i32, i32) {
    %c0_i32 = arith.constant 0 : i32
    %c0_i32_0 = arith.constant 0 : i32
    return %c0_i32, %arg0 : i32, i32
  }
  func.func @transform_1(%arg0: i32) -> (i32, i32) {
    %c0_i32 = arith.constant 0 : i32
    %c0_i32_0 = arith.constant 0 : i32
    return %arg0, %c0_i32 : i32, i32
  }
  func.func @transform_2(%arg0: i32) -> (i32, i32) {
    %c0_i32 = arith.constant 0 : i32
    %c0_i32_0 = arith.constant 0 : i32
    %c0_i32_1 = arith.constant 0 : i32
    return %c0_i32, %c0_i32_0 : i32, i32
  }
  func.func @transform_3(%arg0: i32) -> (i32, i32) {
    %c0_i32 = arith.constant 0 : i32
    %c0_i32_0 = arith.constant 0 : i32
    %c0_i32_1 = arith.constant 0 : i32
    return %c0_i32, %c0_i32_0 : i32, i32
  }
}

module attributes {stable_mosaic.version = 11 : i64} {
  func.func @_lstm_fc_head_kernel(%arg0: memref<2x32xf32, #tpu.memory_space<vmem>>, %arg1: memref<1x128xf32, #tpu.memory_space<vmem>>, %arg2: memref<1x128xf32, #tpu.memory_space<vmem>>, %arg3: memref<32x512xbf16, #tpu.memory_space<vmem>>, %arg4: memref<128x512xbf16, #tpu.memory_space<vmem>>, %arg5: memref<1x512xf32, #tpu.memory_space<vmem>>, %arg6: memref<128x32xf32, #tpu.memory_space<vmem>>, %arg7: memref<1x32xf32, #tpu.memory_space<vmem>>, %arg8: memref<32x100xf32, #tpu.memory_space<vmem>>, %arg9: memref<1x100xf32, #tpu.memory_space<vmem>>, %arg10: memref<100x50xf32, #tpu.memory_space<vmem>>, %arg11: memref<1x50xf32, #tpu.memory_space<vmem>>, %arg12: memref<50x10xf32, #tpu.memory_space<vmem>>, %arg13: memref<1x10xf32, #tpu.memory_space<vmem>>, %arg14: memref<10x1xf32, #tpu.memory_space<vmem>>, %arg15: memref<1x1xf32, #tpu.memory_space<vmem>>, %arg16: memref<2x1xf32, #tpu.memory_space<vmem>>, %arg17: memref<1x128xf32, #tpu.memory_space<vmem>>, %arg18: memref<1x128xf32, #tpu.memory_space<vmem>>, %arg19: memref<2x128xf32, #tpu.memory_space<vmem>>, %arg20: memref<2x512xf32, #tpu.memory_space<vmem>>) attributes {dimension_semantics = [], scalar_prefetch = 0 : i64, scratch_operands = 2 : i64, tpu.core_type = #tpu.core_type<tc>} {
    %c0 = arith.constant 0 : index
    %c0_0 = arith.constant 0 : index
    %0 = vector.load %arg0[%c0, %c0_0] : memref<2x32xf32, #tpu.memory_space<vmem>>, vector<2x32xf32>
    %1 = arith.truncf %0 : vector<2x32xf32> to vector<2x32xbf16>
    %c0_1 = arith.constant 0 : index
    %c0_2 = arith.constant 0 : index
    %2 = vector.load %arg3[%c0_1, %c0_2] : memref<32x512xbf16, #tpu.memory_space<vmem>>, vector<32x512xbf16>
    %cst = arith.constant dense<0.000000e+00> : vector<2x512xf32>
    %3 = tpu.matmul %1, %2, %cst {dimension_numbers = #tpu.dot_dimension_numbers<[1], [0], [0], [1], [0, 0, 1, 1], [], []>} : vector<2x32xbf16>, vector<32x512xbf16>, vector<2x512xf32> -> vector<2x512xf32>
    %c0_3 = arith.constant 0 : index
    %c0_4 = arith.constant 0 : index
    %4 = vector.load %arg5[%c0_3, %c0_4] : memref<1x512xf32, #tpu.memory_space<vmem>>, vector<1x512xf32>
    %5 = vector.broadcast %4 : vector<1x512xf32> to vector<2x512xf32>
    %6 = arith.addf %3, %5 : vector<2x512xf32>
    %c0_5 = arith.constant 0 : index
    %c0_6 = arith.constant 0 : index
    %7 = vector.load %arg20[%c0_5, %c0_6] : memref<2x512xf32, #tpu.memory_space<vmem>>, vector<2x512xf32>
    tpu.vector_store %arg20[%c0_5, %c0_6], %6 {strides = array<i32>} : memref<2x512xf32, #tpu.memory_space<vmem>>, vector<2x512xf32>,
    %c0_7 = arith.constant 0 : index
    %c0_8 = arith.constant 0 : index
    %8 = vector.load %arg1[%c0_7, %c0_8] : memref<1x128xf32, #tpu.memory_space<vmem>>, vector<1x128xf32>
    %c0_9 = arith.constant 0 : index
    %c0_10 = arith.constant 0 : index
    %9 = vector.load %arg2[%c0_9, %c0_10] : memref<1x128xf32, #tpu.memory_space<vmem>>, vector<1x128xf32>
    %c0_i32 = arith.constant 0 : i32
    %10 = arith.index_cast %c0_i32 : i32 to index
    %c0_11 = arith.constant 0 : index
    %11 = vector.load %arg20[%10, %c0_11] : memref<2x512xf32, #tpu.memory_space<vmem>>, vector<1x512xf32>
    %12 = arith.truncf %8 : vector<1x128xf32> to vector<1x128xbf16>
    %c0_12 = arith.constant 0 : index
    %c0_13 = arith.constant 0 : index
    %13 = vector.load %arg4[%c0_12, %c0_13] : memref<128x512xbf16, #tpu.memory_space<vmem>>, vector<128x512xbf16>
    %cst_14 = arith.constant dense<0.000000e+00> : vector<1x512xf32>
    %14 = tpu.matmul %12, %13, %cst_14 {dimension_numbers = #tpu.dot_dimension_numbers<[1], [0], [0], [1], [0, 0, 1, 1], [], []>} : vector<1x128xbf16>, vector<128x512xbf16>, vector<1x512xf32> -> vector<1x512xf32>
    %15 = arith.addf %11, %14 : vector<1x512xf32>
    %16 = vector.extract_strided_slice %15 {offsets = [0, 0], sizes = [1, 128], strides = [1, 1]} : vector<1x512xf32> to vector<1x128xf32>
    %17 = arith.negf %16 : vector<1x128xf32>
    %18 = math.exp %17 : vector<1x128xf32>
    %cst_15 = arith.constant 1.000000e+00 : f32
    %19 = vector.broadcast %cst_15 : f32 to vector<1x128xf32>
    %20 = arith.addf %19, %18 : vector<1x128xf32>
    %21 = arith.divf %19, %20 : vector<1x128xf32>
    %22 = vector.extract_strided_slice %15 {offsets = [0, 128], sizes = [1, 128], strides = [1, 1]} : vector<1x512xf32> to vector<1x128xf32>
    %23 = arith.negf %22 : vector<1x128xf32>
    %24 = math.exp %23 : vector<1x128xf32>
    %cst_16 = arith.constant 1.000000e+00 : f32
    %25 = vector.broadcast %cst_16 : f32 to vector<1x128xf32>
    %26 = arith.addf %25, %24 : vector<1x128xf32>
    %27 = arith.divf %25, %26 : vector<1x128xf32>
    %28 = vector.extract_strided_slice %15 {offsets = [0, 256], sizes = [1, 128], strides = [1, 1]} : vector<1x512xf32> to vector<1x128xf32>
    %29 = math.tanh %28 : vector<1x128xf32>
    %30 = vector.extract_strided_slice %15 {offsets = [0, 384], sizes = [1, 128], strides = [1, 1]} : vector<1x512xf32> to vector<1x128xf32>
    %31 = arith.negf %30 : vector<1x128xf32>
    %32 = math.exp %31 : vector<1x128xf32>
    %cst_17 = arith.constant 1.000000e+00 : f32
    %33 = vector.broadcast %cst_17 : f32 to vector<1x128xf32>
    %34 = arith.addf %33, %32 : vector<1x128xf32>
    %35 = arith.divf %33, %34 : vector<1x128xf32>
    %36 = arith.mulf %27, %9 : vector<1x128xf32>
    %37 = arith.mulf %21, %29 : vector<1x128xf32>
    %38 = arith.addf %36, %37 : vector<1x128xf32>
    %39 = math.tanh %38 : vector<1x128xf32>
    %40 = arith.mulf %35, %39 : vector<1x128xf32>
    %41 = arith.index_cast %c0_i32 : i32 to index
    %c0_18 = arith.constant 0 : index
    %42 = vector.load %arg19[%41, %c0_18] : memref<2x128xf32, #tpu.memory_space<vmem>>, vector<1x128xf32>
    tpu.vector_store %arg19[%41, %c0_18], %40 {strides = array<i32>} : memref<2x128xf32, #tpu.memory_space<vmem>>, vector<1x128xf32>,
    %c1_i32 = arith.constant 1 : i32
    %43 = arith.index_cast %c1_i32 : i32 to index
    %c0_19 = arith.constant 0 : index
    %44 = vector.load %arg20[%43, %c0_19] : memref<2x512xf32, #tpu.memory_space<vmem>>, vector<1x512xf32>
    %45 = arith.truncf %40 : vector<1x128xf32> to vector<1x128xbf16>
    %c0_20 = arith.constant 0 : index
    %c0_21 = arith.constant 0 : index
    %46 = vector.load %arg4[%c0_20, %c0_21] : memref<128x512xbf16, #tpu.memory_space<vmem>>, vector<128x512xbf16>
    %cst_22 = arith.constant dense<0.000000e+00> : vector<1x512xf32>
    %47 = tpu.matmul %45, %46, %cst_22 {dimension_numbers = #tpu.dot_dimension_numbers<[1], [0], [0], [1], [0, 0, 1, 1], [], []>} : vector<1x128xbf16>, vector<128x512xbf16>, vector<1x512xf32> -> vector<1x512xf32>
    %48 = arith.addf %44, %47 : vector<1x512xf32>
    %49 = vector.extract_strided_slice %48 {offsets = [0, 0], sizes = [1, 128], strides = [1, 1]} : vector<1x512xf32> to vector<1x128xf32>
    %50 = arith.negf %49 : vector<1x128xf32>
    %51 = math.exp %50 : vector<1x128xf32>
    %cst_23 = arith.constant 1.000000e+00 : f32
    %52 = vector.broadcast %cst_23 : f32 to vector<1x128xf32>
    %53 = arith.addf %52, %51 : vector<1x128xf32>
    %54 = arith.divf %52, %53 : vector<1x128xf32>
    %55 = vector.extract_strided_slice %48 {offsets = [0, 128], sizes = [1, 128], strides = [1, 1]} : vector<1x512xf32> to vector<1x128xf32>
    %56 = arith.negf %55 : vector<1x128xf32>
    %57 = math.exp %56 : vector<1x128xf32>
    %cst_24 = arith.constant 1.000000e+00 : f32
    %58 = vector.broadcast %cst_24 : f32 to vector<1x128xf32>
    %59 = arith.addf %58, %57 : vector<1x128xf32>
    %60 = arith.divf %58, %59 : vector<1x128xf32>
    %61 = vector.extract_strided_slice %48 {offsets = [0, 256], sizes = [1, 128], strides = [1, 1]} : vector<1x512xf32> to vector<1x128xf32>
    %62 = math.tanh %61 : vector<1x128xf32>
    %63 = vector.extract_strided_slice %48 {offsets = [0, 384], sizes = [1, 128], strides = [1, 1]} : vector<1x512xf32> to vector<1x128xf32>
    %64 = arith.negf %63 : vector<1x128xf32>
    %65 = math.exp %64 : vector<1x128xf32>
    %cst_25 = arith.constant 1.000000e+00 : f32
    %66 = vector.broadcast %cst_25 : f32 to vector<1x128xf32>
    %67 = arith.addf %66, %65 : vector<1x128xf32>
    %68 = arith.divf %66, %67 : vector<1x128xf32>
    %69 = arith.mulf %60, %38 : vector<1x128xf32>
    %70 = arith.mulf %54, %62 : vector<1x128xf32>
    %71 = arith.addf %69, %70 : vector<1x128xf32>
    %72 = math.tanh %71 : vector<1x128xf32>
    %73 = arith.mulf %68, %72 : vector<1x128xf32>
    %74 = arith.index_cast %c1_i32 : i32 to index
    %c0_26 = arith.constant 0 : index
    %75 = vector.load %arg19[%74, %c0_26] : memref<2x128xf32, #tpu.memory_space<vmem>>, vector<1x128xf32>
    tpu.vector_store %arg19[%74, %c0_26], %73 {strides = array<i32>} : memref<2x128xf32, #tpu.memory_space<vmem>>, vector<1x128xf32>,
    %c2_i32 = arith.constant 2 : i32
    %c0_27 = arith.constant 0 : index
    %c0_28 = arith.constant 0 : index
    %76 = vector.load %arg17[%c0_27, %c0_28] : memref<1x128xf32, #tpu.memory_space<vmem>>, vector<1x128xf32>
    tpu.vector_store %arg17[%c0_27, %c0_28], %73 {strides = array<i32>} : memref<1x128xf32, #tpu.memory_space<vmem>>, vector<1x128xf32>,
    %c0_29 = arith.constant 0 : index
    %c0_30 = arith.constant 0 : index
    %77 = vector.load %arg18[%c0_29, %c0_30] : memref<1x128xf32, #tpu.memory_space<vmem>>, vector<1x128xf32>
    tpu.vector_store %arg18[%c0_29, %c0_30], %71 {strides = array<i32>} : memref<1x128xf32, #tpu.memory_space<vmem>>, vector<1x128xf32>,
    %c0_31 = arith.constant 0 : index
    %c0_32 = arith.constant 0 : index
    %78 = vector.load %arg19[%c0_31, %c0_32] : memref<2x128xf32, #tpu.memory_space<vmem>>, vector<2x128xf32>
    %c0_33 = arith.constant 0 : index
    %c0_34 = arith.constant 0 : index
    %79 = vector.load %arg6[%c0_33, %c0_34] : memref<128x32xf32, #tpu.memory_space<vmem>>, vector<128x32xf32>
    %cst_35 = arith.constant dense<0.000000e+00> : vector<2x32xf32>
    %80 = tpu.matmul %78, %79, %cst_35 {dimension_numbers = #tpu.dot_dimension_numbers<[1], [0], [0], [1], [0, 0, 1, 1], [], []>} : vector<2x128xf32>, vector<128x32xf32>, vector<2x32xf32> -> vector<2x32xf32>
    %c0_36 = arith.constant 0 : index
    %c0_37 = arith.constant 0 : index
    %81 = vector.load %arg7[%c0_36, %c0_37] : memref<1x32xf32, #tpu.memory_space<vmem>>, vector<1x32xf32>
    %82 = vector.broadcast %81 : vector<1x32xf32> to vector<2x32xf32>
    %83 = arith.addf %80, %82 : vector<2x32xf32>
    %cst_38 = arith.constant 0.000000e+00 : f32
    %84 = vector.broadcast %cst_38 : f32 to vector<2x32xf32>
    %85 = arith.maximumf %83, %84 : vector<2x32xf32>
    %c0_39 = arith.constant 0 : index
    %c0_40 = arith.constant 0 : index
    %86 = vector.load %arg8[%c0_39, %c0_40] : memref<32x100xf32, #tpu.memory_space<vmem>>, vector<32x100xf32>
    %cst_41 = arith.constant dense<0.000000e+00> : vector<2x100xf32>
    %87 = tpu.matmul %85, %86, %cst_41 {dimension_numbers = #tpu.dot_dimension_numbers<[1], [0], [0], [1], [0, 0, 1, 1], [], []>} : vector<2x32xf32>, vector<32x100xf32>, vector<2x100xf32> -> vector<2x100xf32>
    %c0_42 = arith.constant 0 : index
    %c0_43 = arith.constant 0 : index
    %88 = vector.load %arg9[%c0_42, %c0_43] : memref<1x100xf32, #tpu.memory_space<vmem>>, vector<1x100xf32>
    %89 = vector.broadcast %88 : vector<1x100xf32> to vector<2x100xf32>
    %90 = arith.addf %87, %89 : vector<2x100xf32>
    %cst_44 = arith.constant 0.000000e+00 : f32
    %91 = vector.broadcast %cst_44 : f32 to vector<2x100xf32>
    %92 = arith.maximumf %90, %91 : vector<2x100xf32>
    %c0_45 = arith.constant 0 : index
    %c0_46 = arith.constant 0 : index
    %93 = vector.load %arg10[%c0_45, %c0_46] : memref<100x50xf32, #tpu.memory_space<vmem>>, vector<100x50xf32>
    %cst_47 = arith.constant dense<0.000000e+00> : vector<2x50xf32>
    %94 = tpu.matmul %92, %93, %cst_47 {dimension_numbers = #tpu.dot_dimension_numbers<[1], [0], [0], [1], [0, 0, 1, 1], [], []>} : vector<2x100xf32>, vector<100x50xf32>, vector<2x50xf32> -> vector<2x50xf32>
    %c0_48 = arith.constant 0 : index
    %c0_49 = arith.constant 0 : index
    %95 = vector.load %arg11[%c0_48, %c0_49] : memref<1x50xf32, #tpu.memory_space<vmem>>, vector<1x50xf32>
    %96 = vector.broadcast %95 : vector<1x50xf32> to vector<2x50xf32>
    %97 = arith.addf %94, %96 : vector<2x50xf32>
    %cst_50 = arith.constant 0.000000e+00 : f32
    %98 = vector.broadcast %cst_50 : f32 to vector<2x50xf32>
    %99 = arith.maximumf %97, %98 : vector<2x50xf32>
    %c0_51 = arith.constant 0 : index
    %c0_52 = arith.constant 0 : index
    %100 = vector.load %arg12[%c0_51, %c0_52] : memref<50x10xf32, #tpu.memory_space<vmem>>, vector<50x10xf32>
    %cst_53 = arith.constant dense<0.000000e+00> : vector<2x10xf32>
    %101 = tpu.matmul %99, %100, %cst_53 {dimension_numbers = #tpu.dot_dimension_numbers<[1], [0], [0], [1], [0, 0, 1, 1], [], []>} : vector<2x50xf32>, vector<50x10xf32>, vector<2x10xf32> -> vector<2x10xf32>
    %c0_54 = arith.constant 0 : index
    %c0_55 = arith.constant 0 : index
    %102 = vector.load %arg13[%c0_54, %c0_55] : memref<1x10xf32, #tpu.memory_space<vmem>>, vector<1x10xf32>
    %103 = vector.broadcast %102 : vector<1x10xf32> to vector<2x10xf32>
    %104 = arith.addf %101, %103 : vector<2x10xf32>
    %cst_56 = arith.constant 0.000000e+00 : f32
    %105 = vector.broadcast %cst_56 : f32 to vector<2x10xf32>
    %106 = arith.maximumf %104, %105 : vector<2x10xf32>
    %c0_57 = arith.constant 0 : index
    %c0_58 = arith.constant 0 : index
    %107 = vector.load %arg14[%c0_57, %c0_58] : memref<10x1xf32, #tpu.memory_space<vmem>>, vector<10x1xf32>
    %cst_59 = arith.constant dense<0.000000e+00> : vector<2x1xf32>
    %108 = tpu.matmul %106, %107, %cst_59 {dimension_numbers = #tpu.dot_dimension_numbers<[1], [0], [0], [1], [0, 0, 1, 1], [], []>} : vector<2x10xf32>, vector<10x1xf32>, vector<2x1xf32> -> vector<2x1xf32>
    %c0_60 = arith.constant 0 : index
    %c0_61 = arith.constant 0 : index
    %109 = vector.load %arg15[%c0_60, %c0_61] : memref<1x1xf32, #tpu.memory_space<vmem>>, vector<1x1xf32>
    %110 = vector.broadcast %109 : vector<1x1xf32> to vector<2x1xf32>
    %111 = arith.addf %108, %110 : vector<2x1xf32>
    %c0_62 = arith.constant 0 : index
    %c0_63 = arith.constant 0 : index
    %112 = vector.load %arg16[%c0_62, %c0_63] : memref<2x1xf32, #tpu.memory_space<vmem>>, vector<2x1xf32>
    tpu.vector_store %arg16[%c0_62, %c0_63], %111 {strides = array<i32>} : memref<2x1xf32, #tpu.memory_space<vmem>>, vector<2x1xf32>,
    return
  }
}

</mosaic_0001>

<bundles_post_ra>
// kernel: lstm_driver_forward.13
= control target key start
LH: loop header
LB: loop body
LE: loop exit
PB: predicated region body
PF: predicated region fallthrough
CT: control target
= control target key end

     0   :  { %v310_v0 = vmov 0   ;;  %s673_s1 = inlined_call_operand.vmem [shape: f32[24,1], index: 1, kind: input, shape index: {}]   ;;  %s674_s2 = inlined_call_operand.vmem [shape: f32[24,1], index: 2, kind: input, shape index: {}]   ;;  %s675_s0 = inlined_call_operand.vmem [shape: bf16[24,1920], index: 0, kind: input, shape index: {}]   ;;  %s676_s3 = inlined_call_operand.vmem [shape: bf16[24,1920], index: 3, kind: output, shape index: {}]  }
   0x1   :  { %308 = vset.pattern.permute.xlu1 %v310_v0  ;;  %307 = vset.pattern.permute.xlu0 %v310_v0  ;;  %v85_v1 = vld [vmem:[%s673_s1 + $0x10] sm:$0xff]  ;;  %v83_v2 = vld [vmem:[%s673_s1] sm:$0xff]  ;;  %v147_v3 = vld [vmem:[%s674_s2 + $0x8] sm:$0xff] }
   0x2   :  { %98 = vperm.xlu1 %308, %v85_v1   ;;  %88 = vperm.xlu0 %307, %v83_v2   ;;  %v146_v4 = vld [vmem:[%s674_s2] sm:$0xff]  ;;  %v84_v5 = vld [vmem:[%s673_s1 + $0x8] sm:$0xff]  ;;  %v148_v6 = vld [vmem:[%s674_s2 + $0x10] sm:$0xff] }
   0x3   :  { %309 = vset.pattern.permute.xlu2 %v310_v0  ;;  %v352_v7 = vld [vmem:[%s675_s0 + $0x78] sm:$0xff]  ;;  %v357_v8 = vld [vmem:[%s675_s0 + $0x80] sm:$0xff]  ;;  %v362_v9 = vld [vmem:[%s675_s0 + $0x88] sm:$0xff] }
   0x4   :  { %156 = vperm.xlu2 %309, %v147_v3   ;;  %v367_v10 = vld [vmem:[%s675_s0 + $0x90] sm:$0xff]  ;;  %v372_v11 = vld [vmem:[%s675_s0 + $0x98] sm:$0xff]  ;;  %v377_v12 = vld [vmem:[%s675_s0 + $0xa0] sm:$0xff]  ;;  %v68_v14 = vunpack.c.l.bf16 %v352_v7  ;;  %v69_v16 = vunpack.c.h.bf16 %v352_v7  ;;  %v70_v17 = vunpack.c.l.bf16 %v357_v8  ;;  %v71_v18 = vunpack.c.h.bf16 %v357_v8 }
   0x5   :  { %v382_v13 = vld [vmem:[%s675_s0 + $0xa8] sm:$0xff]  ;;  %v388_v15 = vld [vmem:[%s675_s0 + $0xb0] sm:$0xf]  ;;  %v72_v19 = vunpack.c.l.bf16 %v362_v9  ;;  %v397_v20 = vld [vmem:[%s675_s0] sm:$0xff]  ;;  %v73_v22 = vunpack.c.h.bf16 %v362_v9  ;;  %v74_v23 = vunpack.c.l.bf16 %v367_v10  ;;  %v75_v24 = vunpack.c.h.bf16 %v367_v10 }
   0x6   :  { %v76_v25 = vunpack.c.l.bf16 %v372_v11  ;;  %v408_v26 = vld [vmem:[%s675_s0 + $0x8] sm:$0xff]  ;;  %v413_v27 = vld [vmem:[%s675_s0 + $0x10] sm:$0xff]  ;;  %v77_v28 = vunpack.c.h.bf16 %v372_v11  ;;  %v78_v29 = vunpack.c.l.bf16 %v377_v12  ;;  %v79_v30 = vunpack.c.h.bf16 %v377_v12  ;;  %v422_v32 = vld [vmem:[%s675_s0 + $0x18] sm:$0xff] }
   0x7   :  { %v80_v31 = vunpack.c.l.bf16 %v382_v13  ;;  %v427_v33 = vld [vmem:[%s675_s0 + $0x20] sm:$0xff]  ;;  %v81_v34 = vunpack.c.h.bf16 %v382_v13  ;;  %v82_v35 = vunpack.c.l.bf16 %v388_v15  ;;  %v434_v36 = vld [vmem:[%s675_s0 + $0x28] sm:$0xff]  ;;  %v439_v37 = vld [vmem:[%s675_s0 + $0x30] sm:$0xff]  ;;  %v38_v38 = vunpack.c.l.bf16 %v397_v20 }
   0x8   :  { %v39_v39 = vunpack.c.h.bf16 %v397_v20  ;;  %v446_v40 = vld [vmem:[%s675_s0 + $0x38] sm:$0xf]  ;;  %v40_v41 = vunpack.c.l.bf16 %v408_v26  ;;  %v41_v42 = vunpack.c.h.bf16 %v408_v26  ;;  %v42_v43 = vunpack.c.l.bf16 %v413_v27  ;;  %v455_v45 = vld [vmem:[%s675_s0 + $0x3c] sm:$0xff]  ;;  %v460_v46 = vld [vmem:[%s675_s0 + $0x44] sm:$0xff] }
   0x9   :  { %v43_v44 = vunpack.c.h.bf16 %v413_v27  ;;  %v44_v47 = vunpack.c.l.bf16 %v422_v32  ;;  %v45_v48 = vunpack.c.h.bf16 %v422_v32  ;;  %v46_v49 = vunpack.c.l.bf16 %v427_v33  ;;  %v469_v51 = vld [vmem:[%s675_s0 + $0x4c] sm:$0xff]  ;;  %v474_v52 = vld [vmem:[%s675_s0 + $0x54] sm:$0xff]  ;;  %v483_v57 = vld [vmem:[%s675_s0 + $0x5c] sm:$0xff] }
   0xa   :  { %151 = vperm.xlu1 %308, %v146_v4   ;;  %93 = vperm.xlu0 %307, %v84_v5   ;;  %v47_v50 = vunpack.c.h.bf16 %v427_v33  ;;  %v488_v58 = vld [vmem:[%s675_s0 + $0x64] sm:$0xff]  ;;  %v494_v60 = vld [vmem:[%s675_s0 + $0x6c] sm:$0xff]  ;;  %v499_v61 = vld [vmem:[%s675_s0 + $0x74] sm:$0xf] }
   0xc   :  { %161 = vperm.xlu2 %309, %v148_v6  }
  0x5e   :  { %v399_v21 = vpop.permute.xlu2 %156 }
  0x66   :  { %v162_v3 = vpop.permute.xlu2 %161 }
  0x74   :  { %v99_v12 = vpop.permute.xlu1 %98 }
  0x75   :  { %v131_v4 = vmul.f32 %v99_v12, %v68_v14  ;;  %v132_v6 = vmul.f32 %v99_v12, %v69_v16  ;;  %v133_v10 = vmul.f32 %v99_v12, %v70_v17  ;;  %v134_v11 = vmul.f32 %v99_v12, %v71_v18 }
  0x76   :  { %v135_v15 = vmul.f32 %v99_v12, %v72_v19  ;;  %v136_v13 = vmul.f32 %v99_v12, %v73_v22  ;;  %v137_v1 = vmul.f32 %v99_v12, %v74_v23  ;;  %v138_v5 = vmul.f32 %v99_v12, %v75_v24 }
  0x77   :  { %v139_v2 = vmul.f32 %v99_v12, %v76_v25  ;;  %v140_v0 = vmul.f32 %v99_v12, %v77_v28  ;;  %v141_v63 = vmul.f32 %v99_v12, %v78_v29  ;;  %v142_v62 = vmul.f32 %v99_v12, %v79_v30 }
  0x78   :  { %v143_v14 = vmul.f32 %v99_v12, %v80_v31  ;;  %v144_v59 = vmul.f32 %v99_v12, %v81_v34  ;;  %v145_v7 = vmul.f32 %v99_v12, %v82_v35  ;;  %v194_v16 = vadd.f32 %v162_v3, %v131_v4 }
  0x79   :  { %v195_v56 = vadd.f32 %v162_v3, %v132_v6  ;;  %v196_v55 = vadd.f32 %v162_v3, %v133_v10  ;;  %v197_v17 = vadd.f32 %v162_v3, %v134_v11  ;;  %v198_v54 = vadd.f32 %v162_v3, %v135_v15 }
  0x7a   :  { %v199_v8 = vadd.f32 %v162_v3, %v136_v13  ;;  %v200_v18 = vadd.f32 %v162_v3, %v137_v1  ;;  %v201_v53 = vadd.f32 %v162_v3, %v138_v5  ;;  %v202_v9 = vadd.f32 %v162_v3, %v139_v2  ;;  %v89_v13 = vpop.permute.xlu0 %88 }
  0x7b   :  { %v203_v19 = vadd.f32 %v162_v3, %v140_v0  ;;  %v204_v22 = vadd.f32 %v162_v3, %v141_v63  ;;  %v205_v23 = vadd.f32 %v162_v3, %v142_v62  ;;  %v206_v24 = vadd.f32 %v162_v3, %v143_v14 }
  0x7c   :  { %v207_v25 = vadd.f32 %v162_v3, %v144_v59  ;;  %v208_v28 = vadd.f32 %v162_v3, %v145_v7  ;;  %v239_v29 = vmax.f32 %v194_v16, 0.0  ;;  %v240_v30 = vmax.f32 %v195_v56, 0.0 }
  0x7d   :  { %v241_v31 = vmax.f32 %v196_v55, 0.0  ;;  %v242_v34 = vmax.f32 %v197_v17, 0.0  ;;  %v243_v35 = vmax.f32 %v198_v54, 0.0  ;;  %v244_v4 = vmax.f32 %v199_v8, 0.0  ;;  %v152_v17 = vpop.permute.xlu1 %151 }
  0x7e   :  { %v245_v6 = vmax.f32 %v200_v18, 0.0  ;;  %v246_v10 = vmax.f32 %v201_v53, 0.0  ;;  %v247_v11 = vmax.f32 %v202_v9, 0.0  ;;  %v248_v12 = vmax.f32 %v203_v19, 0.0 }
  0x7f   :  { %v249_v1 = vmax.f32 %v204_v22, 0.0  ;;  %v250_v5 = vmax.f32 %v205_v23, 0.0  ;;  %v251_v2 = vmax.f32 %v206_v24, 0.0  ;;  %v252_v0 = vmax.f32 %v207_v25, 0.0 }
  0x80   :  { %v253_v63 = vmax.f32 %v208_v28, 0.0  ;;  %v270_v62 = vpack.c.bf16 %v240_v30, %v239_v29  ;;  %v271_v15 = vpack.c.bf16 %v242_v34, %v241_v31  ;;  %v272_v59 = vpack.c.bf16 %v244_v4, %v243_v35 }
  0x81   :  { %v273_v3 = vpack.c.bf16 %v246_v10, %v245_v6  ;;  %v274_v14 = vpack.c.bf16 %v248_v12, %v247_v11  ;;  %v275_v56 = vpack.c.bf16 %v250_v5, %v249_v1  ;;  %v276_v55 = vpack.c.bf16 %v252_v0, %v251_v2 }
  0x82   :  { %v277_v7 = vpack.c.bf16 %v253_v63, %v253_v63  ;;  %294 = vst [vmem:[%s676_s3 + $0x78] sm:$0xff] %v270_v62  ;;  %v101_v53 = vmul.f32 %v89_v13, %v38_v38  ;;  %v102_v54 = vmul.f32 %v89_v13, %v39_v39  ;;  %v103_v16 = vmul.f32 %v89_v13, %v40_v41 }
  0x83   :  { %295 = vst [vmem:[%s676_s3 + $0x80] sm:$0xff] %v271_v15  ;;  %v104_v8 = vmul.f32 %v89_v13, %v41_v42  ;;  %v105_v18 = vmul.f32 %v89_v13, %v42_v43  ;;  %v106_v38 = vmul.f32 %v89_v13, %v43_v44  ;;  %v107_v20 = vmul.f32 %v89_v13, %v44_v47 }
  0x84   :  { %296 = vst [vmem:[%s676_s3 + $0x88] sm:$0xff] %v272_v59  ;;  %v108_v39 = vmul.f32 %v89_v13, %v45_v48  ;;  %v109_v26 = vmul.f32 %v89_v13, %v46_v49  ;;  %v110_v41 = vmul.f32 %v89_v13, %v47_v50  ;;  %v677_v42 = vunpack.c.l.bf16 %v434_v36  ;;  %v94_v59 = vpop.permute.xlu0 %93 }
  0x85   :  { %297 = vst [vmem:[%s676_s3 + $0x90] sm:$0xff] %v273_v3  ;;  %v678_v43 = vunpack.c.h.bf16 %v434_v36  ;;  %v679_v47 = vunpack.c.l.bf16 %v439_v37  ;;  %v680_v48 = vunpack.c.h.bf16 %v439_v37  ;;  %v681_v49 = vunpack.c.l.bf16 %v446_v40 }
  0x86   :  { %v111_v27 = vmul.f32 %v89_v13, %v677_v42  ;;  %298 = vst [vmem:[%s676_s3 + $0x98] sm:$0xff] %v274_v14  ;;  %v164_v50 = vadd.f32 %v152_v17, %v101_v53  ;;  %v165_v19 = vadd.f32 %v152_v17, %v102_v54  ;;  %v166_v22 = vadd.f32 %v152_v17, %v103_v16 }
  0x87   :  { %v112_v44 = vmul.f32 %v89_v13, %v678_v43  ;;  %v113_v32 = vmul.f32 %v89_v13, %v679_v47  ;;  %v114_v9 = vmul.f32 %v89_v13, %v680_v48  ;;  %v115_v33 = vmul.f32 %v89_v13, %v681_v49  ;;  %299 = vst [vmem:[%s676_s3 + $0xa0] sm:$0xff] %v275_v56 }
  0x88   :  { %v167_v23 = vadd.f32 %v152_v17, %v104_v8  ;;  %v168_v36 = vadd.f32 %v152_v17, %v105_v18  ;;  %v169_v24 = vadd.f32 %v152_v17, %v106_v38  ;;  %v170_v25 = vadd.f32 %v152_v17, %v107_v20  ;;  %300 = vst [vmem:[%s676_s3 + $0xa8] sm:$0xff] %v276_v55 }
  0x89   :  { %v171_v37 = vadd.f32 %v152_v17, %v108_v39  ;;  %v172_v40 = vadd.f32 %v152_v17, %v109_v26  ;;  %v173_v28 = vadd.f32 %v152_v17, %v110_v41  ;;  %v174_v29 = vadd.f32 %v152_v17, %v111_v27  ;;  %301 = vst [vmem:[%s676_s3 + $0xb0] sm:$0xf] %v277_v7 }
  0x8a   :  { %v175_v30 = vadd.f32 %v152_v17, %v112_v44  ;;  %v176_v31 = vadd.f32 %v152_v17, %v113_v32  ;;  %v177_v34 = vadd.f32 %v152_v17, %v114_v9  ;;  %v178_v35 = vadd.f32 %v152_v17, %v115_v33 }
  0x8b   :  { %v209_v4 = vmax.f32 %v164_v50, 0.0  ;;  %v210_v6 = vmax.f32 %v165_v19, 0.0  ;;  %v211_v10 = vmax.f32 %v166_v22, 0.0  ;;  %v212_v11 = vmax.f32 %v167_v23, 0.0 }
  0x8c   :  { %v213_v12 = vmax.f32 %v168_v36, 0.0  ;;  %v214_v13 = vmax.f32 %v169_v24, 0.0  ;;  %v215_v1 = vmax.f32 %v170_v25, 0.0  ;;  %v216_v5 = vmax.f32 %v171_v37, 0.0 }
  0x8d   :  { %v217_v2 = vmax.f32 %v172_v40, 0.0  ;;  %v218_v0 = vmax.f32 %v173_v28, 0.0  ;;  %v219_v63 = vmax.f32 %v174_v29, 0.0  ;;  %v220_v62 = vmax.f32 %v175_v30, 0.0 }
  0x8e   :  { %v221_v15 = vmax.f32 %v176_v31, 0.0  ;;  %v222_v3 = vmax.f32 %v177_v34, 0.0  ;;  %v223_v14 = vmax.f32 %v178_v35, 0.0  ;;  %v254_v56 = vpack.c.bf16 %v210_v6, %v209_v4 }
  0x8f   :  { %v255_v55 = vpack.c.bf16 %v212_v11, %v211_v10  ;;  %v256_v7 = vpack.c.bf16 %v214_v13, %v213_v12  ;;  %v257_v53 = vpack.c.bf16 %v216_v5, %v215_v1  ;;  %v258_v54 = vpack.c.bf16 %v218_v0, %v217_v2 }
  0x90   :  { %v259_v16 = vpack.c.bf16 %v220_v62, %v219_v63  ;;  %v260_v17 = vpack.c.bf16 %v222_v3, %v221_v15  ;;  %v261_v8 = vpack.c.bf16 %v223_v14, %v223_v14  ;;  %278 = vst [vmem:[%s676_s3] sm:$0xff] %v254_v56  ;;  %v682_v18 = vunpack.c.l.bf16 %v455_v45 }
  0x91   :  { %v683_v20 = vunpack.c.h.bf16 %v455_v45  ;;  %279 = vst [vmem:[%s676_s3 + $0x8] sm:$0xff] %v255_v55  ;;  %v684_v26 = vunpack.c.l.bf16 %v460_v46  ;;  %v685_v42 = vunpack.c.h.bf16 %v460_v46  ;;  %v686_v43 = vunpack.c.l.bf16 %v469_v51 }
  0x92   :  { %v116_v38 = vmul.f32 %v94_v59, %v682_v18  ;;  %v687_v47 = vunpack.c.h.bf16 %v469_v51  ;;  %280 = vst [vmem:[%s676_s3 + $0x10] sm:$0xff] %v256_v7  ;;  %v688_v45 = vunpack.c.l.bf16 %v474_v52  ;;  %v689_v9 = vunpack.c.h.bf16 %v474_v52 }
  0x93   :  { %v117_v39 = vmul.f32 %v94_v59, %v683_v20  ;;  %v118_v41 = vmul.f32 %v94_v59, %v684_v26  ;;  %v119_v27 = vmul.f32 %v94_v59, %v685_v42  ;;  %v120_v44 = vmul.f32 %v94_v59, %v686_v43  ;;  %281 = vst [vmem:[%s676_s3 + $0x18] sm:$0xff] %v257_v53 }
  0x94   :  { %v121_v32 = vmul.f32 %v94_v59, %v687_v47  ;;  %v122_v48 = vmul.f32 %v94_v59, %v688_v45  ;;  %v123_v49 = vmul.f32 %v94_v59, %v689_v9  ;;  %v690_v33 = vunpack.c.l.bf16 %v483_v57  ;;  %282 = vst [vmem:[%s676_s3 + $0x20] sm:$0xff] %v258_v54 }
  0x95   :  { %v691_v50 = vunpack.c.h.bf16 %v483_v57  ;;  %v692_v51 = vunpack.c.l.bf16 %v488_v58  ;;  %v693_v23 = vunpack.c.h.bf16 %v488_v58  ;;  %v694_v24 = vunpack.c.l.bf16 %v494_v60  ;;  %283 = vst [vmem:[%s676_s3 + $0x28] sm:$0xff] %v259_v16 }
  0x96   :  { %v124_v46 = vmul.f32 %v94_v59, %v690_v33  ;;  %v695_v25 = vunpack.c.h.bf16 %v494_v60  ;;  %v696_v57 = vunpack.c.l.bf16 %v499_v61  ;;  %v179_v28 = vadd.f32 %v399_v21, %v116_v38  ;;  %284 = vst [vmem:[%s676_s3 + $0x30] sm:$0xff] %v260_v17 }
  0x97   :  { %v125_v19 = vmul.f32 %v94_v59, %v691_v50  ;;  %v126_v22 = vmul.f32 %v94_v59, %v692_v51  ;;  %v127_v36 = vmul.f32 %v94_v59, %v693_v23  ;;  %v128_v52 = vmul.f32 %v94_v59, %v694_v24  ;;  %285 = vst [vmem:[%s676_s3 + $0x38] sm:$0xf] %v261_v8 }
  0x98   :  { %v129_v37 = vmul.f32 %v94_v59, %v695_v25  ;;  %v130_v40 = vmul.f32 %v94_v59, %v696_v57  ;;  %v180_v29 = vadd.f32 %v399_v21, %v117_v39  ;;  %v181_v58 = vadd.f32 %v399_v21, %v118_v41 }
  0x99   :  { %v182_v60 = vadd.f32 %v399_v21, %v119_v27  ;;  %v183_v30 = vadd.f32 %v399_v21, %v120_v44  ;;  %v184_v31 = vadd.f32 %v399_v21, %v121_v32  ;;  %v185_v34 = vadd.f32 %v399_v21, %v122_v48 }
  0x9a   :  { %v186_v61 = vadd.f32 %v399_v21, %v123_v49  ;;  %v187_v35 = vadd.f32 %v399_v21, %v124_v46  ;;  %v188_v4 = vadd.f32 %v399_v21, %v125_v19  ;;  %v189_v6 = vadd.f32 %v399_v21, %v126_v22 }
  0x9b   :  { %v190_v10 = vadd.f32 %v399_v21, %v127_v36  ;;  %v191_v11 = vadd.f32 %v399_v21, %v128_v52  ;;  %v192_v12 = vadd.f32 %v399_v21, %v129_v37  ;;  %v193_v13 = vadd.f32 %v399_v21, %v130_v40 }
  0x9c   :  { %v224_v1 = vmax.f32 %v179_v28, 0.0  ;;  %v225_v5 = vmax.f32 %v180_v29, 0.0  ;;  %v226_v2 = vmax.f32 %v181_v58, 0.0  ;;  %v227_v0 = vmax.f32 %v182_v60, 0.0 }
  0x9d   :  { %v228_v63 = vmax.f32 %v183_v30, 0.0  ;;  %v229_v62 = vmax.f32 %v184_v31, 0.0  ;;  %v230_v15 = vmax.f32 %v185_v34, 0.0  ;;  %v231_v59 = vmax.f32 %v186_v61, 0.0 }
  0x9e   :  { %v232_v3 = vmax.f32 %v187_v35, 0.0  ;;  %v233_v14 = vmax.f32 %v188_v4, 0.0  ;;  %v234_v56 = vmax.f32 %v189_v6, 0.0  ;;  %v235_v55 = vmax.f32 %v190_v10, 0.0 }
  0x9f   :  { %v236_v7 = vmax.f32 %v191_v11, 0.0  ;;  %v237_v53 = vmax.f32 %v192_v12, 0.0  ;;  %v262_v54 = vpack.c.bf16 %v225_v5, %v224_v1  ;;  %v238_v16 = vmax.f32 %v193_v13, 0.0 }
  0xa0   :  { %v263_v17 = vpack.c.bf16 %v227_v0, %v226_v2  ;;  %v264_v8 = vpack.c.bf16 %v229_v62, %v228_v63  ;;  %v265_v18 = vpack.c.bf16 %v231_v59, %v230_v15  ;;  %v266_v21 = vpack.c.bf16 %v233_v14, %v232_v3 }
  0xa1   :  { %286 = vst [vmem:[%s676_s3 + $0x3c] sm:$0xff] %v262_v54  ;;  %v267_v38 = vpack.c.bf16 %v235_v55, %v234_v56  ;;  %v268_v20 = vpack.c.bf16 %v237_v53, %v236_v7  ;;  %v269_v39 = vpack.c.bf16 %v238_v16, %v238_v16 }
  0xa2   :  { %287 = vst [vmem:[%s676_s3 + $0x44] sm:$0xff] %v263_v17 }
  0xa3   :  { %288 = vst [vmem:[%s676_s3 + $0x4c] sm:$0xff] %v264_v8 }
  0xa4   :  { %289 = vst [vmem:[%s676_s3 + $0x54] sm:$0xff] %v265_v18 }
  0xa5   :  { %290 = vst [vmem:[%s676_s3 + $0x5c] sm:$0xff] %v266_v21 }
  0xa6   :  { %291 = vst [vmem:[%s676_s3 + $0x64] sm:$0xff] %v267_v38 }
  0xa7   :  { %292 = vst [vmem:[%s676_s3 + $0x6c] sm:$0xff] %v268_v20 }
  0xa8   :  { %293 = vst [vmem:[%s676_s3 + $0x74] sm:$0xf] %v269_v39 }

// kernel: lstm_driver_forward.12
= control target key start
LH: loop header
LB: loop body
LE: loop exit
PB: predicated region body
PF: predicated region fallthrough
CT: control target
= control target key end

     0   :  { %vm478_vm0 = vcmask 1044480   ;;  %vm479_vm1 = vcmask 1045504   ;;  %v1544_v2 = vmov 65535   ;;  %vm471_vm2 = vcmask 613376   ;;  %s2313_s0 = inlined_call_operand.vmem [shape: bf16[75,1920], index: 0, kind: input, shape index: {}]   ;;  %s2314_s1 = inlined_call_operand.vmem [shape: bf16[24,75], index: 1, kind: input, shape index: {}]   ;;  %s2315_s2 = inlined_call_operand.vmem [shape: bf16[24,1920], index: 2, kind: output, shape index: {0}]   ;;  %s2316_s3 = inlined_call_operand.vmem [shape: f32[1,24,1], index: 3, kind: output, shape index: {1}]   ;;  %s2317_s4 = inlined_call_operand.vmem [shape: f32[1,24,1], index: 4, kind: output, shape index: {2}]  }
   0x1   :  { %v1374_v0 = vld [vmem:[%s2313_s0 + $0x1e0] sm:$0xf]  ;;  %v1530_v1 = vld [vmem:[%s2313_s0 + $0x218] sm:$0x30]  ;;  %v480_v3 = vsel %vm478_vm0, 4294967295, %v1544_v2  ;;  %vm1016_vm4 = vcmask 7168  }
   0x2   :  { %v1375_v4 = vor.u32 %v1530_v1, %v1374_v0  ;;  %v1576_v5 = vsel %vm479_vm1, %v480_v3, 0  ;;  %v1523_v6 = vld [vmem:[%s2313_s0 + $0x1e4] sm:$0xf]  ;;  %v1376_v7 = vld [vmem:[%s2313_s0 + $0x21c] sm:$0x30] }
   0x3   :  { %v1379_v8 = vor.u32 %v1523_v6, %v1376_v7  ;;  %v1382_v9 = vld [vmem:[%s2313_s0 + $0x1e8] sm:$0xf]  ;;  %v1531_v10 = vld [vmem:[%s2313_s0 + $0x220] sm:$0x30]  ;;  %v1524_v11 = vld [vmem:[%s2313_s0 + $0x1ec] sm:$0xf] }
   0x4   :  { %v483_v12 = vand.u32 %v1375_v4, %v1576_v5  ;;  %v1383_v13 = vor.u32 %v1531_v10, %v1382_v9  ;;  %v1384_v14 = vld [vmem:[%s2313_s0 + $0x224] sm:$0x30]  ;;  %v1515_v16 = vld [vmem:[%s2313_s0 + $0x1a0] sm:$0xf0]  ;;  %v1508_v19 = vld [vmem:[%s2313_s0 + $0x16c] sm:$0xf] }
   0x5   :  { %v1314_v15 = vld [vmem:[%s2313_s0 + $0x168] sm:$0xf]  ;;  %v486_v17 = vand.u32 %v1379_v8, %v1576_v5  ;;  %v1387_v18 = vor.u32 %v1524_v11, %v1384_v14  ;;  %v1322_v21 = vld [vmem:[%s2313_s0 + $0x170] sm:$0xf]  ;;  %v1516_v24 = vld [vmem:[%s2313_s0 + $0x1a8] sm:$0xf0] }
   0x6   :  { %v1316_v20 = vld [vmem:[%s2313_s0 + $0x1a4] sm:$0xf0]  ;;  %530 = vmatpush.bf16.msra.mxu0 %v483_v12  ;;  %v489_v22 = vand.u32 %v1383_v13, %v1576_v5  ;;  %v1315_v23 = vor.u32 %v1515_v16, %v1314_v15  ;;  %v1509_v25 = vld [vmem:[%s2313_s0 + $0x174] sm:$0xf]  ;;  %v1324_v26 = vld [vmem:[%s2313_s0 + $0x1ac] sm:$0xf0]  ;;  %v1323_v31 = vor.u32 %v1516_v24, %v1322_v21 }
   0x7   :  { %548 = vmatpush.bf16.msra.mxu1 %v486_v17  ;;  %v492_v27 = vand.u32 %v1387_v18, %v1576_v5  ;;  %v1319_v28 = vor.u32 %v1508_v19, %v1316_v20  ;;  %v1254_v29 = vld [vmem:[%s2313_s0 + $0xf0] sm:$0xf]  ;;  %v1500_v30 = vld [vmem:[%s2313_s0 + $0x128] sm:$0xf0]  ;;  %v1493_v32 = vld [vmem:[%s2313_s0 + $0xf4] sm:$0xf]  ;;  %v1327_v34 = vor.u32 %v1509_v25, %v1324_v26 }
   0x8   :  { %566 = vmatpush.bf16.msra.mxu2 %v489_v22  ;;  %v1256_v33 = vld [vmem:[%s2313_s0 + $0x12c] sm:$0xf0]  ;;  %v1262_v35 = vld [vmem:[%s2313_s0 + $0xf8] sm:$0xf]  ;;  %v1501_v36 = vld [vmem:[%s2313_s0 + $0x130] sm:$0xf0]  ;;  %v1255_v37 = vor.u32 %v1500_v30, %v1254_v29 }
   0x9   :  { %584 = vmatpush.bf16.msra.mxu3 %v492_v27  ;;  %v1494_v38 = vld [vmem:[%s2313_s0 + $0xfc] sm:$0xf]  ;;  %v1264_v39 = vld [vmem:[%s2313_s0 + $0x134] sm:$0xf0]  ;;  %v1259_v40 = vor.u32 %v1493_v32, %v1256_v33  ;;  %v1485_v42 = vld [vmem:[%s2313_s0 + $0xb0] sm:$0xf0]  ;;  %v1263_v43 = vor.u32 %v1501_v36, %v1262_v35 }
   0xa   :  { %531 = vmatpush.bf16.msra.mxu0 %v1315_v23  ;;  %v1194_v41 = vld [vmem:[%s2313_s0 + $0x78] sm:$0xf]  ;;  %v1478_v44 = vld [vmem:[%s2313_s0 + $0x7c] sm:$0xf]  ;;  %v1202_v46 = vld [vmem:[%s2313_s0 + $0x80] sm:$0xf]  ;;  %v1267_v47 = vor.u32 %v1494_v38, %v1264_v39 }
   0xb   :  { %549 = vmatpush.bf16.msra.mxu1 %v1319_v28  ;;  %v1196_v45 = vld [vmem:[%s2313_s0 + $0xb4] sm:$0xf0]  ;;  %v1486_v48 = vld [vmem:[%s2313_s0 + $0xb8] sm:$0xf0]  ;;  %v1479_v49 = vld [vmem:[%s2313_s0 + $0x84] sm:$0xf]  ;;  %v1195_v51 = vor.u32 %v1485_v42, %v1194_v41 }
   0xc   :  { %567 = vmatpush.bf16.msra.mxu2 %v1323_v31  ;;  %v1204_v50 = vld [vmem:[%s2313_s0 + $0xbc] sm:$0xf0]  ;;  %v1470_v53 = vld [vmem:[%s2313_s0 + $0x38] sm:$0xf0]  ;;  %v1463_v54 = vld [vmem:[%s2313_s0 + $0x4] sm:$0xf]  ;;  %v1199_v55 = vor.u32 %v1478_v44, %v1196_v45  ;;  %v1203_v59 = vor.u32 %v1486_v48, %v1202_v46 }
   0xd   :  { %585 = vmatpush.bf16.msra.mxu3 %v1327_v34  ;;  %v1134_v52 = vld [vmem:[%s2313_s0] sm:$0xf]  ;;  %v1398_v56 = vld [vmem:[%s2313_s0 + $0x1f8] sm:$0xf]  ;;  %v1533_v57 = vld [vmem:[%s2313_s0 + $0x230] sm:$0x30]  ;;  %v1207_v63 = vor.u32 %v1479_v49, %v1204_v50 }
   0xe   :  { %532 = vmatpush.bf16.msra.mxu0 %v1255_v37  ;;  %v1525_v58 = vld [vmem:[%s2313_s0 + $0x1f4] sm:$0xf]  ;;  %v1136_v60 = vld [vmem:[%s2313_s0 + $0x3c] sm:$0xf0]  ;;  %v1142_v61 = vld [vmem:[%s2313_s0 + $0x8] sm:$0xf]  ;;  %v1135_v4 = vor.u32 %v1470_v53, %v1134_v52  ;;  %v1399_v8 = vor.u32 %v1533_v57, %v1398_v56 }
   0xf   :  { %550 = vmatpush.bf16.msra.mxu1 %v1259_v40  ;;  %v1392_v62 = vld [vmem:[%s2313_s0 + $0x22c] sm:$0x30]  ;;  %v1471_v0 = vld [vmem:[%s2313_s0 + $0x40] sm:$0xf0]  ;;  %v1532_v3 = vld [vmem:[%s2313_s0 + $0x228] sm:$0x30]  ;;  %v1139_v10 = vor.u32 %v1463_v54, %v1136_v60 }
  0x10   :  { %568 = vmatpush.bf16.msra.mxu2 %v1263_v43  ;;  %v1395_v1 = vor.u32 %v1525_v58, %v1392_v62  ;;  %v1390_v2 = vld [vmem:[%s2313_s0 + $0x1f0] sm:$0xf]  ;;  %v1464_v6 = vld [vmem:[%s2313_s0 + $0xc] sm:$0xf]  ;;  %v1144_v7 = vld [vmem:[%s2313_s0 + $0x44] sm:$0xf0]  ;;  %v1143_v13 = vor.u32 %v1471_v0, %v1142_v61  ;;  %v501_v21 = vand.u32 %v1399_v8, %v1576_v5 }
  0x11   :  { %586 = vmatpush.bf16.msra.mxu3 %v1267_v47  ;;  %v1391_v9 = vor.u32 %v1532_v3, %v1390_v2  ;;  %v1526_v11 = vld [vmem:[%s2313_s0 + $0x1fc] sm:$0xf]  ;;  %v1400_v12 = vld [vmem:[%s2313_s0 + $0x234] sm:$0x30]  ;;  %v1147_v17 = vor.u32 %v1464_v6, %v1144_v7  ;;  %v1725_v18 = vld [vmem:[%s2314_s1] sm:$0xff] }
  0x12   :  { %533 = vmatpush.bf16.msra.mxu0 %v1195_v51  ;;  %v498_v14 = vand.u32 %v1395_v1, %v1576_v5  ;;  %v1403_v16 = vor.u32 %v1526_v11, %v1400_v12  ;;  %v1510_v19 = vld [vmem:[%s2313_s0 + $0x17c] sm:$0xf]  ;;  %v1332_v20 = vld [vmem:[%s2313_s0 + $0x1b4] sm:$0xf0]  ;;  %v1517_v23 = vld [vmem:[%s2313_s0 + $0x1b0] sm:$0xf0] }
  0x13   :  { %551 = vmatpush.bf16.msra.mxu1 %v1199_v55  ;;  %v495_v15 = vand.u32 %v1391_v9, %v1576_v5  ;;  %v1330_v22 = vld [vmem:[%s2313_s0 + $0x178] sm:$0xf]  ;;  %v1338_v24 = vld [vmem:[%s2313_s0 + $0x180] sm:$0xf]  ;;  %v1518_v25 = vld [vmem:[%s2313_s0 + $0x1b8] sm:$0xf0]  ;;  %v1335_v27 = vor.u32 %v1510_v19, %v1332_v20 }
  0x14   :  { %569 = vmatpush.bf16.msra.mxu2 %v1203_v59  ;;  %v504_v26 = vand.u32 %v1403_v16, %v1576_v5  ;;  %v1511_v28 = vld [vmem:[%s2313_s0 + $0x184] sm:$0xf]  ;;  %v1340_v29 = vld [vmem:[%s2313_s0 + $0x1bc] sm:$0xf0]  ;;  %v1331_v30 = vor.u32 %v1517_v23, %v1330_v22  ;;  %v1339_v33 = vor.u32 %v1518_v25, %v1338_v24  ;;  %v1502_v35 = vld [vmem:[%s2313_s0 + $0x138] sm:$0xf0] }
  0x15   :  { %587 = vmatpush.bf16.msra.mxu3 %v1207_v63  ;;  %v1495_v31 = vld [vmem:[%s2313_s0 + $0x104] sm:$0xf]  ;;  %v1272_v32 = vld [vmem:[%s2313_s0 + $0x13c] sm:$0xf0]  ;;  %v1278_v36 = vld [vmem:[%s2313_s0 + $0x108] sm:$0xf]  ;;  %v1343_v38 = vor.u32 %v1511_v28, %v1340_v29 }
  0x16   :  { %534 = vmatpush.bf16.msra.mxu0 %v1135_v4  ;;  %v1270_v34 = vld [vmem:[%s2313_s0 + $0x100] sm:$0xf]  ;;  %v1503_v37 = vld [vmem:[%s2313_s0 + $0x140] sm:$0xf0]  ;;  %v17_v39 = vld [vmem:[%s2314_s1 + $0x8] sm:$0xf]  ;;  %v1275_v40 = vor.u32 %v1495_v31, %v1272_v32 }
  0x17   :  { %552 = vmatpush.bf16.msra.mxu1 %v1139_v10  ;;  %v1496_v41 = vld [vmem:[%s2313_s0 + $0x10c] sm:$0xf]  ;;  %v1280_v42 = vld [vmem:[%s2313_s0 + $0x144] sm:$0xf0]  ;;  %v1271_v43 = vor.u32 %v1502_v35, %v1270_v34  ;;  %v1279_v47 = vor.u32 %v1503_v37, %v1278_v36  ;;  %v1487_v48 = vld [vmem:[%s2313_s0 + $0xc0] sm:$0xf0]  ;;  %v103_v58 = vunpack.c.l.b16 %v17_v39 }
  0x18   :  { %570 = vmatpush.bf16.msra.mxu2 %v1143_v13  ;;  %v1210_v44 = vld [vmem:[%s2313_s0 + $0x88] sm:$0xf]  ;;  %v1480_v45 = vld [vmem:[%s2313_s0 + $0x8c] sm:$0xf]  ;;  %v1527_v49 = vld [vmem:[%s2313_s0 + $0x204] sm:$0xf]  ;;  %v1283_v53 = vor.u32 %v1496_v41, %v1280_v42 }
  0x19   :  { %588 = vmatpush.bf16.msra.mxu3 %v1147_v17  ;;  %1432 = vmatmul.msk.bf16.vlgmr.msra.gmra.mxu0 %vm471_vm2, %v1725_v18  ;;  %v1212_v46 = vld [vmem:[%s2313_s0 + $0xc4] sm:$0xf0]  ;;  %v1408_v50 = vld [vmem:[%s2313_s0 + $0x23c] sm:$0x30]  ;;  %v1218_v51 = vld [vmem:[%s2313_s0 + $0x90] sm:$0xf]  ;;  %v1211_v59 = vor.u32 %v1487_v48, %v1210_v44  ;;  %v1854_v13 = vpack.c.b16 %v103_v58, %v103_v58 }
  0x1a   :  { %602 = vmatpush.bf16.msrb.mxu0 %v495_v15  ;;  %1434 = vmatmul.msk.bf16.vlgmr.msra.gmra.mxu1 %vm471_vm2, %v1725_v18  ;;  %v1488_v52 = vld [vmem:[%s2313_s0 + $0xc8] sm:$0xf0]  ;;  %v1215_v54 = vor.u32 %v1480_v45, %v1212_v46  ;;  %v1481_v55 = vld [vmem:[%s2313_s0 + $0x94] sm:$0xf]  ;;  %v1220_v56 = vld [vmem:[%s2313_s0 + $0xcc] sm:$0xf0]  ;;  %v1411_v63 = vor.u32 %v1527_v49, %v1408_v50 }
  0x1b   :  { %620 = vmatpush.bf16.msrb.mxu1 %v498_v14  ;;  %1436 = vmatmul.msk.bf16.vlgmr.msra.gmra.mxu2 %vm471_vm2, %v1725_v18  ;;  %v1465_v57 = vld [vmem:[%s2313_s0 + $0x14] sm:$0xf]  ;;  %v1152_v60 = vld [vmem:[%s2313_s0 + $0x4c] sm:$0xf0]  ;;  %v1414_v61 = vld [vmem:[%s2313_s0 + $0x208] sm:$0xf]  ;;  %v1219_v0 = vor.u32 %v1488_v52, %v1218_v51  ;;  %v1223_v4 = vor.u32 %v1481_v55, %v1220_v56 }
  0x1c   :  { %638 = vmatpush.bf16.msrb.mxu2 %v501_v21  ;;  %1438 = vmatmul.msk.bf16.vlgmr.msra.gmra.mxu3 %vm471_vm2, %v1725_v18  ;;  %v1535_v62 = vld [vmem:[%s2313_s0 + $0x240] sm:$0x30]  ;;  %v1158_v1 = vld [vmem:[%s2313_s0 + $0x18] sm:$0xf]  ;;  %v1406_v2 = vld [vmem:[%s2313_s0 + $0x200] sm:$0xf]  ;;  %v1155_v11 = vor.u32 %v1465_v57, %v1152_v60  ;;  %v510_v14 = vand.u32 %v1411_v63, %v1576_v5 }
  0x1d   :  { %656 = vmatpush.bf16.msrb.mxu3 %v504_v26  ;;  %v1534_v3 = vld [vmem:[%s2313_s0 + $0x238] sm:$0x30]  ;;  %v1473_v6 = vld [vmem:[%s2313_s0 + $0x50] sm:$0xf0]  ;;  %v1528_v7 = vld [vmem:[%s2313_s0 + $0x20c] sm:$0xf]  ;;  %v1415_v12 = vor.u32 %v1535_v62, %v1414_v61 }
  0x1e   :  { %603 = vmatpush.bf16.msrb.mxu0 %v1331_v30  ;;  %v1416_v8 = vld [vmem:[%s2313_s0 + $0x244] sm:$0x30]  ;;  %v1150_v9 = vld [vmem:[%s2313_s0 + $0x10] sm:$0xf]  ;;  %v1472_v10 = vld [vmem:[%s2313_s0 + $0x48] sm:$0xf0]  ;;  %v1407_v15 = vor.u32 %v1534_v3, %v1406_v2  ;;  %v1159_v16 = vor.u32 %v1473_v6, %v1158_v1 }
  0x1f   :  { %621 = vmatpush.bf16.msrb.mxu1 %v1335_v27  ;;  %v1466_v17 = vld [vmem:[%s2313_s0 + $0x1c] sm:$0xf]  ;;  %v1160_v19 = vld [vmem:[%s2313_s0 + $0x54] sm:$0xf0]  ;;  %v1419_v20 = vor.u32 %v1528_v7, %v1416_v8  ;;  %v1151_v21 = vor.u32 %v1472_v10, %v1150_v9  ;;  %v1512_v22 = vld [vmem:[%s2313_s0 + $0x18c] sm:$0xf]  ;;  %v513_v24 = vand.u32 %v1415_v12, %v1576_v5 }
  0x20   :  { %639 = vmatpush.bf16.msrb.mxu2 %v1339_v33  ;;  %v1348_v23 = vld [vmem:[%s2313_s0 + $0x1c4] sm:$0xf0]  ;;  %v1163_v25 = vor.u32 %v1466_v17, %v1160_v19  ;;  %v1354_v26 = vld [vmem:[%s2313_s0 + $0x190] sm:$0xf]  ;;  %v1520_v27 = vld [vmem:[%s2313_s0 + $0x1c8] sm:$0xf0]  ;;  %v507_v28 = vand.u32 %v1407_v15, %v1576_v5 }
  0x21   :  { %657 = vmatpush.bf16.msrb.mxu3 %v1343_v38  ;;  %v1351_v29 = vor.u32 %v1512_v22, %v1348_v23  ;;  %v516_v30 = vand.u32 %v1419_v20, %v1576_v5  ;;  %v1346_v31 = vld [vmem:[%s2313_s0 + $0x188] sm:$0xf]  ;;  %v1519_v32 = vld [vmem:[%s2313_s0 + $0x1c0] sm:$0xf0]  ;;  %v1513_v33 = vld [vmem:[%s2313_s0 + $0x194] sm:$0xf]  ;;  %v1355_v35 = vor.u32 %v1520_v27, %v1354_v26 }
  0x22   :  { %604 = vmatpush.bf16.msrb.mxu0 %v1271_v43  ;;  %v1356_v34 = vld [vmem:[%s2313_s0 + $0x1cc] sm:$0xf0]  ;;  %v1497_v36 = vld [vmem:[%s2313_s0 + $0x114] sm:$0xf]  ;;  %v1294_v38 = vld [vmem:[%s2313_s0 + $0x118] sm:$0xf] }
  0x23   :  { %622 = vmatpush.bf16.msrb.mxu1 %v1275_v40  ;;  %v1288_v37 = vld [vmem:[%s2313_s0 + $0x14c] sm:$0xf0]  ;;  %v1505_v39 = vld [vmem:[%s2313_s0 + $0x150] sm:$0xf0]  ;;  %v1347_v40 = vor.u32 %v1519_v32, %v1346_v31  ;;  %v1359_v41 = vor.u32 %v1513_v33, %v1356_v34  ;;  %v1504_v44 = vld [vmem:[%s2313_s0 + $0x148] sm:$0xf0] }
  0x24   :  { %640 = vmatpush.bf16.msrb.mxu2 %v1279_v47  ;;  %v1291_v42 = vor.u32 %v1497_v36, %v1288_v37  ;;  %v1286_v43 = vld [vmem:[%s2313_s0 + $0x110] sm:$0xf]  ;;  %v1498_v45 = vld [vmem:[%s2313_s0 + $0x11c] sm:$0xf]  ;;  %v1296_v46 = vld [vmem:[%s2313_s0 + $0x154] sm:$0xf0]  ;;  %v1295_v49 = vor.u32 %v1505_v39, %v1294_v38 }
  0x25   :  { %658 = vmatpush.bf16.msrb.mxu3 %v1283_v53  ;;  %v1482_v47 = vld [vmem:[%s2313_s0 + $0x9c] sm:$0xf]  ;;  %v1228_v48 = vld [vmem:[%s2313_s0 + $0xd4] sm:$0xf0]  ;;  %v1234_v50 = vld [vmem:[%s2313_s0 + $0xa0] sm:$0xf]  ;;  %v1287_v52 = vor.u32 %v1504_v44, %v1286_v43  ;;  %v1299_v53 = vor.u32 %v1498_v45, %v1296_v46 }
  0x26   :  { %605 = vmatpush.bf16.msrb.mxu0 %v1211_v59  ;;  %v1490_v51 = vld [vmem:[%s2313_s0 + $0xd8] sm:$0xf0]  ;;  %v1226_v55 = vld [vmem:[%s2313_s0 + $0x98] sm:$0xf]  ;;  %v1489_v56 = vld [vmem:[%s2313_s0 + $0xd0] sm:$0xf0] }
  0x27   :  { %623 = vmatpush.bf16.msrb.mxu1 %v1215_v54  ;;  %v1231_v54 = vor.u32 %v1482_v47, %v1228_v48  ;;  %v1235_v57 = vor.u32 %v1490_v51, %v1234_v50  ;;  %v1483_v58 = vld [vmem:[%s2313_s0 + $0xa4] sm:$0xf]  ;;  %v1236_v59 = vld [vmem:[%s2313_s0 + $0xdc] sm:$0xf0]  ;;  %v1174_v60 = vld [vmem:[%s2313_s0 + $0x28] sm:$0xf]  ;;  %v1227_v62 = vor.u32 %v1489_v56, %v1226_v55 }
  0x28   :  { %641 = vmatpush.bf16.msrb.mxu2 %v1219_v0  ;;  %v1475_v61 = vld [vmem:[%s2313_s0 + $0x60] sm:$0xf0]  ;;  %v1168_v0 = vld [vmem:[%s2313_s0 + $0x5c] sm:$0xf0]  ;;  %v1239_v1 = vor.u32 %v1483_v58, %v1236_v59  ;;  %v1474_v3 = vld [vmem:[%s2313_s0 + $0x58] sm:$0xf0] }
  0x29   :  { %659 = vmatpush.bf16.msrb.mxu3 %v1223_v4  ;;  %1433 = vmatmul.msk.bf16.gmra.mxu0 %vm471_vm2, %v1854_v13  ;;  %v1467_v63 = vld [vmem:[%s2313_s0 + $0x24] sm:$0xf]  ;;  %v1166_v2 = vld [vmem:[%s2313_s0 + $0x20] sm:$0xf]  ;;  %v1175_v4 = vor.u32 %v1475_v61, %v1174_v60  ;;  %v1468_v6 = vld [vmem:[%s2313_s0 + $0x2c] sm:$0xf] }
  0x2a   :  { %1435 = vmatmul.msk.bf16.gmra.mxu1 %vm471_vm2, %v1854_v13  ;;  %606 = vmatpush.bf16.msrb.mxu0 %v1151_v21  ;;  %v1176_v7 = vld [vmem:[%s2313_s0 + $0x64] sm:$0xf0]  ;;  %v1171_v8 = vor.u32 %v1467_v63, %v1168_v0  ;;  %v1167_v9 = vor.u32 %v1474_v3, %v1166_v2  ;;  %v1537_v12 = vld [vmem:[%s2313_s0 + $0x250] sm:$0x30]  ;;  %v1370_v17 = vld [vmem:[%s2313_s0 + $0x1a0] sm:$0xf] }
  0x2b   :  { %624 = vmatpush.bf16.msrb.mxu1 %v1155_v11  ;;  %1437 = vmatmul.msk.bf16.gmra.mxu2 %vm471_vm2, %v1854_v13  ;;  %v1179_v10 = vor.u32 %v1468_v6, %v1176_v7  ;;  %v1430_v11 = vld [vmem:[%s2313_s0 + $0x218] sm:$0xf]  ;;  %v1522_v20 = vld [vmem:[%s2313_s0 + $0x1d8] sm:$0xf0]  ;;  %v1422_v21 = vld [vmem:[%s2313_s0 + $0x210] sm:$0xf] }
  0x2c   :  { %642 = vmatpush.bf16.msrb.mxu2 %v1159_v16  ;;  %1439 = vmatmul.msk.bf16.gmra.mxu3 %vm471_vm2, %v1854_v13  ;;  %v1431_v15 = vor.u32 %v1537_v12, %v1430_v11  ;;  %v1424_v16 = vld [vmem:[%s2313_s0 + $0x24c] sm:$0x30]  ;;  %v1536_v22 = vld [vmem:[%s2313_s0 + $0x248] sm:$0x30]  ;;  %v1364_v26 = vld [vmem:[%s2313_s0 + $0x1d4] sm:$0xf0] }
  0x2d   :  { %660 = vmatpush.bf16.msrb.mxu3 %v1163_v25  ;;  %v1514_v25 = vld [vmem:[%s2313_s0 + $0x19c] sm:$0xf]  ;;  %v1310_v31 = vld [vmem:[%s2313_s0 + $0x128] sm:$0xf]  ;;  %v1507_v32 = vld [vmem:[%s2313_s0 + $0x160] sm:$0xf0] }
  0x2e   :  { %674 = vmatpush.bf16.msra.mxu0 %v507_v28  ;;  %v525_v23 = vand.u32 %v1431_v15, %v1576_v5  ;;  %v1371_v28 = vor.u32 %v1522_v20, %v1370_v17  ;;  %v1311_v33 = vor.u32 %v1507_v32, %v1310_v31  ;;  %v1521_v34 = vld [vmem:[%s2313_s0 + $0x1d0] sm:$0xf0]  ;;  %v1499_v36 = vld [vmem:[%s2313_s0 + $0x124] sm:$0xf]  ;;  %v1304_v37 = vld [vmem:[%s2313_s0 + $0x15c] sm:$0xf0] }
  0x2f   :  { %692 = vmatpush.bf16.msra.mxu1 %v510_v14  ;;  %v1529_v14 = vld [vmem:[%s2313_s0 + $0x214] sm:$0xf]  ;;  %v1250_v38 = vld [vmem:[%s2313_s0 + $0xb0] sm:$0xf]  ;;  %v1307_v39 = vor.u32 %v1499_v36, %v1304_v37  ;;  %v1242_v45 = vld [vmem:[%s2313_s0 + $0xa8] sm:$0xf] }
  0x30   :  { %710 = vmatpush.bf16.msra.mxu2 %v513_v24  ;;  %v1427_v19 = vor.u32 %v1529_v14, %v1424_v16  ;;  %v1423_v24 = vor.u32 %v1536_v22, %v1422_v21  ;;  %v1491_v46 = vld [vmem:[%s2313_s0 + $0xe0] sm:$0xf0]  ;;  %v1484_v47 = vld [vmem:[%s2313_s0 + $0xac] sm:$0xf]  ;;  %v1244_v48 = vld [vmem:[%s2313_s0 + $0xe4] sm:$0xf0] }
  0x31   :  { %728 = vmatpush.bf16.msra.mxu3 %v516_v30  ;;  %v1367_v30 = vor.u32 %v1514_v25, %v1364_v26  ;;  %v1477_v50 = vld [vmem:[%s2313_s0 + $0x70] sm:$0xf0]  ;;  %v1247_v51 = vor.u32 %v1484_v47, %v1244_v48  ;;  %v1184_v55 = vld [vmem:[%s2313_s0 + $0x6c] sm:$0xf0] }
  0x32   :  { %675 = vmatpush.bf16.msra.mxu0 %v1347_v40  ;;  %v522_v27 = vand.u32 %v1427_v19, %v1576_v5  ;;  %v1492_v40 = vld [vmem:[%s2313_s0 + $0xe8] sm:$0xf0]  ;;  %v1182_v56 = vld [vmem:[%s2313_s0 + $0x30] sm:$0xf] }
  0x33   :  { %693 = vmatpush.bf16.msra.mxu1 %v1351_v29  ;;  %v519_v29 = vand.u32 %v1423_v24, %v1576_v5  ;;  %v1362_v5 = vld [vmem:[%s2313_s0 + $0x198] sm:$0xf]  ;;  %v1251_v43 = vor.u32 %v1492_v40, %v1250_v38 }
  0x34   :  { %711 = vmatpush.bf16.msra.mxu2 %v1355_v35  ;;  %v1363_v35 = vor.u32 %v1521_v34, %v1362_v5 }
  0x35   :  { %729 = vmatpush.bf16.msra.mxu3 %v1359_v41  ;;  %v1302_v41 = vld [vmem:[%s2313_s0 + $0x120] sm:$0xf] }
  0x36   :  { %676 = vmatpush.bf16.msra.mxu0 %v1287_v52 }
  0x37   :  { %694 = vmatpush.bf16.msra.mxu1 %v1291_v42  ;;  %v1506_v42 = vld [vmem:[%s2313_s0 + $0x158] sm:$0xf0] }
  0x38   :  { %712 = vmatpush.bf16.msra.mxu2 %v1295_v49  ;;  %v1303_v44 = vor.u32 %v1506_v42, %v1302_v41  ;;  %v1190_v49 = vld [vmem:[%s2313_s0 + $0x38] sm:$0xf] }
  0x39   :  { %730 = vmatpush.bf16.msra.mxu3 %v1299_v53  ;;  %1440 = vmatmul.msk.bf16.vlgmr.msrb.gmra.mxu0 %vm471_vm2, %v1725_v18  ;;  %v1191_v52 = vor.u32 %v1477_v50, %v1190_v49  ;;  %v1469_v53 = vld [vmem:[%s2313_s0 + $0x34] sm:$0xf] }
  0x3a   :  { %1442 = vmatmul.msk.bf16.vlgmr.msrb.gmra.mxu1 %vm471_vm2, %v1725_v18  ;;  %677 = vmatpush.bf16.msra.mxu0 %v1227_v62  ;;  %v1187_v58 = vor.u32 %v1469_v53, %v1184_v55 }
  0x3b   :  { %695 = vmatpush.bf16.msra.mxu1 %v1231_v54  ;;  %1444 = vmatmul.msk.bf16.vlgmr.msrb.gmra.mxu2 %vm471_vm2, %v1725_v18  ;;  %v1243_v54 = vor.u32 %v1491_v46, %v1242_v45 }
  0x3c   :  { %713 = vmatpush.bf16.msra.mxu2 %v1235_v57  ;;  %1446 = vmatmul.msk.bf16.vlgmr.msrb.gmra.mxu3 %vm471_vm2, %v1725_v18  ;;  %v1476_v57 = vld [vmem:[%s2313_s0 + $0x68] sm:$0xf0] }
  0x3d   :  { %731 = vmatpush.bf16.msra.mxu3 %v1239_v1  ;;  %v1183_v59 = vor.u32 %v1476_v57, %v1182_v56 }
  0x3e   :  { %678 = vmatpush.bf16.msra.mxu0 %v1167_v9 }
  0x3f   :  { %696 = vmatpush.bf16.msra.mxu1 %v1171_v8 }
  0x40   :  { %714 = vmatpush.bf16.msra.mxu2 %v1175_v4 }
  0x41   :  { %732 = vmatpush.bf16.msra.mxu3 %v1179_v10 }
  0x42   :  { %746 = vmatpush.bf16.msrb.mxu0 %v519_v29 }
  0x43   :  { %764 = vmatpush.bf16.msrb.mxu1 %v522_v27 }
  0x44   :  { %782 = vmatpush.bf16.msrb.mxu2 %v525_v23 }
  0x45   :  { %1538 = vmatpush.bf16.msrb.mxu3 %v519_v29 }
  0x46   :  { %747 = vmatpush.bf16.msrb.mxu0 %v1363_v35 }
  0x47   :  { %765 = vmatpush.bf16.msrb.mxu1 %v1367_v30 }
  0x48   :  { %783 = vmatpush.bf16.msrb.mxu2 %v1371_v28 }
  0x49   :  { %1441 = vmatmul.msk.bf16.gmra.mxu0 %vm471_vm2, %v1854_v13  ;;  %1539 = vmatpush.bf16.msrb.mxu3 %v1363_v35 }
  0x4a   :  { %1443 = vmatmul.msk.bf16.gmra.mxu1 %vm471_vm2, %v1854_v13  ;;  %748 = vmatpush.bf16.msrb.mxu0 %v1303_v44 }
  0x4b   :  { %1445 = vmatmul.msk.bf16.gmra.mxu2 %vm471_vm2, %v1854_v13  ;;  %766 = vmatpush.bf16.msrb.mxu1 %v1307_v39 }
  0x4c   :  { %784 = vmatpush.bf16.msrb.mxu2 %v1311_v33  ;;  %1447 = vmatmul.msk.bf16.gmra.mxu3 %vm471_vm2, %v1854_v13 }
  0x4d   :  { %1540 = vmatpush.bf16.msrb.mxu3 %v1303_v44 }
  0x4e   :  { %749 = vmatpush.bf16.msrb.mxu0 %v1243_v54 }
  0x4f   :  { %767 = vmatpush.bf16.msrb.mxu1 %v1247_v51 }
  0x50   :  { %785 = vmatpush.bf16.msrb.mxu2 %v1251_v43 }
  0x51   :  { %1541 = vmatpush.bf16.msrb.mxu3 %v1243_v54 }
  0x52   :  { %750 = vmatpush.bf16.msrb.mxu0 %v1183_v59 }
  0x53   :  { %768 = vmatpush.bf16.msrb.mxu1 %v1187_v58 }
  0x54   :  { %786 = vmatpush.bf16.msrb.mxu2 %v1191_v52 }
  0x55   :  { %1542 = vmatpush.bf16.msrb.mxu3 %v1183_v59 }
  0x59   :  { %1448 = vmatmul.msk.bf16.vlgmr.msra.gmra.mxu0 %vm471_vm2, %v1725_v18 }
  0x5a   :  { %1450 = vmatmul.msk.bf16.vlgmr.msra.gmra.mxu1 %vm471_vm2, %v1725_v18 }
  0x5b   :  { %1452 = vmatmul.msk.bf16.vlgmr.msra.gmra.mxu2 %vm471_vm2, %v1725_v18 }
  0x5c   :  { %1454 = vmatmul.msk.bf16.vlgmr.msra.gmra.mxu3 %vm471_vm2, %v1725_v18 }
  0x69   :  { %1449 = vmatmul.msk.bf16.gmra.mxu0 %vm471_vm2, %v1854_v13 }
  0x6a   :  { %1451 = vmatmul.msk.bf16.gmra.mxu1 %vm471_vm2, %v1854_v13 }
  0x6b   :  { %1453 = vmatmul.msk.bf16.gmra.mxu2 %vm471_vm2, %v1854_v13 }
  0x6c   :  { %1455 = vmatmul.msk.bf16.gmra.mxu3 %vm471_vm2, %v1854_v13 }
  0x79   :  { %1456 = vmatmul.msk.bf16.vlgmr.msrb.gmra.mxu0 %vm471_vm2, %v1725_v18 }
  0x7a   :  { %1458 = vmatmul.msk.bf16.vlgmr.msrb.gmra.mxu1 %vm471_vm2, %v1725_v18 }
  0x7b   :  { %1460 = vmatmul.msk.bf16.vlgmr.msrb.gmra.mxu2 %vm471_vm2, %v1725_v18 }
  0x7c   :  { %1457 = vmatmul.msk.bf16.vlgmr.msrb.gmra.mxu3 %vm471_vm2, %v1854_v13 }
  0x8a   :  { %1459 = vmatmul.msk.bf16.gmra.mxu1 %vm471_vm2, %v1854_v13 }
  0x8b   :  { %1461 = vmatmul.msk.bf16.gmra.mxu2 %vm471_vm2, %v1854_v13 }
  0x96   :  { %v536_v60 = vpop.f32.mrf.mxu0 }
  0x97   :  { %v1020_v61 = vmul.f32 %v536_v60, %v536_v60  ;;  %v554_v62 = vpop.f32.mrf.mxu1 }
  0x98   :  { %v797_v63 = vpack.c.bf16 %v554_v62, %v536_v60  ;;  %v968_v0 = vadd.f32 %v554_v62, %v536_v60  ;;  %v1021_v1 = vmul.f32 %v554_v62, %v554_v62 }
  0x9a   :  { %821 = vst [vmem:[%s2315_s2] sm:$0xff] %v797_v63  ;;  %v1065_v18 = vadd.f32 %v1021_v1, %v1020_v61 }
  0x9e   :  { %v572_v2 = vpop.f32.mrf.mxu2  ;;  %v538_v3 = vpop.f32.mrf.mxu0 }
  0x9f   :  { %v969_v4 = vadd.f32 %v968_v0, %v572_v2  ;;  %v1022_v6 = vmul.f32 %v572_v2, %v572_v2  ;;  %v590_v7 = vpop.f32.mrf.mxu3  ;;  %v1035_v8 = vmul.f32 %v538_v3, %v538_v3  ;;  %v556_v9 = vpop.f32.mrf.mxu1 }
  0xa0   :  { %v798_v10 = vpack.c.bf16 %v590_v7, %v572_v2  ;;  %v1023_v13 = vmul.f32 %v590_v7, %v590_v7  ;;  %v805_v11 = vpack.c.bf16 %v556_v9, %v538_v3  ;;  %v984_v12 = vadd.f32 %v556_v9, %v538_v3 }
  0xa1   :  { %v1066_v14 = vadd.f32 %v1065_v18, %v1022_v6  ;;  %v2110_v15 = vadd.f32 %v969_v4, %v590_v7  ;;  %v1036_v16 = vmul.f32 %v556_v9, %v556_v9 }
  0xa2   :  { %822 = vst [vmem:[%s2315_s2 + $0x8] sm:$0xff] %v798_v10 }
  0xa3   :  { %v1067_v17 = vadd.f32 %v1066_v14, %v1023_v13  ;;  %829 = vst [vmem:[%s2315_s2 + $0x3c] sm:$0xff] %v805_v11  ;;  %v1081_v19 = vadd.f32 %v1036_v16, %v1035_v8 }
  0xa6   :  { %v574_v20 = vpop.f32.mrf.mxu2  ;;  %v541_v21 = vpop.f32.mrf.mxu0 }
  0xa7   :  { %v985_v22 = vadd.f32 %v984_v12, %v574_v20  ;;  %v1037_v23 = vmul.f32 %v574_v20, %v574_v20  ;;  %v592_v24 = vpop.f32.mrf.mxu3  ;;  %v1050_v25 = vmul.f32 %v541_v21, %v541_v21  ;;  %v559_v26 = vpop.f32.mrf.mxu1 }
  0xa8   :  { %v806_v27 = vpack.c.bf16 %v592_v24, %v574_v20  ;;  %v1038_v28 = vmul.f32 %v592_v24, %v592_v24  ;;  %v813_v29 = vpack.c.bf16 %v559_v26, %v541_v21  ;;  %v1000_v30 = vadd.f32 %v559_v26, %v541_v21 }
  0xa9   :  { %v1082_v31 = vadd.f32 %v1081_v19, %v1037_v23  ;;  %v2118_v32 = vadd.f32 %v985_v22, %v592_v24  ;;  %v1051_v33 = vmul.f32 %v559_v26, %v559_v26 }
  0xaa   :  { %830 = vst [vmem:[%s2315_s2 + $0x44] sm:$0xff] %v806_v27 }
  0xab   :  { %v2123_v5 = vadd.f32 %v1082_v31, %v1038_v28  ;;  %837 = vst [vmem:[%s2315_s2 + $0x78] sm:$0xff] %v813_v29  ;;  %v1097_v34 = vadd.f32 %v1051_v33, %v1050_v25 }
  0xae   :  { %v577_v35 = vpop.f32.mrf.mxu2  ;;  %v543_v36 = vpop.f32.mrf.mxu0 }
  0xaf   :  { %v1001_v37 = vadd.f32 %v1000_v30, %v577_v35  ;;  %v1052_v38 = vmul.f32 %v577_v35, %v577_v35  ;;  %v595_v39 = vpop.f32.mrf.mxu3  ;;  %v561_v40 = vpop.f32.mrf.mxu1 }
  0xb0   :  { %v814_v41 = vpack.c.bf16 %v595_v39, %v577_v35  ;;  %v1053_v42 = vmul.f32 %v595_v39, %v595_v39 }
  0xb1   :  { %v1098_v43 = vadd.f32 %v1097_v34, %v1052_v38  ;;  %v2128_v44 = vadd.f32 %v1001_v37, %v595_v39 }
  0xb2   :  { %838 = vst [vmem:[%s2315_s2 + $0x80] sm:$0xff] %v814_v41 }
  0xb3   :  { %v2133_v45 = vadd.f32 %v1098_v43, %v1053_v42 }
  0xb6   :  { %v579_v46 = vpop.f32.mrf.mxu2  ;;  %v608_v47 = vpop.f32.mrf.mxu0 }
  0xb7   :  { %v597_v48 = vpop.f32.mrf.mxu3  ;;  %v1024_v49 = vmul.f32 %v608_v47, %v608_v47  ;;  %v626_v50 = vpop.f32.mrf.mxu1  ;;  %v971_v25 = vadd.f32 %v2110_v15, %v608_v47 }
  0xb8   :  { %v799_v51 = vpack.c.bf16 %v626_v50, %v608_v47  ;;  %v1025_v52 = vmul.f32 %v626_v50, %v626_v50 }
  0xb9   :  { %v1068_v53 = vadd.f32 %v1067_v17, %v1024_v49  ;;  %v972_v28 = vadd.f32 %v971_v25, %v626_v50  ;;  %v845_v50 = vlaneseq }
  0xba   :  { %823 = vst [vmem:[%s2315_s2 + $0x10] sm:$0xff] %v799_v51 }
  0xbb   :  { %v1069_v54 = vadd.f32 %v1068_v53, %v1025_v52 }
  0xbe   :  { %v644_v55 = vpop.f32.mrf.mxu2  ;;  %v610_v56 = vpop.f32.mrf.mxu0 }
  0xbf   :  { %v1026_v57 = vmul.f32 %v644_v55, %v644_v55  ;;  %v662_v58 = vpop.f32.mrf.mxu3  ;;  %v628_v59 = vpop.f32.mrf.mxu1  ;;  %v1039_v31 = vmul.f32 %v610_v56, %v610_v56  ;;  %v973_v35 = vadd.f32 %v972_v28, %v644_v55  ;;  %v987_v15 = vadd.f32 %v2118_v32, %v610_v56 }
  0xc0   :  { %v800_v60 = vpack.c.bf16 %v662_v58, %v644_v55  ;;  %v1027_v61 = vmul.f32 %v662_v58, %v662_v58  ;;  %v807_v62 = vpack.c.bf16 %v628_v59, %v610_v56  ;;  %v1040_v39 = vmul.f32 %v628_v59, %v628_v59 }
  0xc1   :  { %v1070_v63 = vadd.f32 %v1069_v54, %v1026_v57  ;;  %v1084_v36 = vadd.f32 %v2123_v5, %v1039_v31  ;;  %v974_v37 = vadd.f32 %v973_v35, %v662_v58  ;;  %v988_v38 = vadd.f32 %v987_v15, %v628_v59 }
  0xc2   :  { %824 = vst [vmem:[%s2315_s2 + $0x18] sm:$0xff] %v800_v60  ;;  %v846_v57 = vand.u32 127, %v845_v50 }
  0xc3   :  { %v2141_v0 = vadd.f32 %v1070_v63, %v1027_v61  ;;  %831 = vst [vmem:[%s2315_s2 + $0x4c] sm:$0xff] %v807_v62  ;;  %v1085_v47 = vadd.f32 %v1084_v36, %v1040_v39 }
  0xc6   :  { %v646_v1 = vpop.f32.mrf.mxu2  ;;  %v613_v18 = vpop.f32.mrf.mxu0 }
  0xc7   :  { %v664_v2 = vpop.f32.mrf.mxu3  ;;  %v2146_v3 = vpop.f32.mrf.mxu1  ;;  %v1041_v40 = vmul.f32 %v646_v1, %v646_v1  ;;  %v989_v48 = vadd.f32 %v988_v38, %v646_v1  ;;  %v1054_v51 = vmul.f32 %v613_v18, %v613_v18  ;;  %v1003_v55 = vadd.f32 %v2128_v44, %v613_v18 }
  0xc8   :  { %v808_v4 = vpack.c.bf16 %v664_v2, %v646_v1  ;;  %v815_v6 = vpack.c.bf16 %v2146_v3, %v613_v18  ;;  %v1042_v52 = vmul.f32 %v664_v2, %v664_v2  ;;  %v1055_v59 = vmul.f32 %v2146_v3, %v2146_v3 }
  0xc9   :  { %v1086_v5 = vadd.f32 %v1085_v47, %v1041_v40  ;;  %v990_v54 = vadd.f32 %v989_v48, %v664_v2  ;;  %v1100_v58 = vadd.f32 %v2133_v45, %v1054_v51  ;;  %v1004_v44 = vadd.f32 %v1003_v55, %v2146_v3 }
  0xca   :  { %832 = vst [vmem:[%s2315_s2 + $0x54] sm:$0xff] %v808_v4 }
  0xcb   :  { %839 = vst [vmem:[%s2315_s2 + $0x88] sm:$0xff] %v815_v6  ;;  %v1087_v61 = vadd.f32 %v1086_v5, %v1042_v52 }
  0xce   :  { %v2155_v7 = vpop.f32.mrf.mxu2  ;;  %v615_v8 = vpop.f32.mrf.mxu0 }
  0xcf   :  { %v2157_v9 = vpop.f32.mrf.mxu3  ;;  %v633_v10 = vpop.f32.mrf.mxu1  ;;  %v1056_v4 = vmul.f32 %v2155_v7, %v2155_v7  ;;  %v2228_v8 = vadd.s32 1792, %v846_v57 }
  0xd0   :  { %v816_v13 = vpack.c.bf16 %v2157_v9, %v2155_v7  ;;  %v1101_v10 = vadd.f32 %v1100_v58, %v1055_v59  ;;  %v1057_v3 = vmul.f32 %v2157_v9, %v2157_v9 }
  0xd1   :  { %vm892_vm3 = vcmp.lt.s32.totalorder %v2228_v8, 1800 }
  0xd2   :  { %840 = vst [vmem:[%s2315_s2 + $0x90] sm:$0xff] %v816_v13 }
  0xd6   :  { %v651_v11 = vpop.f32.mrf.mxu2  ;;  %v2164_v12 = vpop.f32.mrf.mxu0 }
  0xd7   :  { %v669_v14 = vpop.f32.mrf.mxu3  ;;  %v2166_v16 = vpop.f32.mrf.mxu1  ;;  %v975_v43 = vadd.f32 %v974_v37, %v2164_v12  ;;  %v1005_v11 = vadd.f32 %v1004_v44, %v2155_v7 }
  0xd8   :  { %v801_v17 = vpack.c.bf16 %v2166_v16, %v2164_v12  ;;  %v1029_v52 = vmul.f32 %v2166_v16, %v2166_v16 }
  0xd9   :  { %v976_v53 = vadd.f32 %v975_v43, %v2166_v16 }
  0xda   :  { %825 = vst [vmem:[%s2315_s2 + $0x20] sm:$0xff] %v801_v17 }
  0xde   :  { %v2173_v19 = vpop.f32.mrf.mxu2  ;;  %v682_v20 = vpop.f32.mrf.mxu0 }
  0xdf   :  { %v2175_v21 = vpop.f32.mrf.mxu3  ;;  %v700_v22 = vpop.f32.mrf.mxu1  ;;  %v1043_v56 = vmul.f32 %v682_v20, %v682_v20  ;;  %v977_v60 = vadd.f32 %v976_v53, %v2173_v19  ;;  %v991_v62 = vadd.f32 %v990_v54, %v682_v20  ;;  %v1030_v54 = vmul.f32 %v2173_v19, %v2173_v19 }
  0xe0   :  { %v802_v23 = vpack.c.bf16 %v2175_v21, %v2173_v19  ;;  %v809_v24 = vpack.c.bf16 %v700_v22, %v682_v20  ;;  %v1044_v17 = vmul.f32 %v700_v22, %v700_v22 }
  0xe1   :  { %v1088_v18 = vadd.f32 %v1087_v61, %v1043_v56  ;;  %v978_v13 = vadd.f32 %v977_v60, %v2175_v21  ;;  %v992_v14 = vadd.f32 %v991_v62, %v700_v22  ;;  %v1006_v22 = vadd.f32 %v1005_v11, %v2157_v9 }
  0xe2   :  { %826 = vst [vmem:[%s2315_s2 + $0x28] sm:$0xff] %v802_v23  ;;  %v1102_v23 = vadd.f32 %v1101_v10, %v1056_v4 }
  0xe3   :  { %833 = vst [vmem:[%s2315_s2 + $0x5c] sm:$0xff] %v809_v24  ;;  %v1089_v25 = vadd.f32 %v1088_v18, %v1044_v17 }
  0xe4   :  { %v1103_v15 = vadd.f32 %v1102_v23, %v1057_v3 }
  0xe6   :  { %v718_v26 = vpop.f32.mrf.mxu2  ;;  %v2186_v27 = vpop.f32.mrf.mxu0 }
  0xe7   :  { %v2188_v29 = vpop.f32.mrf.mxu3  ;;  %v2190_v30 = vpop.f32.mrf.mxu1  ;;  %v1045_v20 = vmul.f32 %v718_v26, %v718_v26  ;;  %v993_v28 = vadd.f32 %v992_v14, %v718_v26  ;;  %v1058_v7 = vmul.f32 %v2186_v27, %v2186_v27  ;;  %v1007_v9 = vadd.f32 %v1006_v22, %v2186_v27 }
  0xe8   :  { %v810_v33 = vpack.c.bf16 %v2188_v29, %v718_v26  ;;  %v817_v34 = vpack.c.bf16 %v2190_v30, %v2186_v27  ;;  %v1059_v48 = vmul.f32 %v2190_v30, %v2190_v30 }
  0xe9   :  { %v1090_v31 = vadd.f32 %v1089_v25, %v1045_v20  ;;  %v994_v40 = vadd.f32 %v993_v28, %v2188_v29  ;;  %v1104_v47 = vadd.f32 %v1103_v15, %v1058_v7 }
  0xea   :  { %834 = vst [vmem:[%s2315_s2 + $0x64] sm:$0xff] %v810_v33  ;;  %v1046_v33 = vmul.f32 %v2188_v29, %v2188_v29 }
  0xeb   :  { %841 = vst [vmem:[%s2315_s2 + $0x98] sm:$0xff] %v817_v34  ;;  %v1105_v53 = vadd.f32 %v1104_v47, %v1059_v48 }
  0xec   :  { %v1091_v50 = vadd.f32 %v1090_v31, %v1046_v33 }
  0xee   :  { %v2203_v41 = vpop.f32.mrf.mxu2  ;;  %v687_v42 = vpop.f32.mrf.mxu0 }
  0xef   :  { %v2206_v32 = vpop.f32.mrf.mxu3  ;;  %v705_v46 = vpop.f32.mrf.mxu1  ;;  %v1060_v27 = vmul.f32 %v2203_v41, %v2203_v41 }
  0xf0   :  { %v818_v49 = vpack.c.bf16 %v2206_v32, %v2203_v41  ;;  %v1028_v46 = vmul.f32 %v2164_v12, %v2164_v12  ;;  %v1008_v12 = vadd.f32 %v1007_v9, %v2190_v30  ;;  %v1061_v60 = vmul.f32 %v2206_v32, %v2206_v32 }
  0xf1   :  { %v1106_v59 = vadd.f32 %v1105_v53, %v1060_v27 }
  0xf2   :  { %842 = vst [vmem:[%s2315_s2 + $0xa0] sm:$0xff] %v818_v49  ;;  %v1072_v5 = vadd.f32 %v2141_v0, %v1028_v46  ;;  %v1009_v55 = vadd.f32 %v1008_v12, %v2203_v41 }
  0xf4   :  { %v1073_v19 = vadd.f32 %v1072_v5, %v1029_v52  ;;  %v1010_v41 = vadd.f32 %v1009_v55, %v2206_v32 }
  0xf6   :  { %v723_v63 = vpop.f32.mrf.mxu2  ;;  %v2219_v1 = vpop.f32.mrf.mxu0  ;;  %v1074_v10 = vadd.f32 %v1073_v19, %v1030_v54 }
  0xf7   :  { %v741_v2 = vpop.f32.mrf.mxu3  ;;  %v2223_v6 = vpop.f32.mrf.mxu1  ;;  %v979_v24 = vadd.f32 %v978_v13, %v2219_v1  ;;  %v1107_v13 = vadd.f32 %v1106_v59, %v1061_v60  ;;  %v1032_v17 = vmul.f32 %v2219_v1, %v2219_v1 }
  0xf8   :  { %v803_v45 = vpack.c.bf16 %v2223_v6, %v2219_v1  ;;  %v1033_v31 = vmul.f32 %v2223_v6, %v2223_v6 }
  0xf9   :  { %v980_v39 = vadd.f32 %v979_v24, %v2223_v6 }
  0xfa   :  { %827 = vst [vmem:[%s2315_s2 + $0x30] sm:$0xff] %v803_v45  ;;  %v1031_v45 = vmul.f32 %v2175_v21, %v2175_v21 }
  0xfc   :  { %v1075_v28 = vadd.f32 %v1074_v10, %v1031_v45 }
  0xfe   :  { %v788_v34 = vpop.f32.mrf.mxu2  ;;  %v754_v35 = vpop.f32.mrf.mxu0  ;;  %v1076_v33 = vadd.f32 %v1075_v28, %v1032_v17 }
  0xff   :  { %v757_v36 = vpop.f32.mrf.mxu3  ;;  %v804_v37 = vpack.c.bf16 %v788_v34, %v788_v34  ;;  %v772_v38 = vpop.f32.mrf.mxu1  ;;  %v2246_v26 = vsel %vm892_vm3, %v788_v34, 0.0  ;;  %v1047_v42 = vmul.f32 %v754_v35, %v754_v35  ;;  %v995_v51 = vadd.f32 %v994_v40, %v754_v35 }
 0x100   :  { %v811_v43 = vpack.c.bf16 %v772_v38, %v754_v35  ;;  %v981_v49 = vadd.f32 %v980_v39, %v2246_v26  ;;  %v1048_v56 = vmul.f32 %v772_v38, %v772_v38  ;;  %v1062_v44 = vmul.f32 %v757_v36, %v757_v36 }
 0x101   :  { %828 = vst [vmem:[%s2315_s2 + $0x38] sm:$0xf] %v804_v37  ;;  %v1092_v29 = vadd.f32 %v1091_v50, %v1047_v42  ;;  %v996_v58 = vadd.f32 %v995_v51, %v772_v38  ;;  %v1011_v11 = vadd.f32 %v1010_v41, %v757_v36  ;;  %v1034_v34 = vmul.f32 %v2246_v26, %v2246_v26 }
 0x102   :  { %835 = vst [vmem:[%s2315_s2 + $0x6c] sm:$0xff] %v811_v43  ;;  %982 = vadd.xlane.f32.xlu0 %v981_v49  ;;  %v1108_v23 = vadd.f32 %v1107_v13, %v1062_v44  ;;  %v1077_v35 = vadd.f32 %v1076_v33, %v1033_v31 }
 0x103   :  { %v1093_v2 = vadd.f32 %v1092_v29, %v1048_v56 }
 0x104   :  { %v1078_v15 = vadd.f32 %v1077_v35, %v1034_v34 }
 0x106   :  { %v790_v57 = vpop.f32.mrf.mxu2 }
 0x107   :  { %v812_v30 = vpack.c.bf16 %v790_v57, %v790_v57  ;;  %v952_v0 = vsel %vm892_vm3, %v790_v57, 0.0  ;;  %v775_v61 = vpop.f32.mrf.mxu1  ;;  %v759_v62 = vpop.f32.mrf.mxu3 }
 0x108   :  { %v819_v16 = vpack.c.bf16 %v775_v61, %v757_v36  ;;  %v997_v63 = vadd.f32 %v996_v58, %v952_v0  ;;  %v1049_v4 = vmul.f32 %v952_v0, %v952_v0  ;;  %v1063_v14 = vmul.f32 %v775_v61, %v775_v61 }
 0x109   :  { %836 = vst [vmem:[%s2315_s2 + $0x74] sm:$0xf] %v812_v30  ;;  %v1012_v32 = vadd.f32 %v1011_v11, %v775_v61 }
 0x10a   :  { %843 = vst [vmem:[%s2315_s2 + $0xa8] sm:$0xff] %v819_v16  ;;  %v1094_v18 = vadd.f32 %v1093_v2, %v1049_v4  ;;  %998 = vadd.xlane.f32.xlu0 %v997_v63  ;;  %v1109_v22 = vadd.f32 %v1108_v23, %v1063_v14 }
 0x10c   :  { %1095 = vadd.xlane.f32.xlu2 %v1094_v18 }
 0x10e   :  { %v793_v20 = vpop.f32.mrf.mxu2 }
 0x10f   :  { %v820_v3 = vpack.c.bf16 %v793_v20, %v793_v20  ;;  %v777_v24 = vpop.f32.mrf.mxu1  ;;  %v967_v25 = vsel %vm892_vm3, %v793_v20, 0.0 }
 0x110   :  { %v1013_v7 = vadd.f32 %v1012_v32, %v967_v25  ;;  %v1064_v21 = vmul.f32 %v967_v25, %v967_v25 }
 0x111   :  { %844 = vst [vmem:[%s2315_s2 + $0xb0] sm:$0xf] %v820_v3 }
 0x112   :  { %1014 = vadd.xlane.f32.xlu1 %v1013_v7  ;;  %v1110_v1 = vadd.f32 %v1109_v22, %v1064_v21 }
 0x114   :  { %1111 = vadd.xlane.f32.xlu2 %v1110_v1 }
 0x116   :  { %v795_v8 = vpop.f32.mrf.mxu2 }
 0x11a   :  { %1079 = vadd.xlane.f32.xlu1 %v1078_v15 }
 0x175   :  { %v983_v36 = vpop.xlane.xlu0 %982 }
 0x176   :  { %1017 = vst.msk [vmem:[%s2316_s3] sm:$0xff] %vm1016_vm4, %v983_v36 }
 0x17d   :  { %v999_v37 = vpop.xlane.xlu0 %998 }
 0x17e   :  { %1018 = vst.msk [vmem:[%s2316_s3 + $0x8] sm:$0xff] %vm1016_vm4, %v999_v37 }
 0x17f   :  { %v1096_v6 = vpop.xlane.xlu2 %1095 }
 0x180   :  { %1114 = vst.msk [vmem:[%s2317_s4 + $0x8] sm:$0xff] %vm1016_vm4, %v1096_v6 }
 0x185   :  { %v1015_v38 = vpop.xlane.xlu1 %1014 }
 0x186   :  { %1019 = vst.msk [vmem:[%s2316_s3 + $0x10] sm:$0xff] %vm1016_vm4, %v1015_v38 }
 0x187   :  { %v1112_v26 = vpop.xlane.xlu2 %1111 }
 0x188   :  { %1115 = vst.msk [vmem:[%s2317_s4 + $0x10] sm:$0xff] %vm1016_vm4, %v1112_v26 }
 0x18d   :  { %v1080_v39 = vpop.xlane.xlu1 %1079 }
 0x18e   :  { %1113 = vst.msk [vmem:[%s2317_s4] sm:$0xff] %vm1016_vm4, %v1080_v39 }

// kernel: lstm_driver_forward.14
= control target key start
LH: loop header
LB: loop body
LE: loop exit
PB: predicated region body
PF: predicated region fallthrough
CT: control target
= control target key end

     0   :  { %vm857_vm0 = vcmask 1043456   ;;  %vm847_vm1 = vcmask 719872   ;;  %vm1288_vm3 = vcmask 7168   ;;  %vm1293_vm4 = vcmask 3072   ;;  %s2993_s0 = inlined_call_operand.vmem [shape: bf16[600,384], index: 0, kind: input, shape index: {}]   ;;  %s2994_s1 = inlined_call_operand.vmem [shape: bf16[36,600], index: 1, kind: input, shape index: {}]   ;;  %s2995_s2 = inlined_call_operand.vmem [shape: bf16[36,384], index: 2, kind: output, shape index: {0}]   ;;  %s2996_s3 = inlined_call_operand.vmem [shape: f32[1,36,1], index: 3, kind: output, shape index: {1}]   ;;  %s2997_s4 = inlined_call_operand.vmem [shape: f32[1,36,1], index: 4, kind: output, shape index: {2}]  }
   0x1   :  { %v1476_v0 = vld [vmem:[%s2993_s0 + $0xa8] sm:$0xf]  ;;  %v1875_v1 = vld [vmem:[%s2993_s0 + $0xb0] sm:$0xf0]  ;;  %v1464_v9 = vld [vmem:[%s2993_s0 + $0x90] sm:$0xf] }
   0x2   :  { %v1572_v2 = vld [vmem:[%s2993_s0 + $0x168] sm:$0xf]  ;;  %v1477_v3 = vor.u32 %v1875_v1, %v1476_v0  ;;  %v1899_v4 = vld [vmem:[%s2993_s0 + $0x170] sm:$0xf0]  ;;  %v1872_v10 = vld [vmem:[%s2993_s0 + $0x98] sm:$0xf0] }
   0x3   :  { %v1668_v5 = vld [vmem:[%s2993_s0 + $0x228] sm:$0xf]  ;;  %v1923_v6 = vld [vmem:[%s2993_s0 + $0x230] sm:$0xf0]  ;;  %v1573_v7 = vor.u32 %v1899_v4, %v1572_v2  ;;  %v1560_v11 = vld [vmem:[%s2993_s0 + $0x150] sm:$0xf]  ;;  %v1465_v12 = vor.u32 %v1872_v10, %v1464_v9 }
   0x4   :  { %v1669_v8 = vor.u32 %v1923_v6, %v1668_v5  ;;  %867 = vmatpush.bf16.msra.mxu0 %v1477_v3  ;;  %1964 = vmatpush.bf16.msra.mxu3 %v1477_v3  ;;  %v1896_v13 = vld [vmem:[%s2993_s0 + $0x158] sm:$0xf0]  ;;  %v1656_v14 = vld [vmem:[%s2993_s0 + $0x210] sm:$0xf]  ;;  %v1452_v18 = vld [vmem:[%s2993_s0 + $0x78] sm:$0xf] }
   0x5   :  { %v1920_v15 = vld [vmem:[%s2993_s0 + $0x218] sm:$0xf0]  ;;  %890 = vmatpush.bf16.msra.mxu1 %v1573_v7  ;;  %v1561_v16 = vor.u32 %v1896_v13, %v1560_v11  ;;  %v1869_v19 = vld [vmem:[%s2993_s0 + $0x80] sm:$0xf0]  ;;  %v1548_v20 = vld [vmem:[%s2993_s0 + $0x138] sm:$0xf] }
   0x6   :  { %913 = vmatpush.bf16.msra.mxu2 %v1669_v8  ;;  %v1657_v17 = vor.u32 %v1920_v15, %v1656_v14  ;;  %v1893_v21 = vld [vmem:[%s2993_s0 + $0x140] sm:$0xf0]  ;;  %v1644_v22 = vld [vmem:[%s2993_s0 + $0x1f8] sm:$0xf]  ;;  %v1453_v24 = vor.u32 %v1869_v19, %v1452_v18  ;;  %v1440_v27 = vld [vmem:[%s2993_s0 + $0x60] sm:$0xf] }
   0x7   :  { %v1917_v23 = vld [vmem:[%s2993_s0 + $0x200] sm:$0xf0]  ;;  %v1549_v25 = vor.u32 %v1893_v21, %v1548_v20  ;;  %v1866_v28 = vld [vmem:[%s2993_s0 + $0x68] sm:$0xf0]  ;;  %v1536_v29 = vld [vmem:[%s2993_s0 + $0x120] sm:$0xf] }
   0x8   :  { %868 = vmatpush.bf16.msra.mxu0 %v1465_v12  ;;  %1965 = vmatpush.bf16.msra.mxu3 %v1465_v12  ;;  %v1645_v26 = vor.u32 %v1917_v23, %v1644_v22  ;;  %v1890_v30 = vld [vmem:[%s2993_s0 + $0x128] sm:$0xf0]  ;;  %v1632_v31 = vld [vmem:[%s2993_s0 + $0x1e0] sm:$0xf]  ;;  %v1441_v33 = vor.u32 %v1866_v28, %v1440_v27  ;;  %v1428_v36 = vld [vmem:[%s2993_s0 + $0x48] sm:$0xf] }
   0x9   :  { %891 = vmatpush.bf16.msra.mxu1 %v1561_v16  ;;  %v1914_v32 = vld [vmem:[%s2993_s0 + $0x1e8] sm:$0xf0]  ;;  %v1537_v34 = vor.u32 %v1890_v30, %v1536_v29  ;;  %v1863_v37 = vld [vmem:[%s2993_s0 + $0x50] sm:$0xf0]  ;;  %v1524_v38 = vld [vmem:[%s2993_s0 + $0x108] sm:$0xf] }
   0xa   :  { %914 = vmatpush.bf16.msra.mxu2 %v1657_v17  ;;  %v1633_v35 = vor.u32 %v1914_v32, %v1632_v31  ;;  %v1887_v39 = vld [vmem:[%s2993_s0 + $0x110] sm:$0xf0]  ;;  %v1620_v40 = vld [vmem:[%s2993_s0 + $0x1c8] sm:$0xf]  ;;  %v1429_v42 = vor.u32 %v1863_v37, %v1428_v36  ;;  %v1416_v45 = vld [vmem:[%s2993_s0 + $0x30] sm:$0xf] }
   0xb   :  { %v1911_v41 = vld [vmem:[%s2993_s0 + $0x1d0] sm:$0xf0]  ;;  %v1525_v43 = vor.u32 %v1887_v39, %v1524_v38  ;;  %v1860_v46 = vld [vmem:[%s2993_s0 + $0x38] sm:$0xf0]  ;;  %v1512_v47 = vld [vmem:[%s2993_s0 + $0xf0] sm:$0xf] }
   0xc   :  { %869 = vmatpush.bf16.msra.mxu0 %v1453_v24  ;;  %1966 = vmatpush.bf16.msra.mxu3 %v1453_v24  ;;  %v1621_v44 = vor.u32 %v1911_v41, %v1620_v40  ;;  %v1884_v48 = vld [vmem:[%s2993_s0 + $0xf8] sm:$0xf0]  ;;  %v1608_v49 = vld [vmem:[%s2993_s0 + $0x1b0] sm:$0xf]  ;;  %v1417_v51 = vor.u32 %v1860_v46, %v1416_v45  ;;  %v1404_v54 = vld [vmem:[%s2993_s0 + $0x18] sm:$0xf] }
   0xd   :  { %892 = vmatpush.bf16.msra.mxu1 %v1549_v25  ;;  %v1908_v50 = vld [vmem:[%s2993_s0 + $0x1b8] sm:$0xf0]  ;;  %v1513_v52 = vor.u32 %v1884_v48, %v1512_v47  ;;  %v1857_v55 = vld [vmem:[%s2993_s0 + $0x20] sm:$0xf0]  ;;  %v1500_v56 = vld [vmem:[%s2993_s0 + $0xd8] sm:$0xf] }
   0xe   :  { %915 = vmatpush.bf16.msra.mxu2 %v1645_v26  ;;  %v1609_v53 = vor.u32 %v1908_v50, %v1608_v49  ;;  %v1881_v57 = vld [vmem:[%s2993_s0 + $0xe0] sm:$0xf0]  ;;  %v1596_v58 = vld [vmem:[%s2993_s0 + $0x198] sm:$0xf]  ;;  %v1392_v60 = vld [vmem:[%s2993_s0] sm:$0xf]  ;;  %v1405_v62 = vor.u32 %v1857_v55, %v1404_v54 }
   0xf   :  { %v1905_v59 = vld [vmem:[%s2993_s0 + $0x1a0] sm:$0xf0]  ;;  %v1854_v61 = vld [vmem:[%s2993_s0 + $0x8] sm:$0xf0]  ;;  %v1488_v63 = vld [vmem:[%s2993_s0 + $0xc0] sm:$0xf]  ;;  %v1501_v2 = vor.u32 %v1881_v57, %v1500_v56 }
  0x10   :  { %870 = vmatpush.bf16.msra.mxu0 %v1441_v33  ;;  %1967 = vmatpush.bf16.msra.mxu3 %v1441_v33  ;;  %v1878_v0 = vld [vmem:[%s2993_s0 + $0xc8] sm:$0xf0]  ;;  %v1584_v1 = vld [vmem:[%s2993_s0 + $0x180] sm:$0xf]  ;;  %v1597_v3 = vor.u32 %v1905_v59, %v1596_v58  ;;  %v1764_v5 = vld [vmem:[%s2993_s0 + $0x2e8] sm:$0xf]  ;;  %v1393_v14 = vor.u32 %v1854_v61, %v1392_v60 }
  0x11   :  { %893 = vmatpush.bf16.msra.mxu1 %v1537_v34  ;;  %v1902_v4 = vld [vmem:[%s2993_s0 + $0x188] sm:$0xf0]  ;;  %v1947_v6 = vld [vmem:[%s2993_s0 + $0x2f0] sm:$0xf0]  ;;  %v1352_v7 = vld [vmem:[%s2994_s1] sm:$0xf]  ;;  %v1489_v18 = vor.u32 %v1878_v0, %v1488_v63 }
  0x12   :  { %916 = vmatpush.bf16.msra.mxu2 %v1633_v35  ;;  %v2153_v8 = vld [vmem:[%s2994_s1 + $0x50] sm:$0x33]  ;;  %v2158_v9 = vld [vmem:[%s2993_s0 + $0x378] sm:$0xff]  ;;  %v1898_v11 = vld [vmem:[%s2993_s0 + $0x16c] sm:$0xf]  ;;  %v1585_v19 = vor.u32 %v1902_v4, %v1584_v1  ;;  %v1765_v24 = vor.u32 %v1947_v6, %v1764_v5 }
  0x13   :  { %v1845_v10 = vld [vmem:[%s2994_s1 + $0x10] sm:$0xf0]  ;;  %v1574_v12 = vld [vmem:[%s2993_s0 + $0x174] sm:$0xf0]  ;;  %v619_v13 = vunpack.c.l.b16 %v2158_v9  ;;  %v1843_v15 = vld [vmem:[%s2994_s1 + $0x4] sm:$0xf]  ;;  %v215_v23 = vunpack.c.l.b16 %v2153_v8 }
  0x14   :  { %871 = vmatpush.bf16.msra.mxu0 %v1429_v42  ;;  %1968 = vmatpush.bf16.msra.mxu3 %v1429_v42  ;;  %v1874_v16 = vld [vmem:[%s2993_s0 + $0xac] sm:$0xf]  ;;  %v1478_v17 = vld [vmem:[%s2993_s0 + $0xb4] sm:$0xf0]  ;;  %v1360_v21 = vld [vmem:[%s2994_s1 + $0x8] sm:$0xf]  ;;  %v1577_v25 = vor.u32 %v1898_v11, %v1574_v12  ;;  %v2195_v29 = vor.u32 %v1845_v10, %v1352_v7 }
  0x15   :  { %894 = vmatpush.bf16.msra.mxu1 %v1525_v43  ;;  %v1354_v20 = vld [vmem:[%s2994_s1 + $0x14] sm:$0xf0]  ;;  %v1846_v22 = vld [vmem:[%s2994_s1 + $0x18] sm:$0xf0]  ;;  %v1752_v26 = vld [vmem:[%s2993_s0 + $0x2d0] sm:$0xf]  ;;  %v733_v28 = vpack.c.b16 %v619_v13, %v619_v13  ;;  %v1481_v30 = vor.u32 %v1874_v16, %v1478_v17  ;;  %v2216_v38 = vpack.c.b16 %v215_v23, %v215_v23 }
  0x16   :  { %917 = vmatpush.bf16.msra.mxu2 %v1621_v44  ;;  %v1944_v27 = vld [vmem:[%s2993_s0 + $0x2d8] sm:$0xf0]  ;;  %v1895_v31 = vld [vmem:[%s2993_s0 + $0x154] sm:$0xf]  ;;  %v1562_v32 = vld [vmem:[%s2993_s0 + $0x15c] sm:$0xf0]  ;;  %v2203_v33 = vor.u32 %v1843_v15, %v1354_v20  ;;  %v2205_v34 = vor.u32 %v1846_v22, %v1360_v21 }
  0x17   :  { %v1871_v35 = vld [vmem:[%s2993_s0 + $0x94] sm:$0xf]  ;;  %v1466_v36 = vld [vmem:[%s2993_s0 + $0x9c] sm:$0xf0]  ;;  %v1740_v37 = vld [vmem:[%s2993_s0 + $0x2b8] sm:$0xf]  ;;  %v1753_v39 = vor.u32 %v1944_v27, %v1752_v26  ;;  %v1565_v40 = vor.u32 %v1895_v31, %v1562_v32 }
  0x18   :  { %872 = vmatpush.bf16.msra.mxu0 %v1417_v51  ;;  %1969 = vmatpush.bf16.msra.mxu3 %v1417_v51  ;;  %v859_v41 = vsel %vm857_vm0, %v733_v28, 0  ;;  %v1824_v42 = vld [vmem:[%s2993_s0 + $0x360] sm:$0xf]  ;;  %v1962_v43 = vld [vmem:[%s2993_s0 + $0x368] sm:$0xf0]  ;;  %v1469_v45 = vor.u32 %v1871_v35, %v1466_v36 }
  0x19   :  { %895 = vmatpush.bf16.msra.mxu1 %v1513_v52  ;;  %v1941_v44 = vld [vmem:[%s2993_s0 + $0x2c0] sm:$0xf0]  ;;  %v1892_v46 = vld [vmem:[%s2993_s0 + $0x13c] sm:$0xf]  ;;  %v1550_v47 = vld [vmem:[%s2993_s0 + $0x144] sm:$0xf0]  ;;  %v1825_v50 = vor.u32 %v1962_v43, %v1824_v42 }
  0x1a   :  { %918 = vmatpush.bf16.msra.mxu2 %v1609_v53  ;;  %v1868_v48 = vld [vmem:[%s2993_s0 + $0x7c] sm:$0xf]  ;;  %v1454_v49 = vld [vmem:[%s2993_s0 + $0x84] sm:$0xf0]  ;;  %v1741_v51 = vor.u32 %v1941_v44, %v1740_v37  ;;  %v1728_v52 = vld [vmem:[%s2993_s0 + $0x2a0] sm:$0xf]  ;;  %v1553_v53 = vor.u32 %v1892_v46, %v1550_v47 }
  0x1b   :  { %v1812_v54 = vld [vmem:[%s2993_s0 + $0x348] sm:$0xf]  ;;  %v1959_v55 = vld [vmem:[%s2993_s0 + $0x350] sm:$0xf0]  ;;  %v1938_v56 = vld [vmem:[%s2993_s0 + $0x2a8] sm:$0xf0]  ;;  %v1457_v57 = vor.u32 %v1868_v48, %v1454_v49 }
  0x1c   :  { %873 = vmatpush.bf16.msra.mxu0 %v1405_v62  ;;  %1970 = vmatpush.bf16.msra.mxu3 %v1405_v62  ;;  %v1889_v58 = vld [vmem:[%s2993_s0 + $0x124] sm:$0xf]  ;;  %v1538_v59 = vld [vmem:[%s2993_s0 + $0x12c] sm:$0xf0]  ;;  %v1716_v62 = vld [vmem:[%s2993_s0 + $0x288] sm:$0xf]  ;;  %v1813_v0 = vor.u32 %v1959_v55, %v1812_v54  ;;  %v1729_v1 = vor.u32 %v1938_v56, %v1728_v52 }
  0x1d   :  { %896 = vmatpush.bf16.msra.mxu1 %v1501_v2  ;;  %v1865_v60 = vld [vmem:[%s2993_s0 + $0x64] sm:$0xf]  ;;  %v1442_v61 = vld [vmem:[%s2993_s0 + $0x6c] sm:$0xf0]  ;;  %v1935_v63 = vld [vmem:[%s2993_s0 + $0x290] sm:$0xf0] }
  0x1e   :  { %919 = vmatpush.bf16.msra.mxu2 %v1597_v3  ;;  %v1372_v2 = vld [vmem:[%s2994_s1 + $0x28] sm:$0xf]  ;;  %v1541_v3 = vor.u32 %v1889_v58, %v1538_v59  ;;  %v1800_v4 = vld [vmem:[%s2993_s0 + $0x330] sm:$0xf]  ;;  %v1956_v5 = vld [vmem:[%s2993_s0 + $0x338] sm:$0xf0]  ;;  %v1445_v7 = vor.u32 %v1865_v60, %v1442_v61 }
  0x1f   :  { %v1850_v6 = vld [vmem:[%s2994_s1 + $0x38] sm:$0xf0]  ;;  %v1886_v10 = vld [vmem:[%s2993_s0 + $0x10c] sm:$0xf]  ;;  %v1526_v11 = vld [vmem:[%s2993_s0 + $0x114] sm:$0xf0] }
  0x20   :  { %874 = vmatpush.bf16.msra.mxu0 %v1393_v14  ;;  %1971 = vmatpush.bf16.msra.mxu3 %v1393_v14  ;;  %v1848_v12 = vld [vmem:[%s2994_s1 + $0x2c] sm:$0xf]  ;;  %v1430_v14 = vld [vmem:[%s2993_s0 + $0x54] sm:$0xf0]  ;;  %v1374_v15 = vld [vmem:[%s2994_s1 + $0x3c] sm:$0xf0]  ;;  %v1529_v21 = vor.u32 %v1886_v10, %v1526_v11 }
  0x21   :  { %897 = vmatpush.bf16.msra.mxu1 %v1489_v18  ;;  %v1862_v13 = vld [vmem:[%s2993_s0 + $0x4c] sm:$0xf]  ;;  %v1380_v16 = vld [vmem:[%s2994_s1 + $0x30] sm:$0xf]  ;;  %v1851_v17 = vld [vmem:[%s2994_s1 + $0x40] sm:$0xf0]  ;;  %v1801_v18 = vor.u32 %v1956_v5, %v1800_v4 }
  0x22   :  { %920 = vmatpush.bf16.msra.mxu2 %v1585_v19  ;;  %v1717_v19 = vor.u32 %v1935_v63, %v1716_v62  ;;  %v1704_v20 = vld [vmem:[%s2993_s0 + $0x270] sm:$0xf]  ;;  %v1788_v22 = vld [vmem:[%s2993_s0 + $0x318] sm:$0xf]  ;;  %v1953_v23 = vld [vmem:[%s2993_s0 + $0x320] sm:$0xf0]  ;;  %v1433_v26 = vor.u32 %v1862_v13, %v1430_v14  ;;  %v2332_v31 = vor.u32 %v1851_v17, %v1380_v16 }
  0x23   :  { %875 = vmatmul.bf16.vlgmr.msra.gmra.mxu0 %v2195_v29  ;;  %885 = vmatmul.bf16.vlgmr.msra.gmra.mxu3 %v2216_v38  ;;  %v1883_v27 = vld [vmem:[%s2993_s0 + $0xf4] sm:$0xf]  ;;  %v1514_v28 = vld [vmem:[%s2993_s0 + $0xfc] sm:$0xf0]  ;;  %v1789_v36 = vor.u32 %v1953_v23, %v1788_v22  ;;  %v1950_v42 = vld [vmem:[%s2993_s0 + $0x308] sm:$0xf0] }
  0x24   :  { %936 = vmatpush.bf16.msrb.mxu3 %v1765_v24  ;;  %898 = vmatmul.bf16.vlgmr.msra.gmra.mxu1 %v2203_v33  ;;  %v2319_v24 = vor.u32 %v1850_v6, %v1372_v2  ;;  %v1859_v32 = vld [vmem:[%s2993_s0 + $0x34] sm:$0xf]  ;;  %v1418_v35 = vld [vmem:[%s2993_s0 + $0x3c] sm:$0xf0]  ;;  %v1929_v43 = vld [vmem:[%s2993_s0 + $0x260] sm:$0xf0] }
  0x25   :  { %982 = vmatpush.bf16.msrb.mxu1 %v1481_v30  ;;  %921 = vmatmul.bf16.vlgmr.msra.gmra.mxu2 %v2205_v34  ;;  %v2330_v30 = vor.u32 %v1848_v12, %v1374_v15  ;;  %v1421_v44 = vor.u32 %v1859_v32, %v1418_v35  ;;  %v1502_v46 = vld [vmem:[%s2993_s0 + $0xe4] sm:$0xf0]  ;;  %v1856_v47 = vld [vmem:[%s2993_s0 + $0x1c] sm:$0xf]  ;;  %v1946_v49 = vld [vmem:[%s2993_s0 + $0x2ec] sm:$0xf]  ;;  %v216_v15 = vunpack.c.h.b16 %v2153_v8 }
  0x26   :  { %1005 = vmatpush.bf16.msrb.mxu2 %v1577_v25  ;;  %961 = vmatpush.bf16.msrb.mxu0 %v859_v41  ;;  %v1932_v25 = vld [vmem:[%s2993_s0 + $0x278] sm:$0xf0]  ;;  %v1776_v41 = vld [vmem:[%s2993_s0 + $0x300] sm:$0xf]  ;;  %v1406_v48 = vld [vmem:[%s2993_s0 + $0x24] sm:$0xf0] }
  0x27   :  { %v1705_v37 = vor.u32 %v1932_v25, %v1704_v20  ;;  %v1766_v52 = vld [vmem:[%s2993_s0 + $0x2f4] sm:$0xf0]  ;;  %v1680_v54 = vld [vmem:[%s2993_s0 + $0x240] sm:$0xf]  ;;  %v1926_v55 = vld [vmem:[%s2993_s0 + $0x248] sm:$0xf0] }
  0x28   :  { %937 = vmatpush.bf16.msrb.mxu3 %v1753_v39  ;;  %v1692_v39 = vld [vmem:[%s2993_s0 + $0x258] sm:$0xf]  ;;  %v1490_v58 = vld [vmem:[%s2993_s0 + $0xcc] sm:$0xf0]  ;;  %v1922_v59 = vld [vmem:[%s2993_s0 + $0x22c] sm:$0xf]  ;;  %v1769_v60 = vor.u32 %v1946_v49, %v1766_v52  ;;  %v1681_v5 = vor.u32 %v1926_v55, %v1680_v54 }
  0x29   :  { %983 = vmatpush.bf16.msrb.mxu1 %v1469_v45  ;;  %v1880_v45 = vld [vmem:[%s2993_s0 + $0xdc] sm:$0xf]  ;;  %v1844_v61 = vld [vmem:[%s2994_s1 + $0xc] sm:$0xf]  ;;  %v1670_v62 = vld [vmem:[%s2993_s0 + $0x234] sm:$0xf0] }
  0x2a   :  { %1006 = vmatpush.bf16.msrb.mxu2 %v1565_v40  ;;  %962 = vmatpush.bf16.msrb.mxu0 %v1825_v50  ;;  %v1517_v40 = vor.u32 %v1883_v27, %v1514_v28  ;;  %v620_v50 = vunpack.c.h.b16 %v2158_v9  ;;  %v1505_v56 = vor.u32 %v1880_v45, %v1502_v46  ;;  %v1409_v9 = vor.u32 %v1856_v47, %v1406_v48  ;;  %v1853_v63 = vld [vmem:[%s2993_s0 + $0x4] sm:$0xf]  ;;  %v1484_v2 = vld [vmem:[%s2993_s0 + $0xb0] sm:$0xf]  ;;  %v1362_v6 = vld [vmem:[%s2994_s1 + $0x1c] sm:$0xf0] }
  0x2b   :  { %v1943_v10 = vld [vmem:[%s2993_s0 + $0x2d4] sm:$0xf]  ;;  %v1754_v11 = vld [vmem:[%s2993_s0 + $0x2dc] sm:$0xf0]  ;;  %v1368_v12 = vld [vmem:[%s2994_s1 + $0x10] sm:$0xf]  ;;  %v1673_v13 = vor.u32 %v1922_v59, %v1670_v62 }
  0x2c   :  { %938 = vmatpush.bf16.msrb.mxu3 %v1741_v51  ;;  %v1777_v51 = vor.u32 %v1950_v42, %v1776_v41  ;;  %v734_v4 = vpack.c.b16 %v620_v50, %v620_v50  ;;  %v1847_v17 = vld [vmem:[%s2994_s1 + $0x20] sm:$0xf0]  ;;  %v1472_v8 = vld [vmem:[%s2993_s0 + $0x98] sm:$0xf]  ;;  %v1757_v23 = vor.u32 %v1943_v10, %v1754_v11  ;;  %v1826_v27 = vld [vmem:[%s2993_s0 + $0x36c] sm:$0xf0] }
  0x2d   :  { %984 = vmatpush.bf16.msrb.mxu1 %v1457_v57  ;;  %v1877_v57 = vld [vmem:[%s2993_s0 + $0xc4] sm:$0xf]  ;;  %v2450_v28 = vor.u32 %v1847_v17, %v1368_v12  ;;  %v1940_v35 = vld [vmem:[%s2993_s0 + $0x2bc] sm:$0xf]  ;;  %v1742_v41 = vld [vmem:[%s2993_s0 + $0x2c4] sm:$0xf0] }
  0x2e   :  { %1007 = vmatpush.bf16.msrb.mxu2 %v1553_v53  ;;  %963 = vmatpush.bf16.msrb.mxu0 %v1813_v0  ;;  %v1693_v53 = vor.u32 %v1929_v43, %v1692_v39  ;;  %v1394_v0 = vld [vmem:[%s2993_s0 + $0xc] sm:$0xf0]  ;;  %v862_v22 = vsel %vm857_vm0, %v734_v4, 0  ;;  %v1873_v25 = vld [vmem:[%s2993_s0 + $0xa0] sm:$0xf0]  ;;  %v1745_v46 = vor.u32 %v1940_v35, %v1742_v41 }
  0x2f   :  { %v1397_v14 = vor.u32 %v1853_v63, %v1394_v0  ;;  %v1916_v39 = vld [vmem:[%s2993_s0 + $0x1fc] sm:$0xf]  ;;  %v1473_v42 = vor.u32 %v1873_v25, %v1472_v8  ;;  %v1870_v45 = vld [vmem:[%s2993_s0 + $0x88] sm:$0xf0]  ;;  %v1937_v48 = vld [vmem:[%s2993_s0 + $0x2a4] sm:$0xf] }
  0x30   :  { %939 = vmatpush.bf16.msrb.mxu3 %v1729_v1  ;;  %v2404_v1 = vld [vmem:[%s2994_s1 + $0x58] sm:$0x33]  ;;  %v1913_v49 = vld [vmem:[%s2993_s0 + $0x1e4] sm:$0xf]  ;;  %v1634_v50 = vld [vmem:[%s2993_s0 + $0x1ec] sm:$0xf0] }
  0x31   :  { %985 = vmatpush.bf16.msrb.mxu1 %v1445_v7  ;;  %v1493_v7 = vor.u32 %v1877_v57, %v1490_v58  ;;  %v217_v16 = vunpack.c.l.b16 %v2404_v1  ;;  %v1814_v54 = vld [vmem:[%s2993_s0 + $0x354] sm:$0xf0]  ;;  %v1637_v58 = vor.u32 %v1913_v49, %v1634_v50  ;;  %v1934_v59 = vld [vmem:[%s2993_s0 + $0x28c] sm:$0xf]  ;;  %v1849_v63 = vld [vmem:[%s2994_s1 + $0x34] sm:$0xf] }
  0x32   :  { %1008 = vmatpush.bf16.msrb.mxu2 %v1541_v3  ;;  %964 = vmatpush.bf16.msrb.mxu0 %v1801_v18  ;;  %v1876_v3 = vld [vmem:[%s2993_s0 + $0xb8] sm:$0xf0]  ;;  %v1919_v18 = vld [vmem:[%s2993_s0 + $0x214] sm:$0xf]  ;;  %v1622_v62 = vld [vmem:[%s2993_s0 + $0x1d4] sm:$0xf0] }
  0x33   :  { %880 = vmatmul.bf16.gmra.mxu0 %v2319_v24  ;;  %v1485_v20 = vor.u32 %v1876_v3, %v1484_v2  ;;  %v1955_v2 = vld [vmem:[%s2993_s0 + $0x334] sm:$0xf]  ;;  %v1802_v3 = vld [vmem:[%s2993_s0 + $0x33c] sm:$0xf0]  ;;  %v1382_v4 = vld [vmem:[%s2994_s1 + $0x44] sm:$0xf0] }
  0x34   :  { %940 = vmatpush.bf16.msrb.mxu3 %v1717_v19  ;;  %903 = vmatmul.bf16.gmra.mxu1 %v2330_v30  ;;  %v1658_v19 = vld [vmem:[%s2993_s0 + $0x21c] sm:$0xf0]  ;;  %v1805_v10 = vor.u32 %v1955_v2, %v1802_v3  ;;  %v1388_v11 = vld [vmem:[%s2994_s1 + $0x38] sm:$0xf]  ;;  %v1694_v25 = vld [vmem:[%s2993_s0 + $0x264] sm:$0xf0] }
  0x35   :  { %986 = vmatpush.bf16.msrb.mxu1 %v1433_v26  ;;  %926 = vmatmul.bf16.gmra.mxu2 %v2332_v31  ;;  %v1961_v26 = vld [vmem:[%s2993_s0 + $0x364] sm:$0xf]  ;;  %v1661_v32 = vor.u32 %v1919_v18, %v1658_v19  ;;  %v1610_v17 = vld [vmem:[%s2993_s0 + $0x1bc] sm:$0xf0]  ;;  %v2551_v18 = vor.u32 %v1849_v63, %v1382_v4  ;;  %v1858_v50 = vld [vmem:[%s2993_s0 + $0x28] sm:$0xf0] }
  0x36   :  { %1009 = vmatpush.bf16.msrb.mxu2 %v1529_v21  ;;  %965 = vmatpush.bf16.msrb.mxu0 %v1789_v36  ;;  %v2435_v21 = vor.u32 %v1844_v61, %v1362_v6  ;;  %v2455_v36 = vpack.c.b16 %v216_v15, %v216_v15  ;;  %v1829_v43 = vor.u32 %v1961_v26, %v1826_v27  ;;  %v1910_v61 = vld [vmem:[%s2993_s0 + $0x1cc] sm:$0xf]  ;;  %v1436_v6 = vld [vmem:[%s2993_s0 + $0x50] sm:$0xf]  ;;  %v1904_v26 = vld [vmem:[%s2993_s0 + $0x19c] sm:$0xf] }
  0x37   :  { %v1625_v12 = vor.u32 %v1910_v61, %v1622_v62  ;;  %v1852_v15 = vld [vmem:[%s2994_s1 + $0x48] sm:$0xf0]  ;;  %v1598_v27 = vld [vmem:[%s2993_s0 + $0x1a4] sm:$0xf0]  ;;  %v1861_v35 = vld [vmem:[%s2993_s0 + $0x40] sm:$0xf0]  ;;  %v218_v62 = vunpack.c.h.b16 %v2404_v1 }
  0x38   :  { %941 = vmatpush.bf16.msrb.mxu3 %v1705_v37  ;;  %v2457_v37 = vpack.c.b16 %v217_v16, %v217_v16  ;;  %v1907_v16 = vld [vmem:[%s2993_s0 + $0x1b4] sm:$0xf]  ;;  %v1568_v1 = vld [vmem:[%s2993_s0 + $0x158] sm:$0xf]  ;;  %v1897_v4 = vld [vmem:[%s2993_s0 + $0x160] sm:$0xf0] }
  0x39   :  { %987 = vmatpush.bf16.msrb.mxu1 %v1421_v44  ;;  %v1460_v44 = vld [vmem:[%s2993_s0 + $0x80] sm:$0xf]  ;;  %v1613_v8 = vor.u32 %v1907_v16, %v1610_v17  ;;  %v2624_v2 = vpack.c.b16 %v218_v62, %v218_v62  ;;  %v1894_v17 = vld [vmem:[%s2993_s0 + $0x148] sm:$0xf0] }
  0x3a   :  { %1010 = vmatpush.bf16.msrb.mxu2 %v1517_v40  ;;  %966 = vmatpush.bf16.msrb.mxu0 %v1777_v51  ;;  %v1646_v40 = vld [vmem:[%s2993_s0 + $0x204] sm:$0xf0]  ;;  %v1730_v51 = vld [vmem:[%s2993_s0 + $0x2ac] sm:$0xf0]  ;;  %v1461_v52 = vor.u32 %v1870_v45, %v1460_v44  ;;  %v1925_v44 = vld [vmem:[%s2993_s0 + $0x244] sm:$0xf] }
  0x3b   :  { %v1649_v47 = vor.u32 %v1916_v39, %v1646_v40  ;;  %v1733_v55 = vor.u32 %v1937_v48, %v1730_v51  ;;  %v1901_v39 = vld [vmem:[%s2993_s0 + $0x184] sm:$0xf]  ;;  %v1682_v45 = vld [vmem:[%s2993_s0 + $0x24c] sm:$0xf0]  ;;  %v1412_v48 = vld [vmem:[%s2993_s0 + $0x20] sm:$0xf] }
  0x3c   :  { %942 = vmatpush.bf16.msrb.mxu3 %v1693_v53  ;;  %v1958_v53 = vld [vmem:[%s2993_s0 + $0x34c] sm:$0xf]  ;;  %v1400_v51 = vld [vmem:[%s2993_s0 + $0x8] sm:$0xf] }
  0x3d   :  { %988 = vmatpush.bf16.msrb.mxu1 %v1409_v9  ;;  %v1867_v9 = vld [vmem:[%s2993_s0 + $0x70] sm:$0xf0]  ;;  %v1817_v57 = vor.u32 %v1958_v53, %v1814_v54  ;;  %v1685_v53 = vor.u32 %v1925_v44, %v1682_v45  ;;  %v1413_v54 = vor.u32 %v1858_v50, %v1412_v48  ;;  %v1532_v45 = vld [vmem:[%s2993_s0 + $0x110] sm:$0xf] }
  0x3e   :  { %1011 = vmatpush.bf16.msrb.mxu2 %v1505_v56  ;;  %1051 = vmatpush.bf16.msra.mxu0 %v1769_v60  ;;  %v1448_v56 = vld [vmem:[%s2993_s0 + $0x68] sm:$0xf]  ;;  %v1718_v60 = vld [vmem:[%s2993_s0 + $0x294] sm:$0xf0] }
  0x3f   :  { %v1449_v0 = vor.u32 %v1867_v9, %v1448_v56  ;;  %v1900_v56 = vld [vmem:[%s2993_s0 + $0x178] sm:$0xf0]  ;;  %v1949_v9 = vld [vmem:[%s2993_s0 + $0x304] sm:$0xf] }
  0x40   :  { %943 = vmatpush.bf16.msrb.mxu3 %v1681_v5  ;;  %v1721_v5 = vor.u32 %v1934_v59, %v1718_v60  ;;  %v29_v59 = vld [vmem:[%s2994_s1 + $0x60] sm:$0x3] }
  0x41   :  { %989 = vmatpush.bf16.msrb.mxu1 %v1397_v14  ;;  %v1706_v14 = vld [vmem:[%s2993_s0 + $0x27c] sm:$0xf0] }
  0x42   :  { %1012 = vmatpush.bf16.msrb.mxu2 %v1493_v7  ;;  %1052 = vmatpush.bf16.msra.mxu0 %v1757_v23  ;;  %v1864_v7 = vld [vmem:[%s2993_s0 + $0x58] sm:$0xf0] }
  0x43   :  { %944 = vmatmul.bf16.vlgmr.msrb.gmra.mxu3 %v2435_v21  ;;  %1834 = vmatmul.msk.bf16.vlgmr.msrb.gmra.mxu0 %vm847_vm1, %v2450_v28  ;;  %v1437_v19 = vor.u32 %v1864_v7, %v1436_v6  ;;  %v1928_v23 = vld [vmem:[%s2993_s0 + $0x25c] sm:$0xf]  ;;  %v179_v6 = vld [vmem:[%s2993_s0 + $0x380] sm:$0xf]  ;;  %v1676_v7 = vld [vmem:[%s2993_s0 + $0x230] sm:$0xf] }
  0x44   :  { %1028 = vmatpush.bf16.msra.mxu3 %v1673_v13  ;;  %908 = vmatmul.bf16.gmra.mxu1 %v2455_v36  ;;  %v1931_v13 = vld [vmem:[%s2993_s0 + $0x274] sm:$0xf]  ;;  %v1697_v40 = vor.u32 %v1928_v23, %v1694_v25 }
  0x45   :  { %1076 = vmatpush.bf16.msra.mxu1 %v862_v22  ;;  %931 = vmatmul.bf16.gmra.mxu2 %v2457_v37  ;;  %v2553_v22 = vor.u32 %v1852_v15, %v1388_v11  ;;  %v621_v11 = vunpack.c.l.b16 %v179_v6  ;;  %v1556_v15 = vld [vmem:[%s2993_s0 + $0x140] sm:$0xf]  ;;  %v1939_v6 = vld [vmem:[%s2993_s0 + $0x2b0] sm:$0xf0] }
  0x46   :  { %1097 = vmatpush.bf16.msra.mxu2 %v1485_v20  ;;  %1053 = vmatpush.bf16.msra.mxu0 %v1745_v46  ;;  %v1709_v20 = vor.u32 %v1931_v13, %v1706_v14  ;;  %v1952_v46 = vld [vmem:[%s2993_s0 + $0x31c] sm:$0xf]  ;;  %v1772_v13 = vld [vmem:[%s2993_s0 + $0x2f0] sm:$0xf]  ;;  %v1557_v23 = vor.u32 %v1894_v17, %v1556_v15 }
  0x47   :  { %v1948_v14 = vld [vmem:[%s2993_s0 + $0x2f8] sm:$0xf0] }
  0x48   :  { %1029 = vmatpush.bf16.msra.mxu3 %v1661_v32  ;;  %v1424_v32 = vld [vmem:[%s2993_s0 + $0x38] sm:$0xf]  ;;  %v1773_v16 = vor.u32 %v1948_v14, %v1772_v13  ;;  %v1879_v13 = vld [vmem:[%s2993_s0 + $0xd0] sm:$0xf0] }
  0x49   :  { %1077 = vmatpush.bf16.msra.mxu1 %v1829_v43  ;;  %v1425_v41 = vor.u32 %v1861_v35, %v1424_v32  ;;  %v1586_v43 = vld [vmem:[%s2993_s0 + $0x18c] sm:$0xf0]  ;;  %v1544_v32 = vld [vmem:[%s2993_s0 + $0x128] sm:$0xf]  ;;  %v1891_v35 = vld [vmem:[%s2993_s0 + $0x130] sm:$0xf0] }
  0x4a   :  { %1098 = vmatpush.bf16.msra.mxu2 %v1473_v42  ;;  %1054 = vmatpush.bf16.msra.mxu0 %v1733_v55  ;;  %v1601_v42 = vor.u32 %v1904_v26, %v1598_v27  ;;  %v1580_v55 = vld [vmem:[%s2993_s0 + $0x170] sm:$0xf]  ;;  %v1832_v26 = vld [vmem:[%s2993_s0 + $0x368] sm:$0xf]  ;;  %v1963_v27 = vld [vmem:[%s2993_s0 + $0x370] sm:$0xf0]  ;;  %v1545_v44 = vor.u32 %v1891_v35, %v1544_v32 }
  0x4b   :  { %v1581_v60 = vor.u32 %v1900_v56, %v1580_v55  ;;  %v1942_v55 = vld [vmem:[%s2993_s0 + $0x2c8] sm:$0xf0]  ;;  %v1820_v56 = vld [vmem:[%s2993_s0 + $0x350] sm:$0xf]  ;;  %v1592_v35 = vld [vmem:[%s2993_s0 + $0x188] sm:$0xf] }
  0x4c   :  { %1030 = vmatpush.bf16.msra.mxu3 %v1649_v47  ;;  %v1790_v47 = vld [vmem:[%s2993_s0 + $0x324] sm:$0xf0] }
  0x4d   :  { %1078 = vmatpush.bf16.msra.mxu1 %v1817_v57  ;;  %v1793_v49 = vor.u32 %v1952_v46, %v1790_v47  ;;  %v1589_v57 = vor.u32 %v1901_v39, %v1586_v43  ;;  %v1760_v39 = vld [vmem:[%s2993_s0 + $0x2d8] sm:$0xf]  ;;  %v1833_v43 = vor.u32 %v1963_v27, %v1832_v26  ;;  %v1888_v46 = vld [vmem:[%s2993_s0 + $0x118] sm:$0xf0]  ;;  %v1652_v47 = vld [vmem:[%s2993_s0 + $0x200] sm:$0xf] }
  0x4e   :  { %1099 = vmatpush.bf16.msra.mxu2 %v1461_v52  ;;  %1055 = vmatpush.bf16.msra.mxu0 %v1721_v5  ;;  %v1855_v52 = vld [vmem:[%s2993_s0 + $0x10] sm:$0xf0]  ;;  %v1569_v5 = vor.u32 %v1897_v4, %v1568_v1  ;;  %v1533_v48 = vor.u32 %v1888_v46, %v1532_v45  ;;  %v1912_v1 = vld [vmem:[%s2993_s0 + $0x1d8] sm:$0xf0]  ;;  %v1604_v26 = vld [vmem:[%s2993_s0 + $0x1a0] sm:$0xf] }
  0x4f   :  { %v1401_v63 = vor.u32 %v1855_v52, %v1400_v51  ;;  %v1520_v51 = vld [vmem:[%s2993_s0 + $0xf8] sm:$0xf]  ;;  %v1885_v52 = vld [vmem:[%s2993_s0 + $0x100] sm:$0xf0]  ;;  %v1906_v27 = vld [vmem:[%s2993_s0 + $0x1a8] sm:$0xf0] }
  0x50   :  { %1031 = vmatpush.bf16.msra.mxu3 %v1637_v58  ;;  %v1778_v58 = vld [vmem:[%s2993_s0 + $0x30c] sm:$0xf0]  ;;  %v1605_v32 = vor.u32 %v1906_v27, %v1604_v26  ;;  %v1933_v45 = vld [vmem:[%s2993_s0 + $0x280] sm:$0xf0]  ;;  %v1700_v46 = vld [vmem:[%s2993_s0 + $0x260] sm:$0xf] }
  0x51   :  { %1079 = vmatpush.bf16.msra.mxu1 %v1805_v10  ;;  %v1781_v61 = vor.u32 %v1949_v9, %v1778_v58  ;;  %v1924_v10 = vld [vmem:[%s2993_s0 + $0x238] sm:$0xf0]  ;;  %v1521_v9 = vor.u32 %v1885_v52, %v1520_v51  ;;  %v1688_v52 = vld [vmem:[%s2993_s0 + $0x248] sm:$0xf] }
  0x52   :  { %1100 = vmatpush.bf16.msra.mxu2 %v1449_v0  ;;  %1056 = vmatpush.bf16.msra.mxu0 %v1709_v20  ;;  %v219_v0 = vunpack.c.l.b16 %v29_v59  ;;  %v1921_v20 = vld [vmem:[%s2993_s0 + $0x220] sm:$0xf0]  ;;  %v1960_v58 = vld [vmem:[%s2993_s0 + $0x358] sm:$0xf0]  ;;  %v1915_v59 = vld [vmem:[%s2993_s0 + $0x1f0] sm:$0xf0] }
  0x53   :  { %949 = vmatmul.bf16.gmra.mxu3 %v2551_v18  ;;  %1835 = vmatmul.msk.bf16.gmra.mxu0 %vm847_vm1, %v2553_v22 }
  0x54   :  { %1032 = vmatpush.bf16.msra.mxu3 %v1625_v12  ;;  %990 = vmatmul.bf16.vlgmr.msrb.gmra.mxu1 %v2195_v29  ;;  %v2626_v3 = vpack.c.b16 %v219_v0, %v219_v0  ;;  %v1677_v12 = vor.u32 %v1924_v10, %v1676_v7  ;;  %v1628_v0 = vld [vmem:[%s2993_s0 + $0x1d0] sm:$0xf]  ;;  %v1808_v7 = vld [vmem:[%s2993_s0 + $0x338] sm:$0xf] }
  0x55   :  { %1013 = vmatmul.bf16.vlgmr.msrb.gmra.mxu2 %v2203_v33  ;;  %1080 = vmatpush.bf16.msra.mxu1 %v1793_v49  ;;  %v1918_v49 = vld [vmem:[%s2993_s0 + $0x208] sm:$0xf0]  ;;  %v1629_v14 = vor.u32 %v1912_v1, %v1628_v0 }
  0x56   :  { %1101 = vmatpush.bf16.msra.mxu2 %v1437_v19  ;;  %1057 = vmatpush.bf16.msra.mxu0 %v1697_v40  ;;  %v1664_v19 = vld [vmem:[%s2993_s0 + $0x218] sm:$0xf]  ;;  %v1945_v40 = vld [vmem:[%s2993_s0 + $0x2e0] sm:$0xf0]  ;;  %v1653_v50 = vor.u32 %v1918_v49, %v1652_v47  ;;  %v1930_v47 = vld [vmem:[%s2993_s0 + $0x268] sm:$0xf0] }
  0x57   :  { %v1665_v25 = vor.u32 %v1921_v20, %v1664_v19  ;;  %v1616_v19 = vld [vmem:[%s2993_s0 + $0x1b8] sm:$0xf]  ;;  %v1909_v20 = vld [vmem:[%s2993_s0 + $0x1c0] sm:$0xf0]  ;;  %v1701_v49 = vor.u32 %v1930_v47, %v1700_v46 }
  0x58   :  { %1033 = vmatpush.bf16.msra.mxu3 %v1613_v8  ;;  %v735_v8 = vpack.c.b16 %v621_v11, %v621_v11  ;;  %v1957_v11 = vld [vmem:[%s2993_s0 + $0x340] sm:$0xf0] }
  0x59   :  { %1081 = vmatpush.bf16.msra.mxu1 %v1781_v61  ;;  %v1821_v61 = vor.u32 %v1960_v58, %v1820_v56  ;;  %v1809_v15 = vor.u32 %v1957_v11, %v1808_v7 }
  0x5a   :  { %1102 = vmatpush.bf16.msra.mxu2 %v1425_v41  ;;  %1058 = vmatpush.bf16.msra.mxu0 %v1685_v53  ;;  %v865_v41 = vsel %vm857_vm0, %v735_v8, 0  ;;  %v1640_v53 = vld [vmem:[%s2993_s0 + $0x1e8] sm:$0xf]  ;;  %v1936_v8 = vld [vmem:[%s2993_s0 + $0x298] sm:$0xf0] }
  0x5b   :  { %v1641_v62 = vor.u32 %v1915_v59, %v1640_v53  ;;  %v1927_v53 = vld [vmem:[%s2993_s0 + $0x250] sm:$0xf0] }
  0x5c   :  { %1034 = vmatpush.bf16.msra.mxu3 %v1601_v42  ;;  %v1761_v42 = vor.u32 %v1945_v40, %v1760_v39  ;;  %v1903_v39 = vld [vmem:[%s2993_s0 + $0x190] sm:$0xf0]  ;;  %v1796_v40 = vld [vmem:[%s2993_s0 + $0x320] sm:$0xf] }
  0x5d   :  { %1166 = vmatpush.bf16.msrb.mxu1 %v1773_v16  ;;  %v1724_v16 = vld [vmem:[%s2993_s0 + $0x290] sm:$0xf] }
  0x5e   :  { %1103 = vmatpush.bf16.msra.mxu2 %v1413_v54  ;;  %1143 = vmatpush.bf16.msrb.mxu0 %v1677_v12  ;;  %v1748_v54 = vld [vmem:[%s2993_s0 + $0x2c0] sm:$0xf]  ;;  %v1496_v12 = vld [vmem:[%s2993_s0 + $0xc8] sm:$0xf] }
  0x5f   :  { %v1497_v17 = vor.u32 %v1879_v13, %v1496_v12 }
  0x60   :  { %1035 = vmatpush.bf16.msra.mxu3 %v1589_v57  ;;  %v1749_v57 = vor.u32 %v1942_v55, %v1748_v54  ;;  %v1689_v54 = vor.u32 %v1927_v53, %v1688_v52 }
  0x61   :  { %1167 = vmatpush.bf16.msrb.mxu1 %v1761_v42  ;;  %v1712_v42 = vld [vmem:[%s2993_s0 + $0x278] sm:$0xf] }
  0x62   :  { %1104 = vmatpush.bf16.msra.mxu2 %v1401_v63  ;;  %1144 = vmatpush.bf16.msrb.mxu0 %v1665_v25  ;;  %v1882_v63 = vld [vmem:[%s2993_s0 + $0xe8] sm:$0xf0]  ;;  %v1617_v25 = vor.u32 %v1909_v20, %v1616_v19 }
  0x63   :  { %954 = vmatmul.bf16.gmra.mxu3 %v2624_v2  ;;  %1836 = vmatmul.msk.bf16.gmra.mxu0 %vm847_vm1, %v2626_v3 }
  0x64   :  { %1120 = vmatpush.bf16.msrb.mxu3 %v1581_v60  ;;  %995 = vmatmul.bf16.gmra.mxu1 %v2319_v24  ;;  %v1508_v60 = vld [vmem:[%s2993_s0 + $0xe0] sm:$0xf] }
  0x65   :  { %1018 = vmatmul.bf16.gmra.mxu2 %v2330_v30  ;;  %1168 = vmatpush.bf16.msrb.mxu1 %v1749_v57  ;;  %v1509_v4 = vor.u32 %v1882_v63, %v1508_v60 }
  0x66   :  { %1191 = vmatpush.bf16.msrb.mxu2 %v865_v41  ;;  %1145 = vmatpush.bf16.msrb.mxu0 %v1653_v50  ;;  %v1954_v41 = vld [vmem:[%s2993_s0 + $0x328] sm:$0xf0]  ;;  %v1951_v50 = vld [vmem:[%s2993_s0 + $0x310] sm:$0xf0] }
  0x68   :  { %1121 = vmatpush.bf16.msrb.mxu3 %v1569_v5  ;;  %v1736_v5 = vld [vmem:[%s2993_s0 + $0x2a8] sm:$0xf] }
  0x69   :  { %v1737_v10 = vor.u32 %v1939_v6, %v1736_v5 }
  0x6a   :  { %1192 = vmatpush.bf16.msrb.mxu2 %v1833_v43  ;;  %1146 = vmatpush.bf16.msrb.mxu0 %v1641_v62  ;;  %v1797_v43 = vor.u32 %v1954_v41, %v1796_v40 }
  0x6b   :  { %1169 = vmatpush.bf16.msrb.mxu1 %v1737_v10 }
  0x6c   :  { %1122 = vmatpush.bf16.msrb.mxu3 %v1557_v23  ;;  %v1725_v23 = vor.u32 %v1936_v8, %v1724_v16 }
  0x6e   :  { %1193 = vmatpush.bf16.msrb.mxu2 %v1821_v61  ;;  %1147 = vmatpush.bf16.msrb.mxu0 %v1629_v14 }
  0x6f   :  { %1170 = vmatpush.bf16.msrb.mxu1 %v1725_v23 }
  0x70   :  { %1123 = vmatpush.bf16.msrb.mxu3 %v1545_v44  ;;  %v1593_v44 = vor.u32 %v1903_v39, %v1592_v35 }
  0x72   :  { %1194 = vmatpush.bf16.msrb.mxu2 %v1809_v15  ;;  %1148 = vmatpush.bf16.msrb.mxu0 %v1617_v25 }
  0x73   :  { %1036 = vmatmul.bf16.vlgmr.msra.gmra.mxu3 %v2205_v34  ;;  %1059 = vmatmul.bf16.vlgmr.msra.gmra.mxu0 %v2435_v21 }
  0x74   :  { %1124 = vmatpush.bf16.msrb.mxu3 %v1533_v48  ;;  %1000 = vmatmul.bf16.gmra.mxu1 %v2216_v38  ;;  %v1784_v48 = vld [vmem:[%s2993_s0 + $0x308] sm:$0xf] }
  0x75   :  { %1023 = vmatmul.bf16.gmra.mxu2 %v2455_v36  ;;  %v1785_v51 = vor.u32 %v1951_v50, %v1784_v48 }
  0x76   :  { %1149 = vmatpush.bf16.msrb.mxu0 %v1605_v32  ;;  %1195 = vmatpush.bf16.msrb.mxu2 %v1797_v43 }
  0x78   :  { %1125 = vmatpush.bf16.msrb.mxu3 %v1521_v9 }
  0x7a   :  { %1150 = vmatpush.bf16.msrb.mxu0 %v1593_v44  ;;  %1196 = vmatpush.bf16.msrb.mxu2 %v1785_v51 }
  0x7c   :  { %1126 = vmatpush.bf16.msrb.mxu3 %v1509_v4 }
  0x80   :  { %1127 = vmatpush.bf16.msrb.mxu3 %v1497_v17 }
  0x83   :  { %1041 = vmatmul.bf16.gmra.mxu3 %v2332_v31  ;;  %1064 = vmatmul.bf16.gmra.mxu0 %v2551_v18 }
  0x84   :  { %1837 = vmatmul.msk.bf16.vlgmr.msra.gmra.mxu1 %vm847_vm1, %v2450_v28 }
  0x85   :  { %1105 = vmatmul.bf16.vlgmr.msra.gmra.mxu2 %v2195_v29  ;;  %v1713_v29 = vor.u32 %v1933_v45, %v1712_v42 }
  0x87   :  { %1171 = vmatpush.bf16.msrb.mxu1 %v1713_v29 }
  0x8b   :  { %1172 = vmatpush.bf16.msrb.mxu1 %v1701_v49 }
  0x8f   :  { %1173 = vmatpush.bf16.msrb.mxu1 %v1689_v54 }
  0x93   :  { %1046 = vmatmul.bf16.gmra.mxu3 %v2457_v37  ;;  %1069 = vmatmul.bf16.gmra.mxu0 %v2624_v2 }
  0x94   :  { %1838 = vmatmul.msk.bf16.gmra.mxu1 %vm847_vm1, %v2553_v22 }
  0x95   :  { %1110 = vmatmul.bf16.gmra.mxu2 %v2319_v24 }
  0xa0   :  { %v876_v55 = vpop.f32.mrf.mxu0 }
  0xa1   :  { %v899_v56 = vpop.f32.mrf.mxu1 }
  0xa2   :  { %v900_v9 = vadd.f32 %v899_v56, %v876_v55 }
  0xa3   :  { %1128 = vmatmul.bf16.vlgmr.msrb.gmra.mxu3 %v2203_v33  ;;  %1151 = vmatmul.bf16.vlgmr.msrb.gmra.mxu0 %v2205_v34 }
  0xa4   :  { %1839 = vmatmul.msk.bf16.gmra.mxu1 %vm847_vm1, %v2626_v3 }
  0xa5   :  { %1115 = vmatmul.bf16.gmra.mxu2 %v2216_v38 }
  0xa6   :  { %v886_v60 = vpop.f32.mrf.mxu3 }
  0xa8   :  { %v922_v57 = vpop.f32.mrf.mxu2  ;;  %v878_v59 = vpop.f32.mrf.mxu0 }
  0xa9   :  { %v923_v58 = vadd.f32 %v922_v57, %v900_v9  ;;  %v901_v61 = vpop.f32.mrf.mxu1 }
  0xaa   :  { %v902_v62 = vadd.f32 %v901_v61, %v878_v59 }
  0xae   :  { %v888_v1 = vpop.f32.mrf.mxu3 }
  0xb0   :  { %v924_v63 = vpop.f32.mrf.mxu2  ;;  %v881_v0 = vpop.f32.mrf.mxu0 }
  0xb1   :  { %v925_v24 = vadd.f32 %v924_v63, %v902_v62  ;;  %v904_v4 = vpop.f32.mrf.mxu1 }
  0xb2   :  { %v905_v33 = vadd.f32 %v904_v4, %v881_v0 }
  0xb3   :  { %1133 = vmatmul.bf16.gmra.mxu3 %v2330_v30  ;;  %1156 = vmatmul.bf16.gmra.mxu0 %v2332_v31 }
  0xb4   :  { %1174 = vmatmul.bf16.vlgmr.msrb.gmra.mxu1 %v2435_v21 }
  0xb5   :  { %1840 = vmatmul.msk.bf16.vlgmr.msrb.gmra.mxu2 %vm847_vm1, %v2450_v28 }
  0xb8   :  { %v927_v34 = vpop.f32.mrf.mxu2  ;;  %v883_v5 = vpop.f32.mrf.mxu0 }
  0xb9   :  { %v928_v38 = vadd.f32 %v927_v34, %v905_v33  ;;  %v906_v6 = vpop.f32.mrf.mxu1 }
  0xba   :  { %v907_v7 = vadd.f32 %v906_v6, %v883_v5 }
  0xc0   :  { %v929_v10 = vpop.f32.mrf.mxu2  ;;  %v968_v12 = vpop.f32.mrf.mxu0 }
  0xc1   :  { %v930_v11 = vadd.f32 %v929_v10, %v907_v7  ;;  %v909_v13 = vpop.f32.mrf.mxu1 }
  0xc2   :  { %v910_v30 = vadd.f32 %v909_v13, %v886_v60 }
  0xc3   :  { %1138 = vmatmul.bf16.gmra.mxu3 %v2455_v36  ;;  %1161 = vmatmul.bf16.gmra.mxu0 %v2457_v37 }
  0xc4   :  { %1179 = vmatmul.bf16.gmra.mxu1 %v2551_v18 }
  0xc5   :  { %1841 = vmatmul.msk.bf16.gmra.mxu2 %vm847_vm1, %v2553_v22 }
  0xc6   :  { %v945_v31 = vpop.f32.mrf.mxu3 }
  0xc7   :  { %v946_v21 = vadd.f32 %v945_v31, %v923_v58 }
  0xc8   :  { %v932_v14 = vpop.f32.mrf.mxu2  ;;  %v970_v16 = vpop.f32.mrf.mxu0 }
  0xc9   :  { %v2834_v28 = vadd.f32 %v968_v12, %v946_v21  ;;  %v933_v15 = vadd.f32 %v932_v14, %v910_v30  ;;  %v911_v17 = vpop.f32.mrf.mxu1 }
  0xce   :  { %v947_v19 = vpop.f32.mrf.mxu3 }
  0xcf   :  { %v948_v20 = vadd.f32 %v947_v19, %v925_v24 }
  0xd0   :  { %v934_v36 = vpop.f32.mrf.mxu2  ;;  %v973_v23 = vpop.f32.mrf.mxu0 }
  0xd1   :  { %v2836_v8 = vadd.f32 %v970_v16, %v948_v20  ;;  %v991_v37 = vpop.f32.mrf.mxu1 }
  0xd4   :  { %1184 = vmatmul.bf16.gmra.mxu1 %v2624_v2 }
  0xd5   :  { %1842 = vmatmul.msk.bf16.gmra.mxu2 %vm847_vm1, %v2626_v3 }
  0xd6   :  { %v950_v25 = vpop.f32.mrf.mxu3 }
  0xd7   :  { %v951_v18 = vadd.f32 %v950_v25, %v928_v38 }
  0xd8   :  { %v1014_v26 = vpop.f32.mrf.mxu2  ;;  %v975_v27 = vpop.f32.mrf.mxu0 }
  0xd9   :  { %v2841_v22 = vadd.f32 %v973_v23, %v951_v18  ;;  %v993_v32 = vpop.f32.mrf.mxu1  ;;  %v1015_v55 = vadd.f32 %v1014_v26, %v991_v37 }
  0xdb   :  { %v1301_v14 = vmul.f32 %v2841_v22, %v2841_v22 }
  0xde   :  { %v952_v35 = vpop.f32.mrf.mxu3 }
  0xdf   :  { %v953_v39 = vadd.f32 %v952_v35, %v930_v11 }
  0xe0   :  { %v1016_v41 = vpop.f32.mrf.mxu2  ;;  %v978_v42 = vpop.f32.mrf.mxu0 }
  0xe1   :  { %v2843_v40 = vadd.f32 %v975_v27, %v953_v39  ;;  %v996_v43 = vpop.f32.mrf.mxu1  ;;  %v1017_v61 = vadd.f32 %v1016_v41, %v993_v32 }
  0xe3   :  { %v1304_v27 = vmul.f32 %v2843_v40, %v2843_v40 }
  0xe6   :  { %v955_v44 = vpop.f32.mrf.mxu3 }
  0xe7   :  { %v956_v45 = vadd.f32 %v955_v44, %v933_v15 }
  0xe8   :  { %v1019_v2 = vpop.f32.mrf.mxu2  ;;  %v980_v46 = vpop.f32.mrf.mxu0 }
  0xe9   :  { %v2845_v29 = vadd.f32 %v978_v42, %v956_v45  ;;  %v998_v3 = vpop.f32.mrf.mxu1  ;;  %v1020_v38 = vadd.f32 %v1019_v2, %v996_v43 }
  0xee   :  { %v957_v47 = vpop.f32.mrf.mxu3 }
  0xf0   :  { %v1021_v48 = vpop.f32.mrf.mxu2  ;;  %v1060_v49 = vpop.f32.mrf.mxu0 }
  0xf1   :  { %v1001_v50 = vpop.f32.mrf.mxu1  ;;  %v1022_v31 = vadd.f32 %v1021_v48, %v998_v3 }
  0xf6   :  { %v1037_v51 = vpop.f32.mrf.mxu3 }
  0xf7   :  { %v1038_v56 = vadd.f32 %v1037_v51, %v1015_v55  ;;  %v1232_v51 = vlaneseq }
  0xf8   :  { %v1024_v52 = vpop.f32.mrf.mxu2  ;;  %v1062_v53 = vpop.f32.mrf.mxu0 }
  0xf9   :  { %v1003_v54 = vpop.f32.mrf.mxu1  ;;  %v1061_v58 = vadd.f32 %v1060_v49, %v1038_v56  ;;  %v1025_v18 = vadd.f32 %v1024_v52, %v1001_v50 }
  0xfa   :  { %v1233_v54 = vand.u32 127, %v1232_v51 }
  0xfe   :  { %v1039_v9 = vpop.f32.mrf.mxu3 }
  0xff   :  { %v1040_v63 = vadd.f32 %v1039_v9, %v1017_v61 }
 0x100   :  { %v1026_v57 = vpop.f32.mrf.mxu2  ;;  %v1065_v59 = vpop.f32.mrf.mxu0 }
 0x101   :  { %v1083_v60 = vpop.f32.mrf.mxu1  ;;  %v1063_v4 = vadd.f32 %v1062_v53, %v1040_v63  ;;  %v2896_v57 = vadd.s32 256, %v1233_v54 }
 0x102   :  { %v2847_v62 = vadd.f32 %v1083_v60, %v1061_v58 }
 0x103   :  { %vm1243_vm2 = vcmp.lt.s32.totalorder %v2896_v57, 338 }
 0x104   :  { %v1212_v24 = vpack.c.bf16 %v2847_v62, %v2834_v28  ;;  %v1296_v63 = vmul.f32 %v2847_v62, %v2847_v62 }
 0x106   :  { %v1042_v0 = vpop.f32.mrf.mxu3  ;;  %1222 = vst [vmem:[%s2995_s2] sm:$0xff] %v1212_v24 }
 0x107   :  { %v1043_v6 = vadd.f32 %v1042_v0, %v1020_v38 }
 0x108   :  { %v1106_v1 = vpop.f32.mrf.mxu2  ;;  %v1067_v33 = vpop.f32.mrf.mxu0 }
 0x109   :  { %v1085_v34 = vpop.f32.mrf.mxu1  ;;  %v1066_v12 = vadd.f32 %v1065_v59, %v1043_v6 }
 0x10a   :  { %v2854_v5 = vadd.f32 %v1085_v34, %v1063_v4  ;;  %v1295_v34 = vmul.f32 %v2834_v28, %v2834_v28 }
 0x10c   :  { %v1214_v7 = vpack.c.bf16 %v2854_v5, %v2836_v8 }
 0x10e   :  { %v1044_v10 = vpop.f32.mrf.mxu3  ;;  %1224 = vst [vmem:[%s2995_s2 + $0xc] sm:$0xff] %v1214_v7 }
 0x10f   :  { %v1045_v15 = vadd.f32 %v1044_v10, %v1022_v31 }
 0x110   :  { %v1108_v11 = vpop.f32.mrf.mxu2  ;;  %v1070_v13 = vpop.f32.mrf.mxu0 }
 0x111   :  { %v1088_v30 = vpop.f32.mrf.mxu1  ;;  %v1068_v23 = vadd.f32 %v1067_v33, %v1045_v15 }
 0x112   :  { %v2861_v21 = vadd.f32 %v1088_v30, %v1066_v12  ;;  %v1310_v12 = vadd.f32 %v1296_v63, %v1295_v34 }
 0x114   :  { %v1216_v16 = vpack.c.bf16 %v2861_v21, %v2841_v22  ;;  %v1302_v17 = vmul.f32 %v2861_v21, %v2861_v21 }
 0x116   :  { %v1047_v19 = vpop.f32.mrf.mxu3  ;;  %1226 = vst [vmem:[%s2995_s2 + $0x18] sm:$0xff] %v1216_v16  ;;  %v2872_v20 = vadd.f32 %v1302_v17, %v1301_v14  ;;  %v1269_v17 = vadd.f32 %v2854_v5, %v2836_v8 }
 0x117   :  { %v1048_v32 = vadd.f32 %v1047_v19, %v1025_v18 }
 0x118   :  { %v1111_v36 = vpop.f32.mrf.mxu2  ;;  %v1072_v37 = vpop.f32.mrf.mxu0 }
 0x119   :  { %v1090_v25 = vpop.f32.mrf.mxu1  ;;  %v1071_v44 = vadd.f32 %v1070_v13, %v1048_v32  ;;  %v1298_v32 = vmul.f32 %v2836_v8, %v2836_v8 }
 0x11a   :  { %v2874_v26 = vadd.f32 %v1090_v25, %v1068_v23 }
 0x11c   :  { %v1218_v35 = vpack.c.bf16 %v2874_v26, %v2843_v40  ;;  %v1305_v39 = vmul.f32 %v2874_v26, %v2874_v26 }
 0x11e   :  { %v1049_v41 = vpop.f32.mrf.mxu3  ;;  %1228 = vst [vmem:[%s2995_s2 + $0x24] sm:$0xff] %v1218_v35  ;;  %v2885_v42 = vadd.f32 %v1305_v39, %v1304_v27 }
 0x120   :  { %v1113_v43 = vpop.f32.mrf.mxu2  ;;  %v1152_v45 = vpop.f32.mrf.mxu0 }
 0x121   :  { %v1093_v2 = vpop.f32.mrf.mxu1 }
 0x122   :  { %v2887_v46 = vadd.f32 %v1093_v2, %v1071_v44 }
 0x124   :  { %v1220_v3 = vpack.c.bf16 %v2887_v46, %v2845_v29 }
 0x126   :  { %v1129_v47 = vpop.f32.mrf.mxu3  ;;  %1230 = vst [vmem:[%s2995_s2 + $0x30] sm:$0x33] %v1220_v3  ;;  %v1273_v3 = vadd.f32 %v2861_v21, %v2841_v22 }
 0x127   :  { %v1130_v55 = vadd.f32 %v1129_v47, %v1106_v1  ;;  %v1265_v1 = vadd.f32 %v2847_v62, %v2834_v28 }
 0x128   :  { %v2894_v48 = vpop.f32.mrf.mxu2  ;;  %v1154_v49 = vpop.f32.mrf.mxu0 }
 0x129   :  { %v1095_v50 = vpop.f32.mrf.mxu1  ;;  %v1153_v58 = vadd.f32 %v1152_v45, %v1130_v55  ;;  %v1277_v55 = vadd.f32 %v2874_v26, %v2843_v40  ;;  %v1282_v26 = vsel %vm857_vm0, %v2887_v46, 0.0 }
 0x12e   :  { %v1131_v52 = vpop.f32.mrf.mxu3 }
 0x12f   :  { %v1132_v24 = vadd.f32 %v1131_v52, %v1108_v11 }
 0x130   :  { %v1118_v53 = vpop.f32.mrf.mxu2  ;;  %v1157_v56 = vpop.f32.mrf.mxu0 }
 0x131   :  { %v1175_v9 = vpop.f32.mrf.mxu1  ;;  %v1155_v13 = vadd.f32 %v1154_v49, %v1132_v24 }
 0x132   :  { %v1176_v60 = vadd.f32 %v1175_v9, %v1153_v58 }
 0x136   :  { %v1134_v59 = vpop.f32.mrf.mxu3 }
 0x137   :  { %v1135_v14 = vadd.f32 %v1134_v59, %v1111_v36  ;;  %v1299_v36 = vmul.f32 %v2854_v5, %v2854_v5 }
 0x138   :  { %v1198_v61 = vpop.f32.mrf.mxu2  ;;  %v1159_v4 = vpop.f32.mrf.mxu0 }
 0x139   :  { %v1199_v0 = vadd.f32 %v1198_v61, %v1176_v60  ;;  %v1177_v33 = vpop.f32.mrf.mxu1  ;;  %v1158_v25 = vadd.f32 %v1157_v56, %v1135_v14  ;;  %v1314_v47 = vadd.f32 %v1299_v36, %v1298_v32  ;;  %v1308_v60 = vmul.f32 %v2887_v46, %v2887_v46 }
 0x13a   :  { %v1178_v31 = vadd.f32 %v1177_v33, %v1155_v13  ;;  %v1307_v61 = vmul.f32 %v2845_v29, %v2845_v29 }
 0x13b   :  { %v1213_v38 = vpack.c.bf16 %v1199_v0, %v1199_v0  ;;  %v1252_v6 = vsel %vm1243_vm2, %v1199_v0, 0.0  ;;  %v1327_v33 = vsel %vm857_vm0, %v1308_v60, 0.0 }
 0x13c   :  { %v1266_v7 = vadd.f32 %v1265_v1, %v1252_v6  ;;  %v1297_v10 = vmul.f32 %v1252_v6, %v1252_v6 }
 0x13d   :  { %1223 = vst [vmem:[%s2995_s2 + $0x8] sm:$0xf] %v1213_v38 }
 0x13e   :  { %v1136_v11 = vpop.f32.mrf.mxu3  ;;  %1267 = vadd.xlane.f32.xlu0 %v1266_v7  ;;  %v1311_v30 = vadd.f32 %v1310_v12, %v1297_v10  ;;  %v1326_v12 = vsel %vm857_vm0, %v1307_v61, 0.0 }
 0x13f   :  { %v1137_v41 = vadd.f32 %v1136_v11, %v1113_v43 }
 0x140   :  { %v1200_v62 = vpop.f32.mrf.mxu2  ;;  %1312 = vadd.xlane.f32.xlu2 %v1311_v30  ;;  %v1162_v15 = vpop.f32.mrf.mxu0 }
 0x141   :  { %v1201_v28 = vadd.f32 %v1200_v62, %v1178_v31  ;;  %v1180_v16 = vpop.f32.mrf.mxu1  ;;  %v1160_v52 = vadd.f32 %v1159_v4, %v1137_v41  ;;  %v1281_v4 = vsel %vm857_vm0, %v2845_v29, 0.0  ;;  %v1328_v29 = vadd.f32 %v1327_v33, %v1326_v12 }
 0x142   :  { %v1181_v27 = vadd.f32 %v1180_v16, %v1158_v25  ;;  %v1283_v38 = vadd.f32 %v1282_v26, %v1281_v4 }
 0x143   :  { %v1215_v19 = vpack.c.bf16 %v1201_v28, %v1201_v28  ;;  %v1255_v23 = vsel %vm1243_vm2, %v1201_v28, 0.0 }
 0x144   :  { %v1270_v37 = vadd.f32 %v1269_v17, %v1255_v23  ;;  %v1300_v39 = vmul.f32 %v1255_v23, %v1255_v23 }
 0x145   :  { %1225 = vst [vmem:[%s2995_s2 + $0x14] sm:$0xf] %v1215_v19 }
 0x146   :  { %v1139_v18 = vpop.f32.mrf.mxu3  ;;  %1271 = vadd.xlane.f32.xlu0 %v1270_v37  ;;  %v1315_v51 = vadd.f32 %v1314_v47, %v1300_v39 }
 0x147   :  { %v1140_v54 = vadd.f32 %v1139_v18, %v2894_v48 }
 0x148   :  { %v1203_v35 = vpop.f32.mrf.mxu2  ;;  %v1164_v45 = vpop.f32.mrf.mxu0 }
 0x149   :  { %v1204_v44 = vadd.f32 %v1203_v35, %v1181_v27  ;;  %v1182_v2 = vpop.f32.mrf.mxu1  ;;  %v1163_v59 = vadd.f32 %v1162_v15, %v1140_v54 }
 0x14a   :  { %v1183_v43 = vadd.f32 %v1182_v2, %v1160_v52 }
 0x14b   :  { %v1217_v49 = vpack.c.bf16 %v1204_v44, %v1204_v44  ;;  %v1258_v50 = vsel %vm1243_vm2, %v1204_v44, 0.0 }
 0x14c   :  { %v1274_v5 = vadd.f32 %v1273_v3, %v1258_v50  ;;  %v1303_v63 = vmul.f32 %v1258_v50, %v1258_v50 }
 0x14d   :  { %1227 = vst [vmem:[%s2995_s2 + $0x20] sm:$0xf] %v1217_v49 }
 0x14e   :  { %v1141_v8 = vpop.f32.mrf.mxu3  ;;  %1275 = vadd.xlane.f32.xlu1 %v1274_v5  ;;  %1316 = vadd.xlane.f32.xlu0 %v1315_v51  ;;  %v1319_v7 = vadd.f32 %v2872_v20, %v1303_v63 }
 0x150   :  { %v1205_v53 = vpop.f32.mrf.mxu2 }
 0x151   :  { %v1206_v22 = vadd.f32 %v1205_v53, %v1183_v43  ;;  %v1185_v21 = vpop.f32.mrf.mxu1 }
 0x152   :  { %v1186_v48 = vadd.f32 %v1185_v21, %v1163_v59 }
 0x153   :  { %v1219_v56 = vpack.c.bf16 %v1206_v22, %v1206_v22  ;;  %v1261_v9 = vsel %vm1243_vm2, %v1206_v22, 0.0 }
 0x154   :  { %v1278_v58 = vadd.f32 %v1277_v55, %v1261_v9  ;;  %v1306_v30 = vmul.f32 %v1261_v9, %v1261_v9 }
 0x155   :  { %1229 = vst [vmem:[%s2995_s2 + $0x2c] sm:$0xf] %v1219_v56 }
 0x156   :  { %1279 = vadd.xlane.f32.xlu1 %v1278_v58  ;;  %v1323_v20 = vadd.f32 %v2885_v42, %v1306_v30 }
 0x158   :  { %v1208_v40 = vpop.f32.mrf.mxu2 }
 0x159   :  { %v1209_v24 = vadd.f32 %v1208_v40, %v1186_v48  ;;  %v1187_v0 = vpop.f32.mrf.mxu1 }
 0x15b   :  { %v1221_v1 = vpack.c.bf16 %v1209_v24, %v1209_v24  ;;  %v1264_v34 = vsel %vm1243_vm2, %v1209_v24, 0.0 }
 0x15c   :  { %v1309_v6 = vmul.f32 %v1264_v34, %v1264_v34  ;;  %v1284_v10 = vsel %vm857_vm0, %v1264_v34, 0.0 }
 0x15d   :  { %1231 = vst [vmem:[%s2995_s2 + $0x38] sm:$0x3] %v1221_v1  ;;  %v1285_v46 = vadd.f32 %v1284_v10, %v1283_v38 }
 0x15e   :  { %1320 = vadd.xlane.f32.xlu1 %v1319_v7  ;;  %v1329_v13 = vsel %vm857_vm0, %v1309_v6, 0.0 }
 0x15f   :  { %1286 = vadd.xlane.f32.xlu2 %v1285_v46  ;;  %v1330_v57 = vadd.f32 %v1329_v13, %v1328_v29 }
 0x160   :  { %v1210_v11 = vpop.f32.mrf.mxu2 }
 0x161   :  { %1331 = vadd.xlane.f32.xlu0 %v1330_v57 }
 0x167   :  { %1324 = vadd.xlane.f32.xlu2 %v1323_v20 }
 0x1b1   :  { %v1268_v31 = vpop.xlane.xlu0 %1267 }
 0x1b2   :  { %1289 = vst.msk [vmem:[%s2996_s3] sm:$0xff] %vm1288_vm3, %v1268_v31 }
 0x1b3   :  { %v1313_v62 = vpop.xlane.xlu2 %1312 }
 0x1b4   :  { %1333 = vst.msk [vmem:[%s2997_s4] sm:$0xff] %vm1288_vm3, %v1313_v62 }
 0x1b9   :  { %v1272_v14 = vpop.xlane.xlu0 %1271 }
 0x1ba   :  { %1290 = vst.msk [vmem:[%s2996_s3 + $0x8] sm:$0xff] %vm1288_vm3, %v1272_v14 }
 0x1c1   :  { %v1276_v42 = vpop.xlane.xlu1 %1275  ;;  %v1317_v28 = vpop.xlane.xlu0 %1316 }
 0x1c2   :  { %1291 = vst.msk [vmem:[%s2996_s3 + $0x10] sm:$0xff] %vm1288_vm3, %v1276_v42 }
 0x1c3   :  { %1334 = vst.msk [vmem:[%s2997_s4 + $0x8] sm:$0xff] %vm1288_vm3, %v1317_v28 }
 0x1c9   :  { %v1280_v15 = vpop.xlane.xlu1 %1279 }
 0x1ca   :  { %1292 = vst.msk [vmem:[%s2996_s3 + $0x18] sm:$0xff] %vm1288_vm3, %v1280_v15 }
 0x1d1   :  { %v1321_v16 = vpop.xlane.xlu1 %1320 }
 0x1d2   :  { %1335 = vst.msk [vmem:[%s2997_s4 + $0x10] sm:$0xff] %vm1288_vm3, %v1321_v16  ;;  %v1287_v17 = vpop.xlane.xlu2 %1286 }
 0x1d3   :  { %1294 = vst.msk [vmem:[%s2996_s3 + $0x20] sm:$0xf] %vm1293_vm4, %v1287_v17 }
 0x1d4   :  { %v1332_v19 = vpop.xlane.xlu0 %1331 }
 0x1d5   :  { %1337 = vst.msk [vmem:[%s2997_s4 + $0x20] sm:$0xf] %vm1293_vm4, %v1332_v19 }
 0x1da   :  { %v1325_v23 = vpop.xlane.xlu2 %1324 }
 0x1db   :  { %1336 = vst.msk [vmem:[%s2997_s4 + $0x18] sm:$0xff] %vm1288_vm3, %v1325_v23 }

// kernel: lstm_driver_forward.15
= control target key start
LH: loop header
LB: loop body
LE: loop exit
PB: predicated region body
PF: predicated region fallthrough
CT: control target
= control target key end

     0   :  { %v172_v0 = vmov 0   ;;  %s288_s1 = inlined_call_operand.vmem [shape: f32[36,1], index: 1, kind: input, shape index: {}]   ;;  %s289_s2 = inlined_call_operand.vmem [shape: f32[36,1], index: 2, kind: input, shape index: {}]   ;;  %s290_s0 = inlined_call_operand.vmem [shape: bf16[36,384], index: 0, kind: input, shape index: {}]   ;;  %s291_s3 = inlined_call_operand.vmem [shape: bf16[36,384], index: 3, kind: output, shape index: {}]  }
   0x1   :  { %170 = vset.pattern.permute.xlu1 %v172_v0  ;;  %169 = vset.pattern.permute.xlu0 %v172_v0  ;;  %v41_v1 = vld [vmem:[%s288_s1 + $0x10] sm:$0xff]  ;;  %v39_v2 = vld [vmem:[%s288_s1] sm:$0xff]  ;;  %v42_v4 = vld [vmem:[%s288_s1 + $0x18] sm:$0xff] }
   0x2   :  { %56 = vperm.xlu1 %170, %v41_v1   ;;  %46 = vperm.xlu0 %169, %v39_v2   ;;  %v43_v3 = vld [vmem:[%s288_s1 + $0x20] sm:$0xf]  ;;  %v40_v5 = vld [vmem:[%s288_s1 + $0x8] sm:$0xff]  ;;  %v86_v7 = vld [vmem:[%s289_s2 + $0x10] sm:$0xff] }
   0x3   :  { %171 = vset.pattern.permute.xlu2 %v172_v0  ;;  %v84_v6 = vld [vmem:[%s289_s2] sm:$0xff]  ;;  %v85_v8 = vld [vmem:[%s289_s2 + $0x8] sm:$0xff]  ;;  %v87_v9 = vld [vmem:[%s289_s2 + $0x18] sm:$0xff] }
   0x4   :  { %66 = vperm.xlu2 %171, %v43_v3   ;;  %v88_v10 = vld [vmem:[%s289_s2 + $0x20] sm:$0xf]  ;;  %v15_v13 = vld [vmem:[%s290_s0 + $0x8] sm:$0xf]  ;;  %v21_v24 = vld [vmem:[%s290_s0 + $0x2c] sm:$0xf] }
   0x5   :  { %v14_v12 = vld [vmem:[%s290_s0] sm:$0xff]  ;;  %v26_v16 = vunpack.c.l.bf16 %v15_v13  ;;  %v35_v31 = vunpack.c.l.bf16 %v21_v24  ;;  %v18_v34 = vld [vmem:[%s290_s0 + $0x18] sm:$0xff]  ;;  %v16_v40 = vld [vmem:[%s290_s0 + $0xc] sm:$0xff] }
   0x6   :  { %v24_v14 = vunpack.c.l.bf16 %v14_v12  ;;  %v25_v15 = vunpack.c.h.bf16 %v14_v12  ;;  %v20_v23 = vld [vmem:[%s290_s0 + $0x24] sm:$0xff]  ;;  %v19_v35 = vld [vmem:[%s290_s0 + $0x20] sm:$0xf]  ;;  %v17_v44 = vld [vmem:[%s290_s0 + $0x14] sm:$0xf]  ;;  %v30_v45 = vunpack.c.l.bf16 %v18_v34  ;;  %v31_v46 = vunpack.c.h.bf16 %v18_v34 }
   0x7   :  { %v33_v29 = vunpack.c.l.bf16 %v20_v23  ;;  %v34_v30 = vunpack.c.h.bf16 %v20_v23  ;;  %v32_v47 = vunpack.c.l.bf16 %v19_v35  ;;  %v27_v52 = vunpack.c.l.bf16 %v16_v40  ;;  %v22_v55 = vld [vmem:[%s290_s0 + $0x30] sm:$0x33]  ;;  %v23_v61 = vld [vmem:[%s290_s0 + $0x38] sm:$0x3] }
   0x8   :  { %v28_v53 = vunpack.c.h.bf16 %v16_v40  ;;  %v29_v54 = vunpack.c.l.bf16 %v17_v44  ;;  %v36_v2 = vunpack.c.l.bf16 %v22_v55  ;;  %v37_v12 = vunpack.c.h.bf16 %v22_v55 }
   0x9   :  { %v38_v13 = vunpack.c.l.bf16 %v23_v61 }
   0xa   :  { %61 = vperm.xlu1 %170, %v42_v4   ;;  %51 = vperm.xlu0 %169, %v40_v5  }
   0xc   :  { %91 = vperm.xlu2 %171, %v84_v6  }
  0x12   :  { %101 = vperm.xlu1 %170, %v86_v7   ;;  %96 = vperm.xlu0 %169, %v85_v8  }
  0x14   :  { %106 = vperm.xlu2 %171, %v87_v9  }
  0x1a   :  { %111 = vperm.xlu0 %169, %v88_v10  }
  0x5e   :  { %v223_v11 = vpop.permute.xlu2 %66 }
  0x66   :  { %v92_v17 = vpop.permute.xlu2 %91 }
  0x6e   :  { %v107_v48 = vpop.permute.xlu2 %106 }
  0x74   :  { %v57_v18 = vpop.permute.xlu1 %56  ;;  %v47_v19 = vpop.permute.xlu0 %46 }
  0x75   :  { %v69_v20 = vmul.f32 %v47_v19, %v24_v14  ;;  %v70_v21 = vmul.f32 %v47_v19, %v25_v15  ;;  %v71_v22 = vmul.f32 %v47_v19, %v26_v16  ;;  %v75_v59 = vmul.f32 %v57_v18, %v30_v45 }
  0x76   :  { %v76_v60 = vmul.f32 %v57_v18, %v31_v46  ;;  %v77_v62 = vmul.f32 %v57_v18, %v32_v47 }
  0x77   :  { %v114_v25 = vadd.f32 %v92_v17, %v69_v20  ;;  %v115_v26 = vadd.f32 %v92_v17, %v70_v21  ;;  %v116_v27 = vadd.f32 %v92_v17, %v71_v22 }
  0x79   :  { %v129_v28 = vmax.f32 %v114_v25, 0.0  ;;  %v130_v32 = vmax.f32 %v115_v26, 0.0  ;;  %v131_v33 = vmax.f32 %v116_v27, 0.0  ;;  %v81_v26 = vmul.f32 %v223_v11, %v36_v2 }
  0x7a   :  { %v82_v27 = vmul.f32 %v223_v11, %v37_v12 }
  0x7b   :  { %v144_v36 = vpack.c.bf16 %v130_v32, %v129_v28  ;;  %v145_v37 = vpack.c.bf16 %v131_v33, %v131_v33  ;;  %v83_v28 = vmul.f32 %v223_v11, %v38_v13 }
  0x7c   :  { %v62_v38 = vpop.permute.xlu1 %61  ;;  %v52_v39 = vpop.permute.xlu0 %51 }
  0x7d   :  { %v78_v41 = vmul.f32 %v62_v38, %v33_v29  ;;  %v79_v42 = vmul.f32 %v62_v38, %v34_v30  ;;  %v80_v43 = vmul.f32 %v62_v38, %v35_v31  ;;  %154 = vst [vmem:[%s291_s3] sm:$0xff] %v144_v36  ;;  %v72_v1 = vmul.f32 %v52_v39, %v27_v52 }
  0x7e   :  { %155 = vst [vmem:[%s291_s3 + $0x8] sm:$0xf] %v145_v37  ;;  %v73_v3 = vmul.f32 %v52_v39, %v28_v53  ;;  %v74_v4 = vmul.f32 %v52_v39, %v29_v54 }
  0x7f   :  { %v123_v49 = vadd.f32 %v107_v48, %v78_v41  ;;  %v124_v50 = vadd.f32 %v107_v48, %v79_v42  ;;  %v125_v51 = vadd.f32 %v107_v48, %v80_v43 }
  0x81   :  { %v138_v56 = vmax.f32 %v123_v49, 0.0  ;;  %v139_v57 = vmax.f32 %v124_v50, 0.0  ;;  %v140_v58 = vmax.f32 %v125_v51, 0.0 }
  0x83   :  { %v150_v63 = vpack.c.bf16 %v139_v57, %v138_v56  ;;  %v151_v0 = vpack.c.bf16 %v140_v58, %v140_v58 }
  0x84   :  { %v102_v5 = vpop.permute.xlu1 %101  ;;  %v97_v6 = vpop.permute.xlu0 %96 }
  0x85   :  { %160 = vst [vmem:[%s291_s3 + $0x24] sm:$0xff] %v150_v63  ;;  %v120_v7 = vadd.f32 %v102_v5, %v75_v59  ;;  %v121_v8 = vadd.f32 %v102_v5, %v76_v60  ;;  %v122_v9 = vadd.f32 %v102_v5, %v77_v62  ;;  %v117_v10 = vadd.f32 %v97_v6, %v72_v1 }
  0x86   :  { %161 = vst [vmem:[%s291_s3 + $0x2c] sm:$0xf] %v151_v0  ;;  %v118_v14 = vadd.f32 %v97_v6, %v73_v3  ;;  %v119_v15 = vadd.f32 %v97_v6, %v74_v4 }
  0x87   :  { %v135_v16 = vmax.f32 %v120_v7, 0.0  ;;  %v136_v17 = vmax.f32 %v121_v8, 0.0  ;;  %v137_v18 = vmax.f32 %v122_v9, 0.0  ;;  %v132_v19 = vmax.f32 %v117_v10, 0.0 }
  0x88   :  { %v133_v20 = vmax.f32 %v118_v14, 0.0  ;;  %v134_v21 = vmax.f32 %v119_v15, 0.0 }
  0x89   :  { %v148_v22 = vpack.c.bf16 %v136_v17, %v135_v16  ;;  %v149_v23 = vpack.c.bf16 %v137_v18, %v137_v18 }
  0x8a   :  { %v146_v24 = vpack.c.bf16 %v133_v20, %v132_v19  ;;  %v147_v25 = vpack.c.bf16 %v134_v21, %v134_v21 }
  0x8b   :  { %158 = vst [vmem:[%s291_s3 + $0x18] sm:$0xff] %v148_v22 }
  0x8c   :  { %159 = vst [vmem:[%s291_s3 + $0x20] sm:$0xf] %v149_v23  ;;  %v112_v29 = vpop.permute.xlu0 %111 }
  0x8d   :  { %156 = vst [vmem:[%s291_s3 + $0xc] sm:$0xff] %v146_v24  ;;  %v126_v30 = vadd.f32 %v112_v29, %v81_v26  ;;  %v127_v31 = vadd.f32 %v112_v29, %v82_v27  ;;  %v128_v32 = vadd.f32 %v112_v29, %v83_v28 }
  0x8e   :  { %157 = vst [vmem:[%s291_s3 + $0x14] sm:$0xf] %v147_v25 }
  0x8f   :  { %v141_v11 = vmax.f32 %v126_v30, 0.0  ;;  %v142_v33 = vmax.f32 %v127_v31, 0.0  ;;  %v143_v34 = vmax.f32 %v128_v32, 0.0 }
  0x91   :  { %v152_v35 = vpack.c.bf16 %v142_v33, %v141_v11  ;;  %v153_v36 = vpack.c.bf16 %v143_v34, %v143_v34 }
  0x93   :  { %162 = vst [vmem:[%s291_s3 + $0x30] sm:$0x33] %v152_v35 }
  0x94   :  { %163 = vst [vmem:[%s291_s3 + $0x38] sm:$0x3] %v153_v36 }

// kernel: lstm_driver_forward.16
= control target key start
LH: loop header
LB: loop body
LE: loop exit
PB: predicated region body
PF: predicated region fallthrough
CT: control target
= control target key end

     0   :  { %vm618_vm0 = vcmask 1041408   ;;  %vm608_vm1 = vcmask 31744   ;;  %vm852_vm3 = vcmask 7168   ;;  %s1745_s0 = inlined_call_operand.vmem [shape: bf16[900,128], index: 0, kind: input, shape index: {}]   ;;  %s1746_s1 = inlined_call_operand.vmem [shape: bf16[48,900], index: 1, kind: input, shape index: {}]   ;;  %s1747_s2 = inlined_call_operand.vmem [shape: bf16[48,128], index: 2, kind: output, shape index: {0}]   ;;  %s1748_s3 = inlined_call_operand.vmem [shape: f32[1,48,1], index: 3, kind: output, shape index: {1}]   ;;  %s1749_s4 = inlined_call_operand.vmem [shape: f32[1,48,1], index: 4, kind: output, shape index: {2}]  }
   0x1   :  { %v1249_v0 = vld [vmem:[%s1745_s0 + $0x38] sm:$0xff]  ;;  %v1248_v4 = vld [vmem:[%s1745_s0 + $0x30] sm:$0xff]  ;;  %v1247_v8 = vld [vmem:[%s1745_s0 + $0x28] sm:$0xff] }
   0x2   :  { %v1257_v1 = vld [vmem:[%s1745_s0 + $0x78] sm:$0xff]  ;;  %622 = vmatpush.bf16.msra.mxu0 %v1249_v0  ;;  %v1256_v5 = vld [vmem:[%s1745_s0 + $0x70] sm:$0xff]  ;;  %v1255_v9 = vld [vmem:[%s1745_s0 + $0x68] sm:$0xff] }
   0x3   :  { %v1265_v2 = vld [vmem:[%s1745_s0 + $0xb8] sm:$0xff]  ;;  %646 = vmatpush.bf16.msra.mxu1 %v1257_v1  ;;  %v1264_v6 = vld [vmem:[%s1745_s0 + $0xb0] sm:$0xff]  ;;  %v1263_v10 = vld [vmem:[%s1745_s0 + $0xa8] sm:$0xff] }
   0x4   :  { %v1273_v3 = vld [vmem:[%s1745_s0 + $0xf8] sm:$0xff]  ;;  %670 = vmatpush.bf16.msra.mxu2 %v1265_v2  ;;  %v1272_v7 = vld [vmem:[%s1745_s0 + $0xf0] sm:$0xff]  ;;  %v1271_v11 = vld [vmem:[%s1745_s0 + $0xe8] sm:$0xff] }
   0x5   :  { %694 = vmatpush.bf16.msra.mxu3 %v1273_v3  ;;  %v1246_v12 = vld [vmem:[%s1745_s0 + $0x20] sm:$0xff]  ;;  %v1245_v16 = vld [vmem:[%s1745_s0 + $0x18] sm:$0xff]  ;;  %v1244_v20 = vld [vmem:[%s1745_s0 + $0x10] sm:$0xff] }
   0x6   :  { %623 = vmatpush.bf16.msra.mxu0 %v1248_v4  ;;  %v1254_v13 = vld [vmem:[%s1745_s0 + $0x60] sm:$0xff]  ;;  %v1253_v17 = vld [vmem:[%s1745_s0 + $0x58] sm:$0xff]  ;;  %v1252_v21 = vld [vmem:[%s1745_s0 + $0x50] sm:$0xff] }
   0x7   :  { %647 = vmatpush.bf16.msra.mxu1 %v1256_v5  ;;  %v1262_v14 = vld [vmem:[%s1745_s0 + $0xa0] sm:$0xff]  ;;  %v1261_v18 = vld [vmem:[%s1745_s0 + $0x98] sm:$0xff]  ;;  %v1260_v22 = vld [vmem:[%s1745_s0 + $0x90] sm:$0xff] }
   0x8   :  { %671 = vmatpush.bf16.msra.mxu2 %v1264_v6  ;;  %v1270_v15 = vld [vmem:[%s1745_s0 + $0xe0] sm:$0xff]  ;;  %v1269_v19 = vld [vmem:[%s1745_s0 + $0xd8] sm:$0xff]  ;;  %v1268_v23 = vld [vmem:[%s1745_s0 + $0xd0] sm:$0xff] }
   0x9   :  { %695 = vmatpush.bf16.msra.mxu3 %v1272_v7  ;;  %v151_v24 = vld [vmem:[%s1745_s0 + $0x1c0] sm:$0x3]  ;;  %v1243_v25 = vld [vmem:[%s1745_s0 + $0x8] sm:$0xff]  ;;  %v1218_v36 = vld [vmem:[%s1746_s1 + $0x4] sm:$0xf] }
   0xa   :  { %624 = vmatpush.bf16.msra.mxu0 %v1247_v8  ;;  %v1251_v26 = vld [vmem:[%s1745_s0 + $0x48] sm:$0xff]  ;;  %v1242_v29 = vld [vmem:[%s1745_s0] sm:$0xff]  ;;  %v494_v31 = vunpack.c.l.b16 %v151_v24  ;;  %v1297_v42 = vld [vmem:[%s1745_s0 + $0x1b8] sm:$0xff] }
   0xb   :  { %648 = vmatpush.bf16.msra.mxu1 %v1255_v9  ;;  %v1259_v27 = vld [vmem:[%s1745_s0 + $0x88] sm:$0xff]  ;;  %v1250_v30 = vld [vmem:[%s1745_s0 + $0x40] sm:$0xff]  ;;  %v1281_v43 = vld [vmem:[%s1745_s0 + $0x138] sm:$0xff] }
   0xc   :  { %672 = vmatpush.bf16.msra.mxu2 %v1263_v10  ;;  %v1267_v28 = vld [vmem:[%s1745_s0 + $0xc8] sm:$0xff]  ;;  %v1258_v32 = vld [vmem:[%s1745_s0 + $0x80] sm:$0xff]  ;;  %v551_v44 = vpack.c.b16 %v494_v31, %v494_v31  ;;  %v1289_v49 = vld [vmem:[%s1745_s0 + $0x178] sm:$0xff] }
   0xd   :  { %696 = vmatpush.bf16.msra.mxu3 %v1271_v11  ;;  %v1266_v33 = vld [vmem:[%s1745_s0 + $0xc0] sm:$0xff]  ;;  %v905_v38 = vld [vmem:[%s1746_s1 + $0x8] sm:$0xf]  ;;  %v1219_v40 = vld [vmem:[%s1746_s1 + $0xc] sm:$0xf] }
   0xe   :  { %625 = vmatpush.bf16.msra.mxu0 %v1246_v12  ;;  %v897_v34 = vld [vmem:[%s1746_s1] sm:$0xf]  ;;  %v899_v37 = vld [vmem:[%s1746_s1 + $0x20] sm:$0xf0]  ;;  %v1223_v39 = vld [vmem:[%s1746_s1 + $0x24] sm:$0xf0] }
   0xf   :  { %649 = vmatpush.bf16.msra.mxu1 %v1254_v13  ;;  %v1222_v35 = vld [vmem:[%s1746_s1 + $0x1c] sm:$0xf0]  ;;  %v907_v41 = vld [vmem:[%s1746_s1 + $0x28] sm:$0xf0]  ;;  %v902_v46 = vor.u32 %v1218_v36, %v899_v37  ;;  %v906_v47 = vor.u32 %v1223_v39, %v905_v38  ;;  %v620_v50 = vsel %vm618_vm0, %v551_v44, 0  ;;  %v1296_v51 = vld [vmem:[%s1745_s0 + $0x1b0] sm:$0xff] }
  0x10   :  { %673 = vmatpush.bf16.msra.mxu2 %v1262_v14  ;;  %v898_v45 = vor.u32 %v1222_v35, %v897_v34  ;;  %v910_v48 = vor.u32 %v1219_v40, %v907_v41  ;;  %v1280_v52 = vld [vmem:[%s1745_s0 + $0x130] sm:$0xff]  ;;  %v1295_v54 = vld [vmem:[%s1745_s0 + $0x1a8] sm:$0xff]  ;;  %v1294_v57 = vld [vmem:[%s1745_s0 + $0x1a0] sm:$0xff] }
  0x11   :  { %697 = vmatpush.bf16.msra.mxu3 %v1270_v15  ;;  %v1288_v53 = vld [vmem:[%s1745_s0 + $0x170] sm:$0xff]  ;;  %v1279_v55 = vld [vmem:[%s1745_s0 + $0x128] sm:$0xff]  ;;  %v1278_v58 = vld [vmem:[%s1745_s0 + $0x120] sm:$0xff] }
  0x12   :  { %626 = vmatpush.bf16.msra.mxu0 %v1245_v16  ;;  %v1287_v56 = vld [vmem:[%s1745_s0 + $0x168] sm:$0xff]  ;;  %v929_v59 = vld [vmem:[%s1746_s1 + $0x40] sm:$0xf]  ;;  %v1226_v61 = vld [vmem:[%s1746_s1 + $0x44] sm:$0xf] }
  0x13   :  { %650 = vmatpush.bf16.msra.mxu1 %v1253_v17  ;;  %v1230_v60 = vld [vmem:[%s1746_s1 + $0x5c] sm:$0xf0]  ;;  %v931_v62 = vld [vmem:[%s1746_s1 + $0x60] sm:$0xf0]  ;;  %v937_v63 = vld [vmem:[%s1746_s1 + $0x48] sm:$0xf] }
  0x14   :  { %674 = vmatpush.bf16.msra.mxu2 %v1261_v18  ;;  %v1231_v0 = vld [vmem:[%s1746_s1 + $0x64] sm:$0xf0]  ;;  %v1227_v1 = vld [vmem:[%s1746_s1 + $0x4c] sm:$0xf]  ;;  %v1286_v3 = vld [vmem:[%s1745_s0 + $0x160] sm:$0xff]  ;;  %v930_v6 = vor.u32 %v1230_v60, %v929_v59  ;;  %v934_v7 = vor.u32 %v1226_v61, %v931_v62 }
  0x15   :  { %698 = vmatpush.bf16.msra.mxu3 %v1269_v19  ;;  %v939_v2 = vld [vmem:[%s1746_s1 + $0x68] sm:$0xf0]  ;;  %v1293_v4 = vld [vmem:[%s1745_s0 + $0x198] sm:$0xff]  ;;  %v938_v8 = vor.u32 %v1231_v0, %v937_v63  ;;  %v1292_v11 = vld [vmem:[%s1745_s0 + $0x190] sm:$0xff] }
  0x16   :  { %627 = vmatpush.bf16.msra.mxu0 %v1244_v20  ;;  %v1277_v5 = vld [vmem:[%s1745_s0 + $0x118] sm:$0xff]  ;;  %v942_v9 = vor.u32 %v1227_v1, %v939_v2  ;;  %v1276_v12 = vld [vmem:[%s1745_s0 + $0x110] sm:$0xff]  ;;  %v1291_v14 = vld [vmem:[%s1745_s0 + $0x188] sm:$0xff] }
  0x17   :  { %651 = vmatpush.bf16.msra.mxu1 %v1252_v21  ;;  %v1285_v10 = vld [vmem:[%s1745_s0 + $0x158] sm:$0xff]  ;;  %v1284_v13 = vld [vmem:[%s1745_s0 + $0x150] sm:$0xff]  ;;  %v1275_v15 = vld [vmem:[%s1745_s0 + $0x108] sm:$0xff] }
  0x18   :  { %675 = vmatpush.bf16.msra.mxu2 %v1260_v22  ;;  %v1283_v16 = vld [vmem:[%s1745_s0 + $0x148] sm:$0xff]  ;;  %v1290_v17 = vld [vmem:[%s1745_s0 + $0x180] sm:$0xff]  ;;  %v1220_v34 = vld [vmem:[%s1746_s1 + $0x14] sm:$0xf] }
  0x19   :  { %699 = vmatpush.bf16.msra.mxu3 %v1268_v23  ;;  %v1274_v18 = vld [vmem:[%s1745_s0 + $0x100] sm:$0xff]  ;;  %v969_v23 = vld [vmem:[%s1746_s1 + $0x88] sm:$0xf]  ;;  %v915_v35 = vld [vmem:[%s1746_s1 + $0x30] sm:$0xf0] }
  0x1a   :  { %628 = vmatpush.bf16.msra.mxu0 %v1243_v25  ;;  %v961_v19 = vld [vmem:[%s1746_s1 + $0x80] sm:$0xf]  ;;  %v1234_v21 = vld [vmem:[%s1746_s1 + $0x84] sm:$0xf]  ;;  %v1239_v24 = vld [vmem:[%s1746_s1 + $0xa4] sm:$0xf0]  ;;  %v918_v41 = vor.u32 %v1220_v34, %v915_v35 }
  0x1b   :  { %652 = vmatpush.bf16.msra.mxu1 %v1251_v26  ;;  %v1238_v20 = vld [vmem:[%s1746_s1 + $0x9c] sm:$0xf0]  ;;  %v963_v22 = vld [vmem:[%s1746_s1 + $0xa0] sm:$0xf0]  ;;  %v1235_v25 = vld [vmem:[%s1746_s1 + $0x8c] sm:$0xf] }
  0x1c   :  { %676 = vmatpush.bf16.msra.mxu2 %v1259_v27  ;;  %v971_v26 = vld [vmem:[%s1746_s1 + $0xa8] sm:$0xf0]  ;;  %v1282_v27 = vld [vmem:[%s1745_s0 + $0x140] sm:$0xff]  ;;  %v921_v36 = vld [vmem:[%s1746_s1 + $0x18] sm:$0xf] }
  0x1d   :  { %700 = vmatpush.bf16.msra.mxu3 %v1267_v28  ;;  %v962_v28 = vor.u32 %v1238_v20, %v961_v19  ;;  %v974_v31 = vor.u32 %v1235_v25, %v971_v26  ;;  %v1225_v37 = vld [vmem:[%s1746_s1 + $0x34] sm:$0xf0]  ;;  %v1221_v38 = vld [vmem:[%s1746_s1 + $0x1c] sm:$0xf]  ;;  %v945_v44 = vld [vmem:[%s1746_s1 + $0x50] sm:$0xf] }
  0x1e   :  { %629 = vmatpush.bf16.msra.mxu0 %v1242_v29  ;;  %v966_v29 = vor.u32 %v1234_v21, %v963_v22  ;;  %v923_v39 = vld [vmem:[%s1746_s1 + $0x38] sm:$0xf0]  ;;  %v979_v59 = vld [vmem:[%s1746_s1 + $0xb0] sm:$0xf0]  ;;  %v985_v60 = vld [vmem:[%s1746_s1 + $0x98] sm:$0xf] }
  0x1f   :  { %653 = vmatpush.bf16.msra.mxu1 %v1250_v30  ;;  %v970_v30 = vor.u32 %v1239_v24, %v969_v23  ;;  %v1241_v61 = vld [vmem:[%s1746_s1 + $0xb4] sm:$0xf0]  ;;  %v1237_v62 = vld [vmem:[%s1746_s1 + $0x9c] sm:$0xf] }
  0x20   :  { %677 = vmatpush.bf16.msra.mxu2 %v1258_v32  ;;  %v913_v32 = vld [vmem:[%s1746_s1 + $0x10] sm:$0xf]  ;;  %v987_v63 = vld [vmem:[%s1746_s1 + $0xb8] sm:$0xf0]  ;;  %v986_v2 = vor.u32 %v1241_v61, %v985_v60 }
  0x21   :  { %701 = vmatpush.bf16.msra.mxu3 %v1266_v33  ;;  %630 = vmatmul.bf16.vlgmr.msra.gmra.mxu0 %v898_v45  ;;  %v1224_v33 = vld [vmem:[%s1746_s1 + $0x2c] sm:$0xf0] }
  0x22   :  { %718 = vmatpush.bf16.msrb.mxu0 %v1281_v43  ;;  %654 = vmatmul.bf16.vlgmr.msra.gmra.mxu1 %v902_v46  ;;  %v914_v40 = vor.u32 %v1224_v33, %v913_v32  ;;  %v926_v43 = vor.u32 %v1221_v38, %v923_v39  ;;  %v1232_v45 = vld [vmem:[%s1746_s1 + $0x6c] sm:$0xf0]  ;;  %v1228_v46 = vld [vmem:[%s1746_s1 + $0x54] sm:$0xf]  ;;  %v826_v33 = vlaneseq }
  0x23   :  { %678 = vmatmul.bf16.vlgmr.msra.gmra.mxu2 %v906_v47  ;;  %742 = vmatpush.bf16.msrb.mxu1 %v1289_v49  ;;  %v947_v47 = vld [vmem:[%s1746_s1 + $0x70] sm:$0xf0]  ;;  %v1233_v49 = vld [vmem:[%s1746_s1 + $0x74] sm:$0xf0] }
  0x24   :  { %766 = vmatpush.bf16.msrb.mxu2 %v1297_v42  ;;  %702 = vmatmul.bf16.vlgmr.msra.gmra.mxu3 %v910_v48  ;;  %v922_v42 = vor.u32 %v1225_v37, %v921_v36  ;;  %v953_v48 = vld [vmem:[%s1746_s1 + $0x58] sm:$0xf]  ;;  %v1668_v37 = vand.u32 127, %v826_v33 }
  0x25   :  { %797 = vmatpush.bf16.msrb.mxu3 %v620_v50  ;;  %v1229_v50 = vld [vmem:[%s1746_s1 + $0x5c] sm:$0xf] }
  0x26   :  { %719 = vmatpush.bf16.msrb.mxu0 %v1280_v52  ;;  %v946_v52 = vor.u32 %v1232_v45, %v945_v44  ;;  %vm831_vm2 = vcmp.lt.s32.totalorder %v1668_v37, 50 }
  0x27   :  { %743 = vmatpush.bf16.msrb.mxu1 %v1288_v53  ;;  %v950_v53 = vor.u32 %v1228_v46, %v947_v47 }
  0x28   :  { %767 = vmatpush.bf16.msrb.mxu2 %v1296_v51  ;;  %v955_v51 = vld [vmem:[%s1746_s1 + $0x78] sm:$0xf0] }
  0x2a   :  { %720 = vmatpush.bf16.msrb.mxu0 %v1279_v55  ;;  %v958_v55 = vor.u32 %v1229_v50, %v955_v51 }
  0x2b   :  { %744 = vmatpush.bf16.msrb.mxu1 %v1287_v56  ;;  %v977_v56 = vld [vmem:[%s1746_s1 + $0x90] sm:$0xf] }
  0x2c   :  { %768 = vmatpush.bf16.msrb.mxu2 %v1295_v54  ;;  %v954_v54 = vor.u32 %v1233_v49, %v953_v48 }
  0x2e   :  { %721 = vmatpush.bf16.msrb.mxu0 %v1278_v58  ;;  %v1236_v58 = vld [vmem:[%s1746_s1 + $0x94] sm:$0xf] }
  0x2f   :  { %745 = vmatpush.bf16.msrb.mxu1 %v1286_v3  ;;  %v982_v1 = vor.u32 %v1236_v58, %v979_v59  ;;  %v990_v3 = vor.u32 %v1237_v62, %v987_v63 }
  0x30   :  { %769 = vmatpush.bf16.msrb.mxu2 %v1294_v57  ;;  %v1240_v57 = vld [vmem:[%s1746_s1 + $0xac] sm:$0xf0] }
  0x31   :  { %635 = vmatmul.bf16.gmra.mxu0 %v930_v6  ;;  %v978_v0 = vor.u32 %v1240_v57, %v977_v56 }
  0x32   :  { %722 = vmatpush.bf16.msrb.mxu0 %v1277_v5  ;;  %659 = vmatmul.bf16.gmra.mxu1 %v934_v7 }
  0x33   :  { %683 = vmatmul.bf16.gmra.mxu2 %v938_v8  ;;  %746 = vmatpush.bf16.msrb.mxu1 %v1285_v10 }
  0x34   :  { %770 = vmatpush.bf16.msrb.mxu2 %v1293_v4  ;;  %707 = vmatmul.bf16.gmra.mxu3 %v942_v9 }
  0x36   :  { %723 = vmatpush.bf16.msrb.mxu0 %v1276_v12 }
  0x37   :  { %747 = vmatpush.bf16.msrb.mxu1 %v1284_v13 }
  0x38   :  { %771 = vmatpush.bf16.msrb.mxu2 %v1292_v11 }
  0x3a   :  { %724 = vmatpush.bf16.msrb.mxu0 %v1275_v15 }
  0x3b   :  { %748 = vmatpush.bf16.msrb.mxu1 %v1283_v16 }
  0x3c   :  { %772 = vmatpush.bf16.msrb.mxu2 %v1291_v14 }
  0x3e   :  { %725 = vmatpush.bf16.msrb.mxu0 %v1274_v18 }
  0x3f   :  { %749 = vmatpush.bf16.msrb.mxu1 %v1282_v27 }
  0x40   :  { %773 = vmatpush.bf16.msrb.mxu2 %v1290_v17 }
  0x41   :  { %640 = vmatmul.bf16.gmra.mxu0 %v962_v28 }
  0x42   :  { %664 = vmatmul.bf16.gmra.mxu1 %v966_v29 }
  0x43   :  { %688 = vmatmul.bf16.gmra.mxu2 %v970_v30 }
  0x44   :  { %712 = vmatmul.bf16.gmra.mxu3 %v974_v31 }
  0x51   :  { %726 = vmatmul.bf16.vlgmr.msrb.gmra.mxu0 %v914_v40 }
  0x52   :  { %750 = vmatmul.bf16.vlgmr.msrb.gmra.mxu1 %v918_v41 }
  0x53   :  { %774 = vmatmul.bf16.vlgmr.msrb.gmra.mxu2 %v922_v42 }
  0x54   :  { %1215 = vmatmul.msk.bf16.vlgmr.msrb.gmra.mxu3 %vm608_vm1, %v926_v43 }
  0x61   :  { %731 = vmatmul.bf16.gmra.mxu0 %v946_v52 }
  0x62   :  { %755 = vmatmul.bf16.gmra.mxu1 %v950_v53 }
  0x63   :  { %779 = vmatmul.bf16.gmra.mxu2 %v954_v54 }
  0x64   :  { %1216 = vmatmul.msk.bf16.gmra.mxu3 %vm608_vm1, %v958_v55 }
  0x71   :  { %736 = vmatmul.bf16.gmra.mxu0 %v978_v0 }
  0x72   :  { %760 = vmatmul.bf16.gmra.mxu1 %v982_v1 }
  0x73   :  { %784 = vmatmul.bf16.gmra.mxu2 %v986_v2 }
  0x74   :  { %1217 = vmatmul.msk.bf16.gmra.mxu3 %vm608_vm1, %v990_v3 }
  0x9e   :  { %v631_v4 = vpop.f32.mrf.mxu0 }
  0x9f   :  { %v655_v5 = vpop.f32.mrf.mxu1 }
  0xa0   :  { %v656_v26 = vadd.f32 %v655_v5, %v631_v4 }
  0xa6   :  { %v679_v6 = vpop.f32.mrf.mxu2  ;;  %v633_v8 = vpop.f32.mrf.mxu0 }
  0xa7   :  { %v703_v7 = vpop.f32.mrf.mxu3  ;;  %v657_v9 = vpop.f32.mrf.mxu1  ;;  %v680_v27 = vadd.f32 %v679_v6, %v656_v26 }
  0xa8   :  { %v658_v34 = vadd.f32 %v657_v9, %v633_v8 }
  0xa9   :  { %v704_v30 = vadd.f32 %v703_v7, %v680_v27 }
  0xae   :  { %v681_v10 = vpop.f32.mrf.mxu2  ;;  %v636_v12 = vpop.f32.mrf.mxu0 }
  0xaf   :  { %v705_v11 = vpop.f32.mrf.mxu3  ;;  %v660_v13 = vpop.f32.mrf.mxu1  ;;  %v682_v36 = vadd.f32 %v681_v10, %v658_v34 }
  0xb0   :  { %v661_v45 = vadd.f32 %v660_v13, %v636_v12 }
  0xb1   :  { %v706_v41 = vadd.f32 %v705_v11, %v682_v36 }
  0xb6   :  { %v684_v14 = vpop.f32.mrf.mxu2  ;;  %v638_v16 = vpop.f32.mrf.mxu0 }
  0xb7   :  { %v708_v15 = vpop.f32.mrf.mxu3  ;;  %v662_v17 = vpop.f32.mrf.mxu1  ;;  %v685_v48 = vadd.f32 %v684_v14, %v661_v45 }
  0xb8   :  { %v663_v57 = vadd.f32 %v662_v17, %v638_v16 }
  0xb9   :  { %v709_v53 = vadd.f32 %v708_v15, %v685_v48 }
  0xbe   :  { %v686_v18 = vpop.f32.mrf.mxu2  ;;  %v641_v20 = vpop.f32.mrf.mxu0 }
  0xbf   :  { %v710_v19 = vpop.f32.mrf.mxu3  ;;  %v665_v21 = vpop.f32.mrf.mxu1  ;;  %v687_v61 = vadd.f32 %v686_v18, %v663_v57 }
  0xc0   :  { %v666_v8 = vadd.f32 %v665_v21, %v641_v20 }
  0xc1   :  { %v711_v4 = vadd.f32 %v710_v19, %v687_v61 }
  0xc6   :  { %v689_v22 = vpop.f32.mrf.mxu2  ;;  %v1660_v24 = vpop.f32.mrf.mxu0 }
  0xc7   :  { %v1658_v23 = vpop.f32.mrf.mxu3  ;;  %v1662_v25 = vpop.f32.mrf.mxu1  ;;  %v690_v11 = vadd.f32 %v689_v22, %v666_v8 }
  0xc8   :  { %v668_v20 = vadd.f32 %v1662_v25, %v1660_v24 }
  0xc9   :  { %v714_v17 = vadd.f32 %v1658_v23, %v690_v11 }
  0xce   :  { %v1664_v28 = vpop.f32.mrf.mxu2  ;;  %v727_v31 = vpop.f32.mrf.mxu0 }
  0xcf   :  { %v1666_v29 = vpop.f32.mrf.mxu3  ;;  %v751_v32 = vpop.f32.mrf.mxu1  ;;  %v728_v35 = vadd.f32 %v727_v31, %v704_v30  ;;  %v692_v27 = vadd.f32 %v1664_v28, %v668_v20 }
  0xd1   :  { %v752_v38 = vadd.f32 %v751_v32, %v728_v35  ;;  %v716_v24 = vadd.f32 %v1666_v29, %v692_v27 }
  0xd6   :  { %v775_v39 = vpop.f32.mrf.mxu2  ;;  %v729_v43 = vpop.f32.mrf.mxu0 }
  0xd7   :  { %v799_v40 = vpop.f32.mrf.mxu3  ;;  %v776_v42 = vadd.f32 %v775_v39, %v752_v38  ;;  %v753_v44 = vpop.f32.mrf.mxu1  ;;  %v730_v47 = vadd.f32 %v729_v43, %v706_v41 }
  0xd9   :  { %v800_v46 = vadd.f32 %v799_v40, %v776_v42  ;;  %v754_v50 = vadd.f32 %v753_v44, %v730_v47 }
  0xdb   :  { %v834_v49 = vsel %vm831_vm2, %v800_v46, 0.0 }
  0xdc   :  { %840 = vadd.xlane.f32.xlu0 %v834_v49  ;;  %v859_v60 = vmul.f32 %v834_v49, %v834_v49 }
  0xde   :  { %v777_v51 = vpop.f32.mrf.mxu2  ;;  %v732_v55 = vpop.f32.mrf.mxu0 }
  0xdf   :  { %v801_v52 = vpop.f32.mrf.mxu3  ;;  %v778_v54 = vadd.f32 %v777_v51, %v754_v50  ;;  %v756_v56 = vpop.f32.mrf.mxu1  ;;  %v733_v59 = vadd.f32 %v732_v55, %v709_v53 }
  0xe1   :  { %v802_v58 = vadd.f32 %v801_v52, %v778_v54  ;;  %v757_v1 = vadd.f32 %v756_v56, %v733_v59 }
  0xe3   :  { %v1301_v62 = vpack.c.bf16 %v802_v58, %v800_v46  ;;  %v835_v63 = vsel %vm831_vm2, %v802_v58, 0.0 }
  0xe4   :  { %865 = vadd.xlane.f32.xlu0 %v859_v60  ;;  %v860_v0 = vmul.f32 %v835_v63, %v835_v63 }
  0xe5   :  { %1302 = vst [vmem:[%s1747_s2] sm:$0xff] %v1301_v62  }
  0xe6   :  { %v780_v2 = vpop.f32.mrf.mxu2  ;;  %867 = vadd.xlane.f32.xlu1 %v860_v0  ;;  %v734_v6 = vpop.f32.mrf.mxu0 }
  0xe7   :  { %v804_v3 = vpop.f32.mrf.mxu3  ;;  %v781_v5 = vadd.f32 %v780_v2, %v757_v1  ;;  %v758_v7 = vpop.f32.mrf.mxu1  ;;  %v735_v10 = vadd.f32 %v734_v6, %v711_v4 }
  0xe9   :  { %v805_v9 = vadd.f32 %v804_v3, %v781_v5  ;;  %v759_v14 = vadd.f32 %v758_v7, %v735_v10 }
  0xeb   :  { %v836_v12 = vsel %vm831_vm2, %v805_v9, 0.0 }
  0xec   :  { %842 = vadd.xlane.f32.xlu0 %v835_v63  ;;  %v861_v13 = vmul.f32 %v836_v12, %v836_v12 }
  0xee   :  { %v782_v15 = vpop.f32.mrf.mxu2  ;;  %869 = vadd.xlane.f32.xlu2 %v861_v13  ;;  %844 = vadd.xlane.f32.xlu1 %v836_v12  ;;  %v737_v19 = vpop.f32.mrf.mxu0 }
  0xef   :  { %v806_v16 = vpop.f32.mrf.mxu3  ;;  %v783_v18 = vadd.f32 %v782_v15, %v759_v14  ;;  %v738_v26 = vadd.f32 %v737_v19, %v714_v17  ;;  %v761_v22 = vpop.f32.mrf.mxu1 }
  0xf1   :  { %v807_v21 = vadd.f32 %v806_v16, %v783_v18  ;;  %v762_v23 = vadd.f32 %v761_v22, %v738_v26 }
  0xf3   :  { %v1306_v30 = vpack.c.bf16 %v807_v21, %v805_v9  ;;  %v837_v31 = vsel %vm831_vm2, %v807_v21, 0.0 }
  0xf4   :  { %v862_v32 = vmul.f32 %v837_v31, %v837_v31 }
  0xf5   :  { %1313 = vst [vmem:[%s1747_s2 + $0x8] sm:$0xff] %v1306_v30  }
  0xf6   :  { %v785_v33 = vpop.f32.mrf.mxu2  ;;  %846 = vadd.xlane.f32.xlu1 %v837_v31  ;;  %871 = vadd.xlane.f32.xlu0 %v862_v32  ;;  %v739_v35 = vpop.f32.mrf.mxu0 }
  0xf7   :  { %v809_v34 = vpop.f32.mrf.mxu3  ;;  %v786_v25 = vadd.f32 %v785_v33, %v762_v23  ;;  %v740_v28 = vadd.f32 %v739_v35, %v716_v24  ;;  %v763_v39 = vpop.f32.mrf.mxu1 }
  0xf9   :  { %v810_v36 = vadd.f32 %v809_v34, %v786_v25  ;;  %v764_v41 = vadd.f32 %v763_v39, %v740_v28 }
  0xfb   :  { %v838_v38 = vsel %vm831_vm2, %v810_v36, 0.0 }
  0xfc   :  { %848 = vadd.xlane.f32.xlu2 %v838_v38  ;;  %v863_v40 = vmul.f32 %v838_v38, %v838_v38 }
  0xfe   :  { %v787_v42 = vpop.f32.mrf.mxu2  ;;  %873 = vadd.xlane.f32.xlu1 %v863_v40 }
  0xff   :  { %v788_v43 = vadd.f32 %v787_v42, %v764_v41  ;;  %v811_v44 = vpop.f32.mrf.mxu3 }
 0x101   :  { %v812_v45 = vadd.f32 %v811_v44, %v788_v43 }
 0x103   :  { %v1311_v46 = vpack.c.bf16 %v812_v45, %v810_v36  ;;  %v839_v29 = vsel %vm831_vm2, %v812_v45, 0.0 }
 0x104   :  { %850 = vadd.xlane.f32.xlu2 %v839_v29  ;;  %v864_v47 = vmul.f32 %v839_v29, %v839_v29 }
 0x105   :  { %1314 = vst [vmem:[%s1747_s2 + $0x10] sm:$0xff] %v1311_v46  }
 0x10c   :  { %875 = vadd.xlane.f32.xlu2 %v864_v47 }
 0x14f   :  { %v841_v48 = vpop.xlane.xlu0 %840 }
 0x150   :  { %853 = vst.msk [vmem:[%s1748_s3] sm:$0xff] %vm852_vm3, %v841_v48 }
 0x157   :  { %v866_v49 = vpop.xlane.xlu0 %865 }
 0x158   :  { %877 = vst.msk [vmem:[%s1749_s4] sm:$0xff] %vm852_vm3, %v866_v49 }
 0x159   :  { %v868_v37 = vpop.xlane.xlu1 %867 }
 0x15a   :  { %878 = vst.msk [vmem:[%s1749_s4 + $0x8] sm:$0xff] %vm852_vm3, %v868_v37 }
 0x15f   :  { %v843_v50 = vpop.xlane.xlu0 %842 }
 0x160   :  { %854 = vst.msk [vmem:[%s1748_s3 + $0x8] sm:$0xff] %vm852_vm3, %v843_v50 }
 0x161   :  { %v870_v51 = vpop.xlane.xlu2 %869  ;;  %v845_v52 = vpop.xlane.xlu1 %844 }
 0x162   :  { %879 = vst.msk [vmem:[%s1749_s4 + $0x10] sm:$0xff] %vm852_vm3, %v870_v51 }
 0x163   :  { %855 = vst.msk [vmem:[%s1748_s3 + $0x10] sm:$0xff] %vm852_vm3, %v845_v52 }
 0x169   :  { %v847_v53 = vpop.xlane.xlu1 %846  ;;  %v872_v54 = vpop.xlane.xlu0 %871 }
 0x16a   :  { %856 = vst.msk [vmem:[%s1748_s3 + $0x18] sm:$0xff] %vm852_vm3, %v847_v53 }
 0x16b   :  { %880 = vst.msk [vmem:[%s1749_s4 + $0x18] sm:$0xff] %vm852_vm3, %v872_v54 }
 0x16f   :  { %v849_v55 = vpop.xlane.xlu2 %848 }
 0x170   :  { %857 = vst.msk [vmem:[%s1748_s3 + $0x20] sm:$0xff] %vm852_vm3, %v849_v55 }
 0x171   :  { %v874_v56 = vpop.xlane.xlu1 %873 }
 0x172   :  { %881 = vst.msk [vmem:[%s1749_s4 + $0x20] sm:$0xff] %vm852_vm3, %v874_v56 }
 0x177   :  { %v851_v57 = vpop.xlane.xlu2 %850 }
 0x178   :  { %858 = vst.msk [vmem:[%s1748_s3 + $0x28] sm:$0xff] %vm852_vm3, %v851_v57 }
 0x17f   :  { %v876_v58 = vpop.xlane.xlu2 %875 }
 0x180   :  { %882 = vst.msk [vmem:[%s1749_s4 + $0x28] sm:$0xff] %vm852_vm3, %v876_v58 }

// kernel: lstm_driver_forward.17
= control target key start
LH: loop header
LB: loop body
LE: loop exit
PB: predicated region body
PF: predicated region fallthrough
CT: control target
= control target key end

     0   :  { %v167_v0 = vmov 0   ;;  %s242_s1 = inlined_call_operand.vmem [shape: f32[48,1], index: 1, kind: input, shape index: {}]   ;;  %s243_s2 = inlined_call_operand.vmem [shape: f32[48,1], index: 2, kind: input, shape index: {}]   ;;  %s244_s0 = inlined_call_operand.vmem [shape: bf16[48,128], index: 0, kind: input, shape index: {}]   ;;  %s245_s3 = inlined_call_operand.vmem [shape: bf16[48,128], index: 3, kind: output, shape index: {}]  }
   0x1   :  { %166 = vset.pattern.permute.xlu2 %v167_v0  ;;  %165 = vset.pattern.permute.xlu1 %v167_v0  ;;  %v30_v1 = vld [vmem:[%s242_s1 + $0x20] sm:$0xff]  ;;  %v28_v2 = vld [vmem:[%s242_s1 + $0x10] sm:$0xff]  ;;  %v31_v4 = vld [vmem:[%s242_s1 + $0x28] sm:$0xff] }
   0x2   :  { %v26_v3 = vld [vmem:[%s242_s1] sm:$0xff]  ;;  %164 = vset.pattern.permute.xlu0 %v167_v0  ;;  %54 = vperm.xlu2 %166, %v30_v1   ;;  %v29_v5 = vld [vmem:[%s242_s1 + $0x18] sm:$0xff]  ;;  %v27_v6 = vld [vmem:[%s242_s1 + $0x8] sm:$0xff] }
   0x3   :  { %44 = vperm.xlu1 %165, %v28_v2   ;;  %34 = vperm.xlu0 %164, %v26_v3   ;;  %v70_v7 = vld [vmem:[%s243_s2 + $0x10] sm:$0xff]  ;;  %v69_v8 = vld [vmem:[%s243_s2 + $0x8] sm:$0xff]  ;;  %v68_v9 = vld [vmem:[%s243_s2] sm:$0xff] }
   0x4   :  { %v73_v10 = vld [vmem:[%s243_s2 + $0x28] sm:$0xff]  ;;  %v72_v11 = vld [vmem:[%s243_s2 + $0x20] sm:$0xff]  ;;  %v71_v12 = vld [vmem:[%s243_s2 + $0x18] sm:$0xff] }
   0x5   :  { %v133_v17 = vld [vmem:[%s244_s0] sm:$0xff]   ;;  %v160_v23 = vld [vmem:[%s244_s0 + $0x10] sm:$0xff]   ;;  %v159_v24 = vld [vmem:[%s244_s0 + $0x8] sm:$0xff]  }
   0x6   :  { %v134_v21 = vunpack.c.l.bf16 %v133_v17  ;;  %v135_v22 = vunpack.c.h.bf16 %v133_v17  ;;  %v143_v25 = vunpack.c.h.bf16 %v160_v23  ;;  %v138_v26 = vunpack.c.l.bf16 %v159_v24 }
   0x7   :  { %v142_v33 = vunpack.c.l.bf16 %v160_v23  ;;  %v139_v34 = vunpack.c.h.bf16 %v159_v24 }
   0xa   :  { %59 = vperm.xlu2 %166, %v31_v4  }
   0xb   :  { %49 = vperm.xlu1 %165, %v29_v5   ;;  %39 = vperm.xlu0 %164, %v27_v6  }
  0x12   :  { %86 = vperm.xlu2 %166, %v70_v7  }
  0x13   :  { %81 = vperm.xlu1 %165, %v69_v8   ;;  %76 = vperm.xlu0 %164, %v68_v9  }
  0x1a   :  { %101 = vperm.xlu2 %166, %v73_v10  }
  0x1b   :  { %96 = vperm.xlu1 %165, %v72_v11   ;;  %91 = vperm.xlu0 %164, %v71_v12  }
  0x5c   :  { %v55_v13 = vpop.permute.xlu2 %54 }
  0x5d   :  { %v66_v41 = vmul.f32 %v142_v33, %v55_v13 }
  0x64   :  { %v60_v14 = vpop.permute.xlu2 %59 }
  0x65   :  { %v67_v35 = vmul.f32 %v143_v25, %v60_v14 }
  0x6c   :  { %v87_v20 = vpop.permute.xlu2 %86 }
  0x74   :  { %v102_v39 = vpop.permute.xlu2 %101 }
  0x75   :  { %v45_v15 = vpop.permute.xlu1 %44  ;;  %v35_v16 = vpop.permute.xlu0 %34  ;;  %v109_v42 = vadd.f32 %v102_v39, %v67_v35 }
  0x76   :  { %v62_v27 = vmul.f32 %v134_v21, %v35_v16  ;;  %v64_v36 = vmul.f32 %v138_v26, %v45_v15 }
  0x77   :  { %v115_v49 = vmax.f32 %v109_v42, 0.0 }
  0x78   :  { %v106_v43 = vadd.f32 %v87_v20, %v64_v36 }
  0x7a   :  { %v112_v50 = vmax.f32 %v106_v43, 0.0 }
  0x7d   :  { %v50_v18 = vpop.permute.xlu1 %49  ;;  %v40_v19 = vpop.permute.xlu0 %39 }
  0x7e   :  { %v63_v28 = vmul.f32 %v135_v22, %v40_v19  ;;  %v65_v44 = vmul.f32 %v139_v34, %v50_v18 }
  0x85   :  { %v82_v29 = vpop.permute.xlu1 %81  ;;  %v77_v30 = vpop.permute.xlu0 %76 }
  0x86   :  { %v105_v31 = vadd.f32 %v82_v29, %v63_v28  ;;  %v104_v32 = vadd.f32 %v77_v30, %v62_v27 }
  0x88   :  { %v111_v37 = vmax.f32 %v105_v31, 0.0  ;;  %v110_v38 = vmax.f32 %v104_v32, 0.0 }
  0x8a   :  { %v147_v40 = vpack.c.bf16 %v111_v37, %v110_v38 }
  0x8c   :  { %148 = vst [vmem:[%s245_s3] sm:$0xff] %v147_v40  }
  0x8d   :  { %v97_v45 = vpop.permute.xlu1 %96  ;;  %v92_v46 = vpop.permute.xlu0 %91 }
  0x8e   :  { %v108_v47 = vadd.f32 %v97_v45, %v66_v41  ;;  %v107_v48 = vadd.f32 %v92_v46, %v65_v44 }
  0x90   :  { %v114_v51 = vmax.f32 %v108_v47, 0.0  ;;  %v113_v52 = vmax.f32 %v107_v48, 0.0 }
  0x92   :  { %v157_v53 = vpack.c.bf16 %v115_v49, %v114_v51  ;;  %v152_v54 = vpack.c.bf16 %v113_v52, %v112_v50 }
  0x94   :  { %162 = vst [vmem:[%s245_s3 + $0x10] sm:$0xff] %v157_v53  }
  0x95   :  { %161 = vst [vmem:[%s245_s3 + $0x8] sm:$0xff] %v152_v54  }

// kernel: lstm_driver_forward.18
= control target key start
LH: loop header
LB: loop body
LE: loop exit
PB: predicated region body
PF: predicated region fallthrough
CT: control target
= control target key end

     0   :  { %vm323_vm0 = vcmask 392192   ;;  %vm500_vm2 = vcmask 7168   ;;  %s1096_s0 = inlined_call_operand.vmem [shape: bf16[432,128], index: 0, kind: input, shape index: {}]   ;;  %s1097_s1 = inlined_call_operand.vmem [shape: bf16[64,432], index: 1, kind: input, shape index: {}]   ;;  %s1098_s2 = inlined_call_operand.vmem [shape: bf16[64,128], index: 2, kind: output, shape index: {0}]   ;;  %s1099_s3 = inlined_call_operand.vmem [shape: f32[1,64,1], index: 3, kind: output, shape index: {1}]   ;;  %s1100_s4 = inlined_call_operand.vmem [shape: f32[1,64,1], index: 4, kind: output, shape index: {2}]  }
   0x1   :  { %v752_v0 = vld [vmem:[%s1096_s0 + $0x38] sm:$0xff]  ;;  %v751_v3 = vld [vmem:[%s1096_s0 + $0x30] sm:$0xff]  ;;  %v750_v7 = vld [vmem:[%s1096_s0 + $0x28] sm:$0xff] }
   0x2   :  { %v760_v1 = vld [vmem:[%s1096_s0 + $0x78] sm:$0xff]  ;;  %336 = vmatpush.bf16.msra.mxu0 %v752_v0  ;;  %v759_v4 = vld [vmem:[%s1096_s0 + $0x70] sm:$0xff]  ;;  %v758_v8 = vld [vmem:[%s1096_s0 + $0x68] sm:$0xff] }
   0x3   :  { %v768_v2 = vld [vmem:[%s1096_s0 + $0xb8] sm:$0xff]  ;;  %365 = vmatpush.bf16.msra.mxu1 %v760_v1  ;;  %v767_v5 = vld [vmem:[%s1096_s0 + $0xb0] sm:$0xff]  ;;  %v766_v9 = vld [vmem:[%s1096_s0 + $0xa8] sm:$0xff] }
   0x4   :  { %394 = vmatpush.bf16.msra.mxu2 %v768_v2  ;;  %v771_v6 = vld [vmem:[%s1096_s0 + $0xd0] sm:$0xff]  ;;  %v770_v10 = vld [vmem:[%s1096_s0 + $0xc8] sm:$0xff]  ;;  %v749_v11 = vld [vmem:[%s1096_s0 + $0x20] sm:$0xff] }
   0x5   :  { %428 = vmatpush.bf16.msra.mxu3 %v771_v6  ;;  %v757_v12 = vld [vmem:[%s1096_s0 + $0x60] sm:$0xff]  ;;  %v730_v15 = vld [vmem:[%s1097_s1 + $0xc] sm:$0xf]  ;;  %v565_v16 = vld [vmem:[%s1097_s1 + $0x18] sm:$0xf0] }
   0x6   :  { %337 = vmatpush.bf16.msra.mxu0 %v751_v3  ;;  %v765_v13 = vld [vmem:[%s1096_s0 + $0xa0] sm:$0xff]  ;;  %v748_v17 = vld [vmem:[%s1096_s0 + $0x18] sm:$0xff]  ;;  %v568_v20 = vor.u32 %v730_v15, %v565_v16  ;;  %v747_v21 = vld [vmem:[%s1096_s0 + $0x10] sm:$0xff] }
   0x7   :  { %366 = vmatpush.bf16.msra.mxu1 %v759_v4  ;;  %v769_v14 = vld [vmem:[%s1096_s0 + $0xc0] sm:$0xff]  ;;  %v756_v18 = vld [vmem:[%s1096_s0 + $0x58] sm:$0xff]  ;;  %v755_v22 = vld [vmem:[%s1096_s0 + $0x50] sm:$0xff] }
   0x8   :  { %395 = vmatpush.bf16.msra.mxu2 %v767_v5  ;;  %v764_v19 = vld [vmem:[%s1096_s0 + $0x98] sm:$0xff]  ;;  %v763_v23 = vld [vmem:[%s1096_s0 + $0x90] sm:$0xff]  ;;  %v746_v24 = vld [vmem:[%s1096_s0 + $0x8] sm:$0xff] }
   0x9   :  { %429 = vmatpush.bf16.msra.mxu3 %v770_v10  ;;  %v754_v25 = vld [vmem:[%s1096_s0 + $0x48] sm:$0xff]  ;;  %v745_v27 = vld [vmem:[%s1096_s0] sm:$0xff]  ;;  %v731_v30 = vld [vmem:[%s1097_s1 + $0xc] sm:$0xf0] }
   0xa   :  { %338 = vmatpush.bf16.msra.mxu0 %v750_v7  ;;  %v762_v26 = vld [vmem:[%s1096_s0 + $0x88] sm:$0xff]  ;;  %v753_v28 = vld [vmem:[%s1096_s0 + $0x40] sm:$0xff]  ;;  %v557_v32 = vld [vmem:[%s1097_s1 + $0x10] sm:$0xf0] }
   0xb   :  { %367 = vmatpush.bf16.msra.mxu1 %v758_v8  ;;  %v555_v29 = vld [vmem:[%s1097_s1] sm:$0xf]  ;;  %v729_v31 = vld [vmem:[%s1097_s1 + $0x4] sm:$0xf]  ;;  %v563_v34 = vld [vmem:[%s1097_s1 + $0x8] sm:$0xf] }
   0xc   :  { %396 = vmatpush.bf16.msra.mxu2 %v766_v9  ;;  %v761_v33 = vld [vmem:[%s1096_s0 + $0x80] sm:$0xff]  ;;  %v732_v35 = vld [vmem:[%s1097_s1 + $0x14] sm:$0xf0]  ;;  %v734_v36 = vld [vmem:[%s1097_s1 + $0x2c] sm:$0xf]  ;;  %v556_v38 = vor.u32 %v731_v30, %v555_v29  ;;  %v560_v39 = vor.u32 %v729_v31, %v557_v32 }
   0xd   :  { %430 = vmatpush.bf16.msra.mxu3 %v769_v14  ;;  %v581_v37 = vld [vmem:[%s1097_s1 + $0x38] sm:$0xf0]  ;;  %v564_v40 = vor.u32 %v732_v35, %v563_v34  ;;  %v571_v42 = vld [vmem:[%s1097_s1 + $0x20] sm:$0xf]  ;;  %v735_v43 = vld [vmem:[%s1097_s1 + $0x2c] sm:$0xf0]  ;;  %v468_v14 = vlaneseq }
   0xe   :  { %339 = vmatpush.bf16.msra.mxu0 %v749_v11  ;;  %v584_v41 = vor.u32 %v734_v36, %v581_v37  ;;  %v733_v44 = vld [vmem:[%s1097_s1 + $0x24] sm:$0xf]  ;;  %v573_v45 = vld [vmem:[%s1097_s1 + $0x30] sm:$0xf0]  ;;  %v579_v46 = vld [vmem:[%s1097_s1 + $0x28] sm:$0xf]  ;;  %v572_v50 = vor.u32 %v735_v43, %v571_v42 }
   0xf   :  { %368 = vmatpush.bf16.msra.mxu1 %v757_v12  ;;  %v736_v47 = vld [vmem:[%s1097_s1 + $0x34] sm:$0xf0]  ;;  %v738_v48 = vld [vmem:[%s1097_s1 + $0x4c] sm:$0xf]  ;;  %v597_v49 = vld [vmem:[%s1097_s1 + $0x58] sm:$0xf0]  ;;  %v576_v51 = vor.u32 %v733_v44, %v573_v45 }
  0x10   :  { %397 = vmatpush.bf16.msra.mxu2 %v765_v13  ;;  %725 = vmatmul.msk.bf16.vlgmr.msra.gmra.mxu3 %vm323_vm0, %v568_v20  ;;  %v580_v52 = vor.u32 %v736_v47, %v579_v46  ;;  %v600_v53 = vor.u32 %v738_v48, %v597_v49  ;;  %v587_v54 = vld [vmem:[%s1097_s1 + $0x40] sm:$0xf]  ;;  %v739_v55 = vld [vmem:[%s1097_s1 + $0x4c] sm:$0xf0]  ;;  %v737_v56 = vld [vmem:[%s1097_s1 + $0x44] sm:$0xf] }
  0x11   :  { %v589_v57 = vld [vmem:[%s1097_s1 + $0x50] sm:$0xf0]  ;;  %v595_v58 = vld [vmem:[%s1097_s1 + $0x48] sm:$0xf]  ;;  %v740_v59 = vld [vmem:[%s1097_s1 + $0x54] sm:$0xf0]  ;;  %v588_v62 = vor.u32 %v739_v55, %v587_v54 }
  0x12   :  { %340 = vmatpush.bf16.msra.mxu0 %v748_v17  ;;  %v742_v60 = vld [vmem:[%s1097_s1 + $0x6c] sm:$0xf]  ;;  %v613_v61 = vld [vmem:[%s1097_s1 + $0x78] sm:$0xf0]  ;;  %v592_v63 = vor.u32 %v737_v56, %v589_v57  ;;  %v596_v0 = vor.u32 %v740_v59, %v595_v58  ;;  %v603_v2 = vld [vmem:[%s1097_s1 + $0x60] sm:$0xf] }
  0x13   :  { %369 = vmatpush.bf16.msra.mxu1 %v756_v18  ;;  %v616_v1 = vor.u32 %v742_v60, %v613_v61  ;;  %v743_v3 = vld [vmem:[%s1097_s1 + $0x6c] sm:$0xf0]  ;;  %v741_v4 = vld [vmem:[%s1097_s1 + $0x64] sm:$0xf]  ;;  %v605_v5 = vld [vmem:[%s1097_s1 + $0x70] sm:$0xf0] }
  0x14   :  { %398 = vmatpush.bf16.msra.mxu2 %v764_v19  ;;  %v611_v6 = vld [vmem:[%s1097_s1 + $0x68] sm:$0xf]  ;;  %v744_v7 = vld [vmem:[%s1097_s1 + $0x74] sm:$0xf0]  ;;  %v604_v8 = vor.u32 %v743_v3, %v603_v2  ;;  %v608_v9 = vor.u32 %v741_v4, %v605_v5  ;;  %v1001_v17 = vand.u32 127, %v468_v14 }
  0x15   :  { %v612_v10 = vor.u32 %v744_v7, %v611_v6 }
  0x16   :  { %341 = vmatpush.bf16.msra.mxu0 %v747_v21  ;;  %vm473_vm1 = vcmp.lt.s32.totalorder %v1001_v17, 18 }
  0x17   :  { %370 = vmatpush.bf16.msra.mxu1 %v755_v22 }
  0x18   :  { %399 = vmatpush.bf16.msra.mxu2 %v763_v23 }
  0x1a   :  { %342 = vmatpush.bf16.msra.mxu0 %v746_v24 }
  0x1b   :  { %371 = vmatpush.bf16.msra.mxu1 %v754_v25 }
  0x1c   :  { %400 = vmatpush.bf16.msra.mxu2 %v762_v26 }
  0x1e   :  { %343 = vmatpush.bf16.msra.mxu0 %v745_v27 }
  0x1f   :  { %372 = vmatpush.bf16.msra.mxu1 %v753_v28 }
  0x20   :  { %401 = vmatpush.bf16.msra.mxu2 %v761_v33  ;;  %726 = vmatmul.msk.bf16.gmra.mxu3 %vm323_vm0, %v584_v41 }
  0x21   :  { %344 = vmatmul.bf16.vlgmr.msra.gmra.mxu0 %v556_v38 }
  0x22   :  { %373 = vmatmul.bf16.vlgmr.msra.gmra.mxu1 %v560_v39 }
  0x23   :  { %402 = vmatmul.bf16.vlgmr.msra.gmra.mxu2 %v564_v40 }
  0x30   :  { %727 = vmatmul.msk.bf16.gmra.mxu3 %vm323_vm0, %v600_v53 }
  0x31   :  { %349 = vmatmul.bf16.gmra.mxu0 %v572_v50 }
  0x32   :  { %378 = vmatmul.bf16.gmra.mxu1 %v576_v51 }
  0x33   :  { %407 = vmatmul.bf16.gmra.mxu2 %v580_v52 }
  0x40   :  { %728 = vmatmul.msk.bf16.gmra.mxu3 %vm323_vm0, %v616_v1 }
  0x41   :  { %354 = vmatmul.bf16.gmra.mxu0 %v588_v62 }
  0x42   :  { %383 = vmatmul.bf16.gmra.mxu1 %v592_v63 }
  0x43   :  { %412 = vmatmul.bf16.gmra.mxu2 %v596_v0 }
  0x51   :  { %359 = vmatmul.bf16.gmra.mxu0 %v604_v8 }
  0x52   :  { %388 = vmatmul.bf16.gmra.mxu1 %v608_v9 }
  0x53   :  { %417 = vmatmul.bf16.gmra.mxu2 %v612_v10 }
  0x93   :  { %v432_v11 = vpop.f32.mrf.mxu3 }
  0x9b   :  { %v434_v16 = vpop.f32.mrf.mxu3 }
  0x9e   :  { %v345_v12 = vpop.f32.mrf.mxu0 }
  0x9f   :  { %v374_v13 = vpop.f32.mrf.mxu1 }
  0xa0   :  { %v375_v15 = vadd.f32 %v374_v13, %v345_v12 }
  0xa3   :  { %v437_v27 = vpop.f32.mrf.mxu3 }
  0xa6   :  { %v403_v18 = vpop.f32.mrf.mxu2  ;;  %v347_v20 = vpop.f32.mrf.mxu0 }
  0xa7   :  { %v404_v19 = vadd.f32 %v403_v18, %v375_v15  ;;  %v376_v21 = vpop.f32.mrf.mxu1 }
  0xa8   :  { %v377_v25 = vadd.f32 %v376_v21, %v347_v20 }
  0xa9   :  { %v433_v22 = vadd.f32 %v432_v11, %v404_v19 }
  0xab   :  { %v476_v23 = vsel %vm473_vm1, %v433_v22, 0.0  ;;  %v439_v39 = vpop.f32.mrf.mxu3 }
  0xac   :  { %484 = vadd.xlane.f32.xlu0 %v476_v23  ;;  %v509_v24 = vmul.f32 %v476_v23, %v476_v23 }
  0xae   :  { %v405_v26 = vpop.f32.mrf.mxu2  ;;  %517 = vadd.xlane.f32.xlu2 %v509_v24  ;;  %v350_v29 = vpop.f32.mrf.mxu0 }
  0xaf   :  { %v406_v28 = vadd.f32 %v405_v26, %v377_v25  ;;  %v379_v30 = vpop.f32.mrf.mxu1 }
  0xb0   :  { %v380_v32 = vadd.f32 %v379_v30, %v350_v29 }
  0xb1   :  { %v435_v31 = vadd.f32 %v434_v16, %v406_v28 }
  0xb3   :  { %v477_v33 = vsel %vm473_vm1, %v435_v31, 0.0  ;;  %v775_v34 = vpack.c.bf16 %v435_v31, %v433_v22  ;;  %v442_v49 = vpop.f32.mrf.mxu3 }
  0xb4   :  { %486 = vadd.xlane.f32.xlu0 %v477_v33  ;;  %v510_v41 = vmul.f32 %v477_v33, %v477_v33 }
  0xb5   :  { %776 = vst [vmem:[%s1098_s2] sm:$0xff] %v775_v34  }
  0xb6   :  { %v408_v35 = vpop.f32.mrf.mxu2  ;;  %v352_v37 = vpop.f32.mrf.mxu0 }
  0xb7   :  { %v409_v36 = vadd.f32 %v408_v35, %v380_v32  ;;  %v381_v38 = vpop.f32.mrf.mxu1 }
  0xb8   :  { %v382_v43 = vadd.f32 %v381_v38, %v352_v37 }
  0xb9   :  { %v438_v40 = vadd.f32 %v437_v27, %v409_v36 }
  0xbb   :  { %v478_v42 = vsel %vm473_vm1, %v438_v40, 0.0  ;;  %v444_v61 = vpop.f32.mrf.mxu3 }
  0xbc   :  { %519 = vadd.xlane.f32.xlu0 %v510_v41  ;;  %488 = vadd.xlane.f32.xlu1 %v478_v42  ;;  %v511_v50 = vmul.f32 %v478_v42, %v478_v42 }
  0xbe   :  { %v410_v44 = vpop.f32.mrf.mxu2  ;;  %v355_v46 = vpop.f32.mrf.mxu0 }
  0xbf   :  { %v411_v45 = vadd.f32 %v410_v44, %v382_v43  ;;  %v384_v47 = vpop.f32.mrf.mxu1 }
  0xc0   :  { %v385_v52 = vadd.f32 %v384_v47, %v355_v46 }
  0xc1   :  { %v440_v48 = vadd.f32 %v439_v39, %v411_v45 }
  0xc3   :  { %v780_v51 = vpack.c.bf16 %v440_v48, %v438_v40  ;;  %v479_v53 = vsel %vm473_vm1, %v440_v48, 0.0  ;;  %v447_v8 = vpop.f32.mrf.mxu3 }
  0xc4   :  { %521 = vadd.xlane.f32.xlu1 %v511_v50  ;;  %v512_v54 = vmul.f32 %v479_v53, %v479_v53 }
  0xc5   :  { %792 = vst [vmem:[%s1098_s2 + $0x8] sm:$0xff] %v780_v51  }
  0xc6   :  { %v413_v55 = vpop.f32.mrf.mxu2  ;;  %523 = vadd.xlane.f32.xlu2 %v512_v54  ;;  %v357_v57 = vpop.f32.mrf.mxu0 }
  0xc7   :  { %v414_v56 = vadd.f32 %v413_v55, %v385_v52  ;;  %v386_v58 = vpop.f32.mrf.mxu1 }
  0xc8   :  { %v387_v63 = vadd.f32 %v386_v58, %v357_v57 }
  0xc9   :  { %v443_v59 = vadd.f32 %v442_v49, %v414_v56 }
  0xcb   :  { %v480_v60 = vsel %vm473_vm1, %v443_v59, 0.0  ;;  %v449_v20 = vpop.f32.mrf.mxu3 }
  0xcc   :  { %490 = vadd.xlane.f32.xlu1 %v479_v53  ;;  %v513_v62 = vmul.f32 %v480_v60, %v480_v60 }
  0xce   :  { %v415_v0 = vpop.f32.mrf.mxu2  ;;  %492 = vadd.xlane.f32.xlu2 %v480_v60  ;;  %525 = vadd.xlane.f32.xlu0 %v513_v62  ;;  %v360_v2 = vpop.f32.mrf.mxu0 }
  0xcf   :  { %v416_v1 = vadd.f32 %v415_v0, %v387_v63  ;;  %v389_v3 = vpop.f32.mrf.mxu1 }
  0xd0   :  { %v390_v5 = vadd.f32 %v389_v3, %v360_v2 }
  0xd1   :  { %v445_v4 = vadd.f32 %v444_v61, %v416_v1 }
  0xd3   :  { %v785_v6 = vpack.c.bf16 %v445_v4, %v443_v59  ;;  %v481_v7 = vsel %vm473_vm1, %v445_v4, 0.0 }
  0xd4   :  { %v514_v25 = vmul.f32 %v481_v7, %v481_v7 }
  0xd5   :  { %793 = vst [vmem:[%s1098_s2 + $0x10] sm:$0xff] %v785_v6  }
  0xd6   :  { %v418_v9 = vpop.f32.mrf.mxu2  ;;  %494 = vadd.xlane.f32.xlu2 %v481_v7  ;;  %v362_v12 = vpop.f32.mrf.mxu0 }
  0xd7   :  { %v419_v10 = vadd.f32 %v418_v9, %v390_v5  ;;  %v391_v13 = vpop.f32.mrf.mxu1 }
  0xd8   :  { %v392_v16 = vadd.f32 %v391_v13, %v362_v12 }
  0xd9   :  { %v448_v11 = vadd.f32 %v447_v8, %v419_v10 }
  0xdb   :  { %v482_v14 = vsel %vm473_vm1, %v448_v11, 0.0 }
  0xdc   :  { %496 = vadd.xlane.f32.xlu0 %v482_v14  ;;  %v515_v15 = vmul.f32 %v482_v14, %v482_v14 }
  0xde   :  { %v420_v18 = vpop.f32.mrf.mxu2  ;;  %529 = vadd.xlane.f32.xlu2 %v515_v15 }
  0xdf   :  { %v421_v19 = vadd.f32 %v420_v18, %v392_v16 }
  0xe1   :  { %v450_v21 = vadd.f32 %v449_v20, %v421_v19 }
  0xe3   :  { %v483_v22 = vsel %vm473_vm1, %v450_v21, 0.0  ;;  %v790_v23 = vpack.c.bf16 %v450_v21, %v448_v11 }
  0xe4   :  { %498 = vadd.xlane.f32.xlu1 %v483_v22  ;;  %v516_v24 = vmul.f32 %v483_v22, %v483_v22 }
  0xe5   :  { %794 = vst [vmem:[%s1098_s2 + $0x18] sm:$0xff] %v790_v23  }
  0xe6   :  { %531 = vadd.xlane.f32.xlu0 %v516_v24 }
  0xec   :  { %527 = vadd.xlane.f32.xlu1 %v514_v25 }
 0x11f   :  { %v485_v26 = vpop.xlane.xlu0 %484 }
 0x120   :  { %501 = vst.msk [vmem:[%s1099_s3] sm:$0xff] %vm500_vm2, %v485_v26 }
 0x121   :  { %v518_v27 = vpop.xlane.xlu2 %517 }
 0x122   :  { %533 = vst.msk [vmem:[%s1100_s4] sm:$0xff] %vm500_vm2, %v518_v27 }
 0x127   :  { %v487_v17 = vpop.xlane.xlu0 %486 }
 0x128   :  { %502 = vst.msk [vmem:[%s1099_s3 + $0x8] sm:$0xff] %vm500_vm2, %v487_v17 }
 0x12f   :  { %v520_v28 = vpop.xlane.xlu0 %519  ;;  %v489_v29 = vpop.xlane.xlu1 %488 }
 0x130   :  { %534 = vst.msk [vmem:[%s1100_s4 + $0x8] sm:$0xff] %vm500_vm2, %v520_v28 }
 0x131   :  { %503 = vst.msk [vmem:[%s1099_s3 + $0x10] sm:$0xff] %vm500_vm2, %v489_v29 }
 0x137   :  { %v522_v30 = vpop.xlane.xlu1 %521 }
 0x138   :  { %535 = vst.msk [vmem:[%s1100_s4 + $0x10] sm:$0xff] %vm500_vm2, %v522_v30 }
 0x139   :  { %v524_v31 = vpop.xlane.xlu2 %523 }
 0x13a   :  { %536 = vst.msk [vmem:[%s1100_s4 + $0x18] sm:$0xff] %vm500_vm2, %v524_v31 }
 0x13f   :  { %v491_v32 = vpop.xlane.xlu1 %490 }
 0x140   :  { %504 = vst.msk [vmem:[%s1099_s3 + $0x18] sm:$0xff] %vm500_vm2, %v491_v32 }
 0x141   :  { %v493_v33 = vpop.xlane.xlu2 %492  ;;  %v526_v34 = vpop.xlane.xlu0 %525 }
 0x142   :  { %505 = vst.msk [vmem:[%s1099_s3 + $0x20] sm:$0xff] %vm500_vm2, %v493_v33 }
 0x143   :  { %537 = vst.msk [vmem:[%s1100_s4 + $0x20] sm:$0xff] %vm500_vm2, %v526_v34 }
 0x149   :  { %v495_v35 = vpop.xlane.xlu2 %494 }
 0x14a   :  { %506 = vst.msk [vmem:[%s1099_s3 + $0x28] sm:$0xff] %vm500_vm2, %v495_v35 }
 0x14f   :  { %v497_v36 = vpop.xlane.xlu0 %496 }
 0x150   :  { %507 = vst.msk [vmem:[%s1099_s3 + $0x30] sm:$0xff] %vm500_vm2, %v497_v36 }
 0x151   :  { %v530_v37 = vpop.xlane.xlu2 %529 }
 0x152   :  { %539 = vst.msk [vmem:[%s1100_s4 + $0x30] sm:$0xff] %vm500_vm2, %v530_v37 }
 0x157   :  { %v499_v38 = vpop.xlane.xlu1 %498 }
 0x158   :  { %508 = vst.msk [vmem:[%s1099_s3 + $0x38] sm:$0xff] %vm500_vm2, %v499_v38 }
 0x159   :  { %v532_v39 = vpop.xlane.xlu0 %531 }
 0x15a   :  { %540 = vst.msk [vmem:[%s1100_s4 + $0x38] sm:$0xff] %vm500_vm2, %v532_v39 }
 0x15f   :  { %v528_v40 = vpop.xlane.xlu1 %527 }
 0x160   :  { %538 = vst.msk [vmem:[%s1100_s4 + $0x28] sm:$0xff] %vm500_vm2, %v528_v40 }

// kernel: lstm_driver_forward.19
= control target key start
LH: loop header
LB: loop body
LE: loop exit
PB: predicated region body
PF: predicated region fallthrough
CT: control target
= control target key end

     0   :  { %v216_v0 = vmov 0   ;;  %s309_s1 = inlined_call_operand.vmem [shape: f32[64,1], index: 1, kind: input, shape index: {}]   ;;  %s310_s2 = inlined_call_operand.vmem [shape: f32[64,1], index: 2, kind: input, shape index: {}]   ;;  %s311_s0 = inlined_call_operand.vmem [shape: bf16[64,128], index: 0, kind: input, shape index: {}]   ;;  %s312_s3 = inlined_call_operand.vmem [shape: bf16[64,128], index: 3, kind: output, shape index: {}]  }
   0x1   :  { %215 = vset.pattern.permute.xlu2 %v216_v0  ;;  %214 = vset.pattern.permute.xlu1 %v216_v0  ;;  %v34_v1 = vld [vmem:[%s309_s1 + $0x20] sm:$0xff]  ;;  %v32_v2 = vld [vmem:[%s309_s1 + $0x10] sm:$0xff]  ;;  %v35_v4 = vld [vmem:[%s309_s1 + $0x28] sm:$0xff] }
   0x2   :  { %v30_v3 = vld [vmem:[%s309_s1] sm:$0xff]  ;;  %213 = vset.pattern.permute.xlu0 %v216_v0  ;;  %60 = vperm.xlu2 %215, %v34_v1   ;;  %v33_v5 = vld [vmem:[%s309_s1 + $0x18] sm:$0xff]  ;;  %v31_v6 = vld [vmem:[%s309_s1 + $0x8] sm:$0xff] }
   0x3   :  { %50 = vperm.xlu1 %214, %v32_v2   ;;  %40 = vperm.xlu0 %213, %v30_v3   ;;  %v86_v7 = vld [vmem:[%s310_s2] sm:$0xff]  ;;  %v37_v8 = vld [vmem:[%s309_s1 + $0x38] sm:$0xff]  ;;  %v36_v9 = vld [vmem:[%s309_s1 + $0x30] sm:$0xff] }
   0x4   :  { %v89_v10 = vld [vmem:[%s310_s2 + $0x18] sm:$0xff]  ;;  %v88_v11 = vld [vmem:[%s310_s2 + $0x10] sm:$0xff]  ;;  %v87_v12 = vld [vmem:[%s310_s2 + $0x8] sm:$0xff] }
   0x5   :  { %v92_v13 = vld [vmem:[%s310_s2 + $0x30] sm:$0xff]  ;;  %v91_v14 = vld [vmem:[%s310_s2 + $0x28] sm:$0xff]  ;;  %v90_v15 = vld [vmem:[%s310_s2 + $0x20] sm:$0xff] }
   0x6   :  { %v93_v16 = vld [vmem:[%s310_s2 + $0x38] sm:$0xff]  ;;  %v206_v24 = vld [vmem:[%s311_s0 + $0x8] sm:$0xff]   ;;  %v171_v25 = vld [vmem:[%s311_s0] sm:$0xff]  }
   0x7   :  { %v172_v26 = vunpack.c.l.bf16 %v171_v25  ;;  %v177_v27 = vunpack.c.h.bf16 %v206_v24  ;;  %v176_v30 = vunpack.c.l.bf16 %v206_v24  ;;  %v173_v33 = vunpack.c.h.bf16 %v171_v25  ;;  %v207_v35 = vld [vmem:[%s311_s0 + $0x10] sm:$0xff]   ;;  %v208_v50 = vld [vmem:[%s311_s0 + $0x18] sm:$0xff]  }
   0x8   :  { %v180_v44 = vunpack.c.l.bf16 %v207_v35  ;;  %v181_v45 = vunpack.c.h.bf16 %v207_v35  ;;  %v184_v55 = vunpack.c.l.bf16 %v208_v50  ;;  %v185_v60 = vunpack.c.h.bf16 %v208_v50 }
   0xa   :  { %65 = vperm.xlu2 %215, %v35_v4  }
   0xb   :  { %55 = vperm.xlu1 %214, %v33_v5   ;;  %45 = vperm.xlu0 %213, %v31_v6  }
  0x12   :  { %96 = vperm.xlu2 %215, %v86_v7  }
  0x13   :  { %75 = vperm.xlu1 %214, %v37_v8   ;;  %70 = vperm.xlu0 %213, %v36_v9  }
  0x1a   :  { %111 = vperm.xlu2 %215, %v89_v10  }
  0x1b   :  { %106 = vperm.xlu1 %214, %v88_v11   ;;  %101 = vperm.xlu0 %213, %v87_v12  }
  0x22   :  { %126 = vperm.xlu2 %215, %v92_v13  }
  0x23   :  { %121 = vperm.xlu1 %214, %v91_v14   ;;  %116 = vperm.xlu0 %213, %v90_v15  }
  0x2b   :  { %131 = vperm.xlu0 %213, %v93_v16  }
  0x5c   :  { %v61_v17 = vpop.permute.xlu2 %60 }
  0x5d   :  { %v82_v53 = vmul.f32 %v180_v44, %v61_v17 }
  0x64   :  { %v66_v20 = vpop.permute.xlu2 %65 }
  0x65   :  { %v83_v54 = vmul.f32 %v181_v45, %v66_v20 }
  0x6c   :  { %v97_v23 = vpop.permute.xlu2 %96 }
  0x74   :  { %v112_v34 = vpop.permute.xlu2 %111 }
  0x75   :  { %v51_v18 = vpop.permute.xlu1 %50  ;;  %v41_v19 = vpop.permute.xlu0 %40 }
  0x76   :  { %v78_v31 = vmul.f32 %v172_v26, %v41_v19  ;;  %v80_v36 = vmul.f32 %v176_v30, %v51_v18 }
  0x78   :  { %v134_v37 = vadd.f32 %v97_v23, %v78_v31 }
  0x7a   :  { %v142_v46 = vmax.f32 %v134_v37, 0.0 }
  0x7c   :  { %v127_v1 = vpop.permute.xlu2 %126 }
  0x7d   :  { %v56_v21 = vpop.permute.xlu1 %55  ;;  %v46_v22 = vpop.permute.xlu0 %45 }
  0x7e   :  { %v81_v32 = vmul.f32 %v177_v27, %v56_v21  ;;  %v79_v39 = vmul.f32 %v173_v33, %v46_v22 }
  0x80   :  { %v137_v38 = vadd.f32 %v112_v34, %v81_v32 }
  0x82   :  { %v145_v47 = vmax.f32 %v137_v38, 0.0 }
  0x85   :  { %v76_v28 = vpop.permute.xlu1 %75  ;;  %v71_v29 = vpop.permute.xlu0 %70 }
  0x86   :  { %v84_v61 = vmul.f32 %v184_v55, %v71_v29  ;;  %v85_v2 = vmul.f32 %v185_v60, %v76_v28 }
  0x88   :  { %v140_v3 = vadd.f32 %v127_v1, %v84_v61 }
  0x8a   :  { %v148_v6 = vmax.f32 %v140_v3, 0.0 }
  0x8d   :  { %v107_v40 = vpop.permute.xlu1 %106  ;;  %v102_v41 = vpop.permute.xlu0 %101 }
  0x8e   :  { %v136_v42 = vadd.f32 %v107_v40, %v80_v36  ;;  %v135_v43 = vadd.f32 %v102_v41, %v79_v39 }
  0x90   :  { %v144_v48 = vmax.f32 %v136_v42, 0.0  ;;  %v143_v49 = vmax.f32 %v135_v43, 0.0 }
  0x92   :  { %v194_v51 = vpack.c.bf16 %v145_v47, %v144_v48  ;;  %v189_v52 = vpack.c.bf16 %v143_v49, %v142_v46 }
  0x94   :  { %209 = vst [vmem:[%s312_s3 + $0x8] sm:$0xff] %v194_v51  }
  0x95   :  { %190 = vst [vmem:[%s312_s3] sm:$0xff] %v189_v52   ;;  %v122_v56 = vpop.permute.xlu1 %121  ;;  %v117_v57 = vpop.permute.xlu0 %116 }
  0x96   :  { %v139_v58 = vadd.f32 %v122_v56, %v83_v54  ;;  %v138_v59 = vadd.f32 %v117_v57, %v82_v53 }
  0x98   :  { %v147_v62 = vmax.f32 %v139_v58, 0.0  ;;  %v146_v63 = vmax.f32 %v138_v59, 0.0 }
  0x9a   :  { %v199_v0 = vpack.c.bf16 %v147_v62, %v146_v63 }
  0x9c   :  { %210 = vst [vmem:[%s312_s3 + $0x10] sm:$0xff] %v199_v0  }
  0x9d   :  { %v132_v4 = vpop.permute.xlu0 %131 }
  0x9e   :  { %v141_v5 = vadd.f32 %v132_v4, %v85_v2 }
  0xa0   :  { %v149_v7 = vmax.f32 %v141_v5, 0.0 }
  0xa2   :  { %v204_v8 = vpack.c.bf16 %v149_v7, %v148_v6 }
  0xa4   :  { %211 = vst [vmem:[%s312_s3 + $0x18] sm:$0xff] %v204_v8  }

// kernel: lstm_driver_forward.22
= control target key start
LH: loop header
LB: loop body
LE: loop exit
PB: predicated region body
PF: predicated region fallthrough
CT: control target
= control target key end

     0   :  { %vm18_vm0 = vcmask 254976   ;;  %v158_v2 = vmov 0.0   ;;  %s215_s1 = inlined_call_operand.vmem [shape: bf16[128,32], index: 1, kind: input, shape index: {}]   ;;  %s216_s2 = inlined_call_operand.vmem [shape: f32[1,32], index: 2, kind: input, shape index: {}]   ;;  %s217_s0 = inlined_call_operand.vmem [shape: bf16[2,128], index: 0, kind: input, shape index: {}]   ;;  %s218_s3 = inlined_call_operand.vmem [shape: f32[2,32], index: 3, kind: output, shape index: {}]  }
   0x1   :  { %v155_v0 = vld [vmem:[%s215_s1 + $0x38] sm:$0xff]  ;;  %v154_v1 = vld [vmem:[%s215_s1 + $0x30] sm:$0xff]  ;;  %19 = vst.msk [vmem:[#allocation2] sm:$0x3] %vm18_vm0, %v158_v2  ;;  %v153_v3 = vld [vmem:[%s215_s1 + $0x28] sm:$0xff] }
   0x2   :  { %86 = vmatpush.bf16.msra.mxu0 %v155_v0  ;;  %v152_v4 = vld [vmem:[%s215_s1 + $0x20] sm:$0xff]  ;;  %v151_v5 = vld [vmem:[%s215_s1 + $0x18] sm:$0xff]  ;;  %v150_v6 = vld [vmem:[%s215_s1 + $0x10] sm:$0xff] }
   0x3   :  { %v149_v7 = vld [vmem:[%s215_s1 + $0x8] sm:$0xff]  ;;  %v148_v8 = vld [vmem:[%s215_s1] sm:$0xff] }
   0x4   :  { %v21_v9 = vld [vmem:[%s217_s0] sm:$0x1] }
   0x5   :  { %v157_v13 = vld [vmem:[%s216_s2] ss:$0 sm:$0xff] }
   0x6   :  { %87 = vmatpush.bf16.msra.mxu0 %v154_v1 }
   0x8   :  { %v20_v10 = vld [vmem:[#allocation2] sm:$0x3] }
   0xa   :  { %88 = vmatpush.bf16.msra.mxu0 %v153_v3 }
   0xe   :  { %89 = vmatpush.bf16.msra.mxu0 %v152_v4 }
  0x12   :  { %90 = vmatpush.bf16.msra.mxu0 %v151_v5 }
  0x16   :  { %91 = vmatpush.bf16.msra.mxu0 %v150_v6 }
  0x1a   :  { %92 = vmatpush.bf16.msra.mxu0 %v149_v7 }
  0x1e   :  { %93 = vmatpush.bf16.msra.mxu0 %v148_v8 }
  0x21   :  { %94 = vmatmul.bf16.vlgmr.msra.gmra.mxu0 %v21_v9 }
  0x9e   :  { %v95_v11 = vpop.f32.mrf.mxu0 }
  0x9f   :  { %v99_v12 = vadd.f32 %v95_v11, %v20_v10 }
  0xa1   :  { %101 = vst.msk [vmem:[#allocation2] sm:$0x3] %vm18_vm0, %v99_v12 }
  0xa6   :  { %v97_v14 = vpop.f32.mrf.mxu0 }
  0xa8   :  { %v105_v15 = vld [vmem:[#allocation2] sm:$0x3] }
  0xa9   :  { %v110_v16 = vadd.f32 %v157_v13, %v105_v15 }
  0xab   :  { %111 = vst.msk [vmem:[%s218_s3] sm:$0x3] %vm18_vm0, %v110_v16 }

// kernel: lstm_driver_forward.20
= control target key start
LH: loop header
LB: loop body
LE: loop exit
PB: predicated region body
PF: predicated region fallthrough
CT: control target
= control target key end

     0   :  { %vm427_vm0 = vcmask 523264   ;;  %vm633_vm2 = vcmask 7168   ;;  %s1370_s0 = inlined_call_operand.vmem [shape: bf16[576,128], index: 0, kind: input, shape index: {}]   ;;  %s1371_s1 = inlined_call_operand.vmem [shape: bf16[64,576], index: 1, kind: input, shape index: {}]   ;;  %s1372_s2 = inlined_call_operand.vmem [shape: bf16[64,128], index: 2, kind: output, shape index: {0}]   ;;  %s1373_s3 = inlined_call_operand.vmem [shape: f32[1,64,1], index: 3, kind: output, shape index: {1}]   ;;  %s1374_s4 = inlined_call_operand.vmem [shape: f32[1,64,1], index: 4, kind: output, shape index: {2}]  }
   0x1   :  { %v941_v0 = vld [vmem:[%s1370_s0 + $0x38] sm:$0xff]  ;;  %v940_v1 = vld [vmem:[%s1370_s0 + $0x30] sm:$0xff]  ;;  %v939_v4 = vld [vmem:[%s1370_s0 + $0x28] sm:$0xff] }
   0x2   :  { %993 = vmatpush.bf16.msra.mxu1 %v941_v0  ;;  %994 = vmatpush.bf16.msra.mxu2 %v941_v0  ;;  %v965_v2 = vld [vmem:[%s1370_s0 + $0xf8] sm:$0xff]  ;;  %v964_v3 = vld [vmem:[%s1370_s0 + $0xf0] sm:$0xff]  ;;  %v963_v5 = vld [vmem:[%s1370_s0 + $0xe8] sm:$0xff] }
   0x3   :  { %440 = vmatpush.bf16.msra.mxu0 %v941_v0  ;;  %527 = vmatpush.bf16.msra.mxu3 %v965_v2  ;;  %v938_v6 = vld [vmem:[%s1370_s0 + $0x20] sm:$0xff]  ;;  %v937_v8 = vld [vmem:[%s1370_s0 + $0x18] sm:$0xff]  ;;  %v936_v10 = vld [vmem:[%s1370_s0 + $0x10] sm:$0xff] }
   0x4   :  { %v962_v7 = vld [vmem:[%s1370_s0 + $0xe0] sm:$0xff]  ;;  %v961_v9 = vld [vmem:[%s1370_s0 + $0xd8] sm:$0xff]  ;;  %v960_v11 = vld [vmem:[%s1370_s0 + $0xd0] sm:$0xff] }
   0x5   :  { %v935_v12 = vld [vmem:[%s1370_s0 + $0x8] sm:$0xff]  ;;  %v934_v14 = vld [vmem:[%s1370_s0] sm:$0xff]  ;;  %v921_v16 = vld [vmem:[%s1371_s1 + $0x38] sm:$0xf0] }
   0x6   :  { %995 = vmatpush.bf16.msra.mxu1 %v940_v1  ;;  %996 = vmatpush.bf16.msra.mxu2 %v940_v1  ;;  %v959_v13 = vld [vmem:[%s1370_s0 + $0xc8] sm:$0xff]  ;;  %v748_v17 = vld [vmem:[%s1371_s1 + $0x78] sm:$0xf]  ;;  %v688_v21 = vld [vmem:[%s1371_s1] sm:$0xf] }
   0x7   :  { %441 = vmatpush.bf16.msra.mxu0 %v940_v1  ;;  %528 = vmatpush.bf16.msra.mxu3 %v964_v3  ;;  %v708_v15 = vld [vmem:[%s1371_s1 + $0x28] sm:$0xf]  ;;  %v931_v18 = vld [vmem:[%s1371_s1 + $0x88] sm:$0xf0]  ;;  %v957_v19 = vld [vmem:[%s1370_s0 + $0xb8] sm:$0xff] }
   0x8   :  { %v949_v20 = vld [vmem:[%s1370_s0 + $0x78] sm:$0xff]  ;;  %v958_v22 = vld [vmem:[%s1370_s0 + $0xc0] sm:$0xff]  ;;  %v709_v23 = vor.u32 %v921_v16, %v708_v15  ;;  %v749_v24 = vor.u32 %v931_v18, %v748_v17  ;;  %v916_v25 = vld [vmem:[%s1371_s1 + $0x10] sm:$0xf0] }
   0x9   :  { %v915_v26 = vld [vmem:[%s1371_s1 + $0xc] sm:$0xf]  ;;  %v698_v27 = vld [vmem:[%s1371_s1 + $0x1c] sm:$0xf0]  ;;  %v969_v28 = vld [vmem:[%s1370_s0 + $0x118] sm:$0xff]  ;;  %v689_v31 = vor.u32 %v916_v25, %v688_v21 }
   0xa   :  { %997 = vmatpush.bf16.msra.mxu1 %v939_v4  ;;  %998 = vmatpush.bf16.msra.mxu2 %v939_v4  ;;  %v956_v29 = vld [vmem:[%s1370_s0 + $0xb0] sm:$0xff]  ;;  %v701_v32 = vor.u32 %v915_v26, %v698_v27  ;;  %v955_v34 = vld [vmem:[%s1370_s0 + $0xa8] sm:$0xff]  ;;  %v954_v37 = vld [vmem:[%s1370_s0 + $0xa0] sm:$0xff] }
   0xb   :  { %442 = vmatpush.bf16.msra.mxu0 %v939_v4  ;;  %529 = vmatpush.bf16.msra.mxu3 %v963_v5  ;;  %v948_v30 = vld [vmem:[%s1370_s0 + $0x70] sm:$0xff]  ;;  %v947_v35 = vld [vmem:[%s1370_s0 + $0x68] sm:$0xff]  ;;  %v946_v38 = vld [vmem:[%s1370_s0 + $0x60] sm:$0xff] }
   0xc   :  { %v968_v33 = vld [vmem:[%s1370_s0 + $0x110] sm:$0xff]  ;;  %v967_v36 = vld [vmem:[%s1370_s0 + $0x108] sm:$0xff]  ;;  %v926_v40 = vld [vmem:[%s1371_s1 + $0x60] sm:$0xf0] }
   0xd   :  { %v728_v39 = vld [vmem:[%s1371_s1 + $0x50] sm:$0xf]  ;;  %v966_v41 = vld [vmem:[%s1370_s0 + $0x100] sm:$0xff]  ;;  %v953_v42 = vld [vmem:[%s1370_s0 + $0x98] sm:$0xff] }
   0xe   :  { %999 = vmatpush.bf16.msra.mxu1 %v938_v6  ;;  %1000 = vmatpush.bf16.msra.mxu2 %v938_v6  ;;  %v945_v43 = vld [vmem:[%s1370_s0 + $0x58] sm:$0xff]  ;;  %v704_v44 = vld [vmem:[%s1371_s1 + $0x10] sm:$0xf]  ;;  %v729_v45 = vor.u32 %v926_v40, %v728_v39  ;;  %v918_v46 = vld [vmem:[%s1371_s1 + $0x20] sm:$0xf0] }
   0xf   :  { %443 = vmatpush.bf16.msra.mxu0 %v938_v6  ;;  %530 = vmatpush.bf16.msra.mxu3 %v962_v7  ;;  %v920_v47 = vld [vmem:[%s1371_s1 + $0x34] sm:$0xf]  ;;  %v718_v48 = vld [vmem:[%s1371_s1 + $0x44] sm:$0xf0]  ;;  %v705_v51 = vor.u32 %v918_v46, %v704_v44  ;;  %v950_v55 = vld [vmem:[%s1370_s0 + $0x80] sm:$0xff] }
  0x10   :  { %v952_v49 = vld [vmem:[%s1370_s0 + $0x90] sm:$0xff]  ;;  %v721_v52 = vor.u32 %v920_v47, %v718_v48  ;;  %v951_v53 = vld [vmem:[%s1370_s0 + $0x88] sm:$0xff]  ;;  %v942_v56 = vld [vmem:[%s1370_s0 + $0x40] sm:$0xff] }
  0x11   :  { %v944_v50 = vld [vmem:[%s1370_s0 + $0x50] sm:$0xff]  ;;  %v943_v54 = vld [vmem:[%s1370_s0 + $0x48] sm:$0xff]  ;;  %v917_v58 = vld [vmem:[%s1371_s1 + $0x18] sm:$0xf0] }
  0x12   :  { %1001 = vmatpush.bf16.msra.mxu1 %v937_v8  ;;  %1002 = vmatpush.bf16.msra.mxu2 %v937_v8  ;;  %v696_v57 = vld [vmem:[%s1371_s1 + $0x8] sm:$0xf]  ;;  %v914_v60 = vld [vmem:[%s1371_s1 + $0x4] sm:$0xf]  ;;  %v690_v61 = vld [vmem:[%s1371_s1 + $0x14] sm:$0xf0] }
  0x13   :  { %444 = vmatpush.bf16.msra.mxu0 %v937_v8  ;;  %531 = vmatpush.bf16.msra.mxu3 %v961_v9  ;;  %v697_v59 = vor.u32 %v917_v58, %v696_v57  ;;  %v724_v62 = vld [vmem:[%s1371_s1 + $0x38] sm:$0xf]  ;;  %v693_v63 = vor.u32 %v914_v60, %v690_v61  ;;  %v923_v0 = vld [vmem:[%s1371_s1 + $0x48] sm:$0xf0]  ;;  %v925_v1 = vld [vmem:[%s1371_s1 + $0x5c] sm:$0xf] }
  0x14   :  { %v738_v2 = vld [vmem:[%s1371_s1 + $0x6c] sm:$0xf0]  ;;  %v725_v3 = vor.u32 %v923_v0, %v724_v62  ;;  %v922_v6 = vld [vmem:[%s1371_s1 + $0x40] sm:$0xf0]  ;;  %v919_v8 = vld [vmem:[%s1371_s1 + $0x2c] sm:$0xf] }
  0x15   :  { %v741_v4 = vor.u32 %v925_v1, %v738_v2  ;;  %v716_v5 = vld [vmem:[%s1371_s1 + $0x30] sm:$0xf]  ;;  %v710_v9 = vld [vmem:[%s1371_s1 + $0x3c] sm:$0xf0]  ;;  %v736_v17 = vld [vmem:[%s1371_s1 + $0x58] sm:$0xf] }
  0x16   :  { %1003 = vmatpush.bf16.msra.mxu1 %v936_v10  ;;  %1004 = vmatpush.bf16.msra.mxu2 %v936_v10  ;;  %v717_v7 = vor.u32 %v922_v6, %v716_v5  ;;  %v927_v18 = vld [vmem:[%s1371_s1 + $0x68] sm:$0xf0]  ;;  %v730_v21 = vld [vmem:[%s1371_s1 + $0x64] sm:$0xf0]  ;;  %v756_v26 = vld [vmem:[%s1371_s1 + $0x80] sm:$0xf] }
  0x17   :  { %445 = vmatpush.bf16.msra.mxu0 %v936_v10  ;;  %532 = vmatpush.bf16.msra.mxu3 %v960_v11  ;;  %v744_v10 = vld [vmem:[%s1371_s1 + $0x60] sm:$0xf]  ;;  %v713_v11 = vor.u32 %v919_v8, %v710_v9  ;;  %v932_v27 = vld [vmem:[%s1371_s1 + $0x90] sm:$0xf0] }
  0x1a   :  { %1005 = vmatpush.bf16.msra.mxu1 %v935_v12  ;;  %1006 = vmatpush.bf16.msra.mxu2 %v935_v12 }
  0x1b   :  { %446 = vmatpush.bf16.msra.mxu0 %v935_v12  ;;  %533 = vmatpush.bf16.msra.mxu3 %v959_v13  ;;  %v928_v12 = vld [vmem:[%s1371_s1 + $0x70] sm:$0xf0]  ;;  %v930_v13 = vld [vmem:[%s1371_s1 + $0x84] sm:$0xf] }
  0x1c   :  { %v745_v15 = vor.u32 %v928_v12, %v744_v10 }
  0x1e   :  { %1007 = vmatpush.bf16.msra.mxu1 %v934_v14  ;;  %1008 = vmatpush.bf16.msra.mxu2 %v934_v14 }
  0x1f   :  { %447 = vmatpush.bf16.msra.mxu0 %v934_v14  ;;  %534 = vmatpush.bf16.msra.mxu3 %v958_v22  ;;  %v758_v14 = vld [vmem:[%s1371_s1 + $0x94] sm:$0xf0] }
  0x20   :  { %v761_v16 = vor.u32 %v930_v13, %v758_v14 }
  0x21   :  { %453 = vmatmul.bf16.vlgmr.msra.gmra.mxu1 %v709_v23  ;;  %463 = vmatmul.bf16.vlgmr.msra.gmra.mxu2 %v749_v24  ;;  %v764_v23 = vld [vmem:[%s1371_s1 + $0x88] sm:$0xf]  ;;  %v933_v24 = vld [vmem:[%s1371_s1 + $0x98] sm:$0xf0] }
  0x22   :  { %498 = vmatpush.bf16.msrb.mxu2 %v957_v19  ;;  %469 = vmatpush.bf16.msrb.mxu1 %v949_v20  ;;  %v737_v19 = vor.u32 %v927_v18, %v736_v17  ;;  %v924_v20 = vld [vmem:[%s1371_s1 + $0x54] sm:$0xf]  ;;  %v765_v25 = vor.u32 %v933_v24, %v764_v23 }
  0x23   :  { %560 = vmatpush.bf16.msrb.mxu0 %v969_v28  ;;  %535 = vmatmul.bf16.vlgmr.msra.gmra.mxu3 %v701_v32  ;;  %v733_v22 = vor.u32 %v924_v20, %v730_v21  ;;  %v757_v28 = vor.u32 %v932_v27, %v756_v26 }
  0x24   :  { %448 = vmatmul.bf16.vlgmr.msra.gmra.mxu0 %v689_v31 }
  0x26   :  { %499 = vmatpush.bf16.msrb.mxu2 %v956_v29  ;;  %470 = vmatpush.bf16.msrb.mxu1 %v948_v30  ;;  %v929_v29 = vld [vmem:[%s1371_s1 + $0x7c] sm:$0xf]  ;;  %v750_v30 = vld [vmem:[%s1371_s1 + $0x8c] sm:$0xf0] }
  0x27   :  { %561 = vmatpush.bf16.msrb.mxu0 %v968_v33  ;;  %v753_v31 = vor.u32 %v929_v29, %v750_v30 }
  0x2a   :  { %500 = vmatpush.bf16.msrb.mxu2 %v955_v34  ;;  %471 = vmatpush.bf16.msrb.mxu1 %v947_v35 }
  0x2b   :  { %562 = vmatpush.bf16.msrb.mxu0 %v967_v36 }
  0x2e   :  { %501 = vmatpush.bf16.msrb.mxu2 %v954_v37  ;;  %472 = vmatpush.bf16.msrb.mxu1 %v946_v38 }
  0x2f   :  { %563 = vmatpush.bf16.msrb.mxu0 %v966_v41 }
  0x31   :  { %458 = vmatmul.bf16.gmra.mxu1 %v729_v45 }
  0x32   :  { %502 = vmatpush.bf16.msrb.mxu2 %v953_v42  ;;  %473 = vmatpush.bf16.msrb.mxu1 %v945_v43  ;;  %v601_v42 = vlaneseq }
  0x33   :  { %540 = vmatmul.bf16.gmra.mxu3 %v721_v52 }
  0x34   :  { %910 = vmatmul.msk.bf16.vlgmr.msrb.gmra.mxu0 %vm427_vm0, %v705_v51  ;;  %v1272_v48 = vand.u32 127, %v601_v42 }
  0x36   :  { %503 = vmatpush.bf16.msrb.mxu2 %v952_v49  ;;  %474 = vmatpush.bf16.msrb.mxu1 %v944_v50  ;;  %vm606_vm1 = vcmp.lt.s32.totalorder %v1272_v48, 2 }
  0x3a   :  { %504 = vmatpush.bf16.msrb.mxu2 %v951_v53  ;;  %475 = vmatpush.bf16.msrb.mxu1 %v943_v54 }
  0x3e   :  { %505 = vmatpush.bf16.msrb.mxu2 %v950_v55  ;;  %476 = vmatpush.bf16.msrb.mxu1 %v942_v56 }
  0x41   :  { %506 = vmatmul.bf16.vlgmr.msrb.gmra.mxu2 %v697_v59  ;;  %477 = vmatmul.bf16.vlgmr.msrb.gmra.mxu1 %v693_v63 }
  0x43   :  { %545 = vmatmul.bf16.gmra.mxu3 %v741_v4 }
  0x44   :  { %911 = vmatmul.msk.bf16.gmra.mxu0 %vm427_vm0, %v725_v3 }
  0x51   :  { %511 = vmatmul.bf16.gmra.mxu2 %v717_v7  ;;  %482 = vmatmul.bf16.gmra.mxu1 %v713_v11 }
  0x53   :  { %550 = vmatmul.bf16.gmra.mxu3 %v761_v16 }
  0x54   :  { %912 = vmatmul.msk.bf16.gmra.mxu0 %vm427_vm0, %v745_v15 }
  0x61   :  { %516 = vmatmul.bf16.gmra.mxu2 %v737_v19  ;;  %487 = vmatmul.bf16.gmra.mxu1 %v733_v22 }
  0x64   :  { %913 = vmatmul.msk.bf16.gmra.mxu0 %vm427_vm0, %v765_v25 }
  0x71   :  { %521 = vmatmul.bf16.gmra.mxu2 %v757_v28  ;;  %492 = vmatmul.bf16.gmra.mxu1 %v753_v31 }
  0x9e   :  { %v454_v32 = vpop.f32.mrf.mxu1 }
  0xa1   :  { %v449_v33 = vpop.f32.mrf.mxu0 }
  0xa4   :  { %v1266_v37 = vpop.f32.mrf.mxu2 }
  0xa6   :  { %v456_v34 = vpop.f32.mrf.mxu1  ;;  %v536_v38 = vpop.f32.mrf.mxu3 }
  0xa9   :  { %v451_v35 = vpop.f32.mrf.mxu0 }
  0xac   :  { %v1270_v41 = vpop.f32.mrf.mxu2 }
  0xae   :  { %v459_v36 = vpop.f32.mrf.mxu1  ;;  %v538_v45 = vpop.f32.mrf.mxu3 }
  0xb1   :  { %v565_v40 = vpop.f32.mrf.mxu0 }
  0xb6   :  { %v1268_v39 = vpop.f32.mrf.mxu1  ;;  %v541_v56 = vpop.f32.mrf.mxu3 }
  0xb9   :  { %v567_v47 = vpop.f32.mrf.mxu0 }
  0xbe   :  { %v478_v43 = vpop.f32.mrf.mxu1  ;;  %v543_v4 = vpop.f32.mrf.mxu3 }
  0xbf   :  { %v479_v44 = vadd.f32 %v478_v43, %v449_v33 }
  0xc1   :  { %v570_v59 = vpop.f32.mrf.mxu0 }
  0xc4   :  { %v507_v46 = vpop.f32.mrf.mxu2 }
  0xc5   :  { %v508_v49 = vadd.f32 %v507_v46, %v479_v44 }
  0xc6   :  { %v480_v51 = vpop.f32.mrf.mxu1  ;;  %v546_v15 = vpop.f32.mrf.mxu3 }
  0xc7   :  { %v537_v50 = vadd.f32 %v536_v38, %v508_v49  ;;  %v481_v53 = vadd.f32 %v480_v51, %v451_v35 }
  0xc9   :  { %v566_v52 = vadd.f32 %v565_v40, %v537_v50  ;;  %v572_v6 = vpop.f32.mrf.mxu0 }
  0xcb   :  { %v609_v54 = vsel %vm606_vm1, %v566_v52, 0.0 }
  0xcc   :  { %v509_v55 = vpop.f32.mrf.mxu2  ;;  %617 = vadd.xlane.f32.xlu0 %v609_v54  ;;  %v642_v57 = vmul.f32 %v609_v54, %v609_v54 }
  0xcd   :  { %v510_v58 = vadd.f32 %v509_v55, %v481_v53 }
  0xce   :  { %650 = vadd.xlane.f32.xlu2 %v642_v57  ;;  %v483_v61 = vpop.f32.mrf.mxu1  ;;  %v548_v29 = vpop.f32.mrf.mxu3 }
  0xcf   :  { %v539_v60 = vadd.f32 %v538_v45, %v510_v58  ;;  %v484_v63 = vadd.f32 %v483_v61, %v454_v32 }
  0xd1   :  { %v568_v62 = vadd.f32 %v567_v47, %v539_v60  ;;  %v575_v18 = vpop.f32.mrf.mxu0 }
  0xd3   :  { %v610_v0 = vsel %vm606_vm1, %v568_v62, 0.0  ;;  %v973_v1 = vpack.c.bf16 %v568_v62, %v566_v52 }
  0xd4   :  { %v512_v2 = vpop.f32.mrf.mxu2  ;;  %619 = vadd.xlane.f32.xlu0 %v610_v0  ;;  %v643_v10 = vmul.f32 %v610_v0, %v610_v0 }
  0xd5   :  { %v513_v3 = vadd.f32 %v512_v2, %v484_v63  ;;  %974 = vst [vmem:[%s1372_s2] sm:$0xff] %v973_v1  }
  0xd6   :  { %v485_v7 = vpop.f32.mrf.mxu1  ;;  %v551_v44 = vpop.f32.mrf.mxu3 }
  0xd7   :  { %v542_v5 = vadd.f32 %v541_v56, %v513_v3  ;;  %v486_v9 = vadd.f32 %v485_v7, %v456_v34 }
  0xd9   :  { %v571_v8 = vadd.f32 %v570_v59, %v542_v5  ;;  %v577_v32 = vpop.f32.mrf.mxu0 }
  0xdb   :  { %v611_v11 = vsel %vm606_vm1, %v571_v8, 0.0 }
  0xdc   :  { %v514_v12 = vpop.f32.mrf.mxu2  ;;  %621 = vadd.xlane.f32.xlu1 %v611_v11  ;;  %652 = vadd.xlane.f32.xlu0 %v643_v10  ;;  %v644_v20 = vmul.f32 %v611_v11, %v611_v11 }
  0xdd   :  { %v515_v13 = vadd.f32 %v514_v12, %v486_v9 }
  0xde   :  { %v488_v17 = vpop.f32.mrf.mxu1  ;;  %v553_v56 = vpop.f32.mrf.mxu3 }
  0xdf   :  { %v544_v14 = vadd.f32 %v543_v4, %v515_v13  ;;  %v489_v19 = vadd.f32 %v488_v17, %v459_v36 }
  0xe1   :  { %v573_v16 = vadd.f32 %v572_v6, %v544_v14  ;;  %v580_v47 = vpop.f32.mrf.mxu0 }
  0xe3   :  { %v978_v21 = vpack.c.bf16 %v573_v16, %v571_v8  ;;  %v612_v22 = vsel %vm606_vm1, %v573_v16, 0.0 }
  0xe4   :  { %v517_v23 = vpop.f32.mrf.mxu2  ;;  %654 = vadd.xlane.f32.xlu1 %v644_v20  ;;  %v645_v24 = vmul.f32 %v612_v22, %v612_v22 }
  0xe5   :  { %990 = vst [vmem:[%s1372_s2 + $0x8] sm:$0xff] %v978_v21   ;;  %v518_v25 = vadd.f32 %v517_v23, %v489_v19 }
  0xe6   :  { %656 = vadd.xlane.f32.xlu2 %v645_v24  ;;  %v490_v27 = vpop.f32.mrf.mxu1 }
  0xe7   :  { %v547_v26 = vadd.f32 %v546_v15, %v518_v25  ;;  %v491_v30 = vadd.f32 %v490_v27, %v1268_v39 }
  0xe9   :  { %v576_v28 = vadd.f32 %v575_v18, %v547_v26  ;;  %v582_v58 = vpop.f32.mrf.mxu0 }
  0xeb   :  { %v613_v31 = vsel %vm606_vm1, %v576_v28, 0.0 }
  0xec   :  { %v519_v33 = vpop.f32.mrf.mxu2  ;;  %623 = vadd.xlane.f32.xlu1 %v612_v22  ;;  %v646_v34 = vmul.f32 %v613_v31, %v613_v31 }
  0xed   :  { %v520_v35 = vadd.f32 %v519_v33, %v491_v30 }
  0xee   :  { %625 = vadd.xlane.f32.xlu2 %v613_v31  ;;  %658 = vadd.xlane.f32.xlu0 %v646_v34  ;;  %v493_v38 = vpop.f32.mrf.mxu1 }
  0xef   :  { %v549_v36 = vadd.f32 %v548_v29, %v520_v35  ;;  %v494_v42 = vadd.f32 %v493_v38, %v1266_v37 }
  0xf1   :  { %v578_v40 = vadd.f32 %v577_v32, %v549_v36 }
  0xf3   :  { %v983_v43 = vpack.c.bf16 %v578_v40, %v576_v28  ;;  %v614_v39 = vsel %vm606_vm1, %v578_v40, 0.0 }
  0xf4   :  { %v522_v45 = vpop.f32.mrf.mxu2 }
  0xf5   :  { %v523_v46 = vadd.f32 %v522_v45, %v494_v42  ;;  %991 = vst [vmem:[%s1372_s2 + $0x10] sm:$0xff] %v983_v43  }
  0xf6   :  { %627 = vadd.xlane.f32.xlu2 %v614_v39  ;;  %v495_v50 = vpop.f32.mrf.mxu1 }
  0xf7   :  { %v552_v49 = vadd.f32 %v551_v44, %v523_v46  ;;  %v496_v52 = vadd.f32 %v495_v50, %v1270_v41  ;;  %v647_v41 = vmul.f32 %v614_v39, %v614_v39 }
  0xf9   :  { %v581_v51 = vadd.f32 %v580_v47, %v552_v49 }
  0xfb   :  { %v615_v37 = vsel %vm606_vm1, %v581_v51, 0.0 }
  0xfc   :  { %v524_v53 = vpop.f32.mrf.mxu2  ;;  %629 = vadd.xlane.f32.xlu0 %v615_v37  ;;  %v648_v54 = vmul.f32 %v615_v37, %v615_v37 }
  0xfd   :  { %v525_v55 = vadd.f32 %v524_v53, %v496_v52 }
  0xfe   :  { %662 = vadd.xlane.f32.xlu2 %v648_v54 }
  0xff   :  { %v554_v57 = vadd.f32 %v553_v56, %v525_v55 }
 0x101   :  { %v583_v59 = vadd.f32 %v582_v58, %v554_v57 }
 0x103   :  { %v988_v60 = vpack.c.bf16 %v583_v59, %v581_v51  ;;  %v616_v61 = vsel %vm606_vm1, %v583_v59, 0.0 }
 0x104   :  { %631 = vadd.xlane.f32.xlu1 %v616_v61  ;;  %v649_v62 = vmul.f32 %v616_v61, %v616_v61 }
 0x105   :  { %992 = vst [vmem:[%s1372_s2 + $0x18] sm:$0xff] %v988_v60  }
 0x106   :  { %664 = vadd.xlane.f32.xlu0 %v649_v62 }
 0x10c   :  { %660 = vadd.xlane.f32.xlu1 %v647_v41 }
 0x13f   :  { %v618_v63 = vpop.xlane.xlu0 %617 }
 0x140   :  { %634 = vst.msk [vmem:[%s1373_s3] sm:$0xff] %vm633_vm2, %v618_v63 }
 0x141   :  { %v651_v0 = vpop.xlane.xlu2 %650 }
 0x142   :  { %666 = vst.msk [vmem:[%s1374_s4] sm:$0xff] %vm633_vm2, %v651_v0 }
 0x147   :  { %v620_v48 = vpop.xlane.xlu0 %619 }
 0x148   :  { %635 = vst.msk [vmem:[%s1373_s3 + $0x8] sm:$0xff] %vm633_vm2, %v620_v48 }
 0x14f   :  { %v622_v1 = vpop.xlane.xlu1 %621  ;;  %v653_v2 = vpop.xlane.xlu0 %652 }
 0x150   :  { %636 = vst.msk [vmem:[%s1373_s3 + $0x10] sm:$0xff] %vm633_vm2, %v622_v1 }
 0x151   :  { %667 = vst.msk [vmem:[%s1374_s4 + $0x8] sm:$0xff] %vm633_vm2, %v653_v2 }
 0x157   :  { %v655_v3 = vpop.xlane.xlu1 %654 }
 0x158   :  { %668 = vst.msk [vmem:[%s1374_s4 + $0x10] sm:$0xff] %vm633_vm2, %v655_v3 }
 0x159   :  { %v657_v4 = vpop.xlane.xlu2 %656 }
 0x15a   :  { %669 = vst.msk [vmem:[%s1374_s4 + $0x18] sm:$0xff] %vm633_vm2, %v657_v4 }
 0x15f   :  { %v624_v5 = vpop.xlane.xlu1 %623 }
 0x160   :  { %637 = vst.msk [vmem:[%s1373_s3 + $0x18] sm:$0xff] %vm633_vm2, %v624_v5 }
 0x161   :  { %v626_v6 = vpop.xlane.xlu2 %625  ;;  %v659_v7 = vpop.xlane.xlu0 %658 }
 0x162   :  { %638 = vst.msk [vmem:[%s1373_s3 + $0x20] sm:$0xff] %vm633_vm2, %v626_v6 }
 0x163   :  { %670 = vst.msk [vmem:[%s1374_s4 + $0x20] sm:$0xff] %vm633_vm2, %v659_v7 }
 0x169   :  { %v628_v8 = vpop.xlane.xlu2 %627 }
 0x16a   :  { %639 = vst.msk [vmem:[%s1373_s3 + $0x28] sm:$0xff] %vm633_vm2, %v628_v8 }
 0x16f   :  { %v630_v9 = vpop.xlane.xlu0 %629 }
 0x170   :  { %640 = vst.msk [vmem:[%s1373_s3 + $0x30] sm:$0xff] %vm633_vm2, %v630_v9 }
 0x171   :  { %v663_v10 = vpop.xlane.xlu2 %662 }
 0x172   :  { %672 = vst.msk [vmem:[%s1374_s4 + $0x30] sm:$0xff] %vm633_vm2, %v663_v10 }
 0x177   :  { %v632_v11 = vpop.xlane.xlu1 %631 }
 0x178   :  { %641 = vst.msk [vmem:[%s1373_s3 + $0x38] sm:$0xff] %vm633_vm2, %v632_v11 }
 0x179   :  { %v665_v12 = vpop.xlane.xlu0 %664 }
 0x17a   :  { %673 = vst.msk [vmem:[%s1374_s4 + $0x38] sm:$0xff] %vm633_vm2, %v665_v12 }
 0x17f   :  { %v661_v13 = vpop.xlane.xlu1 %660 }
 0x180   :  { %671 = vst.msk [vmem:[%s1374_s4 + $0x28] sm:$0xff] %vm633_vm2, %v661_v13 }

// kernel: lstm_driver_forward.23
= control target key start
LH: loop header
LB: loop body
LE: loop exit
PB: predicated region body
PF: predicated region fallthrough
CT: control target
= control target key end

     0   :  { %vm119_vm0 = vcmask 261120   ;;  %vm182_vm1 = vcmask 1041408   ;;  %vm184_vm2 = vcmask 1045508   ;;  %vm186_vm3 = vcmask 1043456   ;;  %s2202_s3 = inlined_call_operand.vmem [shape: bf16[32,512], index: 3, kind: input, shape index: {}]   ;;  %s2203_s4 = inlined_call_operand.vmem [shape: bf16[128,512], index: 4, kind: input, shape index: {}]   ;;  %s2204_s0 = inlined_call_operand.vmem [shape: f32[2,32], index: 0, kind: input, shape index: {}]   ;;  %s2205_s1 = inlined_call_operand.vmem [shape: f32[1,128], index: 1, kind: input, shape index: {}]   ;;  %s2206_s5 = inlined_call_operand.vmem [shape: f32[1,512], index: 5, kind: input, shape index: {}]   ;;  %s2207_s2 = inlined_call_operand.vmem [shape: f32[1,128], index: 2, kind: input, shape index: {}]   ;;  %s2208_s7 = inlined_call_operand.vmem [shape: f32[1,32], index: 7, kind: input, shape index: {}]   ;;  %s2209_s6 = inlined_call_operand.vmem [shape: f32[128,32], index: 6, kind: input, shape index: {}]   ;;  %s2210_s8 = inlined_call_operand.vmem [shape: f32[32,100], index: 8, kind: input, shape index: {}]   ;;  %s2211_s18 = inlined_call_operand.vmem [shape: f32[1,128], index: 18, kind: output, shape index: {2}]   ;;  %s2212_s17 = inlined_call_operand.vmem [shape: f32[1,128], index: 17, kind: output, shape index: {1}]   ;;  %s2213_s9 = inlined_call_operand.vmem [shape: f32[1,100], index: 9, kind: input, shape index: {}]   ;;  %s2214_s10 = inlined_call_operand.vmem [shape: f32[100,50], index: 10, kind: input, shape index: {}]   ;;  %s2215_s11 = inlined_call_operand.vmem [shape: f32[1,50], index: 11, kind: input, shape index: {}]   ;;  %s2216_s12 = inlined_call_operand.vmem [shape: f32[50,10], index: 12, kind: input, shape index: {}]   ;;  %s2217_s13 = inlined_call_operand.vmem [shape: f32[1,10], index: 13, kind: input, shape index: {}]   ;;  %s2218_s14 = inlined_call_operand.vmem [shape: f32[10,1], index: 14, kind: input, shape index: {}]   ;;  %s2219_s15 = inlined_call_operand.<no memory space> [shape: f32[1,1], index: 15, kind: input, shape index: {}]   ;;  %s2220_s16 = inlined_call_operand.vmem [shape: f32[2,1], index: 16, kind: output, shape index: {0}]  }
   0x1   :  { %2223 = sst [smem:[#allocation5_spill]] %s2202_s3  ;;  %vm445_vm4 = vcmask 1040384   ;;  %vm447_vm5 = vcmask 1042434  }
   0x2   :  { %2224 = sst [smem:[#allocation6_spill]] %s2203_s4 }
   0x3   :  { %2225 = sst [smem:[#allocation7_spill]] %s2204_s0 }
   0x4   :  { %s2226_s29 = sld [smem:[#allocation5_spill]] }
   0x5   :  { %s2227_s20 = sld [smem:[#allocation6_spill]] }
   0x6   :  { %s2228_s24 = sld [smem:[#allocation7_spill]] }
   0xa   :  { %v1078_v0 = vld [vmem:[%s2226_s29 + $0x20] sm:$0xf]  ;;  %v1371_v1 = vld [vmem:[%s2226_s29 + $0x2c] sm:$0xf0]  ;;  %v1369_v2 = vld [vmem:[%s2226_s29 + $0x24] sm:$0xf] }
   0xb   :  { %v1079_v3 = vor.u32 %v1371_v1, %v1078_v0  ;;  %v1080_v4 = vld [vmem:[%s2226_s29 + $0x30] sm:$0xf0]  ;;  %v1086_v5 = vld [vmem:[%s2226_s29 + $0x28] sm:$0xf]  ;;  %v1372_v6 = vld [vmem:[%s2226_s29 + $0x34] sm:$0xf0] }
   0xc   :  { %v1083_v7 = vor.u32 %v1369_v2, %v1080_v4  ;;  %v1087_v8 = vor.u32 %v1372_v6, %v1086_v5  ;;  %v1370_v9 = vld [vmem:[%s2226_s29 + $0x2c] sm:$0xf]  ;;  %v1088_v10 = vld [vmem:[%s2226_s29 + $0x38] sm:$0xf0]  ;;  %v1062_v11 = vld [vmem:[%s2226_s29] sm:$0xf] }
   0xd   :  { %129 = vmatpush.bf16.msra.mxu0 %v1079_v3  ;;  %v1091_v12 = vor.u32 %v1370_v9, %v1088_v10  ;;  %v1367_v13 = vld [vmem:[%s2226_s29 + $0xc] sm:$0xf0]  ;;  %v1365_v14 = vld [vmem:[%s2226_s29 + $0x4] sm:$0xf]  ;;  %v1064_v15 = vld [vmem:[%s2226_s29 + $0x10] sm:$0xf0] }
   0xe   :  { %142 = vmatpush.bf16.msra.mxu1 %v1083_v7  ;;  %155 = vmatpush.bf16.msra.mxu2 %v1087_v8  ;;  %v1063_v16 = vor.u32 %v1367_v13, %v1062_v11  ;;  %v1067_v17 = vor.u32 %v1365_v14, %v1064_v15  ;;  %v1070_v18 = vld [vmem:[%s2226_s29 + $0x8] sm:$0xf]  ;;  %v1368_v19 = vld [vmem:[%s2226_s29 + $0x14] sm:$0xf0]  ;;  %v1366_v20 = vld [vmem:[%s2226_s29 + $0xc] sm:$0xf] }
   0xf   :  { %168 = vmatpush.bf16.msra.mxu3 %v1091_v12  ;;  %v1071_v21 = vor.u32 %v1368_v19, %v1070_v18  ;;  %v1072_v22 = vld [vmem:[%s2226_s29 + $0x18] sm:$0xf0]  ;;  %v1210_v23 = vld [vmem:[%s2227_s20 + $0xe0] sm:$0xf]  ;;  %v1403_v24 = vld [vmem:[%s2227_s20 + $0xec] sm:$0xf0] }
  0x10   :  { %v1075_v25 = vor.u32 %v1366_v20, %v1072_v22  ;;  %v1211_v26 = vor.u32 %v1403_v24, %v1210_v23  ;;  %v1401_v27 = vld [vmem:[%s2227_s20 + $0xe4] sm:$0xf]  ;;  %v1212_v28 = vld [vmem:[%s2227_s20 + $0xf0] sm:$0xf0]  ;;  %v1218_v29 = vld [vmem:[%s2227_s20 + $0xe8] sm:$0xf] }
  0x11   :  { %130 = vmatpush.bf16.msra.mxu0 %v1063_v16  ;;  %v1215_v30 = vor.u32 %v1401_v27, %v1212_v28  ;;  %v1404_v31 = vld [vmem:[%s2227_s20 + $0xf4] sm:$0xf0]  ;;  %v1402_v32 = vld [vmem:[%s2227_s20 + $0xec] sm:$0xf]  ;;  %v1220_v33 = vld [vmem:[%s2227_s20 + $0xf8] sm:$0xf0] }
  0x12   :  { %143 = vmatpush.bf16.msra.mxu1 %v1067_v17  ;;  %156 = vmatpush.bf16.msra.mxu2 %v1071_v21  ;;  %v1219_v34 = vor.u32 %v1404_v31, %v1218_v29  ;;  %v1223_v35 = vor.u32 %v1402_v32, %v1220_v33  ;;  %v1194_v36 = vld [vmem:[%s2227_s20 + $0xc0] sm:$0xf]  ;;  %v1399_v37 = vld [vmem:[%s2227_s20 + $0xcc] sm:$0xf0]  ;;  %v1397_v38 = vld [vmem:[%s2227_s20 + $0xc4] sm:$0xf] }
  0x13   :  { %169 = vmatpush.bf16.msra.mxu3 %v1075_v25  ;;  %v1195_v39 = vor.u32 %v1399_v37, %v1194_v36  ;;  %v1196_v40 = vld [vmem:[%s2227_s20 + $0xd0] sm:$0xf0]  ;;  %v1202_v41 = vld [vmem:[%s2227_s20 + $0xc8] sm:$0xf]  ;;  %v1400_v42 = vld [vmem:[%s2227_s20 + $0xd4] sm:$0xf0] }
  0x14   :  { %v1199_v43 = vor.u32 %v1397_v38, %v1196_v40  ;;  %v1203_v44 = vor.u32 %v1400_v42, %v1202_v41  ;;  %v1398_v45 = vld [vmem:[%s2227_s20 + $0xcc] sm:$0xf]  ;;  %v1204_v46 = vld [vmem:[%s2227_s20 + $0xd8] sm:$0xf0]  ;;  %v59_v47 = vld [vmem:[%s2228_s24] sm:$0x3] }
  0x15   :  { %386 = vmatpush.bf16.msrb.mxu0 %v1211_v26  ;;  %v1207_v48 = vor.u32 %v1398_v45, %v1204_v46  ;;  %v60_v49 = vpack.c.bf16 %v59_v47, %v59_v47  ;;  %v1178_v50 = vld [vmem:[%s2227_s20 + $0xa0] sm:$0xf]  ;;  %v1395_v51 = vld [vmem:[%s2227_s20 + $0xac] sm:$0xf0]  ;;  %v1393_v52 = vld [vmem:[%s2227_s20 + $0xa4] sm:$0xf] }
  0x16   :  { %399 = vmatpush.bf16.msrb.mxu1 %v1215_v30  ;;  %412 = vmatpush.bf16.msrb.mxu2 %v1219_v34  ;;  %v1180_v53 = vld [vmem:[%s2227_s20 + $0xb0] sm:$0xf0]  ;;  %v1186_v54 = vld [vmem:[%s2227_s20 + $0xa8] sm:$0xf]  ;;  %v1396_v55 = vld [vmem:[%s2227_s20 + $0xb4] sm:$0xf0]  ;;  %v1179_v56 = vor.u32 %v1395_v51, %v1178_v50 }
  0x17   :  { %425 = vmatpush.bf16.msrb.mxu3 %v1223_v35  ;;  %1094 = vmatmul.msk.bf16.vlgmr.msra.gmra.mxu2 %vm119_vm0, %v60_v49  ;;  %v1394_v57 = vld [vmem:[%s2227_s20 + $0xac] sm:$0xf]  ;;  %v1188_v58 = vld [vmem:[%s2227_s20 + $0xb8] sm:$0xf0]  ;;  %v1183_v59 = vor.u32 %v1393_v52, %v1180_v53  ;;  %v1187_v60 = vor.u32 %v1396_v55, %v1186_v54  ;;  %v1162_v61 = vld [vmem:[%s2227_s20 + $0x80] sm:$0xf] }
  0x18   :  { %v1391_v62 = vld [vmem:[%s2227_s20 + $0x8c] sm:$0xf0]  ;;  %v1389_v63 = vld [vmem:[%s2227_s20 + $0x84] sm:$0xf]  ;;  %v1191_v0 = vor.u32 %v1394_v57, %v1188_v58  ;;  %v1164_v1 = vld [vmem:[%s2227_s20 + $0x90] sm:$0xf0]  ;;  %1093 = vmatmul.msk.bf16.vlgmr.msra.gmra.mxu1 %vm119_vm0, %v60_v49  ;;  %1095 = vmatmul.msk.bf16.vlgmr.msra.gmra.mxu3 %vm119_vm0, %v60_v49 }
  0x19   :  { %387 = vmatpush.bf16.msrb.mxu0 %v1195_v39  ;;  %v1170_v2 = vld [vmem:[%s2227_s20 + $0x88] sm:$0xf]  ;;  %v1392_v3 = vld [vmem:[%s2227_s20 + $0x94] sm:$0xf0]  ;;  %v1390_v4 = vld [vmem:[%s2227_s20 + $0x8c] sm:$0xf]  ;;  %v1163_v6 = vor.u32 %v1391_v62, %v1162_v61  ;;  %v1167_v7 = vor.u32 %v1389_v63, %v1164_v1 }
  0x1a   :  { %400 = vmatpush.bf16.msrb.mxu1 %v1199_v43  ;;  %413 = vmatpush.bf16.msrb.mxu2 %v1203_v44  ;;  %v1172_v5 = vld [vmem:[%s2227_s20 + $0x98] sm:$0xf0]  ;;  %v1171_v8 = vor.u32 %v1392_v3, %v1170_v2  ;;  %v1146_v9 = vld [vmem:[%s2227_s20 + $0x60] sm:$0xf]  ;;  %v1387_v10 = vld [vmem:[%s2227_s20 + $0x6c] sm:$0xf0] }
  0x1b   :  { %426 = vmatpush.bf16.msrb.mxu3 %v1207_v48  ;;  %1092 = vmatmul.msk.bf16.vlgmr.msra.gmra.mxu0 %vm119_vm0, %v60_v49  ;;  %v1385_v11 = vld [vmem:[%s2227_s20 + $0x64] sm:$0xf]  ;;  %v1175_v12 = vor.u32 %v1390_v4, %v1172_v5  ;;  %v1148_v13 = vld [vmem:[%s2227_s20 + $0x70] sm:$0xf0]  ;;  %v1154_v14 = vld [vmem:[%s2227_s20 + $0x68] sm:$0xf]  ;;  %v1147_v18 = vor.u32 %v1387_v10, %v1146_v9 }
  0x1c   :  { %v1388_v15 = vld [vmem:[%s2227_s20 + $0x74] sm:$0xf0]  ;;  %v1386_v16 = vld [vmem:[%s2227_s20 + $0x6c] sm:$0xf]  ;;  %v1156_v17 = vld [vmem:[%s2227_s20 + $0x78] sm:$0xf0]  ;;  %v1151_v19 = vor.u32 %v1385_v11, %v1148_v13 }
  0x1d   :  { %388 = vmatpush.bf16.msrb.mxu0 %v1179_v56  ;;  %v1155_v20 = vor.u32 %v1388_v15, %v1154_v14  ;;  %v1130_v21 = vld [vmem:[%s2227_s20 + $0x40] sm:$0xf]  ;;  %v1383_v22 = vld [vmem:[%s2227_s20 + $0x4c] sm:$0xf0]  ;;  %v1381_v23 = vld [vmem:[%s2227_s20 + $0x44] sm:$0xf]  ;;  %v1159_v24 = vor.u32 %v1386_v16, %v1156_v17 }
  0x1e   :  { %401 = vmatpush.bf16.msrb.mxu1 %v1183_v59  ;;  %414 = vmatpush.bf16.msrb.mxu2 %v1187_v60  ;;  %v1132_v25 = vld [vmem:[%s2227_s20 + $0x50] sm:$0xf0]  ;;  %v1138_v26 = vld [vmem:[%s2227_s20 + $0x48] sm:$0xf]  ;;  %v1384_v27 = vld [vmem:[%s2227_s20 + $0x54] sm:$0xf0]  ;;  %v1131_v30 = vor.u32 %v1383_v22, %v1130_v21 }
  0x1f   :  { %427 = vmatpush.bf16.msrb.mxu3 %v1191_v0  ;;  %v1382_v28 = vld [vmem:[%s2227_s20 + $0x4c] sm:$0xf]  ;;  %v1140_v29 = vld [vmem:[%s2227_s20 + $0x58] sm:$0xf0]  ;;  %v1135_v31 = vor.u32 %v1381_v23, %v1132_v25  ;;  %v1139_v32 = vor.u32 %v1384_v27, %v1138_v26  ;;  %v1114_v33 = vld [vmem:[%s2227_s20 + $0x20] sm:$0xf] }
  0x20   :  { %v1379_v34 = vld [vmem:[%s2227_s20 + $0x2c] sm:$0xf0]  ;;  %v1377_v35 = vld [vmem:[%s2227_s20 + $0x24] sm:$0xf]  ;;  %v1143_v36 = vor.u32 %v1382_v28, %v1140_v29  ;;  %v1116_v37 = vld [vmem:[%s2227_s20 + $0x30] sm:$0xf0] }
  0x21   :  { %389 = vmatpush.bf16.msrb.mxu0 %v1163_v6  ;;  %v1122_v38 = vld [vmem:[%s2227_s20 + $0x28] sm:$0xf]  ;;  %v1380_v39 = vld [vmem:[%s2227_s20 + $0x34] sm:$0xf0]  ;;  %v1378_v40 = vld [vmem:[%s2227_s20 + $0x2c] sm:$0xf]  ;;  %v1115_v42 = vor.u32 %v1379_v34, %v1114_v33  ;;  %v1119_v43 = vor.u32 %v1377_v35, %v1116_v37 }
  0x22   :  { %402 = vmatpush.bf16.msrb.mxu1 %v1167_v7  ;;  %415 = vmatpush.bf16.msrb.mxu2 %v1171_v8  ;;  %v1124_v41 = vld [vmem:[%s2227_s20 + $0x38] sm:$0xf0]  ;;  %v1123_v44 = vor.u32 %v1380_v39, %v1122_v38  ;;  %v1098_v45 = vld [vmem:[%s2227_s20] sm:$0xf]  ;;  %v1375_v46 = vld [vmem:[%s2227_s20 + $0xc] sm:$0xf0] }
  0x23   :  { %428 = vmatpush.bf16.msrb.mxu3 %v1175_v12  ;;  %v1373_v47 = vld [vmem:[%s2227_s20 + $0x4] sm:$0xf]  ;;  %v1127_v48 = vor.u32 %v1378_v40, %v1124_v41  ;;  %v1100_v49 = vld [vmem:[%s2227_s20 + $0x10] sm:$0xf0]  ;;  %v1106_v50 = vld [vmem:[%s2227_s20 + $0x8] sm:$0xf]  ;;  %v1099_v54 = vor.u32 %v1375_v46, %v1098_v45 }
  0x24   :  { %v1376_v51 = vld [vmem:[%s2227_s20 + $0x14] sm:$0xf0]  ;;  %v1374_v52 = vld [vmem:[%s2227_s20 + $0xc] sm:$0xf]  ;;  %v1108_v53 = vld [vmem:[%s2227_s20 + $0x18] sm:$0xf0]  ;;  %v1103_v56 = vor.u32 %v1373_v47, %v1100_v49 }
  0x25   :  { %390 = vmatpush.bf16.msrb.mxu0 %v1147_v18  ;;  %v190_v55 = vld [vmem:[%s2205_s1] sm:$0x1]  ;;  %v1107_v57 = vor.u32 %v1376_v51, %v1106_v50  ;;  %v1111_v58 = vor.u32 %v1374_v52, %v1108_v53  ;;  %v1433_v21 = vld [vmem:[%s2227_s20 + $0xe4] sm:$0xf]  ;;  %v1343_v23 = vld [vmem:[%s2227_s20 + $0xf0] sm:$0xf0] }
  0x26   :  { %403 = vmatpush.bf16.msrb.mxu1 %v1151_v19  ;;  %416 = vmatpush.bf16.msrb.mxu2 %v1155_v20  ;;  %v193_v59 = vpack.c.bf16 %v190_v55, %v190_v55  ;;  %v69_v60 = vld [vmem:[%s2206_s5] sm:$0xf]  ;;  %v1435_v20 = vld [vmem:[%s2227_s20 + $0xec] sm:$0xf0]  ;;  %v1349_v25 = vld [vmem:[%s2227_s20 + $0xe8] sm:$0xf] }
  0x27   :  { %429 = vmatpush.bf16.msrb.mxu3 %v1159_v24  ;;  %v72_v61 = vperm.slane %v69_v60, 1  ;;  %v73_v63 = vperm.slane %v69_v60, 2  ;;  %v71_v2 = vperm.slane %v69_v60, 0  ;;  %v74_v4 = vperm.slane %v69_v60, 3  ;;  %v1341_v19 = vld [vmem:[%s2227_s20 + $0xe0] sm:$0xf] }
  0x28   :  { %v1342_v22 = vor.u32 %v1435_v20, %v1341_v19  ;;  %v1346_v24 = vor.u32 %v1433_v21, %v1343_v23  ;;  %v1436_v26 = vld [vmem:[%s2227_s20 + $0xf4] sm:$0xf0]  ;;  %v1434_v27 = vld [vmem:[%s2227_s20 + $0xec] sm:$0xf]  ;;  %v1351_v29 = vld [vmem:[%s2227_s20 + $0xf8] sm:$0xf0] }
  0x29   :  { %391 = vmatpush.bf16.msrb.mxu0 %v1131_v30  ;;  %v1350_v28 = vor.u32 %v1436_v26, %v1349_v25  ;;  %v1354_v30 = vor.u32 %v1434_v27, %v1351_v29  ;;  %v1429_v33 = vld [vmem:[%s2227_s20 + $0xc4] sm:$0xf]  ;;  %v1333_v37 = vld [vmem:[%s2227_s20 + $0xc8] sm:$0xf]  ;;  %v1432_v38 = vld [vmem:[%s2227_s20 + $0xd4] sm:$0xf0] }
  0x2a   :  { %404 = vmatpush.bf16.msrb.mxu1 %v1135_v31  ;;  %417 = vmatpush.bf16.msrb.mxu2 %v1139_v32  ;;  %v1325_v31 = vld [vmem:[%s2227_s20 + $0xc0] sm:$0xf]  ;;  %v1431_v32 = vld [vmem:[%s2227_s20 + $0xcc] sm:$0xf0]  ;;  %v1334_v41 = vor.u32 %v1432_v38, %v1333_v37  ;;  %v1311_v50 = vld [vmem:[%s2227_s20 + $0xb0] sm:$0xf0] }
  0x2b   :  { %430 = vmatpush.bf16.msrb.mxu3 %v1143_v36  ;;  %v1326_v35 = vor.u32 %v1431_v32, %v1325_v31  ;;  %v1327_v36 = vld [vmem:[%s2227_s20 + $0xd0] sm:$0xf0]  ;;  %v1309_v46 = vld [vmem:[%s2227_s20 + $0xa0] sm:$0xf]  ;;  %v1427_v47 = vld [vmem:[%s2227_s20 + $0xac] sm:$0xf0] }
  0x2c   :  { %v1330_v40 = vor.u32 %v1429_v33, %v1327_v36  ;;  %v1310_v49 = vor.u32 %v1427_v47, %v1309_v46  ;;  %v1317_v51 = vld [vmem:[%s2227_s20 + $0xa8] sm:$0xf]  ;;  %v1428_v52 = vld [vmem:[%s2227_s20 + $0xb4] sm:$0xf0]  ;;  %v1426_v55 = vld [vmem:[%s2227_s20 + $0xac] sm:$0xf] }
  0x2d   :  { %392 = vmatpush.bf16.msrb.mxu0 %v1115_v42  ;;  %v1430_v42 = vld [vmem:[%s2227_s20 + $0xcc] sm:$0xf]  ;;  %v1421_v60 = vld [vmem:[%s2227_s20 + $0x84] sm:$0xf]  ;;  %v1285_v19 = vld [vmem:[%s2227_s20 + $0x68] sm:$0xf] }
  0x2e   :  { %405 = vmatpush.bf16.msrb.mxu1 %v1119_v43  ;;  %418 = vmatpush.bf16.msrb.mxu2 %v1123_v44  ;;  %v1335_v43 = vld [vmem:[%s2227_s20 + $0xd8] sm:$0xf0]  ;;  %v1420_v20 = vld [vmem:[%s2227_s20 + $0x74] sm:$0xf0]  ;;  %v1418_v23 = vld [vmem:[%s2227_s20 + $0x6c] sm:$0xf] }
  0x2f   :  { %431 = vmatpush.bf16.msrb.mxu3 %v1127_v48  ;;  %v1338_v45 = vor.u32 %v1430_v42, %v1335_v43  ;;  %v1425_v48 = vld [vmem:[%s2227_s20 + $0xa4] sm:$0xf]  ;;  %v1261_v25 = vld [vmem:[%s2227_s20 + $0x40] sm:$0xf]  ;;  %v1286_v27 = vor.u32 %v1420_v20, %v1285_v19  ;;  %v1269_v33 = vld [vmem:[%s2227_s20 + $0x48] sm:$0xf] }
  0x30   :  { %v1314_v53 = vor.u32 %v1425_v48, %v1311_v50  ;;  %v1413_v29 = vld [vmem:[%s2227_s20 + $0x44] sm:$0xf]  ;;  %v1414_v36 = vld [vmem:[%s2227_s20 + $0x4c] sm:$0xf]  ;;  %v1271_v37 = vld [vmem:[%s2227_s20 + $0x58] sm:$0xf0] }
  0x31   :  { %393 = vmatpush.bf16.msrb.mxu0 %v1099_v54  ;;  %v1318_v54 = vor.u32 %v1428_v52, %v1317_v51  ;;  %v1245_v38 = vld [vmem:[%s2227_s20 + $0x20] sm:$0xf]  ;;  %v1409_v47 = vld [vmem:[%s2227_s20 + $0x24] sm:$0xf]  ;;  %v1247_v48 = vld [vmem:[%s2227_s20 + $0x30] sm:$0xf0]  ;;  %v1274_v52 = vor.u32 %v1414_v36, %v1271_v37 }
  0x32   :  { %406 = vmatpush.bf16.msrb.mxu1 %v1103_v56  ;;  %419 = vmatpush.bf16.msrb.mxu2 %v1107_v57  ;;  %v1319_v56 = vld [vmem:[%s2227_s20 + $0xb8] sm:$0xf0]  ;;  %v1293_v57 = vld [vmem:[%s2227_s20 + $0x80] sm:$0xf] }
  0x33   :  { %432 = vmatpush.bf16.msrb.mxu3 %v1111_v58  ;;  %v1322_v58 = vor.u32 %v1426_v55, %v1319_v56  ;;  %v1410_v55 = vld [vmem:[%s2227_s20 + $0x2c] sm:$0xf]  ;;  %v1255_v56 = vld [vmem:[%s2227_s20 + $0x38] sm:$0xf0] }
  0x34   :  { %394 = vmatmul.bf16.vlgmr.msrb.gmra.mxu0 %v193_v59 }
  0x35   :  { %407 = vmatmul.bf16.vlgmr.msrb.gmra.mxu1 %v193_v59  ;;  %420 = vmatmul.bf16.vlgmr.msrb.gmra.mxu2 %v193_v59 }
  0x36   :  { %433 = vmatmul.bf16.vlgmr.msrb.gmra.mxu3 %v193_v59  ;;  %718 = vmatpush.bf16.msra.mxu0 %v1342_v22  ;;  %v1423_v59 = vld [vmem:[%s2227_s20 + $0x8c] sm:$0xf0] }
  0x37   :  { %731 = vmatpush.bf16.msra.mxu1 %v1346_v24  ;;  %744 = vmatpush.bf16.msra.mxu2 %v1350_v28  ;;  %v1287_v24 = vld [vmem:[%s2227_s20 + $0x78] sm:$0xf0]  ;;  %v1415_v28 = vld [vmem:[%s2227_s20 + $0x4c] sm:$0xf0] }
  0x38   :  { %757 = vmatpush.bf16.msra.mxu3 %v1354_v30  ;;  %v1263_v30 = vld [vmem:[%s2227_s20 + $0x50] sm:$0xf0]  ;;  %v1290_v32 = vor.u32 %v1418_v23, %v1287_v24 }
  0x39   :  { %v1266_v43 = vor.u32 %v1413_v29, %v1263_v30 }
  0x3a   :  { %719 = vmatpush.bf16.msra.mxu0 %v1326_v35  ;;  %v1262_v35 = vor.u32 %v1415_v28, %v1261_v25 }
  0x3b   :  { %732 = vmatpush.bf16.msra.mxu1 %v1330_v40  ;;  %745 = vmatpush.bf16.msra.mxu2 %v1334_v41 }
  0x3c   :  { %758 = vmatpush.bf16.msra.mxu3 %v1338_v45 }
  0x3e   :  { %720 = vmatpush.bf16.msra.mxu0 %v1310_v49  ;;  %v1253_v49 = vld [vmem:[%s2227_s20 + $0x28] sm:$0xf] }
  0x3f   :  { %733 = vmatpush.bf16.msra.mxu1 %v1314_v53  ;;  %746 = vmatpush.bf16.msra.mxu2 %v1318_v54  ;;  %v1412_v53 = vld [vmem:[%s2227_s20 + $0x34] sm:$0xf0] }
  0x40   :  { %759 = vmatpush.bf16.msra.mxu3 %v1322_v58  ;;  %v1229_v58 = vld [vmem:[%s2227_s20] sm:$0xf] }
  0x95   :  { %v145_v62 = vpop.f32.mrf.mxu1 }
  0x96   :  { %v146_v1 = vadd.f32 %v145_v62, %v72_v61  ;;  %v1295_v61 = vld [vmem:[%s2227_s20 + $0x90] sm:$0xf0] }
  0x98   :  { %v132_v0 = vpop.f32.mrf.mxu0  ;;  %v179_v6 = vrot.slane %v146_v1, 6  ;;  %v1301_v1 = vld [vmem:[%s2227_s20 + $0x88] sm:$0xf] }
  0x99   :  { %v133_v7 = vadd.f32 %v132_v0, %v71_v2  ;;  %v1298_v0 = vor.u32 %v1421_v60, %v1295_v61  ;;  %v1424_v2 = vld [vmem:[%s2227_s20 + $0x94] sm:$0xf0]  ;;  %v1254_v60 = vor.u32 %v1412_v53, %v1253_v49  ;;  %v1405_v61 = vld [vmem:[%s2227_s20 + $0x4] sm:$0xf] }
  0x9a   :  { %v158_v3 = vpop.f32.mrf.mxu2 }
  0x9b   :  { %v159_v5 = vadd.f32 %v158_v3, %v73_v63  ;;  %v171_v8 = vpop.f32.mrf.mxu3  ;;  %v183_v14 = vsel %vm182_vm1, %v133_v7, %v179_v6  ;;  %v1294_v63 = vor.u32 %v1423_v59, %v1293_v57  ;;  %v1422_v3 = vld [vmem:[%s2227_s20 + $0x8c] sm:$0xf]  ;;  %v1302_v7 = vor.u32 %v1424_v2, %v1301_v1  ;;  %734 = vmatpush.bf16.msra.mxu1 %v1298_v0  ;;  %v1407_v59 = vld [vmem:[%s2227_s20 + $0xc] sm:$0xf0]  ;;  %v1237_v0 = vld [vmem:[%s2227_s20 + $0x8] sm:$0xf] }
  0x9c   :  { %v172_v10 = vadd.f32 %v171_v8, %v74_v4  ;;  %v1303_v8 = vld [vmem:[%s2227_s20 + $0x98] sm:$0xf0]  ;;  %v1250_v57 = vor.u32 %v1409_v47, %v1247_v48  ;;  %v1408_v1 = vld [vmem:[%s2227_s20 + $0x14] sm:$0xf0]  ;;  %v1230_v2 = vor.u32 %v1407_v59, %v1229_v58 }
  0x9d   :  { %v180_v9 = vrot.slane %v159_v5, 4  ;;  %v147_v11 = vpop.f32.mrf.mxu1  ;;  %721 = vmatpush.bf16.msra.mxu0 %v1294_v63  ;;  %747 = vmatpush.bf16.msra.mxu2 %v1302_v7  ;;  %v1258_v63 = vor.u32 %v1410_v55, %v1255_v56  ;;  %v871_v55 = vld [vmem:[%s2209_s6 + $0x78] sm:$0xff]  ;;  %v870_v56 = vld [vmem:[%s2209_s6 + $0x70] sm:$0xff] }
  0x9e   :  { %v181_v13 = vrot.slane %v172_v10, 2 }
  0xa0   :  { %v134_v12 = vpop.f32.mrf.mxu0  ;;  %v185_v15 = vsel %vm184_vm2, %v180_v9, %v181_v13  ;;  %v1277_v9 = vld [vmem:[%s2227_s20 + $0x60] sm:$0xf]  ;;  %v1306_v13 = vor.u32 %v1422_v3, %v1303_v8  ;;  %v1406_v3 = vld [vmem:[%s2227_s20 + $0xc] sm:$0xf]  ;;  %v1238_v8 = vor.u32 %v1408_v1, %v1237_v0 }
  0xa1   :  { %v187_v17 = vsel %vm186_vm3, %v183_v14, %v185_v15  ;;  %v1419_v14 = vld [vmem:[%s2227_s20 + $0x6c] sm:$0xf0]  ;;  %v1417_v15 = vld [vmem:[%s2227_s20 + $0x64] sm:$0xf]  ;;  %748 = vmatpush.bf16.msra.mxu2 %v1286_v27 }
  0xa2   :  { %v160_v16 = vpop.f32.mrf.mxu2  ;;  %189 = vst [vmem:[#allocation3] sm:$0xff] %v187_v17  ;;  %v1278_v17 = vor.u32 %v1419_v14, %v1277_v9  ;;  %760 = vmatpush.bf16.msra.mxu3 %v1306_v13  ;;  %v868_v1 = vld [vmem:[%s2209_s6 + $0x60] sm:$0xff] }
  0xa3   :  { %v173_v18 = vpop.f32.mrf.mxu3 }
  0xa4   :  { %v1279_v18 = vld [vmem:[%s2227_s20 + $0x70] sm:$0xf0]  ;;  %722 = vmatpush.bf16.msra.mxu0 %v1278_v17 }
  0xa5   :  { %v1282_v22 = vor.u32 %v1417_v15, %v1279_v18 }
  0xa6   :  { %761 = vmatpush.bf16.msra.mxu3 %v1290_v32 }
  0xa7   :  { %735 = vmatpush.bf16.msra.mxu1 %v1282_v22 }
  0xa8   :  { %723 = vmatpush.bf16.msra.mxu0 %v1262_v35 }
  0xa9   :  { %v192_v16 = vld [vmem:[#allocation3] ss:$2 sm:$0xf] }
  0xaa   :  { %762 = vmatpush.bf16.msra.mxu3 %v1274_v52 }
  0xab   :  { %736 = vmatpush.bf16.msra.mxu1 %v1266_v43 }
  0xae   :  { %763 = vmatpush.bf16.msra.mxu3 %v1258_v63 }
  0xaf   :  { %737 = vmatpush.bf16.msra.mxu1 %v1250_v57 }
  0xb1   :  { %v395_v34 = vpop.f32.mrf.mxu0 }
  0xb2   :  { %v408_v39 = vpop.f32.mrf.mxu1 }
  0xb3   :  { %v442_v44 = vrot.slane %v408_v39, 7 }
  0xb5   :  { %v446_v10 = vsel %vm445_vm4, %v395_v34, %v442_v44  ;;  %v1416_v34 = vld [vmem:[%s2227_s20 + $0x54] sm:$0xf0]  ;;  %v1411_v44 = vld [vmem:[%s2227_s20 + $0x2c] sm:$0xf0] }
  0xb6   :  { %v1270_v46 = vor.u32 %v1416_v34, %v1269_v33  ;;  %v1246_v54 = vor.u32 %v1411_v44, %v1245_v38  ;;  %v191_v34 = vld [vmem:[%s2207_s2] sm:$0x1] }
  0xb8   :  { %v421_v62 = vpop.f32.mrf.mxu2  ;;  %749 = vmatpush.bf16.msra.mxu2 %v1270_v46  ;;  %724 = vmatpush.bf16.msra.mxu0 %v1246_v54 }
  0xb9   :  { %v443_v4 = vrot.slane %v421_v62, 6  ;;  %v434_v5 = vpop.f32.mrf.mxu3  ;;  %v397_v6 = vpop.f32.mrf.mxu0  ;;  %v1231_v62 = vld [vmem:[%s2227_s20 + $0x10] sm:$0xf0] }
  0xba   :  { %v444_v11 = vrot.slane %v434_v5, 5  ;;  %v410_v12 = vpop.f32.mrf.mxu1  ;;  %v1234_v6 = vor.u32 %v1405_v61, %v1231_v62 }
  0xbc   :  { %v448_v21 = vsel %vm447_vm5, %v443_v4, %v444_v11  ;;  %v1239_v4 = vld [vmem:[%s2227_s20 + $0x18] sm:$0xf0]  ;;  %750 = vmatpush.bf16.msra.mxu2 %v1254_v60  ;;  %725 = vmatpush.bf16.msra.mxu0 %v1230_v2  ;;  %v869_v60 = vld [vmem:[%s2209_s6 + $0x68] sm:$0xff] }
  0xbd   :  { %v449_v26 = vsel %vm182_vm1, %v446_v10, %v448_v21  ;;  %v1242_v10 = vor.u32 %v1406_v3, %v1239_v4  ;;  %738 = vmatpush.bf16.msra.mxu1 %v1234_v6  ;;  %v524_v4 = vld [vmem:[#allocation3 + $0x1] ss:$2 sm:$0xf]  ;;  %v867_v6 = vld [vmem:[%s2209_s6 + $0x58] sm:$0xff] }
  0xbe   :  { %v1959_v31 = vadd.f32 %v449_v26, %v192_v16 }
  0xbf   :  { %764 = vmatpush.bf16.msra.mxu3 %v1242_v10 }
  0xc0   :  { %v1224_v39 = vmul.f32 -1.442695, %v1959_v31  ;;  %v472_v40 = vrot.slane %v1959_v31, 1  ;;  %v496_v41 = vrot.slane %v1959_v31, 3  ;;  %v423_v42 = vpop.f32.mrf.mxu2  ;;  %751 = vmatpush.bf16.msra.mxu2 %v1238_v8  ;;  %v493_v17 = vrot.slane %v1959_v31, 2  ;;  %876 = vmatpush.msrb.mxu0 %v871_v55  ;;  %v866_v8 = vld [vmem:[%s2209_s6 + $0x50] sm:$0xff] }
  0xc1   :  { %v436_v45 = vpop.f32.mrf.mxu3 }
  0xc2   :  { %1442 = vpow2.f32 %v1224_v39  ;;  %v1225_v50 = vmul.f32 -1.442695, %v472_v40  ;;  %v1226_v51 = vmul.f32 -1.442695, %v496_v41  ;;  %877 = vmatpush.msrb.mxu0 %v870_v56 }
  0xc4   :  { %1444 = vpow2.f32 %v1225_v50  ;;  %878 = vmatpush.msrb.mxu0 %v869_v60 }
  0xc5   :  { %1446 = vpow2.f32 %v1226_v51 }
  0xc6   :  { %879 = vmatpush.msrb.mxu0 %v868_v1 }
  0xc8   :  { %v1443_v5 = vpop.eup %1442  ;;  %880 = vmatpush.msrb.mxu0 %v867_v6 }
  0xc9   :  { %v455_v7 = vadd.f32 1.0, %v1443_v5 }
  0xca   :  { %v1445_v9 = vpop.eup %1444  ;;  %881 = vmatpush.msrb.mxu0 %v866_v8 }
  0xcb   :  { %v1447_v11 = vpop.eup %1446  ;;  %1448 = vrcp.f32 %v455_v7  ;;  %v477_v12 = vadd.f32 1.0, %v1445_v9  ;;  %v467_v21 = vand.u32 2147483648, %v455_v7  ;;  %v465_v25 = vand.u32 2147483647, %v455_v7 }
  0xcc   :  { %v501_v13 = vadd.f32 1.0, %v1447_v11  ;;  %vm461_vm7 = vweird.f32 %v455_v7 }
  0xcd   :  { %1450 = vrcp.f32 %v477_v12  ;;  %v489_v26 = vand.u32 2147483648, %v477_v12  ;;  %v487_v29 = vand.u32 2147483647, %v477_v12  ;;  %v468_v30 = vor.u32 1.1754944e-38, %v467_v21 }
  0xce   :  { %1452 = vrcp.f32 %v501_v13  ;;  %vm466_vm10 = vcmp.eq.f32.partialorder %v465_v25, 8.507059e+37  ;;  %vm483_vm11 = vweird.f32 %v477_v12  ;;  %v513_v45 = vand.u32 2147483648, %v501_v13  ;;  %v860_v25 = vld [vmem:[%s2209_s6 + $0x20] sm:$0xff] }
  0xcf   :  { %1454 = vtanh.f32 %v493_v17  ;;  %v490_v36 = vor.u32 1.1754944e-38, %v489_v26  ;;  %vm488_vm13 = vcmp.eq.f32.partialorder %v487_v29, 8.507059e+37  ;;  %vm507_vm15 = vweird.f32 %v501_v13  ;;  %v864_v17 = vld [vmem:[%s2209_s6 + $0x40] sm:$0xff]  ;;  %v858_v29 = vld [vmem:[%s2209_s6 + $0x10] sm:$0xff] }
  0xd0   :  { %v511_v46 = vand.u32 2147483647, %v501_v13  ;;  %v514_v48 = vor.u32 1.1754944e-38, %v513_v45 }
  0xd1   :  { %v1449_v14 = vpop.eup %1448 }
  0xd2   :  { %v457_v15 = vmul.f32 %v1449_v14, %v455_v7  ;;  %vm462_vm6 = vweird.f32 %v1449_v14 }
  0xd3   :  { %v1451_v16 = vpop.eup %1450  ;;  %vm463_vm9 = vmor %vm461_vm7, %vm462_vm6  ;;  %vm512_vm6 = vcmp.eq.f32.partialorder %v511_v46, 8.507059e+37 }
  0xd4   :  { %v1453_v18 = vpop.eup %1452  ;;  %v458_v19 = vsub.f32 1.0, %v457_v15  ;;  %v479_v20 = vmul.f32 %v1451_v16, %v477_v12  ;;  %vm484_vm8 = vweird.f32 %v1451_v16 }
  0xd5   :  { %v503_v22 = vmul.f32 %v1453_v18, %v501_v13  ;;  %vm485_vm12 = vmor %vm483_vm11, %vm484_vm8  ;;  %v1455_v38 = vpop.eup %1454  ;;  %vm508_vm14 = vweird.f32 %v1453_v18 }
  0xd6   :  { %v480_v23 = vsub.f32 1.0, %v479_v20  ;;  %v459_v24 = vmul.f32 %v1449_v14, %v458_v19  ;;  %vm509_vm2 = vmor %vm507_vm15, %vm508_vm14  ;;  %v862_v19 = vld [vmem:[%s2209_s6 + $0x30] sm:$0xff] }
  0xd7   :  { %v504_v32 = vsub.f32 1.0, %v503_v22  ;;  %v861_v22 = vld [vmem:[%s2209_s6 + $0x28] sm:$0xff] }
  0xd8   :  { %v460_v27 = vadd.f32 %v1449_v14, %v459_v24  ;;  %v481_v28 = vmul.f32 %v1451_v16, %v480_v23 }
  0xd9   :  { %v505_v40 = vmul.f32 %v1453_v18, %v504_v32 }
  0xda   :  { %v464_v31 = vsel %vm463_vm9, %v1449_v14, %v460_v27  ;;  %v482_v33 = vadd.f32 %v1451_v16, %v481_v28  ;;  %v865_v14 = vld [vmem:[%s2209_s6 + $0x48] sm:$0xff]  ;;  %v859_v28 = vld [vmem:[%s2209_s6 + $0x18] sm:$0xff] }
  0xdb   :  { %v469_v35 = vsel %vm466_vm10, %v468_v30, %v464_v31  ;;  %v506_v44 = vadd.f32 %v1453_v18, %v505_v40  ;;  %882 = vmatpush.msrb.mxu0 %v865_v14  ;;  %v857_v30 = vld [vmem:[%s2209_s6 + $0x8] sm:$0xff]  ;;  %v856_v31 = vld [vmem:[%s2209_s6] sm:$0xff]  ;;  %v899_v40 = vld [vmem:[%s2210_s8 + $0x10] sm:$0xff] }
  0xdc   :  { %v486_v37 = vsel %vm485_vm12, %v1451_v16, %v482_v33  ;;  %v518_v42 = vmul.f32 %v1455_v38, %v469_v35  ;;  %v937_v14 = vld [vmem:[%s2214_s10 + $0x40] sm:$0xff] }
  0xdd   :  { %v491_v39 = vsel %vm488_vm13, %v490_v36, %v486_v37  ;;  %v510_v47 = vsel %vm509_vm2, %v1453_v18, %v506_v44  ;;  %883 = vmatpush.msrb.mxu0 %v864_v17  ;;  %v863_v18 = vld [vmem:[%s2209_s6 + $0x38] sm:$0xff]  ;;  %v934_v17 = vld [vmem:[%s2214_s10 + $0x28] sm:$0xff] }
  0xde   :  { %v517_v41 = vmul.f32 %v491_v39, %v191_v34  ;;  %v515_v50 = vsel %vm512_vm6, %v514_v48, %v510_v47  ;;  %v900_v39 = vld [vmem:[%s2210_s8 + $0x18] sm:$0xff]  ;;  %v898_v47 = vld [vmem:[%s2210_s8 + $0x8] sm:$0xff]  ;;  %vm1046_vm6 = vcmask 1024  }
  0xdf   :  { %884 = vmatpush.msrb.mxu0 %v863_v18  ;;  %920 = vmatpush.msrb.mxu1 %v900_v39  ;;  %v933_v18 = vld [vmem:[%s2214_s10 + $0x20] sm:$0xff] }
  0xe0   :  { %v2028_v43 = vadd.f32 %v518_v42, %v517_v41  ;;  %v1439_v39 = vld [vmem:[%s2215_s11] ss:$0 sm:$0xff] }
  0xe1   :  { %885 = vmatpush.msrb.mxu0 %v862_v19  ;;  %921 = vmatpush.msrb.mxu1 %v899_v40  ;;  %v932_v19 = vld [vmem:[%s2214_s10 + $0x18] sm:$0xff] }
  0xe2   :  { %1456 = vtanh.f32 %v2028_v43 }
  0xe3   :  { %886 = vmatpush.msrb.mxu0 %v861_v22  ;;  %922 = vmatpush.msrb.mxu1 %v898_v47 }
  0xe5   :  { %887 = vmatpush.msrb.mxu0 %v860_v25  ;;  %v930_v25 = vld [vmem:[%s2214_s10 + $0x8] sm:$0xff] }
  0xe7   :  { %888 = vmatpush.msrb.mxu0 %v859_v28  ;;  %v979_v28 = vld [vmem:[%s2216_s12 + $0x28] sm:$0xff] }
  0xe8   :  { %v1457_v49 = vpop.eup %1456 }
  0xe9   :  { %v521_v51 = vmul.f32 %v1457_v49, %v515_v50  ;;  %889 = vmatpush.msrb.mxu0 %v858_v29  ;;  %v978_v29 = vld [vmem:[%s2216_s12 + $0x20] sm:$0xff] }
  0xeb   :  { %522 = vst [vmem:[#allocation2] sm:$0x1] %v521_v51  ;;  %v525_v52 = vpack.c.bf16 %v521_v51, %v521_v51  ;;  %890 = vmatpush.msrb.mxu0 %v857_v30  ;;  %v977_v30 = vld [vmem:[%s2216_s12 + $0x18] sm:$0xff] }
  0xed   :  { %726 = vmatmul.bf16.vlgmr.msra.gmra.mxu0 %v525_v52  ;;  %739 = vmatmul.bf16.vlgmr.msra.gmra.mxu1 %v525_v52 }
  0xee   :  { %752 = vmatmul.bf16.vlgmr.msra.gmra.mxu2 %v525_v52  ;;  %765 = vmatmul.bf16.vlgmr.msra.gmra.mxu3 %v525_v52 }
  0xef   :  { %891 = vmatpush.msrb.mxu0 %v856_v31  ;;  %v1438_v31 = vld [vmem:[%s2213_s9] ss:$0 sm:$0xff] }
 0x16a   :  { %v727_v53 = vpop.f32.mrf.mxu0  ;;  %v740_v54 = vpop.f32.mrf.mxu1 }
 0x16b   :  { %v774_v57 = vrot.slane %v740_v54, 7 }
 0x16d   :  { %v777_v2 = vsel %vm445_vm4, %v727_v53, %v774_v57 }
 0x171   :  { %v753_v58 = vpop.f32.mrf.mxu2  ;;  %v766_v59 = vpop.f32.mrf.mxu3 }
 0x172   :  { %v775_v61 = vrot.slane %v753_v58, 6  ;;  %v776_v62 = vrot.slane %v766_v59, 5  ;;  %v729_v63 = vpop.f32.mrf.mxu0  ;;  %v742_v0 = vpop.f32.mrf.mxu1 }
 0x174   :  { %v778_v3 = vsel %vm447_vm5, %v775_v61, %v776_v62 }
 0x175   :  { %v779_v5 = vsel %vm182_vm1, %v777_v2, %v778_v3 }
 0x176   :  { %v2049_v7 = vadd.f32 %v779_v5, %v524_v4 }
 0x178   :  { %v1355_v9 = vmul.f32 -1.442695, %v2049_v7  ;;  %v802_v10 = vrot.slane %v2049_v7, 1  ;;  %v826_v11 = vrot.slane %v2049_v7, 3  ;;  %v823_v36 = vrot.slane %v2049_v7, 2 }
 0x179   :  { %v755_v12 = vpop.f32.mrf.mxu2  ;;  %v768_v13 = vpop.f32.mrf.mxu3 }
 0x17a   :  { %1458 = vpow2.f32 %v1355_v9  ;;  %v1356_v15 = vmul.f32 -1.442695, %v802_v10  ;;  %v1357_v16 = vmul.f32 -1.442695, %v826_v11  ;;  %v897_v9 = vld [vmem:[%s2210_s8] sm:$0xff]  ;;  %v940_v11 = vld [vmem:[%s2214_s10 + $0x58] sm:$0xff] }
 0x17b   :  { %923 = vmatpush.msrb.mxu1 %v897_v9  ;;  %v941_v10 = vld [vmem:[%s2214_s10 + $0x60] sm:$0xf]  ;;  %v939_v12 = vld [vmem:[%s2214_s10 + $0x50] sm:$0xff]  ;;  %v938_v13 = vld [vmem:[%s2214_s10 + $0x48] sm:$0xff] }
 0x17c   :  { %1460 = vpow2.f32 %v1356_v15  ;;  %1359 = vmatpush.msk.msrb.mxu2 %vm186_vm3, %v941_v10  ;;  %v936_v15 = vld [vmem:[%s2214_s10 + $0x38] sm:$0xff]  ;;  %vm985_vm3 = vcmask 408576  }
 0x17d   :  { %1462 = vpow2.f32 %v1357_v16  ;;  %v935_v16 = vld [vmem:[%s2214_s10 + $0x30] sm:$0xff] }
 0x17e   :  { %957 = vmatpush.msrb.mxu2 %v940_v11 }
 0x180   :  { %v1459_v20 = vpop.eup %1458  ;;  %958 = vmatpush.msrb.mxu2 %v939_v12 }
 0x181   :  { %v785_v21 = vadd.f32 1.0, %v1459_v20  ;;  %v1437_v20 = vld [vmem:[%s2208_s7] ss:$0 sm:$0xff] }
 0x182   :  { %v1461_v23 = vpop.eup %1460  ;;  %959 = vmatpush.msrb.mxu2 %v938_v13 }
 0x183   :  { %v1463_v24 = vpop.eup %1462  ;;  %1464 = vrcp.f32 %v785_v21  ;;  %v807_v26 = vadd.f32 1.0, %v1461_v23  ;;  %v797_v42 = vand.u32 2147483648, %v785_v21  ;;  %v795_v45 = vand.u32 2147483647, %v785_v21 }
 0x184   :  { %v2075_v27 = vadd.f32 1.0, %v1463_v24  ;;  %vm791_vm5 = vweird.f32 %v785_v21  ;;  %960 = vmatpush.msrb.mxu2 %v937_v14  ;;  %v931_v24 = vld [vmem:[%s2214_s10 + $0x10] sm:$0xff] }
 0x185   :  { %1466 = vrcp.f32 %v807_v26  ;;  %v819_v49 = vand.u32 2147483648, %v807_v26  ;;  %v817_v51 = vand.u32 2147483647, %v807_v26  ;;  %v798_v53 = vor.u32 1.1754944e-38, %v797_v42 }
 0x186   :  { %1468 = vrcp.f32 %v2075_v27  ;;  %vm796_vm9 = vcmp.eq.f32.partialorder %v795_v45, 8.507059e+37  ;;  %vm813_vm10 = vweird.f32 %v807_v26  ;;  %v843_v2 = vand.u32 2147483648, %v2075_v27  ;;  %961 = vmatpush.msrb.mxu2 %v936_v15 }
 0x187   :  { %1470 = vtanh.f32 %v823_v36  ;;  %v820_v57 = vor.u32 1.1754944e-38, %v819_v49  ;;  %vm818_vm12 = vcmp.eq.f32.partialorder %v817_v51, 8.507059e+37  ;;  %vm837_vm14 = vweird.f32 %v2075_v27  ;;  %v975_v36 = vld [vmem:[%s2216_s12 + $0x8] sm:$0xff] }
 0x188   :  { %v841_v3 = vand.u32 2147483647, %v2075_v27  ;;  %v844_v5 = vor.u32 1.1754944e-38, %v843_v2  ;;  %962 = vmatpush.msrb.mxu2 %v935_v16  ;;  %v24_v45 = vstv %s2219_s15 }
 0x189   :  { %v1465_v32 = vpop.eup %1464  ;;  %25 = vst [vmem:[#allocation4] sm:$0x1] %v24_v45 }
 0x18a   :  { %v787_v33 = vmul.f32 %v1465_v32, %v785_v21  ;;  %vm792_vm4 = vweird.f32 %v1465_v32  ;;  %vm842_vm2 = vcmp.eq.f32.partialorder %v841_v3, 8.507059e+37  ;;  %963 = vmatpush.msrb.mxu2 %v934_v17 }
 0x18b   :  { %v1467_v34 = vpop.eup %1466  ;;  %vm793_vm7 = vmor %vm791_vm5, %vm792_vm4 }
 0x18c   :  { %v788_v35 = vsub.f32 1.0, %v787_v33  ;;  %v1469_v37 = vpop.eup %1468  ;;  %v809_v38 = vmul.f32 %v1467_v34, %v807_v26  ;;  %vm814_vm8 = vweird.f32 %v1467_v34  ;;  %964 = vmatpush.msrb.mxu2 %v933_v18  ;;  %v929_v26 = vld [vmem:[%s2214_s10] sm:$0xff] }
 0x18d   :  { %v833_v44 = vmul.f32 %v1469_v37, %v2075_v27  ;;  %vm815_vm11 = vmor %vm813_vm10, %vm814_vm8  ;;  %v1471_v59 = vpop.eup %1470  ;;  %vm838_vm13 = vweird.f32 %v1469_v37  ;;  %v980_v27 = vld [vmem:[%s2216_s12 + $0x30] sm:$0x3] }
 0x18e   :  { %v789_v41 = vmul.f32 %v1465_v32, %v788_v35  ;;  %v810_v46 = vsub.f32 1.0, %v809_v38  ;;  %vm839_vm15 = vmor %vm837_vm14, %vm838_vm13  ;;  %965 = vmatpush.msrb.mxu2 %v932_v19  ;;  %1361 = vmatpush.msk.msrb.mxu3 %vm182_vm1, %v980_v27  ;;  %v1014_v38 = vld [vmem:[%s2218_s14 + $0x8] sm:$0x3] }
 0x18f   :  { %v834_v54 = vsub.f32 1.0, %v833_v44  ;;  %1363 = vmatpush.msk.msra.mxu1 %vm182_vm1, %v1014_v38  ;;  %v1013_v44 = vld [vmem:[%s2218_s14] sm:$0xff]  ;;  %vm1019_vm1 = vcmask 80896  }
 0x190   :  { %v790_v48 = vadd.f32 %v1465_v32, %v789_v41  ;;  %v811_v50 = vmul.f32 %v1467_v34, %v810_v46  ;;  %966 = vmatpush.msrb.mxu2 %v931_v24  ;;  %1002 = vmatpush.msrb.mxu3 %v979_v28  ;;  %v1440_v46 = vld [vmem:[%s2217_s13] ss:$0 sm:$0xff] }
 0x191   :  { %v835_v61 = vmul.f32 %v1469_v37, %v834_v54  ;;  %1041 = vmatpush.msra.mxu1 %v1013_v44 }
 0x192   :  { %v794_v52 = vsel %vm793_vm7, %v1465_v32, %v790_v48  ;;  %v812_v55 = vadd.f32 %v1467_v34, %v811_v50  ;;  %967 = vmatpush.msrb.mxu2 %v930_v25  ;;  %1003 = vmatpush.msrb.mxu3 %v978_v29  ;;  %v976_v32 = vld [vmem:[%s2216_s12 + $0x10] sm:$0xff]  ;;  %v1441_v50 = vld [vmem:[#allocation4] ss:$0 sm:$0xff] }
 0x193   :  { %v799_v56 = vsel %vm796_vm9, %v798_v53, %v794_v52  ;;  %v836_v1 = vadd.f32 %v1469_v37, %v835_v61 }
 0x194   :  { %v816_v58 = vsel %vm815_vm11, %v1467_v34, %v812_v55  ;;  %v848_v63 = vmul.f32 %v1471_v59, %v799_v56  ;;  %968 = vmatpush.msrb.mxu2 %v929_v26  ;;  %1004 = vmatpush.msrb.mxu3 %v977_v30 }
 0x195   :  { %v821_v60 = vsel %vm818_vm12, %v820_v57, %v816_v58  ;;  %v840_v4 = vsel %vm839_vm15, %v1469_v37, %v836_v1  ;;  %v974_v37 = vld [vmem:[%s2216_s12] sm:$0xff] }
 0x196   :  { %v847_v62 = vmul.f32 %v821_v60, %v2028_v43  ;;  %v845_v6 = vsel %vm842_vm2, %v844_v5, %v840_v4  ;;  %1005 = vmatpush.msrb.mxu3 %v976_v32 }
 0x198   :  { %v849_v0 = vadd.f32 %v848_v63, %v847_v62  ;;  %1006 = vmatpush.msrb.mxu3 %v975_v36 }
 0x19a   :  { %1472 = vtanh.f32 %v849_v0  ;;  %854 = vst [vmem:[%s2211_s18] sm:$0x1] %v849_v0  ;;  %1007 = vmatpush.msrb.mxu3 %v974_v37 }
 0x1a0   :  { %v1473_v43 = vpop.eup %1472 }
 0x1a1   :  { %v851_v7 = vmul.f32 %v1473_v43, %v845_v6 }
 0x1a3   :  { %853 = vst [vmem:[%s2212_s17] sm:$0x1] %v851_v7 }
 0x1a4   :  { %852 = vst [vmem:[#allocation2 + $0x1] sm:$0x1] %v851_v7 }
 0x1ab   :  { %v855_v8 = vld [vmem:[#allocation2] sm:$0x3] }
 0x1ac   :  { %892 = vmatmul.f32.vlgmr.msrb.gmra.mxu0 %v855_v8 }
 0x229   :  { %v893_v21 = vpop.f32.mrf.mxu0 }
 0x22a   :  { %v894_v22 = vadd.f32 %v1437_v20, %v893_v21 }
 0x22c   :  { %v896_v23 = vmax.f32 %v894_v22, 0.0 }
 0x22e   :  { %1358 = vmatmul.msk.f32.vlgmr.msrb.gmra.mxu1 %vm119_vm0, %v896_v23  ;;  %vm946_vm0 = vcmask 818176  }
 0x2ab   :  { %v925_v33 = vpop.f32.mrf.mxu1 }
 0x2ac   :  { %v926_v34 = vadd.f32 %v1438_v31, %v925_v33 }
 0x2ae   :  { %v928_v35 = vmax.f32 %v926_v34, 0.0 }
 0x2b0   :  { %1360 = vmatmul.msk.f32.vlgmr.msrb.gmra.mxu2 %vm946_vm0, %v928_v35 }
 0x333   :  { %v970_v40 = vpop.f32.mrf.mxu2 }
 0x334   :  { %v971_v41 = vadd.f32 %v1439_v39, %v970_v40 }
 0x336   :  { %v973_v42 = vmax.f32 %v971_v41, 0.0 }
 0x338   :  { %1362 = vmatmul.msk.f32.vlgmr.msrb.gmra.mxu3 %vm985_vm3, %v973_v42 }
 0x3bb   :  { %v1009_v47 = vpop.f32.mrf.mxu3 }
 0x3bc   :  { %v1010_v48 = vadd.f32 %v1440_v46, %v1009_v47 }
 0x3be   :  { %v1012_v49 = vmax.f32 %v1010_v48, 0.0 }
 0x3c0   :  { %1364 = vmatmul.msk.f32.vlgmr.msra.gmra.mxu1 %vm1019_vm1, %v1012_v49 }
 0x43d   :  { %v1043_v51 = vpop.f32.mrf.mxu1 }
 0x43e   :  { %v1044_v52 = vadd.f32 %v1441_v50, %v1043_v51 }
 0x440   :  { %1047 = vst.msk [vmem:[%s2220_s16] sm:$0x3] %vm1046_vm6, %v1044_v52 }

</bundles_post_ra>
